<compile_context>
chip_gen: v7x
topology: tpu7x:2x2x1
jax: 0.10.0
libtpu: 0.0.40
codegen_flags: <defaults>
</compile_context>

<pallas_src>
import functools
import math

import numpy as np
import jax
import jax.numpy as jnp
from jax.experimental import pallas as pl
from jax.experimental.pallas import tpu as pltpu


# ----------------------------------------------------------------------------------
# sin/cos positional embedding (verbatim numpy port of the reference helpers)
# ----------------------------------------------------------------------------------
def get_1d_sincos_pos_embed_from_grid(embed_dim, pos):
    assert embed_dim % 2 == 0
    omega = np.arange(embed_dim // 2, dtype=np.float64)
    omega /= embed_dim / 2.0
    omega = 1.0 / 10000 ** omega
    pos = pos.reshape(-1)
    out = np.einsum('m,d->md', pos, omega)
    emb_sin = np.sin(out)
    emb_cos = np.cos(out)
    return np.concatenate([emb_sin, emb_cos], axis=1)


def get_2d_sincos_pos_embed_from_grid(embed_dim, grid):
    assert embed_dim % 2 == 0
    emb_h = get_1d_sincos_pos_embed_from_grid(embed_dim // 2, grid[0])
    emb_w = get_1d_sincos_pos_embed_from_grid(embed_dim // 2, grid[1])
    return np.concatenate([emb_h, emb_w], axis=1)


def get_2d_sincos_pos_embed(embed_dim, grid_size):
    grid_h = np.arange(grid_size, dtype=np.float32)
    grid_w = np.arange(grid_size, dtype=np.float32)
    grid = np.meshgrid(grid_w, grid_h)
    grid = np.stack(grid, axis=0)
    grid = grid.reshape([2, 1, grid_size, grid_size])
    return get_2d_sincos_pos_embed_from_grid(embed_dim, grid)


# ----------------------------------------------------------------------------------
# shared math helpers (used inside the Pallas kernel and by the pure-JAX reference,
# so kernel and reference execute the exact same op graph / bf16 casts)
# ----------------------------------------------------------------------------------
def _wdot(a, w):
    """Activation @ weight; bf16 into the MXU, f32 accumulation."""
    return jnp.dot(a.astype(jnp.bfloat16), w.astype(jnp.bfloat16),
                   preferred_element_type=jnp.float32)


def _adot_nt(a, b):  # a @ b.T (activation-activation, bf16 in / f32 accumulate)
    return jax.lax.dot_general(a.astype(jnp.bfloat16), b.astype(jnp.bfloat16),
                               (((1,), (1,)), ((), ())),
                               preferred_element_type=jnp.float32)


def _adot(a, b):     # a @ b (activation-activation, bf16 in / f32 accumulate)
    return jax.lax.dot_general(a.astype(jnp.bfloat16), b.astype(jnp.bfloat16),
                               (((1,), (0,)), ((), ())),
                               preferred_element_type=jnp.float32)


def _ln(v, eps=1e-6):  # LayerNorm without affine (torch: biased variance), f32
    mu = jnp.mean(v, axis=-1, keepdims=True)
    var = jnp.mean(jnp.square(v - mu), axis=-1, keepdims=True)
    return (v - mu) * jax.lax.rsqrt(var + eps)


def _softmax(s):
    m = jnp.max(s, axis=-1, keepdims=True)
    e = jnp.exp(s - m)
    return e / jnp.sum(e, axis=-1, keepdims=True)


def _silu(v):
    return v / (1.0 + jnp.exp(-v))


def _gelu_tanh(v):
    c0 = 0.7978845608028654  # sqrt(2/pi)
    return 0.5 * v * (1.0 + jnp.tanh(c0 * (v + 0.044715 * v * v * v)))


def _modulate(v, shift, scale):
    return v * (1.0 + scale) + shift


def timestep_embedding(t, dim, max_period=10000.0):
    half = dim // 2
    freqs = jnp.exp(-math.log(max_period) * jnp.arange(half, dtype=jnp.float32) / half)
    args = t[:, None].astype(jnp.float32) * freqs[None, :]
    return jnp.concatenate([jnp.cos(args), jnp.sin(args)], axis=-1)


def make_attention_biases(B, L, slice_size, neg=-1e30):
    """Additive masks for the batch-folded (B*L x B*L) score matrices.
    nat: block-diag with block L//slice_size (local groups, also separates samples);
    msa: block-diag with block L (per-sample global attention)."""
    BL = B * L
    Lg = L // slice_size
    idx = np.arange(BL)
    local = (idx[:, None] // Lg) == (idx[None, :] // Lg)
    glob = (idx[:, None] // L) == (idx[None, :] // L)
    nat_bias = np.where(local, 0.0, neg).astype(np.float32)
    msa_bias = np.where(glob, 0.0, neg).astype(np.float32)
    return jnp.asarray(nat_bias), jnp.asarray(msa_bias)


# ----------------------------------------------------------------------------------
# batch-folded math for one DiT block.
#   x  : (B*L, D) f32 token state
#   sc : (B*L, D) f32 silu(c), already broadcast to every token row of its sample
# Packed per-layer weights (all bf16):
#   w_ada  (D, 15D)  = [adaLN (9D) | adaLN2 (6D)]
#   w_qkvs (D, 6D)   = [global qkv (3D) | local qkv (3D)]
#   w_projs(D, 2D)   = [global proj (D) | local proj (D)]
#   w_fc1  (2D, Dm), w_fc2 (Dm, D)
#   b_all  (1, 21D+Dm) = [bada 9D | bada2 6D | bqkv 3D | bproj D | bprojl D | bfc1 Dm | bfc2 D]
# ----------------------------------------------------------------------------------
def _block_math(x, sc, w_ada, w_qkvs, w_projs, w_fc1, w_fc2, b_all,
                nat_bias, msa_bias, *, num_heads):
    BL, D = x.shape
    Dm = w_fc1.shape[-1]
    hd = D // num_heads

    # adaLN: one matmul for both modulation heads; every row already carries its
    # sample's conditioning, so chunks are directly (BL, D) — no broadcasts needed.
    ada = _wdot(sc, w_ada) + b_all[:, 0:15 * D]               # (BL, 15D)
    shift_msa = ada[:, 0 * D:1 * D]
    scale_msa = ada[:, 1 * D:2 * D]
    gate_msa = ada[:, 2 * D:3 * D]
    gate_mlp = ada[:, 5 * D:6 * D]
    shift_nat = ada[:, 6 * D:7 * D]
    scale_nat = ada[:, 7 * D:8 * D]
    gate_nat = ada[:, 8 * D:9 * D]
    shift_mlp = ada[:, 9 * D:11 * D]                          # adaLN2 chunk(3)[0]
    scale_mlp = ada[:, 11 * D:13 * D]                         # adaLN2 chunk(3)[1]

    x0 = _ln(x)  # norm4

    # --- local single-head attention (no qkv bias), block-diag additive mask -------
    wqkvl = w_qkvs[:, 3 * D:6 * D]
    qkvl = _wdot(x0, wqkvl)                                   # (BL, 3D)
    ql, kl, vl = qkvl[:, 0:D], qkvl[:, D:2 * D], qkvl[:, 2 * D:3 * D]
    sl = _adot_nt(ql, kl) * (1.0 / math.sqrt(D)) + nat_bias   # num_heads=1 -> head_dim=D
    probs_l = _softmax(sl)
    og = _adot(probs_l, vl)                                   # (BL, D)
    x1a = _wdot(og, w_projs[:, D:2 * D]) + b_all[:, 19 * D:20 * D]
    x1 = x0 + gate_nat * _modulate(_ln(x1a), shift_nat, scale_nat)    # norm2

    # --- global multi-head attention (qkv_bias=True), per-sample additive mask -----
    xm = _modulate(_ln(x0), shift_msa, scale_msa)             # norm1
    qkv = _wdot(xm, w_qkvs[:, 0:3 * D]) + b_all[:, 15 * D:18 * D]     # (BL, 3D)
    wproj = w_projs[:, 0:D]
    inv_hd = 1.0 / math.sqrt(hd)
    att = None
    for h in range(num_heads):
        lo = h * hd
        q = qkv[:, lo:lo + hd]
        k = qkv[:, D + lo:D + lo + hd]
        v = qkv[:, 2 * D + lo:2 * D + lo + hd]
        s = _adot_nt(q, k) * inv_hd + msa_bias
        p = _softmax(s)
        contrib = _wdot(_adot(p, v), wproj[lo:lo + hd, :])    # per-head proj accumulate
        att = contrib if att is None else att + contrib
    att = att + b_all[:, 18 * D:19 * D]
    x2 = x0 + gate_msa * att

    # --- MLP over concat(x1, x2) with 2D-wide modulation from adaLN_modulation2 ----
    xcat = jnp.concatenate([x1, x2], axis=1)                  # (BL, 2D)
    xcat = _modulate(_ln(xcat), shift_mlp, scale_mlp)         # norm3
    h1 = _gelu_tanh(_wdot(xcat, w_fc1) + b_all[:, 20 * D:20 * D + Dm])
    h2 = _wdot(h1, w_fc2) + b_all[:, 20 * D + Dm:21 * D + Dm]
    return x0 + gate_mlp * h2


def _final_math(x, sc, f_wada, f_bada, f_wlin, f_blin):
    D = x.shape[-1]
    ada = _wdot(sc, f_wada) + f_bada                          # (BL, 2D)
    shift, scale = ada[:, 0:D], ada[:, D:2 * D]
    return _wdot(_modulate(_ln(x), shift, scale), f_wlin) + f_blin


# ----------------------------------------------------------------------------------
# fused Pallas kernel: grid = (depth,); token state and silu(c) resident in VMEM
# ----------------------------------------------------------------------------------
def dit_fused_kernel(num_heads,
                     # inputs
                     x_ref, pos_ref, tf_ref, ye_ref, natb_ref, msab_ref,
                     tw1_ref, tb1_ref, tw2_ref, tb2_ref,
                     wada_ref, wqkvs_ref, wprojs_ref, wfc1_ref, wfc2_ref, ball_ref,
                     fwada_ref, fbada_ref, fwlin_ref, fblin_ref,
                     # output
                     o_ref,
                     # scratch
                     x_scr, sc_scr):
    layer = pl.program_id(0)
    n_layers = pl.num_programs(0)

    @pl.when(layer == 0)
    def _init():
        # pos-embed add + conditioning MLP (timestep MLP + label embedding), done once;
        # inputs are already broadcast to all B*L rows, so everything is M = B*L.
        x_scr[...] = x_ref[...] + pos_ref[...]
        h = _silu(_wdot(tf_ref[...], tw1_ref[...]) + tb1_ref[...])
        c = _wdot(h, tw2_ref[...]) + tb2_ref[...] + ye_ref[...]
        sc_scr[...] = _silu(c)

    x_new = _block_math(
        x_scr[...], sc_scr[...],
        wada_ref[0], wqkvs_ref[0], wprojs_ref[0], wfc1_ref[0], wfc2_ref[0],
        ball_ref[0], natb_ref[...], msab_ref[...],
        num_heads=num_heads)
    x_scr[...] = x_new

    @pl.when(layer == n_layers - 1)
    def _final():
        # single lane-dense (B*L, 2D) write, flushed once at grid end
        o_ref[...] = _final_math(x_new, sc_scr[...],
                                 fwada_ref[...], fbada_ref[...],
                                 fwlin_ref[...], fblin_ref[...])


def dit_forward_pallas(x_img, t, y, params, nat_bias, msa_bias, *, num_heads):
    B, C, Hh, Ww = x_img.shape
    L = Hh * Ww
    D = params['pos_embed'].shape[-1]
    assert C == D, "DiT.forward implies channel dim == hidden_size"
    BL = B * L
    depth = params['w_ada'].shape[0]
    F = params['t_w1'].shape[0]

    # glue (reshape / sinusoid table / embedding gather / row broadcast) — tiny
    x = x_img.reshape(B, C, L).transpose(0, 2, 1).reshape(BL, D)
    pos_full = jnp.tile(params['pos_embed'], (B, 1))                   # (BL, D)
    tfreq_full = jnp.repeat(timestep_embedding(t, F), L, axis=0)       # (BL, F)
    yemb_full = jnp.repeat(params['y_table'][y], L, axis=0)            # (BL, D)

    const_inputs = [x, pos_full, tfreq_full, yemb_full, nat_bias, msa_bias,
                    params['t_w1'], params['t_b1'], params['t_w2'], params['t_b2']]
    layer_inputs = [params['w_ada'], params['w_qkvs'], params['w_projs'],
                    params['w_fc1'], params['w_fc2'], params['b_all']]
    final_inputs = [params['f_wada'], params['f_bada'],
                    params['f_wlin'], params['f_blin']]

    def const_spec(a):
        nd = a.ndim
        return pl.BlockSpec(tuple(a.shape), lambda l, nd=nd: (0,) * nd)

    def layer_spec(a):
        nd = a.ndim
        return pl.BlockSpec((1,) + tuple(a.shape[1:]),
                            lambda l, nd=nd: (l,) + (0,) * (nd - 1))

    in_specs = ([const_spec(a) for a in const_inputs]
                + [layer_spec(a) for a in layer_inputs]
                + [const_spec(a) for a in final_inputs])

    kernel = functools.partial(dit_fused_kernel, num_heads)
    out = pl.pallas_call(
        kernel,
        out_shape=jax.ShapeDtypeStruct((BL, 2 * D), jnp.float32),
        grid=(depth,),
        in_specs=in_specs,
        out_specs=pl.BlockSpec((BL, 2 * D), lambda l: (0, 0)),
        scratch_shapes=[pltpu.VMEM((BL, D), jnp.float32),    # resident token state
                        pltpu.VMEM((BL, D), jnp.float32)],   # silu(c) per token row
        compiler_params=pltpu.CompilerParams(
            dimension_semantics=("arbitrary",),              # layer axis: sequential
            vmem_limit_bytes=32 * 1024 * 1024),
    )(*const_inputs, *layer_inputs, *final_inputs)
    return out.reshape(B, L, 2 * D).transpose(0, 2, 1).reshape(B, 2 * C, Hh, Ww)


# ----------------------------------------------------------------------------------
# pure-JAX reference (same math helpers / same packed bf16 weights, no Pallas)
# ----------------------------------------------------------------------------------
def dit_forward_reference(x_img, t, y, params, nat_bias, msa_bias, *, num_heads):
    B, C, Hh, Ww = x_img.shape
    L = Hh * Ww
    D = params['pos_embed'].shape[-1]
    BL = B * L
    F = params['t_w1'].shape[0]

    x = x_img.reshape(B, C, L).transpose(0, 2, 1).reshape(BL, D)
    x = x + jnp.tile(params['pos_embed'], (B, 1))
    tfreq = jnp.repeat(timestep_embedding(t, F), L, axis=0)
    yemb = jnp.repeat(params['y_table'][y], L, axis=0)
    h = _silu(_wdot(tfreq, params['t_w1']) + params['t_b1'])
    c = _wdot(h, params['t_w2']) + params['t_b2'] + yemb
    sc = _silu(c)

    depth = params['w_ada'].shape[0]
    for l in range(depth):
        x = _block_math(x, sc,
                        params['w_ada'][l], params['w_qkvs'][l], params['w_projs'][l],
                        params['w_fc1'][l], params['w_fc2'][l], params['b_all'][l],
                        nat_bias, msa_bias, num_heads=num_heads)
    out = _final_math(x, sc, params['f_wada'], params['f_bada'],
                      params['f_wlin'], params['f_blin'])
    return out.reshape(B, L, 2 * D).transpose(0, 2, 1).reshape(B, 2 * C, Hh, Ww)


# ----------------------------------------------------------------------------------
# deterministic parameter init (shapes from DiT.__init__, small config), packed bf16
# ----------------------------------------------------------------------------------
def init_params(key, *, D, L, mlp_ratio, depth, num_classes, freq_dim):
    Dm = int(D * mlp_ratio)
    keys = iter(jax.random.split(key, 4096))
    bf16 = jnp.bfloat16

    def lin(fan_in, fan_out):
        w = jax.random.normal(next(keys), (fan_in, fan_out), jnp.float32) / np.sqrt(fan_in)
        b = 0.02 * jax.random.normal(next(keys), (1, fan_out), jnp.float32)
        return w, b

    params = {}
    grid_size = int(round(math.sqrt(L)))
    params['pos_embed'] = jnp.asarray(
        get_2d_sincos_pos_embed(D, grid_size), jnp.float32)            # (L, D)

    tw1, tb1 = lin(freq_dim, D)
    tw2, tb2 = lin(D, D)
    params['t_w1'], params['t_b1'] = tw1.astype(bf16), tb1.astype(bf16)
    params['t_w2'], params['t_b2'] = tw2.astype(bf16), tb2.astype(bf16)
    params['y_table'] = 0.02 * jax.random.normal(next(keys), (num_classes + 1, D),
                                                 jnp.float32)

    w_ada, w_qkvs, w_projs, w_fc1, w_fc2, b_all = [], [], [], [], [], []
    for _ in range(depth):
        wada, bada = lin(D, 9 * D)
        wada2, bada2 = lin(D, 6 * D)
        wqkv, bqkv = lin(D, 3 * D)
        wproj, bproj = lin(D, D)
        wqkvl, _unused = lin(D, 3 * D)     # local attention: no qkv bias (timm default)
        wprojl, bprojl = lin(D, D)
        wfc1, bfc1 = lin(2 * D, Dm)
        wfc2, bfc2 = lin(Dm, D)
        w_ada.append(jnp.concatenate([wada, wada2], axis=1))            # (D, 15D)
        w_qkvs.append(jnp.concatenate([wqkv, wqkvl], axis=1))           # (D, 6D)
        w_projs.append(jnp.concatenate([wproj, wprojl], axis=1))        # (D, 2D)
        w_fc1.append(wfc1)
        w_fc2.append(wfc2)
        b_all.append(jnp.concatenate(
            [bada, bada2, bqkv, bproj, bprojl, bfc1, bfc2], axis=1))     # (1, 21D+Dm)

    params['w_ada'] = jnp.stack(w_ada).astype(bf16)
    params['w_qkvs'] = jnp.stack(w_qkvs).astype(bf16)
    params['w_projs'] = jnp.stack(w_projs).astype(bf16)
    params['w_fc1'] = jnp.stack(w_fc1).astype(bf16)
    params['w_fc2'] = jnp.stack(w_fc2).astype(bf16)
    params['b_all'] = jnp.stack(b_all).astype(bf16)

    fwada, fbada = lin(D, 2 * D)
    fwlin, fblin = lin(D, 2 * D)
    params['f_wada'], params['f_bada'] = fwada.astype(bf16), fbada.astype(bf16)
    params['f_wlin'], params['f_blin'] = fwlin.astype(bf16), fblin.astype(bf16)
    return params


# ----------------------------------------------------------------------------------
if __name__ == "__main__":
    # small config: hidden_size D = 256 = in_channels (forced by forward semantics),
    # H = W = 4 -> L = 16 tokens, 2 heads (head_dim 128), mlp_ratio 4, depth 2.
    B, Hh, Ww = 2, 4, 4
    D = 256
    num_heads = 2
    mlp_ratio = 4.0
    depth = 2
    slice_size = 2
    num_classes = 10
    freq_dim = 256
    L = Hh * Ww

    key = jax.random.PRNGKey(0)
    kx, kt, ky, kp = jax.random.split(key, 4)
    x = jax.random.normal(kx, (B, D, Hh, Ww), jnp.float32)      # NCHW, C == hidden_size
    t = jax.random.uniform(kt, (B,), jnp.float32, 0.0, 1000.0)
    y = jax.random.randint(ky, (B,), 0, num_classes)

    params = init_params(kp, D=D, L=L, mlp_ratio=mlp_ratio, depth=depth,
                         num_classes=num_classes, freq_dim=freq_dim)
    nat_bias, msa_bias = make_attention_biases(B, L, slice_size)

    fwd = jax.jit(functools.partial(dit_forward_pallas, num_heads=num_heads))
    out = jax.block_until_ready(fwd(x, t, y, params, nat_bias, msa_bias))

    ref_fn = jax.jit(functools.partial(dit_forward_reference, num_heads=num_heads))
    ref = jax.block_until_ready(ref_fn(x, t, y, params, nat_bias, msa_bias))

    assert out.shape == (B, 2 * D, Hh, Ww), out.shape
    assert bool(jnp.all(jnp.isfinite(out)))
    max_err = float(jnp.max(jnp.abs(out - ref)))
    ref_scale = float(jnp.max(jnp.abs(ref)))
    assert max_err <= 5e-3 * (1.0 + ref_scale), \
        f"mismatch vs reference: {max_err} (ref scale {ref_scale})"

    print("KERNEL_OK")
</pallas_src>

<mosaic_0001>
module attributes {stable_mosaic.version = 11 : i64} {
  func.func @dit_fused_kernel(%arg0: i32, %arg1: memref<32x256xf32, #tpu.memory_space<vmem>>, %arg2: memref<32x256xf32, #tpu.memory_space<vmem>>, %arg3: memref<32x256xf32, #tpu.memory_space<vmem>>, %arg4: memref<32x256xf32, #tpu.memory_space<vmem>>, %arg5: memref<32x32xf32, #tpu.memory_space<vmem>>, %arg6: memref<32x32xf32, #tpu.memory_space<vmem>>, %arg7: memref<256x256xbf16, #tpu.memory_space<vmem>>, %arg8: memref<1x256xbf16, #tpu.memory_space<vmem>>, %arg9: memref<256x256xbf16, #tpu.memory_space<vmem>>, %arg10: memref<1x256xbf16, #tpu.memory_space<vmem>>, %arg11: memref<1x256x3840xbf16, #tpu.memory_space<vmem>>, %arg12: memref<1x256x1536xbf16, #tpu.memory_space<vmem>>, %arg13: memref<1x256x512xbf16, #tpu.memory_space<vmem>>, %arg14: memref<1x512x1024xbf16, #tpu.memory_space<vmem>>, %arg15: memref<1x1024x256xbf16, #tpu.memory_space<vmem>>, %arg16: memref<1x1x6400xbf16, #tpu.memory_space<vmem>>, %arg17: memref<256x512xbf16, #tpu.memory_space<vmem>>, %arg18: memref<1x512xbf16, #tpu.memory_space<vmem>>, %arg19: memref<256x512xbf16, #tpu.memory_space<vmem>>, %arg20: memref<1x512xbf16, #tpu.memory_space<vmem>>, %arg21: memref<32x512xf32, #tpu.memory_space<vmem>>, %arg22: memref<32x256xf32, #tpu.memory_space<vmem>>, %arg23: memref<32x256xf32, #tpu.memory_space<vmem>>) attributes {dimension_semantics = [#tpu.dimension_semantics<arbitrary>], iteration_bounds = array<i64: 2>, scalar_prefetch = 0 : i64, scratch_operands = 2 : i64, tpu.core_type = #tpu.core_type<tc>, window_params = [{pipeline_mode = #tpu.pipeline_mode<synchronous>, transform_indices = @transform_0, window_bounds = array<i64: 32, 256>}, {pipeline_mode = #tpu.pipeline_mode<synchronous>, transform_indices = @transform_1, window_bounds = array<i64: 32, 256>}, {pipeline_mode = #tpu.pipeline_mode<synchronous>, transform_indices = @transform_2, window_bounds = array<i64: 32, 256>}, {pipeline_mode = #tpu.pipeline_mode<synchronous>, transform_indices = @transform_3, window_bounds = array<i64: 32, 256>}, {pipeline_mode = #tpu.pipeline_mode<synchronous>, transform_indices = @transform_4, window_bounds = array<i64: 32, 32>}, {pipeline_mode = #tpu.pipeline_mode<synchronous>, transform_indices = @transform_5, window_bounds = array<i64: 32, 32>}, {pipeline_mode = #tpu.pipeline_mode<synchronous>, transform_indices = @transform_6, window_bounds = array<i64: 256, 256>}, {pipeline_mode = #tpu.pipeline_mode<synchronous>, transform_indices = @transform_7, window_bounds = array<i64: 1, 256>}, {pipeline_mode = #tpu.pipeline_mode<synchronous>, transform_indices = @transform_8, window_bounds = array<i64: 256, 256>}, {pipeline_mode = #tpu.pipeline_mode<synchronous>, transform_indices = @transform_9, window_bounds = array<i64: 1, 256>}, {transform_indices = @transform_10, window_bounds = array<i64: 1, 256, 3840>}, {transform_indices = @transform_11, window_bounds = array<i64: 1, 256, 1536>}, {transform_indices = @transform_12, window_bounds = array<i64: 1, 256, 512>}, {transform_indices = @transform_13, window_bounds = array<i64: 1, 512, 1024>}, {transform_indices = @transform_14, window_bounds = array<i64: 1, 1024, 256>}, {transform_indices = @transform_15, window_bounds = array<i64: 1, 1, 6400>}, {pipeline_mode = #tpu.pipeline_mode<synchronous>, transform_indices = @transform_16, window_bounds = array<i64: 256, 512>}, {pipeline_mode = #tpu.pipeline_mode<synchronous>, transform_indices = @transform_17, window_bounds = array<i64: 1, 512>}, {pipeline_mode = #tpu.pipeline_mode<synchronous>, transform_indices = @transform_18, window_bounds = array<i64: 256, 512>}, {pipeline_mode = #tpu.pipeline_mode<synchronous>, transform_indices = @transform_19, window_bounds = array<i64: 1, 512>}, {pipeline_mode = #tpu.pipeline_mode<synchronous>, transform_indices = @transform_20, window_bounds = array<i64: 32, 512>}]} {
    %c0_i32 = arith.constant 0 : i32
    %0 = arith.cmpi eq, %arg0, %c0_i32 : i32
    %1 = arith.extui %0 : i1 to i32
    %c0_i32_0 = arith.constant 0 : i32
    %2 = arith.cmpi ne, %1, %c0_i32_0 : i32
    scf.if %2 {
      %c0_78 = arith.constant 0 : index
      %c0_79 = arith.constant 0 : index
      %246 = vector.load %arg1[%c0_78, %c0_79] : memref<32x256xf32, #tpu.memory_space<vmem>>, vector<32x256xf32>
      %c0_80 = arith.constant 0 : index
      %c0_81 = arith.constant 0 : index
      %247 = vector.load %arg2[%c0_80, %c0_81] : memref<32x256xf32, #tpu.memory_space<vmem>>, vector<32x256xf32>
      %248 = arith.addf %246, %247 : vector<32x256xf32>
      %c0_82 = arith.constant 0 : index
      %c0_83 = arith.constant 0 : index
      %249 = vector.load %arg22[%c0_82, %c0_83] : memref<32x256xf32, #tpu.memory_space<vmem>>, vector<32x256xf32>
      tpu.vector_store %arg22[%c0_82, %c0_83], %248 {strides = array<i32>} : memref<32x256xf32, #tpu.memory_space<vmem>>, vector<32x256xf32>,
      %c0_84 = arith.constant 0 : index
      %c0_85 = arith.constant 0 : index
      %250 = vector.load %arg3[%c0_84, %c0_85] : memref<32x256xf32, #tpu.memory_space<vmem>>, vector<32x256xf32>
      %c0_86 = arith.constant 0 : index
      %c0_87 = arith.constant 0 : index
      %251 = vector.load %arg7[%c0_86, %c0_87] : memref<256x256xbf16, #tpu.memory_space<vmem>>, vector<256x256xbf16>
      %252 = arith.truncf %250 : vector<32x256xf32> to vector<32x256xbf16>
      %cst_88 = arith.constant dense<0.000000e+00> : vector<32x256xf32>
      %253 = tpu.matmul %252, %251, %cst_88 {dimension_numbers = #tpu.dot_dimension_numbers<[1], [0], [0], [1], [0, 0, 1, 1], [], []>} : vector<32x256xbf16>, vector<256x256xbf16>, vector<32x256xf32> -> vector<32x256xf32>
      %c0_89 = arith.constant 0 : index
      %c0_90 = arith.constant 0 : index
      %254 = vector.load %arg8[%c0_89, %c0_90] : memref<1x256xbf16, #tpu.memory_space<vmem>>, vector<1x256xbf16>
      %255 = arith.extf %254 : vector<1x256xbf16> to vector<1x256xf32>
      %256 = vector.broadcast %255 : vector<1x256xf32> to vector<32x256xf32>
      %257 = arith.addf %253, %256 : vector<32x256xf32>
      %cst_91 = arith.constant 0.000000e+00 : f32
      %258 = vector.broadcast %cst_91 : f32 to vector<32x256xf32>
      %259 = arith.subf %258, %257 : vector<32x256xf32>
      %260 = math.exp %259 : vector<32x256xf32>
      %cst_92 = arith.constant 1.000000e+00 : f32
      %261 = vector.broadcast %cst_92 : f32 to vector<32x256xf32>
      %262 = arith.addf %261, %260 : vector<32x256xf32>
      %263 = arith.divf %257, %262 : vector<32x256xf32>
      %c0_93 = arith.constant 0 : index
      %c0_94 = arith.constant 0 : index
      %264 = vector.load %arg9[%c0_93, %c0_94] : memref<256x256xbf16, #tpu.memory_space<vmem>>, vector<256x256xbf16>
      %265 = arith.truncf %263 : vector<32x256xf32> to vector<32x256xbf16>
      %cst_95 = arith.constant dense<0.000000e+00> : vector<32x256xf32>
      %266 = tpu.matmul %265, %264, %cst_95 {dimension_numbers = #tpu.dot_dimension_numbers<[1], [0], [0], [1], [0, 0, 1, 1], [], []>} : vector<32x256xbf16>, vector<256x256xbf16>, vector<32x256xf32> -> vector<32x256xf32>
      %c0_96 = arith.constant 0 : index
      %c0_97 = arith.constant 0 : index
      %267 = vector.load %arg10[%c0_96, %c0_97] : memref<1x256xbf16, #tpu.memory_space<vmem>>, vector<1x256xbf16>
      %268 = arith.extf %267 : vector<1x256xbf16> to vector<1x256xf32>
      %269 = vector.broadcast %268 : vector<1x256xf32> to vector<32x256xf32>
      %270 = arith.addf %266, %269 : vector<32x256xf32>
      %c0_98 = arith.constant 0 : index
      %c0_99 = arith.constant 0 : index
      %271 = vector.load %arg4[%c0_98, %c0_99] : memref<32x256xf32, #tpu.memory_space<vmem>>, vector<32x256xf32>
      %272 = arith.addf %270, %271 : vector<32x256xf32>
      %cst_100 = arith.constant 0.000000e+00 : f32
      %273 = vector.broadcast %cst_100 : f32 to vector<32x256xf32>
      %274 = arith.subf %273, %272 : vector<32x256xf32>
      %275 = math.exp %274 : vector<32x256xf32>
      %cst_101 = arith.constant 1.000000e+00 : f32
      %276 = vector.broadcast %cst_101 : f32 to vector<32x256xf32>
      %277 = arith.addf %276, %275 : vector<32x256xf32>
      %278 = arith.divf %272, %277 : vector<32x256xf32>
      %c0_102 = arith.constant 0 : index
      %c0_103 = arith.constant 0 : index
      %279 = vector.load %arg23[%c0_102, %c0_103] : memref<32x256xf32, #tpu.memory_space<vmem>>, vector<32x256xf32>
      tpu.vector_store %arg23[%c0_102, %c0_103], %278 {strides = array<i32>} : memref<32x256xf32, #tpu.memory_space<vmem>>, vector<32x256xf32>,
    } else {
    }
    %c0 = arith.constant 0 : index
    %c0_1 = arith.constant 0 : index
    %3 = vector.load %arg22[%c0, %c0_1] : memref<32x256xf32, #tpu.memory_space<vmem>>, vector<32x256xf32>
    %c0_2 = arith.constant 0 : index
    %c0_3 = arith.constant 0 : index
    %4 = vector.load %arg23[%c0_2, %c0_3] : memref<32x256xf32, #tpu.memory_space<vmem>>, vector<32x256xf32>
    %c0_4 = arith.constant 0 : index
    %c0_5 = arith.constant 0 : index
    %c0_6 = arith.constant 0 : index
    %5 = vector.load %arg11[%c0_4, %c0_5, %c0_6] : memref<1x256x3840xbf16, #tpu.memory_space<vmem>>, vector<1x256x3840xbf16>
    %6 = vector.shape_cast %5 : vector<1x256x3840xbf16> to vector<256x3840xbf16>
    %c0_7 = arith.constant 0 : index
    %c0_8 = arith.constant 0 : index
    %c0_9 = arith.constant 0 : index
    %7 = vector.load %arg12[%c0_7, %c0_8, %c0_9] : memref<1x256x1536xbf16, #tpu.memory_space<vmem>>, vector<1x256x1536xbf16>
    %8 = vector.shape_cast %7 : vector<1x256x1536xbf16> to vector<256x1536xbf16>
    %c0_10 = arith.constant 0 : index
    %c0_11 = arith.constant 0 : index
    %c0_12 = arith.constant 0 : index
    %9 = vector.load %arg13[%c0_10, %c0_11, %c0_12] : memref<1x256x512xbf16, #tpu.memory_space<vmem>>, vector<1x256x512xbf16>
    %10 = vector.shape_cast %9 : vector<1x256x512xbf16> to vector<256x512xbf16>
    %c0_13 = arith.constant 0 : index
    %c0_14 = arith.constant 0 : index
    %c0_15 = arith.constant 0 : index
    %11 = vector.load %arg14[%c0_13, %c0_14, %c0_15] : memref<1x512x1024xbf16, #tpu.memory_space<vmem>>, vector<1x512x1024xbf16>
    %12 = vector.shape_cast %11 : vector<1x512x1024xbf16> to vector<512x1024xbf16>
    %c0_16 = arith.constant 0 : index
    %c0_17 = arith.constant 0 : index
    %c0_18 = arith.constant 0 : index
    %13 = vector.load %arg15[%c0_16, %c0_17, %c0_18] : memref<1x1024x256xbf16, #tpu.memory_space<vmem>>, vector<1x1024x256xbf16>
    %14 = vector.shape_cast %13 : vector<1x1024x256xbf16> to vector<1024x256xbf16>
    %c0_19 = arith.constant 0 : index
    %c0_20 = arith.constant 0 : index
    %c0_21 = arith.constant 0 : index
    %15 = vector.load %arg16[%c0_19, %c0_20, %c0_21] : memref<1x1x6400xbf16, #tpu.memory_space<vmem>>, vector<1x1x6400xbf16>
    %16 = vector.shape_cast %15 : vector<1x1x6400xbf16> to vector<1x6400xbf16>
    %c0_22 = arith.constant 0 : index
    %c0_23 = arith.constant 0 : index
    %17 = vector.load %arg5[%c0_22, %c0_23] : memref<32x32xf32, #tpu.memory_space<vmem>>, vector<32x32xf32>
    %c0_24 = arith.constant 0 : index
    %c0_25 = arith.constant 0 : index
    %18 = vector.load %arg6[%c0_24, %c0_25] : memref<32x32xf32, #tpu.memory_space<vmem>>, vector<32x32xf32>
    %19 = arith.truncf %4 : vector<32x256xf32> to vector<32x256xbf16>
    %cst = arith.constant dense<0.000000e+00> : vector<32x3840xf32>
    %20 = tpu.matmul %19, %6, %cst {dimension_numbers = #tpu.dot_dimension_numbers<[1], [0], [0], [1], [0, 0, 1, 1], [], []>} : vector<32x256xbf16>, vector<256x3840xbf16>, vector<32x3840xf32> -> vector<32x3840xf32>
    %21 = vector.extract_strided_slice %16 {offsets = [0, 0], sizes = [1, 3840], strides = [1, 1]} : vector<1x6400xbf16> to vector<1x3840xbf16>
    %22 = arith.extf %21 : vector<1x3840xbf16> to vector<1x3840xf32>
    %23 = vector.broadcast %22 : vector<1x3840xf32> to vector<32x3840xf32>
    %24 = arith.addf %20, %23 : vector<32x3840xf32>
    %25 = vector.extract_strided_slice %24 {offsets = [0, 0], sizes = [32, 256], strides = [1, 1]} : vector<32x3840xf32> to vector<32x256xf32>
    %26 = vector.extract_strided_slice %24 {offsets = [0, 256], sizes = [32, 256], strides = [1, 1]} : vector<32x3840xf32> to vector<32x256xf32>
    %27 = vector.extract_strided_slice %24 {offsets = [0, 512], sizes = [32, 256], strides = [1, 1]} : vector<32x3840xf32> to vector<32x256xf32>
    %28 = vector.extract_strided_slice %24 {offsets = [0, 1280], sizes = [32, 256], strides = [1, 1]} : vector<32x3840xf32> to vector<32x256xf32>
    %29 = vector.extract_strided_slice %24 {offsets = [0, 1536], sizes = [32, 256], strides = [1, 1]} : vector<32x3840xf32> to vector<32x256xf32>
    %30 = vector.extract_strided_slice %24 {offsets = [0, 1792], sizes = [32, 256], strides = [1, 1]} : vector<32x3840xf32> to vector<32x256xf32>
    %31 = vector.extract_strided_slice %24 {offsets = [0, 2048], sizes = [32, 256], strides = [1, 1]} : vector<32x3840xf32> to vector<32x256xf32>
    %32 = vector.extract_strided_slice %24 {offsets = [0, 2304], sizes = [32, 512], strides = [1, 1]} : vector<32x3840xf32> to vector<32x512xf32>
    %33 = vector.extract_strided_slice %24 {offsets = [0, 2816], sizes = [32, 512], strides = [1, 1]} : vector<32x3840xf32> to vector<32x512xf32>
    %cst_26 = arith.constant dense<0.000000e+00> : vector<32xf32>
    %34 = vector.multi_reduction <add>, %3, %cst_26 [1] : vector<32x256xf32> to vector<32xf32>
    %35 = vector.shape_cast %34 : vector<32xf32> to vector<32x1xf32>
    %cst_27 = arith.constant 2.560000e+02 : f32
    %36 = vector.broadcast %cst_27 : f32 to vector<32x1xf32>
    %37 = arith.divf %35, %36 : vector<32x1xf32>
    %38 = vector.broadcast %37 : vector<32x1xf32> to vector<32x256xf32>
    %39 = arith.subf %3, %38 : vector<32x256xf32>
    %40 = arith.mulf %39, %39 : vector<32x256xf32>
    %cst_28 = arith.constant dense<0.000000e+00> : vector<32xf32>
    %41 = vector.multi_reduction <add>, %40, %cst_28 [1] : vector<32x256xf32> to vector<32xf32>
    %42 = vector.shape_cast %41 : vector<32xf32> to vector<32x1xf32>
    %cst_29 = arith.constant 2.560000e+02 : f32
    %43 = vector.broadcast %cst_29 : f32 to vector<32x1xf32>
    %44 = arith.divf %42, %43 : vector<32x1xf32>
    %45 = vector.broadcast %37 : vector<32x1xf32> to vector<32x256xf32>
    %46 = arith.subf %3, %45 : vector<32x256xf32>
    %cst_30 = arith.constant 9.99999997E-7 : f32
    %47 = vector.broadcast %cst_30 : f32 to vector<32x1xf32>
    %48 = arith.addf %44, %47 : vector<32x1xf32>
    %49 = math.rsqrt %48 : vector<32x1xf32>
    %50 = vector.broadcast %49 : vector<32x1xf32> to vector<32x256xf32>
    %51 = arith.mulf %46, %50 : vector<32x256xf32>
    %52 = vector.extract_strided_slice %8 {offsets = [0, 768], sizes = [256, 768], strides = [1, 1]} : vector<256x1536xbf16> to vector<256x768xbf16>
    %53 = arith.truncf %51 : vector<32x256xf32> to vector<32x256xbf16>
    %cst_31 = arith.constant dense<0.000000e+00> : vector<32x768xf32>
    %54 = tpu.matmul %53, %52, %cst_31 {dimension_numbers = #tpu.dot_dimension_numbers<[1], [0], [0], [1], [0, 0, 1, 1], [], []>} : vector<32x256xbf16>, vector<256x768xbf16>, vector<32x768xf32> -> vector<32x768xf32>
    %55 = vector.extract_strided_slice %54 {offsets = [0, 0], sizes = [32, 256], strides = [1, 1]} : vector<32x768xf32> to vector<32x256xf32>
    %56 = vector.extract_strided_slice %54 {offsets = [0, 256], sizes = [32, 256], strides = [1, 1]} : vector<32x768xf32> to vector<32x256xf32>
    %57 = vector.extract_strided_slice %54 {offsets = [0, 512], sizes = [32, 256], strides = [1, 1]} : vector<32x768xf32> to vector<32x256xf32>
    %58 = arith.truncf %55 : vector<32x256xf32> to vector<32x256xbf16>
    %59 = arith.truncf %56 : vector<32x256xf32> to vector<32x256xbf16>
    %cst_32 = arith.constant dense<0.000000e+00> : vector<32x32xf32>
    %60 = tpu.matmul %58, %59, %cst_32 {dimension_numbers = #tpu.dot_dimension_numbers<[1], [1], [0], [0], [0, 0, 1, 0], [], []>} : vector<32x256xbf16>, vector<32x256xbf16>, vector<32x32xf32> -> vector<32x32xf32>
    %cst_33 = arith.constant 6.250000e-02 : f32
    %61 = vector.broadcast %cst_33 : f32 to vector<32x32xf32>
    %62 = arith.mulf %60, %61 : vector<32x32xf32>
    %63 = arith.addf %62, %17 : vector<32x32xf32>
    %cst_34 = arith.constant dense<0xFF800000> : vector<32xf32>
    %64 = vector.multi_reduction <maximumf>, %63, %cst_34 [1] : vector<32x32xf32> to vector<32xf32>
    %65 = vector.shape_cast %64 : vector<32xf32> to vector<32x1xf32>
    %66 = vector.broadcast %65 : vector<32x1xf32> to vector<32x32xf32>
    %67 = arith.subf %63, %66 : vector<32x32xf32>
    %68 = math.exp %67 : vector<32x32xf32>
    %cst_35 = arith.constant dense<0.000000e+00> : vector<32xf32>
    %69 = vector.multi_reduction <add>, %68, %cst_35 [1] : vector<32x32xf32> to vector<32xf32>
    %70 = vector.shape_cast %69 : vector<32xf32> to vector<32x1xf32>
    %71 = vector.broadcast %70 : vector<32x1xf32> to vector<32x32xf32>
    %72 = arith.divf %68, %71 : vector<32x32xf32>
    %73 = arith.truncf %72 : vector<32x32xf32> to vector<32x32xbf16>
    %74 = arith.truncf %57 : vector<32x256xf32> to vector<32x256xbf16>
    %cst_36 = arith.constant dense<0.000000e+00> : vector<32x256xf32>
    %75 = tpu.matmul %73, %74, %cst_36 {dimension_numbers = #tpu.dot_dimension_numbers<[1], [0], [0], [1], [0, 0, 1, 1], [], []>} : vector<32x32xbf16>, vector<32x256xbf16>, vector<32x256xf32> -> vector<32x256xf32>
    %76 = vector.extract_strided_slice %10 {offsets = [0, 256], sizes = [256, 256], strides = [1, 1]} : vector<256x512xbf16> to vector<256x256xbf16>
    %77 = arith.truncf %75 : vector<32x256xf32> to vector<32x256xbf16>
    %cst_37 = arith.constant dense<0.000000e+00> : vector<32x256xf32>
    %78 = tpu.matmul %77, %76, %cst_37 {dimension_numbers = #tpu.dot_dimension_numbers<[1], [0], [0], [1], [0, 0, 1, 1], [], []>} : vector<32x256xbf16>, vector<256x256xbf16>, vector<32x256xf32> -> vector<32x256xf32>
    %79 = vector.extract_strided_slice %16 {offsets = [0, 4864], sizes = [1, 256], strides = [1, 1]} : vector<1x6400xbf16> to vector<1x256xbf16>
    %80 = arith.extf %79 : vector<1x256xbf16> to vector<1x256xf32>
    %81 = vector.broadcast %80 : vector<1x256xf32> to vector<32x256xf32>
    %82 = arith.addf %78, %81 : vector<32x256xf32>
    %cst_38 = arith.constant dense<0.000000e+00> : vector<32xf32>
    %83 = vector.multi_reduction <add>, %82, %cst_38 [1] : vector<32x256xf32> to vector<32xf32>
    %84 = vector.shape_cast %83 : vector<32xf32> to vector<32x1xf32>
    %cst_39 = arith.constant 2.560000e+02 : f32
    %85 = vector.broadcast %cst_39 : f32 to vector<32x1xf32>
    %86 = arith.divf %84, %85 : vector<32x1xf32>
    %87 = vector.broadcast %86 : vector<32x1xf32> to vector<32x256xf32>
    %88 = arith.subf %82, %87 : vector<32x256xf32>
    %89 = arith.mulf %88, %88 : vector<32x256xf32>
    %cst_40 = arith.constant dense<0.000000e+00> : vector<32xf32>
    %90 = vector.multi_reduction <add>, %89, %cst_40 [1] : vector<32x256xf32> to vector<32xf32>
    %91 = vector.shape_cast %90 : vector<32xf32> to vector<32x1xf32>
    %cst_41 = arith.constant 2.560000e+02 : f32
    %92 = vector.broadcast %cst_41 : f32 to vector<32x1xf32>
    %93 = arith.divf %91, %92 : vector<32x1xf32>
    %94 = vector.broadcast %86 : vector<32x1xf32> to vector<32x256xf32>
    %95 = arith.subf %82, %94 : vector<32x256xf32>
    %cst_42 = arith.constant 9.99999997E-7 : f32
    %96 = vector.broadcast %cst_42 : f32 to vector<32x1xf32>
    %97 = arith.addf %93, %96 : vector<32x1xf32>
    %98 = math.rsqrt %97 : vector<32x1xf32>
    %99 = vector.broadcast %98 : vector<32x1xf32> to vector<32x256xf32>
    %100 = arith.mulf %95, %99 : vector<32x256xf32>
    %cst_43 = arith.constant 1.000000e+00 : f32
    %101 = vector.broadcast %cst_43 : f32 to vector<32x256xf32>
    %102 = arith.addf %101, %30 : vector<32x256xf32>
    %103 = arith.mulf %100, %102 : vector<32x256xf32>
    %104 = arith.addf %103, %29 : vector<32x256xf32>
    %105 = arith.mulf %31, %104 : vector<32x256xf32>
    %106 = arith.addf %51, %105 : vector<32x256xf32>
    %cst_44 = arith.constant dense<0.000000e+00> : vector<32xf32>
    %107 = vector.multi_reduction <add>, %51, %cst_44 [1] : vector<32x256xf32> to vector<32xf32>
    %108 = vector.shape_cast %107 : vector<32xf32> to vector<32x1xf32>
    %cst_45 = arith.constant 2.560000e+02 : f32
    %109 = vector.broadcast %cst_45 : f32 to vector<32x1xf32>
    %110 = arith.divf %108, %109 : vector<32x1xf32>
    %111 = vector.broadcast %110 : vector<32x1xf32> to vector<32x256xf32>
    %112 = arith.subf %51, %111 : vector<32x256xf32>
    %113 = arith.mulf %112, %112 : vector<32x256xf32>
    %cst_46 = arith.constant dense<0.000000e+00> : vector<32xf32>
    %114 = vector.multi_reduction <add>, %113, %cst_46 [1] : vector<32x256xf32> to vector<32xf32>
    %115 = vector.shape_cast %114 : vector<32xf32> to vector<32x1xf32>
    %cst_47 = arith.constant 2.560000e+02 : f32
    %116 = vector.broadcast %cst_47 : f32 to vector<32x1xf32>
    %117 = arith.divf %115, %116 : vector<32x1xf32>
    %118 = vector.broadcast %110 : vector<32x1xf32> to vector<32x256xf32>
    %119 = arith.subf %51, %118 : vector<32x256xf32>
    %cst_48 = arith.constant 9.99999997E-7 : f32
    %120 = vector.broadcast %cst_48 : f32 to vector<32x1xf32>
    %121 = arith.addf %117, %120 : vector<32x1xf32>
    %122 = math.rsqrt %121 : vector<32x1xf32>
    %123 = vector.broadcast %122 : vector<32x1xf32> to vector<32x256xf32>
    %124 = arith.mulf %119, %123 : vector<32x256xf32>
    %cst_49 = arith.constant 1.000000e+00 : f32
    %125 = vector.broadcast %cst_49 : f32 to vector<32x256xf32>
    %126 = arith.addf %125, %26 : vector<32x256xf32>
    %127 = arith.mulf %124, %126 : vector<32x256xf32>
    %128 = arith.addf %127, %25 : vector<32x256xf32>
    %129 = vector.extract_strided_slice %8 {offsets = [0, 0], sizes = [256, 768], strides = [1, 1]} : vector<256x1536xbf16> to vector<256x768xbf16>
    %130 = arith.truncf %128 : vector<32x256xf32> to vector<32x256xbf16>
    %cst_50 = arith.constant dense<0.000000e+00> : vector<32x768xf32>
    %131 = tpu.matmul %130, %129, %cst_50 {dimension_numbers = #tpu.dot_dimension_numbers<[1], [0], [0], [1], [0, 0, 1, 1], [], []>} : vector<32x256xbf16>, vector<256x768xbf16>, vector<32x768xf32> -> vector<32x768xf32>
    %132 = vector.extract_strided_slice %16 {offsets = [0, 3840], sizes = [1, 768], strides = [1, 1]} : vector<1x6400xbf16> to vector<1x768xbf16>
    %133 = arith.extf %132 : vector<1x768xbf16> to vector<1x768xf32>
    %134 = vector.broadcast %133 : vector<1x768xf32> to vector<32x768xf32>
    %135 = arith.addf %131, %134 : vector<32x768xf32>
    %136 = vector.extract_strided_slice %10 {offsets = [0, 0], sizes = [256, 256], strides = [1, 1]} : vector<256x512xbf16> to vector<256x256xbf16>
    %137 = vector.extract_strided_slice %135 {offsets = [0, 0], sizes = [32, 128], strides = [1, 1]} : vector<32x768xf32> to vector<32x128xf32>
    %138 = vector.extract_strided_slice %135 {offsets = [0, 256], sizes = [32, 128], strides = [1, 1]} : vector<32x768xf32> to vector<32x128xf32>
    %139 = vector.extract_strided_slice %135 {offsets = [0, 512], sizes = [32, 128], strides = [1, 1]} : vector<32x768xf32> to vector<32x128xf32>
    %140 = arith.truncf %137 : vector<32x128xf32> to vector<32x128xbf16>
    %141 = arith.truncf %138 : vector<32x128xf32> to vector<32x128xbf16>
    %cst_51 = arith.constant dense<0.000000e+00> : vector<32x32xf32>
    %142 = tpu.matmul %140, %141, %cst_51 {dimension_numbers = #tpu.dot_dimension_numbers<[1], [1], [0], [0], [0, 0, 1, 0], [], []>} : vector<32x128xbf16>, vector<32x128xbf16>, vector<32x32xf32> -> vector<32x32xf32>
    %cst_52 = arith.constant 0.0883883461 : f32
    %143 = vector.broadcast %cst_52 : f32 to vector<32x32xf32>
    %144 = arith.mulf %142, %143 : vector<32x32xf32>
    %145 = arith.addf %144, %18 : vector<32x32xf32>
    %cst_53 = arith.constant dense<0xFF800000> : vector<32xf32>
    %146 = vector.multi_reduction <maximumf>, %145, %cst_53 [1] : vector<32x32xf32> to vector<32xf32>
    %147 = vector.shape_cast %146 : vector<32xf32> to vector<32x1xf32>
    %148 = vector.broadcast %147 : vector<32x1xf32> to vector<32x32xf32>
    %149 = arith.subf %145, %148 : vector<32x32xf32>
    %150 = math.exp %149 : vector<32x32xf32>
    %cst_54 = arith.constant dense<0.000000e+00> : vector<32xf32>
    %151 = vector.multi_reduction <add>, %150, %cst_54 [1] : vector<32x32xf32> to vector<32xf32>
    %152 = vector.shape_cast %151 : vector<32xf32> to vector<32x1xf32>
    %153 = vector.broadcast %152 : vector<32x1xf32> to vector<32x32xf32>
    %154 = arith.divf %150, %153 : vector<32x32xf32>
    %155 = arith.truncf %154 : vector<32x32xf32> to vector<32x32xbf16>
    %156 = arith.truncf %139 : vector<32x128xf32> to vector<32x128xbf16>
    %cst_55 = arith.constant dense<0.000000e+00> : vector<32x128xf32>
    %157 = tpu.matmul %155, %156, %cst_55 {dimension_numbers = #tpu.dot_dimension_numbers<[1], [0], [0], [1], [0, 0, 1, 1], [], []>} : vector<32x32xbf16>, vector<32x128xbf16>, vector<32x128xf32> -> vector<32x128xf32>
    %158 = vector.extract_strided_slice %136 {offsets = [0, 0], sizes = [128, 256], strides = [1, 1]} : vector<256x256xbf16> to vector<128x256xbf16>
    %159 = arith.truncf %157 : vector<32x128xf32> to vector<32x128xbf16>
    %cst_56 = arith.constant dense<0.000000e+00> : vector<32x256xf32>
    %160 = tpu.matmul %159, %158, %cst_56 {dimension_numbers = #tpu.dot_dimension_numbers<[1], [0], [0], [1], [0, 0, 1, 1], [], []>} : vector<32x128xbf16>, vector<128x256xbf16>, vector<32x256xf32> -> vector<32x256xf32>
    %161 = vector.extract_strided_slice %135 {offsets = [0, 128], sizes = [32, 128], strides = [1, 1]} : vector<32x768xf32> to vector<32x128xf32>
    %162 = vector.extract_strided_slice %135 {offsets = [0, 384], sizes = [32, 128], strides = [1, 1]} : vector<32x768xf32> to vector<32x128xf32>
    %163 = vector.extract_strided_slice %135 {offsets = [0, 640], sizes = [32, 128], strides = [1, 1]} : vector<32x768xf32> to vector<32x128xf32>
    %164 = arith.truncf %161 : vector<32x128xf32> to vector<32x128xbf16>
    %165 = arith.truncf %162 : vector<32x128xf32> to vector<32x128xbf16>
    %cst_57 = arith.constant dense<0.000000e+00> : vector<32x32xf32>
    %166 = tpu.matmul %164, %165, %cst_57 {dimension_numbers = #tpu.dot_dimension_numbers<[1], [1], [0], [0], [0, 0, 1, 0], [], []>} : vector<32x128xbf16>, vector<32x128xbf16>, vector<32x32xf32> -> vector<32x32xf32>
    %cst_58 = arith.constant 0.0883883461 : f32
    %167 = vector.broadcast %cst_58 : f32 to vector<32x32xf32>
    %168 = arith.mulf %166, %167 : vector<32x32xf32>
    %169 = arith.addf %168, %18 : vector<32x32xf32>
    %cst_59 = arith.constant dense<0xFF800000> : vector<32xf32>
    %170 = vector.multi_reduction <maximumf>, %169, %cst_59 [1] : vector<32x32xf32> to vector<32xf32>
    %171 = vector.shape_cast %170 : vector<32xf32> to vector<32x1xf32>
    %172 = vector.broadcast %171 : vector<32x1xf32> to vector<32x32xf32>
    %173 = arith.subf %169, %172 : vector<32x32xf32>
    %174 = math.exp %173 : vector<32x32xf32>
    %cst_60 = arith.constant dense<0.000000e+00> : vector<32xf32>
    %175 = vector.multi_reduction <add>, %174, %cst_60 [1] : vector<32x32xf32> to vector<32xf32>
    %176 = vector.shape_cast %175 : vector<32xf32> to vector<32x1xf32>
    %177 = vector.broadcast %176 : vector<32x1xf32> to vector<32x32xf32>
    %178 = arith.divf %174, %177 : vector<32x32xf32>
    %179 = arith.truncf %178 : vector<32x32xf32> to vector<32x32xbf16>
    %180 = arith.truncf %163 : vector<32x128xf32> to vector<32x128xbf16>
    %cst_61 = arith.constant dense<0.000000e+00> : vector<32x128xf32>
    %181 = tpu.matmul %179, %180, %cst_61 {dimension_numbers = #tpu.dot_dimension_numbers<[1], [0], [0], [1], [0, 0, 1, 1], [], []>} : vector<32x32xbf16>, vector<32x128xbf16>, vector<32x128xf32> -> vector<32x128xf32>
    %182 = vector.extract_strided_slice %136 {offsets = [128, 0], sizes = [128, 256], strides = [1, 1]} : vector<256x256xbf16> to vector<128x256xbf16>
    %183 = arith.truncf %181 : vector<32x128xf32> to vector<32x128xbf16>
    %cst_62 = arith.constant dense<0.000000e+00> : vector<32x256xf32>
    %184 = tpu.matmul %183, %182, %cst_62 {dimension_numbers = #tpu.dot_dimension_numbers<[1], [0], [0], [1], [0, 0, 1, 1], [], []>} : vector<32x128xbf16>, vector<128x256xbf16>, vector<32x256xf32> -> vector<32x256xf32>
    %185 = arith.addf %160, %184 : vector<32x256xf32>
    %186 = vector.extract_strided_slice %16 {offsets = [0, 4608], sizes = [1, 256], strides = [1, 1]} : vector<1x6400xbf16> to vector<1x256xbf16>
    %187 = arith.extf %186 : vector<1x256xbf16> to vector<1x256xf32>
    %188 = vector.broadcast %187 : vector<1x256xf32> to vector<32x256xf32>
    %189 = arith.addf %185, %188 : vector<32x256xf32>
    %190 = arith.mulf %27, %189 : vector<32x256xf32>
    %191 = arith.addf %51, %190 : vector<32x256xf32>
    %192 = tpu.concatenate %106, %191 in 1 : vector<32x256xf32>, vector<32x256xf32> -> vector<32x512xf32>
    %cst_63 = arith.constant dense<0.000000e+00> : vector<32xf32>
    %193 = vector.multi_reduction <add>, %192, %cst_63 [1] : vector<32x512xf32> to vector<32xf32>
    %194 = vector.shape_cast %193 : vector<32xf32> to vector<32x1xf32>
    %cst_64 = arith.constant 5.120000e+02 : f32
    %195 = vector.broadcast %cst_64 : f32 to vector<32x1xf32>
    %196 = arith.divf %194, %195 : vector<32x1xf32>
    %197 = vector.broadcast %196 : vector<32x1xf32> to vector<32x512xf32>
    %198 = arith.subf %192, %197 : vector<32x512xf32>
    %199 = arith.mulf %198, %198 : vector<32x512xf32>
    %cst_65 = arith.constant dense<0.000000e+00> : vector<32xf32>
    %200 = vector.multi_reduction <add>, %199, %cst_65 [1] : vector<32x512xf32> to vector<32xf32>
    %201 = vector.shape_cast %200 : vector<32xf32> to vector<32x1xf32>
    %cst_66 = arith.constant 5.120000e+02 : f32
    %202 = vector.broadcast %cst_66 : f32 to vector<32x1xf32>
    %203 = arith.divf %201, %202 : vector<32x1xf32>
    %204 = vector.broadcast %196 : vector<32x1xf32> to vector<32x512xf32>
    %205 = arith.subf %192, %204 : vector<32x512xf32>
    %cst_67 = arith.constant 9.99999997E-7 : f32
    %206 = vector.broadcast %cst_67 : f32 to vector<32x1xf32>
    %207 = arith.addf %203, %206 : vector<32x1xf32>
    %208 = math.rsqrt %207 : vector<32x1xf32>
    %209 = vector.broadcast %208 : vector<32x1xf32> to vector<32x512xf32>
    %210 = arith.mulf %205, %209 : vector<32x512xf32>
    %cst_68 = arith.constant 1.000000e+00 : f32
    %211 = vector.broadcast %cst_68 : f32 to vector<32x512xf32>
    %212 = arith.addf %211, %33 : vector<32x512xf32>
    %213 = arith.mulf %210, %212 : vector<32x512xf32>
    %214 = arith.addf %213, %32 : vector<32x512xf32>
    %215 = arith.truncf %214 : vector<32x512xf32> to vector<32x512xbf16>
    %cst_69 = arith.constant dense<0.000000e+00> : vector<32x1024xf32>
    %216 = tpu.matmul %215, %12, %cst_69 {dimension_numbers = #tpu.dot_dimension_numbers<[1], [0], [0], [1], [0, 0, 1, 1], [], []>} : vector<32x512xbf16>, vector<512x1024xbf16>, vector<32x1024xf32> -> vector<32x1024xf32>
    %217 = vector.extract_strided_slice %16 {offsets = [0, 5120], sizes = [1, 1024], strides = [1, 1]} : vector<1x6400xbf16> to vector<1x1024xbf16>
    %218 = arith.extf %217 : vector<1x1024xbf16> to vector<1x1024xf32>
    %219 = vector.broadcast %218 : vector<1x1024xf32> to vector<32x1024xf32>
    %220 = arith.addf %216, %219 : vector<32x1024xf32>
    %cst_70 = arith.constant 5.000000e-01 : f32
    %221 = vector.broadcast %cst_70 : f32 to vector<32x1024xf32>
    %222 = arith.mulf %221, %220 : vector<32x1024xf32>
    %cst_71 = arith.constant 4.471500e-02 : f32
    %223 = vector.broadcast %cst_71 : f32 to vector<32x1024xf32>
    %224 = arith.mulf %223, %220 : vector<32x1024xf32>
    %225 = arith.mulf %224, %220 : vector<32x1024xf32>
    %226 = arith.mulf %225, %220 : vector<32x1024xf32>
    %227 = arith.addf %220, %226 : vector<32x1024xf32>
    %cst_72 = arith.constant 0.797884583 : f32
    %228 = vector.broadcast %cst_72 : f32 to vector<32x1024xf32>
    %229 = arith.mulf %228, %227 : vector<32x1024xf32>
    %230 = math.tanh %229 : vector<32x1024xf32>
    %cst_73 = arith.constant 1.000000e+00 : f32
    %231 = vector.broadcast %cst_73 : f32 to vector<32x1024xf32>
    %232 = arith.addf %231, %230 : vector<32x1024xf32>
    %233 = arith.mulf %222, %232 : vector<32x1024xf32>
    %234 = arith.truncf %233 : vector<32x1024xf32> to vector<32x1024xbf16>
    %cst_74 = arith.constant dense<0.000000e+00> : vector<32x256xf32>
    %235 = tpu.matmul %234, %14, %cst_74 {dimension_numbers = #tpu.dot_dimension_numbers<[1], [0], [0], [1], [0, 0, 1, 1], [], []>} : vector<32x1024xbf16>, vector<1024x256xbf16>, vector<32x256xf32> -> vector<32x256xf32>
    %236 = vector.extract_strided_slice %16 {offsets = [0, 6144], sizes = [1, 256], strides = [1, 1]} : vector<1x6400xbf16> to vector<1x256xbf16>
    %237 = arith.extf %236 : vector<1x256xbf16> to vector<1x256xf32>
    %238 = vector.broadcast %237 : vector<1x256xf32> to vector<32x256xf32>
    %239 = arith.addf %235, %238 : vector<32x256xf32>
    %240 = arith.mulf %28, %239 : vector<32x256xf32>
    %241 = arith.addf %51, %240 : vector<32x256xf32>
    %c0_75 = arith.constant 0 : index
    %c0_76 = arith.constant 0 : index
    %242 = vector.load %arg22[%c0_75, %c0_76] : memref<32x256xf32, #tpu.memory_space<vmem>>, vector<32x256xf32>
    tpu.vector_store %arg22[%c0_75, %c0_76], %241 {strides = array<i32>} : memref<32x256xf32, #tpu.memory_space<vmem>>, vector<32x256xf32>,
    %c1_i32 = arith.constant 1 : i32
    %243 = arith.cmpi eq, %arg0, %c1_i32 : i32
    %244 = arith.extui %243 : i1 to i32
    %c0_i32_77 = arith.constant 0 : i32
    %245 = arith.cmpi ne, %244, %c0_i32_77 : i32
    scf.if %245 {
      %c0_78 = arith.constant 0 : index
      %c0_79 = arith.constant 0 : index
      %246 = vector.load %arg23[%c0_78, %c0_79] : memref<32x256xf32, #tpu.memory_space<vmem>>, vector<32x256xf32>
      %c0_80 = arith.constant 0 : index
      %c0_81 = arith.constant 0 : index
      %247 = vector.load %arg17[%c0_80, %c0_81] : memref<256x512xbf16, #tpu.memory_space<vmem>>, vector<256x512xbf16>
      %c0_82 = arith.constant 0 : index
      %c0_83 = arith.constant 0 : index
      %248 = vector.load %arg18[%c0_82, %c0_83] : memref<1x512xbf16, #tpu.memory_space<vmem>>, vector<1x512xbf16>
      %c0_84 = arith.constant 0 : index
      %c0_85 = arith.constant 0 : index
      %249 = vector.load %arg19[%c0_84, %c0_85] : memref<256x512xbf16, #tpu.memory_space<vmem>>, vector<256x512xbf16>
      %c0_86 = arith.constant 0 : index
      %c0_87 = arith.constant 0 : index
      %250 = vector.load %arg20[%c0_86, %c0_87] : memref<1x512xbf16, #tpu.memory_space<vmem>>, vector<1x512xbf16>
      %251 = arith.truncf %246 : vector<32x256xf32> to vector<32x256xbf16>
      %cst_88 = arith.constant dense<0.000000e+00> : vector<32x512xf32>
      %252 = tpu.matmul %251, %247, %cst_88 {dimension_numbers = #tpu.dot_dimension_numbers<[1], [0], [0], [1], [0, 0, 1, 1], [], []>} : vector<32x256xbf16>, vector<256x512xbf16>, vector<32x512xf32> -> vector<32x512xf32>
      %253 = arith.extf %248 : vector<1x512xbf16> to vector<1x512xf32>
      %254 = vector.broadcast %253 : vector<1x512xf32> to vector<32x512xf32>
      %255 = arith.addf %252, %254 : vector<32x512xf32>
      %256 = vector.extract_strided_slice %255 {offsets = [0, 0], sizes = [32, 256], strides = [1, 1]} : vector<32x512xf32> to vector<32x256xf32>
      %257 = vector.extract_strided_slice %255 {offsets = [0, 256], sizes = [32, 256], strides = [1, 1]} : vector<32x512xf32> to vector<32x256xf32>
      %cst_89 = arith.constant dense<0.000000e+00> : vector<32xf32>
      %258 = vector.multi_reduction <add>, %241, %cst_89 [1] : vector<32x256xf32> to vector<32xf32>
      %259 = vector.shape_cast %258 : vector<32xf32> to vector<32x1xf32>
      %cst_90 = arith.constant 2.560000e+02 : f32
      %260 = vector.broadcast %cst_90 : f32 to vector<32x1xf32>
      %261 = arith.divf %259, %260 : vector<32x1xf32>
      %262 = vector.broadcast %261 : vector<32x1xf32> to vector<32x256xf32>
      %263 = arith.subf %241, %262 : vector<32x256xf32>
      %264 = arith.mulf %263, %263 : vector<32x256xf32>
      %cst_91 = arith.constant dense<0.000000e+00> : vector<32xf32>
      %265 = vector.multi_reduction <add>, %264, %cst_91 [1] : vector<32x256xf32> to vector<32xf32>
      %266 = vector.shape_cast %265 : vector<32xf32> to vector<32x1xf32>
      %cst_92 = arith.constant 2.560000e+02 : f32
      %267 = vector.broadcast %cst_92 : f32 to vector<32x1xf32>
      %268 = arith.divf %266, %267 : vector<32x1xf32>
      %269 = vector.broadcast %261 : vector<32x1xf32> to vector<32x256xf32>
      %270 = arith.subf %241, %269 : vector<32x256xf32>
      %cst_93 = arith.constant 9.99999997E-7 : f32
      %271 = vector.broadcast %cst_93 : f32 to vector<32x1xf32>
      %272 = arith.addf %268, %271 : vector<32x1xf32>
      %273 = math.rsqrt %272 : vector<32x1xf32>
      %274 = vector.broadcast %273 : vector<32x1xf32> to vector<32x256xf32>
      %275 = arith.mulf %270, %274 : vector<32x256xf32>
      %cst_94 = arith.constant 1.000000e+00 : f32
      %276 = vector.broadcast %cst_94 : f32 to vector<32x256xf32>
      %277 = arith.addf %276, %257 : vector<32x256xf32>
      %278 = arith.mulf %275, %277 : vector<32x256xf32>
      %279 = arith.addf %278, %256 : vector<32x256xf32>
      %280 = arith.truncf %279 : vector<32x256xf32> to vector<32x256xbf16>
      %cst_95 = arith.constant dense<0.000000e+00> : vector<32x512xf32>
      %281 = tpu.matmul %280, %249, %cst_95 {dimension_numbers = #tpu.dot_dimension_numbers<[1], [0], [0], [1], [0, 0, 1, 1], [], []>} : vector<32x256xbf16>, vector<256x512xbf16>, vector<32x512xf32> -> vector<32x512xf32>
      %282 = arith.extf %250 : vector<1x512xbf16> to vector<1x512xf32>
      %283 = vector.broadcast %282 : vector<1x512xf32> to vector<32x512xf32>
      %284 = arith.addf %281, %283 : vector<32x512xf32>
      %c0_96 = arith.constant 0 : index
      %c0_97 = arith.constant 0 : index
      %285 = vector.load %arg21[%c0_96, %c0_97] : memref<32x512xf32, #tpu.memory_space<vmem>>, vector<32x512xf32>
      tpu.vector_store %arg21[%c0_96, %c0_97], %284 {strides = array<i32>} : memref<32x512xf32, #tpu.memory_space<vmem>>, vector<32x512xf32>,
    } else {
    }
    return
  }
  func.func @transform_0(%arg0: i32) -> (i32, i32) {
    %c0_i32 = arith.constant 0 : i32
    %c0_i32_0 = arith.constant 0 : i32
    %c0_i32_1 = arith.constant 0 : i32
    return %c0_i32, %c0_i32_0 : i32, i32
  }
  func.func @transform_1(%arg0: i32) -> (i32, i32) {
    %c0_i32 = arith.constant 0 : i32
    %c0_i32_0 = arith.constant 0 : i32
    %c0_i32_1 = arith.constant 0 : i32
    return %c0_i32, %c0_i32_0 : i32, i32
  }
  func.func @transform_2(%arg0: i32) -> (i32, i32) {
    %c0_i32 = arith.constant 0 : i32
    %c0_i32_0 = arith.constant 0 : i32
    %c0_i32_1 = arith.constant 0 : i32
    return %c0_i32, %c0_i32_0 : i32, i32
  }
  func.func @transform_3(%arg0: i32) -> (i32, i32) {
    %c0_i32 = arith.constant 0 : i32
    %c0_i32_0 = arith.constant 0 : i32
    %c0_i32_1 = arith.constant 0 : i32
    return %c0_i32, %c0_i32_0 : i32, i32
  }
  func.func @transform_4(%arg0: i32) -> (i32, i32) {
    %c0_i32 = arith.constant 0 : i32
    %c0_i32_0 = arith.constant 0 : i32
    %c0_i32_1 = arith.constant 0 : i32
    return %c0_i32, %c0_i32_0 : i32, i32
  }
  func.func @transform_5(%arg0: i32) -> (i32, i32) {
    %c0_i32 = arith.constant 0 : i32
    %c0_i32_0 = arith.constant 0 : i32
    %c0_i32_1 = arith.constant 0 : i32
    return %c0_i32, %c0_i32_0 : i32, i32
  }
  func.func @transform_6(%arg0: i32) -> (i32, i32) {
    %c0_i32 = arith.constant 0 : i32
    %c0_i32_0 = arith.constant 0 : i32
    %c0_i32_1 = arith.constant 0 : i32
    return %c0_i32, %c0_i32_0 : i32, i32
  }
  func.func @transform_7(%arg0: i32) -> (i32, i32) {
    %c0_i32 = arith.constant 0 : i32
    %c0_i32_0 = arith.constant 0 : i32
    %c0_i32_1 = arith.constant 0 : i32
    return %c0_i32, %c0_i32_0 : i32, i32
  }
  func.func @transform_8(%arg0: i32) -> (i32, i32) {
    %c0_i32 = arith.constant 0 : i32
    %c0_i32_0 = arith.constant 0 : i32
    %c0_i32_1 = arith.constant 0 : i32
    return %c0_i32, %c0_i32_0 : i32, i32
  }
  func.func @transform_9(%arg0: i32) -> (i32, i32) {
    %c0_i32 = arith.constant 0 : i32
    %c0_i32_0 = arith.constant 0 : i32
    %c0_i32_1 = arith.constant 0 : i32
    return %c0_i32, %c0_i32_0 : i32, i32
  }
  func.func @transform_10(%arg0: i32) -> (i32, i32, i32) {
    %c0_i32 = arith.constant 0 : i32
    %c0_i32_0 = arith.constant 0 : i32
    %c0_i32_1 = arith.constant 0 : i32
    return %arg0, %c0_i32, %c0_i32_0 : i32, i32, i32
  }
  func.func @transform_11(%arg0: i32) -> (i32, i32, i32) {
    %c0_i32 = arith.constant 0 : i32
    %c0_i32_0 = arith.constant 0 : i32
    %c0_i32_1 = arith.constant 0 : i32
    return %arg0, %c0_i32, %c0_i32_0 : i32, i32, i32
  }
  func.func @transform_12(%arg0: i32) -> (i32, i32, i32) {
    %c0_i32 = arith.constant 0 : i32
    %c0_i32_0 = arith.constant 0 : i32
    %c0_i32_1 = arith.constant 0 : i32
    return %arg0, %c0_i32, %c0_i32_0 : i32, i32, i32
  }
  func.func @transform_13(%arg0: i32) -> (i32, i32, i32) {
    %c0_i32 = arith.constant 0 : i32
    %c0_i32_0 = arith.constant 0 : i32
    %c0_i32_1 = arith.constant 0 : i32
    return %arg0, %c0_i32, %c0_i32_0 : i32, i32, i32
  }
  func.func @transform_14(%arg0: i32) -> (i32, i32, i32) {
    %c0_i32 = arith.constant 0 : i32
    %c0_i32_0 = arith.constant 0 : i32
    %c0_i32_1 = arith.constant 0 : i32
    return %arg0, %c0_i32, %c0_i32_0 : i32, i32, i32
  }
  func.func @transform_15(%arg0: i32) -> (i32, i32, i32) {
    %c0_i32 = arith.constant 0 : i32
    %c0_i32_0 = arith.constant 0 : i32
    %c0_i32_1 = arith.constant 0 : i32
    return %arg0, %c0_i32, %c0_i32_0 : i32, i32, i32
  }
  func.func @transform_16(%arg0: i32) -> (i32, i32) {
    %c0_i32 = arith.constant 0 : i32
    %c0_i32_0 = arith.constant 0 : i32
    %c0_i32_1 = arith.constant 0 : i32
    return %c0_i32, %c0_i32_0 : i32, i32
  }
  func.func @transform_17(%arg0: i32) -> (i32, i32) {
    %c0_i32 = arith.constant 0 : i32
    %c0_i32_0 = arith.constant 0 : i32
    %c0_i32_1 = arith.constant 0 : i32
    return %c0_i32, %c0_i32_0 : i32, i32
  }
  func.func @transform_18(%arg0: i32) -> (i32, i32) {
    %c0_i32 = arith.constant 0 : i32
    %c0_i32_0 = arith.constant 0 : i32
    %c0_i32_1 = arith.constant 0 : i32
    return %c0_i32, %c0_i32_0 : i32, i32
  }
  func.func @transform_19(%arg0: i32) -> (i32, i32) {
    %c0_i32 = arith.constant 0 : i32
    %c0_i32_0 = arith.constant 0 : i32
    %c0_i32_1 = arith.constant 0 : i32
    return %c0_i32, %c0_i32_0 : i32, i32
  }
  func.func @transform_20(%arg0: i32) -> (i32, i32) {
    %c0_i32 = arith.constant 0 : i32
    %c0_i32_0 = arith.constant 0 : i32
    %c0_i32_1 = arith.constant 0 : i32
    return %c0_i32, %c0_i32_0 : i32, i32
  }
}

</mosaic_0001>

<bundles_post_ra>
// kernel: dit_forward_pallas.1
= control target key start
LH: loop header
LB: loop body
LE: loop exit
PB: predicated region body
PF: predicated region fallthrough
CT: control target
= control target key end

     0   :  { %s19490_s0 = inlined_call_operand.vmem [shape: f32[32,256], index: 0, kind: input, shape index: {}]   ;;  %s19491_s1 = inlined_call_operand.vmem [shape: f32[32,256], index: 1, kind: input, shape index: {}]   ;;  %s19492_s2 = inlined_call_operand.vmem [shape: f32[32,256], index: 2, kind: input, shape index: {}]   ;;  %s19493_s3 = inlined_call_operand.vmem [shape: f32[32,256], index: 3, kind: input, shape index: {}]   ;;  %s19494_s4 = inlined_call_operand.hbm [shape: f32[32,32], index: 4, kind: input, shape index: {}]   ;;  %s19495_s5 = inlined_call_operand.hbm [shape: f32[32,32], index: 5, kind: input, shape index: {}]   ;;  %s19496_s6 = inlined_call_operand.hbm [shape: bf16[256,256], index: 6, kind: input, shape index: {}]   ;;  %s19497_s7 = inlined_call_operand.hbm [shape: bf16[1,256], index: 7, kind: input, shape index: {}]   ;;  %s19498_s8 = inlined_call_operand.hbm [shape: bf16[256,256], index: 8, kind: input, shape index: {}]   ;;  %s19499_s9 = inlined_call_operand.hbm [shape: bf16[1,256], index: 9, kind: input, shape index: {}]   ;;  %s19500_s10 = inlined_call_operand.hbm [shape: bf16[2,256,3840], index: 10, kind: input, shape index: {}]   ;;  %s19501_s11 = inlined_call_operand.hbm [shape: bf16[2,256,1536], index: 11, kind: input, shape index: {}]   ;;  %s19502_s12 = inlined_call_operand.hbm [shape: bf16[2,256,512], index: 12, kind: input, shape index: {}]   ;;  %s19503_s13 = inlined_call_operand.hbm [shape: bf16[2,512,1024], index: 13, kind: input, shape index: {}]   ;;  %s19504_s14 = inlined_call_operand.hbm [shape: bf16[2,1024,256], index: 14, kind: input, shape index: {}]   ;;  %s19505_s15 = inlined_call_operand.vmem [shape: bf16[2,1,6400], index: 15, kind: input, shape index: {}]   ;;  %s19506_s16 = inlined_call_operand.hbm [shape: bf16[256,512], index: 16, kind: input, shape index: {}]   ;;  %s19507_s17 = inlined_call_operand.hbm [shape: bf16[1,512], index: 17, kind: input, shape index: {}]   ;;  %s19508_s18 = inlined_call_operand.hbm [shape: bf16[256,512], index: 18, kind: input, shape index: {}]   ;;  %s19509_s19 = inlined_call_operand.hbm [shape: bf16[1,512], index: 19, kind: input, shape index: {}]   ;;  %s19510_s20 = inlined_call_operand.vmem [shape: f32[32,512], index: 20, kind: output, shape index: {}]  }
   0x1   :  { %19589 = sst [smem:[#allocation108_spill]] %s19490_s0 }
   0x2   :  { %19590 = sst [smem:[#allocation109_spill]] %s19491_s1 }
   0x3   :  { %19591 = sst [smem:[#allocation110_spill]] %s19492_s2 }
   0x4   :  { %19592 = sst [smem:[#allocation111_spill]] %s19493_s3 }
   0x5   :  { %19593 = sst [smem:[#allocation112_spill]] %s19494_s4 }
   0x6   :  { %19594 = sst [smem:[#allocation113_spill]] %s19495_s5 }
   0x7   :  { %19595 = sst [smem:[#allocation114_spill]] %s19496_s6 }
   0x8   :  { %19596 = sst [smem:[#allocation115_spill]] %s19497_s7 }
   0x9   :  { %19597 = sst [smem:[#allocation116_spill]] %s19498_s8 }
   0xa   :  { %19598 = sst [smem:[#allocation117_spill]] %s19499_s9 }
   0xb   :  { %19599 = sst [smem:[#allocation118_spill]] %s19500_s10 }
   0xc   :  { %19600 = sst [smem:[#allocation119_spill]] %s19504_s14 }
   0xd   :  { %19601 = sst [smem:[#allocation120_spill]] %s19505_s15 }
   0xe   :  { %19602 = sst [smem:[#allocation121_spill]] %s19508_s18 }
   0xf   :  { %19603 = sst [smem:[#allocation122_spill]] %s19509_s19 }
  0x10   :  { %19604 = sst [smem:[#allocation123_spill]] %s19510_s20 }
  0x11   :  { %25 = vsyncpa [#allocation5], 0 }
  0x12   :  { %26 = vsyncpa [#allocation7], 0 }
  0x13   :  { %27 = vsyncpa [#allocation10], 0 }
  0x14   :  { %28 = vsyncpa [#allocation13], 0 }
  0x15   :  { %29 = vsyncpa [#allocation23], 0  ;;  %s16247_s1 = smov 0   ;;  %s16249_s22 = smov 0  }
  0x16   :  { %s16251_s23 = smov 0   ;;  %s16253_s24 = smov 0  }
  0x17 LB: > { %19605 = sst [smem:[#allocation33_spill]] %s16106_s22  ;;  %s16116_s2 = smov [#allocation4]   ;;  %s16114_s24 = sphi %s16253_s24, %s19829_s24   ;;  %s16110_s23 = sphi %s16251_s23, %s19832_s23   ;;  %s16106_s22 = sphi %s16249_s22, %s19831_s22   ;;  %s16102_s1 = sphi %s16247_s1, %s19830_s1  }
  0x18   : > { %19606 = sst [smem:[#allocation34_spill]] %s16110_s23  ;;  %s535_s25 = sshll.u32 %s16116_s2, 4  ;;  %s536_s25 = int_to_ptr.vmem [resolvable:$true] %s535_s25 }
  0x19   : > { %s16268_s3 = sadd.s32 4294967295, %s16114_s24   ;;  %p12435_p0 = scmp.ge.s32.totalorder %s16114_s24, 1 }
  0x1a   : > { %19607 = sst [smem:[#allocation35_spill]] %s16268_s3  ;;  %p19518_p1 = scmp.eq.s32.totalorder %s16268_s3, 0 }
  0x1b   : > { %p511_p2 = scmp.lt.s32.totalorder %s16114_s24, 3  ;;  %s16287_s28 = sadd.s32 1, %s16114_s24  }
  0x1c   : > { %19611 = sst [smem:[#allocation37_spill]] %s16287_s28  ;;  %s19612_s30 = sld [smem:[#allocation112_spill]] }
  0x1d   : > { %p16274_p4 = pnand %p12435_p0, %p511_p2 }
  0x1f   : > { %s19608_s26 = scalar_select %p16274_p4, 1, 0 }
  0x20   : > { %p13878_p5 = pneg %p16274_p4 }
  0x21   : > { %19609 = sst [smem:[#allocation36_spill]] %s19608_s26 }
  0x22   : > { %p16282_p6 = pnand %p13878_p5, %p19518_p1  ;;  %s15618_s0 = scalar_lea.hbm %s19612_s30, 512 }
  0x23   : > { %p15619_p7 = scmp.ne.s32.totalorder %s19612_s30, %s15618_s0  ;;  %p15625_p11 = scmp.lt.u32.totalorder %s15618_s0, %s19612_s30 }
  0x24   : > { %s19610_s27 = scalar_select %p16282_p6, 1, 0 }
  0x25   : > { %p16297_p8 = pneg %p16282_p6 }
  0x27   : > { %s19613_s20 = scalar_select %p16297_p8, 1, 0 }
  0x28   : > { %p15621_p9 = pnand %p16297_p8, %p15619_p7 }
  0x2a   : > { %p15622_p10 = pneg %p15621_p9 }
  0x2c   : > { %p15627_p12 = pnand %p15625_p11, %p15622_p10 }
  0x2e   : > { %15630 = shalt.err (!%p15627_p12)
}
  0x2f   : > { %s15631_s4 = scalar_lea.vmem %s536_s25, 512  ;;  %p15639_p5 = scmp.lt.s32.totalorder %s536_s25, %s536_s25 }
  0x30   : > { %p15632_p13 = scmp.ne.s32.totalorder %s536_s25, %s15631_s4  ;;  %p15640_p3 = scmp.lt.s32.totalorder %s15631_s4, %s15631_s4 }
  0x32   : > { %p15634_p0 = pnand %p15632_p13, %p16297_p8  ;;  %p15641_p1 = por %p15640_p3, %p15639_p5 }
  0x34   : > { %p15635_p2 = pneg %p15634_p0 }
  0x36   : > { %p15642_p4 = pnand %p15641_p1, %p15635_p2 }
  0x38   : > { %15645 = shalt.err (!%p15642_p4)
}
  0x39   : > { %s19523_s29 = smov 128   ;;  %s19525_s15 = smov 8  }
  0x3a   : > { %13881 = dma.hbm_to_vmem [thread:$0]  (!%p16282_p6), %s19612_s30, 512, %s536_s25, [#allocation5], %s19523_s29, %s19523_s29, %s19525_s15  }
  0x3b   : > { %s249_s21 = ssub.s32 %s16114_s24, %s16287_s28  ;;  %s252_s2 = sadd.s32 1, %s16110_s23 }
  0x3c   : > { %p250_p1 = scmp.eq.s32.totalorder %s249_s21, 0  ;;  %p259_p3 = scmp.ne.s32.totalorder %s16110_s23, %s16106_s22 }
  0x3d   : > { %p260_p4 = scmp.eq.s32.totalorder %s16114_s24, 0  ;;  %p265_p7 = scmp.ne.s32.totalorder %s16106_s22, %s16102_s1 }
  0x3e   : > { %s16325_s4 = scalar_select %p250_p1, %s16110_s23, %s252_s2  }
  0x3f   : > { %p261_p9 = por %p260_p4, %p259_p3  ;;  %p19615_p10 = scmp.eq.s32.totalorder %s16268_s3, 0 }
  0x40   : > { %19614 = sst [smem:[#allocation38_spill]] %s16325_s4  ;;  %p13935_p12 = scmp.lt.s32.totalorder %s16114_s24, 2 }
  0x41   : > { %p16329_p11 = por %p19615_p10, %p265_p7  ;;  %s658_s19 = sand.u32 1, %s16114_s24  }
  0x42   : > { %s16336_s18 = sand.u32 1, %s16110_s23   ;;  %p16339_p13 = pnand %p13935_p12, %p261_p9 }
  0x43   : > { %s19616_s14 = scalar_select %p16329_p11, 1, 0 }
  0x44   : > { %s13821_s25 = smul.u32 3840, %s16336_s18  ;;  %s19619_s10 = sld [smem:[#allocation118_spill]] }
  0x45   : > { %19617 = sst [smem:[#allocation39_spill]] %s19616_s14  ;;  %s13822_s1 = smul.u32 61440, %s16114_s24 }
  0x46   : > { %s19618_s26 = scalar_select %p16339_p13, 1, 0 }
  0x47   : > { %s662_s29 = scalar_lea.vmem [#allocation14], %s13821_s25  ;;  %s16351_s30 = scalar_lea.sflag [#allocation5], %s658_s19 }
  0x48   : > { %s669_s15 = sshll.u32 %s662_s29, 4  ;;  %p16357_p2 = pneg %p16339_p13  ;;  %s16349_s15 = int_to_ptr.vmem [resolvable:$true] %s669_s15 }
  0x4a   : > { %s16347_s2 = scalar_lea.hbm %s19619_s10, %s13822_s1  ;;  %s15651_s25 = scalar_lea.hbm %s19619_s10, 122880 }
  0x4b   : > { %s15646_s4 = scalar_lea.hbm %s16347_s2, 61440  ;;  %p15652_p3 = scmp.lt.u32.totalorder %s16347_s2, %s19619_s10 }
  0x4c   : > { %p15647_p0 = scmp.ne.s32.totalorder %s16347_s2, %s15646_s4  ;;  %p15653_p4 = scmp.lt.u32.totalorder %s15651_s25, %s15646_s4 }
  0x4d   : > { %s19620_s23 = scalar_select %p16357_p2, 1, 0 }
  0x4e   : > { %p15649_p5 = pnand %p16357_p2, %p15647_p0  ;;  %p15654_p7 = por %p15653_p4, %p15652_p3 }
  0x4f   : > { %p15655_p9 = scmp.lt.u32.totalorder %s15646_s4, %s16347_s2 }
  0x50   : > { %p15650_p1 = pneg %p15649_p5 }
  0x51   : > { %p15656_p10 = por %p15655_p9, %p15654_p7 }
  0x53   : > { %p15657_p12 = pnand %p15656_p10, %p15650_p1 }
  0x55   : > { %15660 = shalt.err (!%p15657_p12)
}
  0x56   : > { %s15661_s19 = scalar_lea.vmem %s16349_s15, 61440  ;;  %s16119_s1 = smov [#allocation14]  }
  0x57   : > { %p15662_p0 = scmp.ne.s32.totalorder %s16349_s15, %s15661_s19  ;;  %s15666_s0 = sshll.u32 %s16119_s1, 4  ;;  %s15667_s0 = int_to_ptr.vmem [resolvable:$false] %s15666_s0 }
  0x58   : > { %s15668_s29 = scalar_lea.vmem %s15667_s0, 122880  ;;  %p15669_p6 = scmp.lt.s32.totalorder %s16349_s15, %s15667_s0 }
  0x59   : > { %p15664_p5 = pnand %p15662_p0, %p16357_p2  ;;  %p15670_p8 = scmp.lt.s32.totalorder %s15668_s29, %s15661_s19 }
  0x5b   : > { %p15665_p11 = pneg %p15664_p5  ;;  %p15671_p3 = por %p15670_p8, %p15669_p6 }
  0x5d   : > { %p15672_p4 = pnand %p15671_p3, %p15665_p11 }
  0x5f   : > { %15675 = shalt.err (!%p15672_p4)
}
  0x60   : > { %s16120_s4 = smov 1920   ;;  %s16121_s25 = smov 120  }
  0x61   : > { %13912 = dma.hbm_to_vmem [thread:$0]  (!%p16339_p13), %s16347_s2, 61440, %s16349_s15, %s16351_s30, %s16120_s4, %s16120_s4, %s16121_s25  }
  0x62   : > { %s13823_s21 = smul.u32 1536, %s16336_s18  ;;  %s16122_s14 = smov [#allocation6]  }
  0x63   : > { %s13824_s1 = smul.u32 24576, %s16114_s24  ;;  %s16390_s22 = sshll.u32 %s16122_s14, 4  ;;  %s549_s22 = int_to_ptr.vmem [resolvable:$true] %s16390_s22 }
  0x64   : > { %s683_s0 = scalar_lea.vmem [#allocation15], %s13823_s21  ;;  %s15681_s28 = scalar_lea.hbm %s19501_s11, 49152 }
  0x65   : > { %s16386_s19 = scalar_lea.hbm %s19501_s11, %s13824_s1  ;;  %s690_s29 = sshll.u32 %s683_s0, 4  ;;  %s16388_s29 = int_to_ptr.vmem [resolvable:$true] %s690_s29 }
  0x66   : > { %s15676_s3 = scalar_lea.hbm %s16386_s19, 24576  ;;  %p15682_p1 = scmp.lt.u32.totalorder %s16386_s19, %s19501_s11 }
  0x67   : > { %p15677_p6 = scmp.ne.s32.totalorder %s16386_s19, %s15676_s3  ;;  %p15683_p7 = scmp.lt.u32.totalorder %s15681_s28, %s15676_s3 }
  0x68   : > { %p15685_p10 = scmp.lt.u32.totalorder %s15676_s3, %s16386_s19 }
  0x69   : > { %p15679_p8 = pnand %p15677_p6, %p16357_p2  ;;  %p15684_p9 = por %p15683_p7, %p15682_p1 }
  0x6b   : > { %p15680_p11 = pneg %p15679_p8  ;;  %p15686_p12 = por %p15685_p10, %p15684_p9 }
  0x6d   : > { %p15687_p0 = pnand %p15686_p12, %p15680_p11 }
  0x6f   : > { %15690 = shalt.err (!%p15687_p0)
}
  0x70   : > { %s15691_s14 = scalar_lea.vmem %s16388_s29, 24576  ;;  %s16123_s25 = smov [#allocation15]  }
  0x71   : > { %p15692_p5 = scmp.ne.s32.totalorder %s16388_s29, %s15691_s14  ;;  %s15696_s21 = sshll.u32 %s16123_s25, 4  ;;  %s15697_s21 = int_to_ptr.vmem [resolvable:$false] %s15696_s21 }
  0x72   : > { %s15698_s1 = scalar_lea.vmem %s15697_s21, 49152  ;;  %p15699_p6 = scmp.lt.s32.totalorder %s16388_s29, %s15697_s21 }
  0x73   : > { %p15694_p3 = pnand %p15692_p5, %p16357_p2  ;;  %p15700_p8 = scmp.lt.s32.totalorder %s15698_s1, %s15691_s14 }
  0x75   : > { %p15695_p4 = pneg %p15694_p3  ;;  %p15701_p1 = por %p15700_p8, %p15699_p6 }
  0x77   : > { %p15702_p7 = pnand %p15701_p1, %p15695_p4 }
  0x79   : > { %15705 = shalt.err (!%p15702_p7)
}
  0x7a   : > { %s16124_s3 = smov 768   ;;  %s16125_s0 = smov 48  }
  0x7b   : > { %13915 = dma.hbm_to_vmem [thread:$0]  (!%p16339_p13), %s16386_s19, 24576, %s16388_s29, %s16351_s30, %s16124_s3, %s16124_s3, %s16125_s0  }
  0x7c   : > { %s19621_s5 = sld [smem:[#allocation113_spill]]  ;;  %p19622_p9 = scmp.ne.s32.totalorder %s19613_s20, 0 }
  0x82   : > { %s15706_s28 = scalar_lea.hbm %s19621_s5, 512 }
  0x83   : > { %p15707_p11 = scmp.ne.s32.totalorder %s19621_s5, %s15706_s28  ;;  %p15713_p0 = scmp.lt.u32.totalorder %s15706_s28, %s19621_s5 }
  0x85   : > { %p15709_p10 = pnand %p15707_p11, %p19622_p9 }
  0x87   : > { %p15710_p12 = pneg %p15709_p10 }
  0x89   : > { %p15715_p5 = pnand %p15713_p0, %p15710_p12 }
  0x8b   : > { %15718 = shalt.err (!%p15715_p5)
}
  0x8c   : > { %s15719_s21 = scalar_lea.vmem %s549_s22, 512  ;;  %p15727_p8 = scmp.lt.s32.totalorder %s549_s22, %s549_s22 }
  0x8d   : > { %p15720_p3 = scmp.ne.s32.totalorder %s549_s22, %s15719_s21  ;;  %p15728_p1 = scmp.lt.s32.totalorder %s15719_s21, %s15719_s21 }
  0x8f   : > { %p15722_p4 = pnand %p15720_p3, %p19622_p9  ;;  %p15729_p7 = por %p15728_p1, %p15727_p8 }
  0x91   : > { %p15723_p6 = pneg %p15722_p4 }
  0x93   : > { %p15730_p13 = pnand %p15729_p7, %p15723_p6 }
  0x95   : > { %15733 = shalt.err (!%p15730_p13)
}
  0x96   : > { %p19623_p11 = scmp.ne.s32.totalorder %s19610_s27, 0  ;;  %s19624_s19 = smov 8  }
  0x97   : > { %s19625_s29 = smov 128   ;;  %s16126_s0 = smov [#allocation9]  }
  0x98   : > { %13884 = dma.hbm_to_vmem [thread:$0]  (!%p19623_p11), %s19621_s5, 512, %s549_s22, [#allocation7], %s19625_s29, %s19625_s29, %s19624_s19  }
  0x99   : > { %s575_s15 = sshll.u32 %s16126_s0, 4  ;;  %s19626_s7 = sld [smem:[#allocation115_spill]]  ;;  %s576_s15 = int_to_ptr.vmem [resolvable:$true] %s575_s15 }
  0x9f   : > { %s15734_s2 = scalar_lea.hbm %s19626_s7, 32 }
  0xa0   : > { %p15735_p13 = scmp.ne.s32.totalorder %s19626_s7, %s15734_s2  ;;  %p15741_p0 = scmp.lt.u32.totalorder %s15734_s2, %s19626_s7 }
  0xa2   : > { %p15737_p10 = pnand %p15735_p13, %p19622_p9 }
  0xa4   : > { %p15738_p12 = pneg %p15737_p10 }
  0xa6   : > { %p15743_p5 = pnand %p15741_p0, %p15738_p12 }
  0xa8   : > { %15746 = shalt.err (!%p15743_p5)
}
  0xa9   : > { %s15747_s22 = scalar_lea.vmem %s576_s15, 32  ;;  %p15755_p8 = scmp.lt.s32.totalorder %s576_s15, %s576_s15 }
  0xaa   : > { %p15748_p3 = scmp.ne.s32.totalorder %s576_s15, %s15747_s22  ;;  %p15756_p1 = scmp.lt.s32.totalorder %s15747_s22, %s15747_s22 }
  0xac   : > { %p15750_p4 = pnand %p15748_p3, %p19622_p9  ;;  %p15757_p7 = por %p15756_p1, %p15755_p8 }
  0xae   : > { %p15751_p6 = pneg %p15750_p4 }
  0xb0   : > { %p15758_p2 = pnand %p15757_p7, %p15751_p6 }
  0xb2   : > { %15761 = shalt.err (!%p15758_p2)
}
  0xb3   : > { %13890 = dma.hbm_to_vmem [thread:$0]  (!%p19623_p11), %s19626_s7, 32, %s576_s15, [#allocation10]  }
  0xb4   : > { %s12449_s0 = sshll.u32 %s16336_s18, 9  ;;  %s13666_s10 = sshll.u32 %s16114_s24, 13 }
  0xb5   : > { %s16459_s4 = scalar_lea.hbm %s19502_s12, %s13666_s10  ;;  %s704_s14 = scalar_lea.vmem [#allocation16], %s12449_s0 }
  0xb6   : > { %s711_s25 = sshll.u32 %s704_s14, 4  ;;  %s16127_s21 = smov [#allocation8]   ;;  %s16461_s25 = int_to_ptr.vmem [resolvable:$true] %s711_s25 }
  0xb7   : > { %s16463_s22 = sshll.u32 %s16127_s21, 4  ;;  %s15762_s1 = scalar_lea.hbm %s16459_s4, 8192  ;;  %s562_s22 = int_to_ptr.vmem [resolvable:$true] %s16463_s22 }
  0xb8   : > { %p15763_p2 = scmp.ne.s32.totalorder %s16459_s4, %s15762_s1  ;;  %p19627_p13 = scmp.ne.s32.totalorder %s19620_s23, 0 }
  0xb9   : > { %s15767_s10 = scalar_lea.hbm %s19502_s12, 16384  ;;  %p15768_p0 = scmp.lt.u32.totalorder %s16459_s4, %s19502_s12 }
  0xba   : > { %p15765_p10 = pnand %p15763_p2, %p19627_p13  ;;  %p15769_p5 = scmp.lt.u32.totalorder %s15767_s10, %s15762_s1 }
  0xbb   : > { %p15771_p4 = scmp.lt.u32.totalorder %s15762_s1, %s16459_s4 }
  0xbc   : > { %p15766_p12 = pneg %p15765_p10  ;;  %p15770_p3 = por %p15769_p5, %p15768_p0 }
  0xbe   : > { %p15772_p6 = por %p15771_p4, %p15770_p3 }
  0xc0   : > { %p15773_p8 = pnand %p15772_p6, %p15766_p12 }
  0xc2   : > { %15776 = shalt.err (!%p15773_p8)
}
  0xc3   : > { %s15777_s0 = scalar_lea.vmem %s16461_s25, 8192  ;;  %s16128_s14 = smov [#allocation16]  }
  0xc4   : > { %p15778_p1 = scmp.ne.s32.totalorder %s16461_s25, %s15777_s0  ;;  %s15782_s21 = sshll.u32 %s16128_s14, 4  ;;  %s15783_s21 = int_to_ptr.vmem [resolvable:$false] %s15782_s21 }
  0xc5   : > { %s15784_s15 = scalar_lea.vmem %s15783_s21, 16384  ;;  %p15785_p10 = scmp.lt.s32.totalorder %s16461_s25, %s15783_s21 }
  0xc6   : > { %p15780_p7 = pnand %p15778_p1, %p19627_p13  ;;  %p15786_p11 = scmp.lt.s32.totalorder %s15784_s15, %s15777_s0 }
  0xc8   : > { %p15781_p2 = pneg %p15780_p7  ;;  %p15787_p0 = por %p15786_p11, %p15785_p10 }
  0xca   : > { %p15788_p5 = pnand %p15787_p0, %p15781_p2 }
  0xcc   : > { %15791 = shalt.err (!%p15788_p5)
}
  0xcd   : > { %s19546_s1 = smov 256   ;;  %s19548_s3 = smov 16  }
  0xce   : > { %p19628_p12 = scmp.ne.s32.totalorder %s19618_s26, 0  ;;  %s19629_s6 = sld [smem:[#allocation114_spill]] }
  0xd0   : > { %13918 = dma.hbm_to_vmem [thread:$0]  (!%p19628_p12), %s16459_s4, 8192, %s16461_s25, %s16351_s30, %s19546_s1, %s19546_s1, %s19548_s3  }
  0xd4   : > { %s15792_s2 = scalar_lea.hbm %s19629_s6, 4096 }
  0xd5   : > { %p15793_p11 = scmp.ne.s32.totalorder %s19629_s6, %s15792_s2  ;;  %p15799_p6 = scmp.lt.u32.totalorder %s15792_s2, %s19629_s6 }
  0xd7   : > { %p15795_p3 = pnand %p15793_p11, %p19622_p9 }
  0xd9   : > { %p15796_p4 = pneg %p15795_p3 }
  0xdb   : > { %p15801_p8 = pnand %p15799_p6, %p15796_p4 }
  0xdd   : > { %15804 = shalt.err (!%p15801_p8)
}
  0xde   : > { %s15805_s5 = scalar_lea.vmem %s562_s22, 4096  ;;  %p15813_p10 = scmp.lt.s32.totalorder %s562_s22, %s562_s22 }
  0xdf   : > { %p15806_p1 = scmp.ne.s32.totalorder %s562_s22, %s15805_s5  ;;  %p15814_p0 = scmp.lt.s32.totalorder %s15805_s5, %s15805_s5 }
  0xe1   : > { %p15808_p7 = pnand %p15806_p1, %p19622_p9  ;;  %p15815_p5 = por %p15814_p0, %p15813_p10 }
  0xe3   : > { %p15809_p2 = pneg %p15808_p7 }
  0xe5   : > { %p15816_p12 = pnand %p15815_p5, %p15809_p2 }
  0xe7   : > { %15819 = shalt.err (!%p15816_p12)
}
  0xe8   : > { %p19630_p11 = scmp.ne.s32.totalorder %s19610_s27, 0  ;;  %s16131_s10 = smov [#allocation11]  }
  0xe9   : > { %s585_s28 = sshll.u32 %s16131_s10, 4  ;;  %s16132_s2 = smov [#allocation12]   ;;  %s586_s28 = int_to_ptr.vmem [resolvable:$true] %s585_s28 }
  0xea   : > { %13887 = dma.hbm_to_vmem [thread:$0]  (!%p19630_p11), %s19629_s6, 4096, %s562_s22, [#allocation7], %s19625_s29, %s19625_s29, %s19624_s19  }
  0xeb   : > { %s599_s0 = sshll.u32 %s16132_s2, 4  ;;  %s19631_s8 = sld [smem:[#allocation116_spill]]  ;;  %s600_s0 = int_to_ptr.vmem [resolvable:$true] %s599_s0 }
  0xf1   : > { %s15820_s21 = scalar_lea.hbm %s19631_s8, 4096 }
  0xf2   : > { %p15821_p12 = scmp.ne.s32.totalorder %s19631_s8, %s15820_s21  ;;  %p15827_p6 = scmp.lt.u32.totalorder %s15820_s21, %s19631_s8 }
  0xf4   : > { %p15823_p3 = pnand %p15821_p12, %p19622_p9 }
  0xf6   : > { %p15824_p4 = pneg %p15823_p3 }
  0xf8   : > { %p15829_p8 = pnand %p15827_p6, %p15824_p4 }
  0xfa   : > { %15832 = shalt.err (!%p15829_p8)
}
  0xfb   : > { %s15833_s22 = scalar_lea.vmem %s586_s28, 4096  ;;  %p15841_p10 = scmp.lt.s32.totalorder %s586_s28, %s586_s28 }
  0xfc   : > { %p15834_p1 = scmp.ne.s32.totalorder %s586_s28, %s15833_s22  ;;  %p15842_p0 = scmp.lt.s32.totalorder %s15833_s22, %s15833_s22 }
  0xfe   : > { %p15836_p7 = pnand %p15834_p1, %p19622_p9  ;;  %p15843_p5 = por %p15842_p0, %p15841_p10 }
 0x100   : > { %p15837_p2 = pneg %p15836_p7 }
 0x102   : > { %p15844_p13 = pnand %p15843_p5, %p15837_p2 }
 0x104   : > { %15847 = shalt.err (!%p15844_p13)
}
 0x105   : > { %13893 = dma.hbm_to_vmem [thread:$0]  (!%p19630_p11), %s19631_s8, 4096, %s586_s28, [#allocation10], %s19625_s29, %s19625_s29, %s19624_s19  }
 0x106   : > { %s12452_s25 = sshll.u32 %s16336_s18, 11  ;;  %s19632_s9 = sld [smem:[#allocation117_spill]] }
 0x10c   : > { %s15848_s14 = scalar_lea.hbm %s19632_s9, 32 }
 0x10d   : > { %p15849_p13 = scmp.ne.s32.totalorder %s19632_s9, %s15848_s14  ;;  %p15855_p4 = scmp.lt.u32.totalorder %s15848_s14, %s19632_s9 }
 0x10f   : > { %p15851_p12 = pnand %p15849_p13, %p19622_p9 }
 0x111   : > { %p15852_p3 = pneg %p15851_p12 }
 0x113   : > { %p15857_p6 = pnand %p15855_p4, %p15852_p3 }
 0x115   : > { %15860 = shalt.err (!%p15857_p6)
}
 0x116   : > { %s15861_s28 = scalar_lea.vmem %s600_s0, 32  ;;  %p15869_p2 = scmp.lt.s32.totalorder %s600_s0, %s600_s0 }
 0x117   : > { %p15862_p8 = scmp.ne.s32.totalorder %s600_s0, %s15861_s28  ;;  %p15870_p10 = scmp.lt.s32.totalorder %s15861_s28, %s15861_s28 }
 0x119   : > { %p15864_p1 = pnand %p15862_p8, %p19622_p9  ;;  %p15871_p0 = por %p15870_p10, %p15869_p2 }
 0x11b   : > { %p15865_p7 = pneg %p15864_p1 }
 0x11d   : > { %p15872_p5 = pnand %p15871_p0, %p15865_p7 }
 0x11f   : > { %15875 = shalt.err (!%p15872_p5)
}
 0x120   : > { %13896 = dma.hbm_to_vmem [thread:$0]  (!%p19630_p11), %s19632_s9, 32, %s600_s0, [#allocation13]  }
 0x121   : > { %s13667_s3 = sshll.u32 %s16114_s24, 15  ;;  %s725_s5 = scalar_lea.vmem [#allocation17], %s12452_s25 }
 0x122   : > { %s16556_s14 = scalar_lea.hbm %s19503_s13, %s13667_s3  ;;  %s732_s21 = sshll.u32 %s725_s5, 4  ;;  %s16558_s21 = int_to_ptr.vmem [resolvable:$true] %s732_s21 }
 0x123   : > { %s15876_s15 = scalar_lea.hbm %s16556_s14, 32768  ;;  %p19633_p12 = scmp.ne.s32.totalorder %s19620_s23, 0 }
 0x124   : > { %p15877_p13 = scmp.ne.s32.totalorder %s16556_s14, %s15876_s15  ;;  %s15881_s28 = scalar_lea.hbm %s19503_s13, 65536 }
 0x125   : > { %p15882_p6 = scmp.lt.u32.totalorder %s16556_s14, %s19503_s13  ;;  %p15883_p8 = scmp.lt.u32.totalorder %s15881_s28, %s15876_s15 }
 0x126   : > { %p15879_p3 = pnand %p15877_p13, %p19633_p12  ;;  %p15885_p7 = scmp.lt.u32.totalorder %s15876_s15, %s16556_s14 }
 0x127   : > { %p15884_p1 = por %p15883_p8, %p15882_p6 }
 0x128   : > { %p15880_p4 = pneg %p15879_p3 }
 0x129   : > { %p15886_p2 = por %p15885_p7, %p15884_p1 }
 0x12b   : > { %p15887_p10 = pnand %p15886_p2, %p15880_p4 }
 0x12d   : > { %15890 = shalt.err (!%p15887_p10)
}
 0x12e   : > { %s15891_s25 = scalar_lea.vmem %s16558_s21, 32768  ;;  %s16133_s3 = smov [#allocation17]  }
 0x12f   : > { %p15892_p0 = scmp.ne.s32.totalorder %s16558_s21, %s15891_s25  ;;  %s15896_s10 = sshll.u32 %s16133_s3, 4  ;;  %s15897_s10 = int_to_ptr.vmem [resolvable:$false] %s15896_s10 }
 0x130   : > { %s15898_s2 = scalar_lea.vmem %s15897_s10, 65536  ;;  %p15899_p3 = scmp.lt.s32.totalorder %s16558_s21, %s15897_s10 }
 0x131   : > { %p15894_p5 = pnand %p15892_p0, %p19633_p12  ;;  %p15900_p11 = scmp.lt.s32.totalorder %s15898_s2, %s15891_s25 }
 0x133   : > { %p15895_p13 = pneg %p15894_p5  ;;  %p15901_p6 = por %p15900_p11, %p15899_p3 }
 0x135   : > { %p15902_p8 = pnand %p15901_p6, %p15895_p13 }
 0x137   : > { %15905 = shalt.err (!%p15902_p8)
}
 0x138   : > { %s16134_s5 = smov 512   ;;  %s16135_s15 = smov 32  }
 0x139   : > { %p19634_p4 = scmp.ne.s32.totalorder %s19618_s26, 0  ;;  %s16136_s0 = smov [#allocation19]  }
 0x13a   : > { %s609_s4 = sshll.u32 %s16136_s0, 4  ;;  %s16137_s28 = smov [#allocation20]   ;;  %s610_s4 = int_to_ptr.vmem [resolvable:$true] %s609_s4 }
 0x13b   : > { %13921 = dma.hbm_to_vmem [thread:$0]  (!%p19634_p4), %s16556_s14, 32768, %s16558_s21, %s16351_s30, %s16134_s5, %s16134_s5, %s16135_s15  }
 0x13c   : > { %s623_s22 = sshll.u32 %s16137_s28, 4  ;;  %s15906_s25 = scalar_lea.hbm %s19506_s16, 8192  ;;  %s624_s22 = int_to_ptr.vmem [resolvable:$true] %s623_s22 }
 0x13d   : > { %p15907_p11 = scmp.ne.s32.totalorder %s19506_s16, %s15906_s25  ;;  %p15913_p2 = scmp.lt.u32.totalorder %s15906_s25, %s19506_s16 }
 0x13f   : > { %p15909_p1 = pnand %p15907_p11, %p19622_p9 }
 0x141   : > { %p15910_p7 = pneg %p15909_p1 }
 0x143   : > { %p15915_p10 = pnand %p15913_p2, %p15910_p7 }
 0x145   : > { %15918 = shalt.err (!%p15915_p10)
}
 0x146   : > { %s15919_s14 = scalar_lea.vmem %s610_s4, 8192  ;;  %p15927_p3 = scmp.lt.s32.totalorder %s610_s4, %s610_s4 }
 0x147   : > { %p15920_p0 = scmp.ne.s32.totalorder %s610_s4, %s15919_s14  ;;  %p15928_p6 = scmp.lt.s32.totalorder %s15919_s14, %s15919_s14 }
 0x149   : > { %p15922_p5 = pnand %p15920_p0, %p19622_p9  ;;  %p15929_p8 = por %p15928_p6, %p15927_p3 }
 0x14b   : > { %p15923_p13 = pneg %p15922_p5 }
 0x14d   : > { %p15930_p4 = pnand %p15929_p8, %p15923_p13 }
 0x14f   : > { %15933 = shalt.err (!%p15930_p4)
}
 0x150   : > { %p19635_p11 = scmp.ne.s32.totalorder %s19610_s27, 0  ;;  %s19636_s21 = smov 16  }
 0x151   : > { %s19637_s5 = smov 256   ;;  %s15934_s28 = scalar_lea.hbm %s19507_s17, 64 }
 0x152   : > { %13899 = dma.hbm_to_vmem [thread:$0]  (!%p19635_p11), %s19506_s16, 8192, %s610_s4, [#allocation7], %s19637_s5, %s19637_s5, %s19636_s21  }
 0x153   : > { %p15935_p1 = scmp.ne.s32.totalorder %s19507_s17, %s15934_s28  ;;  %p15941_p2 = scmp.lt.u32.totalorder %s15934_s28, %s19507_s17 }
 0x155   : > { %p15937_p4 = pnand %p15935_p1, %p19622_p9 }
 0x157   : > { %p15938_p7 = pneg %p15937_p4 }
 0x159   : > { %p15943_p10 = pnand %p15941_p2, %p15938_p7 }
 0x15b   : > { %15946 = shalt.err (!%p15943_p10)
}
 0x15c   : > { %s15947_s2 = scalar_lea.vmem %s624_s22, 64  ;;  %p15955_p3 = scmp.lt.s32.totalorder %s624_s22, %s624_s22 }
 0x15d   : > { %p15948_p0 = scmp.ne.s32.totalorder %s624_s22, %s15947_s2  ;;  %p15956_p6 = scmp.lt.s32.totalorder %s15947_s2, %s15947_s2 }
 0x15f   : > { %p15950_p5 = pnand %p15948_p0, %p19622_p9  ;;  %p15957_p8 = por %p15956_p6, %p15955_p3 }
 0x161   : > { %p15951_p13 = pneg %p15950_p5 }
 0x163   : > { %p15958_p12 = pnand %p15957_p8, %p15951_p13 }
 0x165   : > { %15961 = shalt.err (!%p15958_p12)
}
 0x166   : > { %13902 = dma.hbm_to_vmem [thread:$0]  (!%p19635_p11), %s19507_s17, 64, %s624_s22, [#allocation10]  }
 0x167   : > { %s16138_s6 = smov [#allocation21]   ;;  %s16139_s15 = smov [#allocation22]  }
 0x168   : > { %s633_s7 = sshll.u32 %s16138_s6, 4  ;;  %s647_s0 = sshll.u32 %s16139_s15, 4  ;;  %s634_s7 = int_to_ptr.vmem [resolvable:$true] %s633_s7  ;;  %s648_s0 = int_to_ptr.vmem [resolvable:$true] %s647_s0 }
 0x169   : > { %s19638_s3 = sld [smem:[#allocation121_spill]] }
 0x16f   : > { %s15962_s25 = scalar_lea.hbm %s19638_s3, 8192 }
 0x170   : > { %p15963_p12 = scmp.ne.s32.totalorder %s19638_s3, %s15962_s25  ;;  %p15969_p7 = scmp.lt.u32.totalorder %s15962_s25, %s19638_s3 }
 0x172   : > { %p15965_p1 = pnand %p15963_p12, %p19622_p9 }
 0x174   : > { %p15966_p4 = pneg %p15965_p1 }
 0x176   : > { %p15971_p2 = pnand %p15969_p7, %p15966_p4 }
 0x178   : > { %15974 = shalt.err (!%p15971_p2)
}
 0x179   : > { %s15975_s22 = scalar_lea.vmem %s634_s7, 8192  ;;  %p15983_p13 = scmp.lt.s32.totalorder %s634_s7, %s634_s7 }
 0x17a   : > { %p15976_p10 = scmp.ne.s32.totalorder %s634_s7, %s15975_s22  ;;  %p15984_p3 = scmp.lt.s32.totalorder %s15975_s22, %s15975_s22 }
 0x17c   : > { %p15978_p0 = pnand %p15976_p10, %p19622_p9  ;;  %p15985_p6 = por %p15984_p3, %p15983_p13 }
 0x17e   : > { %p15979_p5 = pneg %p15978_p0 }
 0x180   : > { %p15986_p8 = pnand %p15985_p6, %p15979_p5 }
 0x182   : > { %15989 = shalt.err (!%p15986_p8)
}
 0x183   : > { %13905 = dma.hbm_to_vmem [thread:$0]  (!%p19635_p11), %s19638_s3, 8192, %s634_s7, [#allocation13], %s19637_s5, %s19637_s5, %s19636_s21  }
 0x184   : > { %s12455_s6 = sshll.u32 %s16336_s18, 10  ;;  %s19639_s1 = sld [smem:[#allocation122_spill]] }
 0x18a   : > { %s19640_s25 = smov %s19639_s1  ;;  %s15990_s10 = scalar_lea.hbm %s19639_s1, 64 }
 0x18b   : > { %p15991_p12 = scmp.ne.s32.totalorder %s19640_s25, %s15990_s10  ;;  %p15997_p7 = scmp.lt.u32.totalorder %s15990_s10, %s19640_s25 }
 0x18d   : > { %p15993_p1 = pnand %p15991_p12, %p19622_p9 }
 0x18f   : > { %p15994_p4 = pneg %p15993_p1 }
 0x191   : > { %p15999_p2 = pnand %p15997_p7, %p15994_p4 }
 0x193   : > { %16002 = shalt.err (!%p15999_p2)
}
 0x194   : > { %s16003_s21 = scalar_lea.vmem %s648_s0, 64  ;;  %p16011_p13 = scmp.lt.s32.totalorder %s648_s0, %s648_s0 }
 0x195   : > { %p16004_p10 = scmp.ne.s32.totalorder %s648_s0, %s16003_s21  ;;  %p16012_p3 = scmp.lt.s32.totalorder %s16003_s21, %s16003_s21 }
 0x197   : > { %p16006_p0 = pnand %p16004_p10, %p19622_p9  ;;  %p16013_p6 = por %p16012_p3, %p16011_p13 }
 0x199   : > { %p16007_p5 = pneg %p16006_p0 }
 0x19b   : > { %p16014_p8 = pnand %p16013_p6, %p16007_p5 }
 0x19d   : > { %16017 = shalt.err (!%p16014_p8)
}
 0x19e   : > { %13908 = dma.hbm_to_vmem [thread:$0]  (!%p19635_p11), %s19640_s25, 64, %s648_s0, [#allocation23]  }
 0x19f   : > { %s13668_s9 = sshll.u32 %s16114_s24, 14  ;;  %s19641_s14 = sld [smem:[#allocation119_spill]] }
 0x1a0   : > { %s746_s15 = scalar_lea.vmem [#allocation18], %s12455_s6  ;;  %p19642_p12 = scmp.ne.s32.totalorder %s19620_s23, 0 }
 0x1a1   : > { %s753_s28 = sshll.u32 %s746_s15, 4  ;;  %s16667_s28 = int_to_ptr.vmem [resolvable:$true] %s753_s28 }
 0x1a5   : > { %s16665_s20 = scalar_lea.hbm %s19641_s14, %s13668_s9  ;;  %s16023_s1 = scalar_lea.hbm %s19641_s14, 32768 }
 0x1a6   : > { %s16018_s27 = scalar_lea.hbm %s16665_s20, 16384  ;;  %p16024_p11 = scmp.lt.u32.totalorder %s16665_s20, %s19641_s14 }
 0x1a7   : > { %p16019_p9 = scmp.ne.s32.totalorder %s16665_s20, %s16018_s27  ;;  %p16025_p7 = scmp.lt.u32.totalorder %s16023_s1, %s16018_s27 }
 0x1a8   : > { %p16027_p10 = scmp.lt.u32.totalorder %s16018_s27, %s16665_s20 }
 0x1a9   : > { %p16021_p1 = pnand %p16019_p9, %p19642_p12  ;;  %p16026_p2 = por %p16025_p7, %p16024_p11 }
 0x1ab   : > { %p16022_p4 = pneg %p16021_p1  ;;  %p16028_p0 = por %p16027_p10, %p16026_p2 }
 0x1ad   : > { %p16029_p5 = pnand %p16028_p0, %p16022_p4 }
 0x1af   : > { %16032 = shalt.err (!%p16029_p5)
}
 0x1b0   : > { %s16033_s6 = scalar_lea.vmem %s16667_s28, 16384  ;;  %s16140_s4 = smov [#allocation18]  }
 0x1b1   : > { %p16034_p13 = scmp.ne.s32.totalorder %s16667_s28, %s16033_s6  ;;  %s16038_s22 = sshll.u32 %s16140_s4, 4  ;;  %s16039_s22 = int_to_ptr.vmem [resolvable:$false] %s16038_s22 }
 0x1b2   : > { %s16040_s21 = scalar_lea.vmem %s16039_s22, 32768  ;;  %p16041_p8 = scmp.lt.s32.totalorder %s16667_s28, %s16039_s22 }
 0x1b3   : > { %p16036_p3 = pnand %p16034_p13, %p19642_p12  ;;  %p16042_p9 = scmp.lt.s32.totalorder %s16040_s21, %s16033_s6 }
 0x1b5   : > { %p16037_p6 = pneg %p16036_p3  ;;  %p16043_p1 = por %p16042_p9, %p16041_p8 }
 0x1b7   : > { %p16044_p11 = pnand %p16043_p1, %p16037_p6 }
 0x1b9   : > { %16047 = shalt.err (!%p16044_p11)
}
 0x1ba   : > { %p19643_p4 = scmp.ne.s32.totalorder %s19618_s26, 0  ;;  %s19644_s23 = sld [smem:[#allocation36_spill]] }
 0x1bc   : > { %13924 = dma.hbm_to_vmem [thread:$0]  (!%p19643_p4), %s16665_s20, 16384, %s16667_s28, %s16351_s30, %s19625_s29, %s19625_s29, %s19624_s19  }
 0x1c0   : > { %p19645_p12 = scmp.ne.s32.totalorder %s19644_s23, 0 }
 0x1c2   : > { %772 = sbr.rel (%p19645_p12) target bundleno = 5420 (0x152c), region = 100 }
 0x1c9   : > { %s19646_s18 = sld [smem:[#allocation35_spill]] }
 0x1cf   : > { %p19647_p7 = scmp.eq.s32.totalorder %s19646_s18, 0 }
 0x1d1   : > { %16065 = dma.done.wait (%p19647_p7), [#allocation5], 512   ;;  %p19648_p2 = pmov %p19647_p7 }
 0x1d3   : > { %16067 = vsyncadd (%p19648_p2), [#allocation5], 4294966784  ;;  %p19649_p10 = pmov %p19648_p2 }
 0x1d4   : > { %p19650_p0 = pmov %p19648_p2 }
 0x1d5   : > { %16069 = dma.done.wait (%p19649_p10), [#allocation7], 4608  }
 0x1d6   : > { %16071 = vsyncadd (%p19650_p0), [#allocation7], 4294962688  ;;  %p19651_p5 = pmov %p19650_p0 }
 0x1d7   : > { %p19652_p13 = pmov %p19650_p0 }
 0x1d8   : > { %16073 = dma.done.wait (%p19651_p5), [#allocation10], 4128  }
 0x1d9   : > { %16075 = vsyncadd (%p19652_p13), [#allocation10], 4294963168  ;;  %p19653_p3 = pmov %p19650_p0 }
 0x1da   : > { %p19654_p6 = pmov %p19650_p0 }
 0x1db   : > { %16077 = dma.done.wait (%p19653_p3), [#allocation13], 32  }
 0x1dc   : > { %16079 = vsyncadd (%p19654_p6), [#allocation13], 4294967264  ;;  %s19655_s30 = sld [smem:[#allocation33_spill]]  ;;  %s19656_s26 = sld [smem:[#allocation39_spill]] }
 0x1dd   : > { %s798_s19 = sand.u32 1, %s19646_s18  }
 0x1de   : > { %s799_s9 = scalar_lea.sflag [#allocation5], %s798_s19 }
 0x1e2   : > { %s800_s29 = sand.u32 1, %s19655_s30   ;;  %p19657_p8 = scmp.ne.s32.totalorder %s19656_s26, 0 }
 0x1e3   : > { %s13825_s5 = smul.u32 3840, %s800_s29 }
 0x1e5   : > { %s16714_s7 = scalar_lea.vmem [#allocation14], %s13825_s5 }
 0x1e6   : > { %16081 = dma.done.wait (%p19657_p8), %s799_s9, 143360  }
 0x1e7   : > { %16083 = vsyncadd (%p19657_p8), %s799_s9, 4294823936  ;;  %s13826_s8 = smul.u32 1536, %s800_s29  ;;  %s12465_s20 = sshll.u32 %s800_s29, 9 }
 0x1e8   : > { %s12466_s15 = sshll.u32 %s800_s29, 11  ;;  %s12467_s28 = sshll.u32 %s800_s29, 10 }
 0x1e9   : > { %s16720_s27 = scalar_lea.vmem [#allocation15], %s13826_s8  ;;  %s16722_s0 = scalar_lea.vmem [#allocation16], %s12465_s20 }
 0x1ea   : > { %s16724_s24 = scalar_lea.vmem [#allocation17], %s12466_s15  ;;  %s16726_s1 = scalar_lea.vmem [#allocation18], %s12467_s28 }
 0x1eb   : > { %p19658_p9 = pmov %p19650_p0 }
 0x1ec   : > { %p19659_p1 = pmov %p19650_p0 }
 0x1ed   : > { %16085 = dma.done.wait (%p19658_p9), [#allocation7], 8192  }
 0x1ee   : > { %16087 = vsyncadd (%p19659_p1), [#allocation7], 4294959104  ;;  %p19660_p11 = pmov %p19650_p0 }
 0x1ef   : > { %p19661_p4 = pmov %p19650_p0 }
 0x1f0   : > { %16089 = dma.done.wait (%p19660_p11), [#allocation10], 64  }
 0x1f1   : > { %16091 = vsyncadd (%p19661_p4), [#allocation10], 4294967232  ;;  %p19662_p12 = pmov %p19650_p0 }
 0x1f2   : > { %p19663_p7 = pmov %p19650_p0 }
 0x1f3   : > { %16093 = dma.done.wait (%p19662_p12), [#allocation13], 8192  }
 0x1f4   : > { %16095 = vsyncadd (%p19663_p7), [#allocation13], 4294959104  ;;  %p19664_p2 = pmov %p19650_p0 }
 0x1f5   : > { %p19665_p10 = pmov %p19650_p0 }
 0x1f6   : > { %16097 = dma.done.wait (%p19664_p2), [#allocation23], 64  }
 0x1f7   : > { %16099 = vsyncadd (%p19665_p10), [#allocation23], 4294967232  ;;  %p930_p0 = scmp.lt.s32.totalorder %s19646_s18, 1  ;;  %s19666_s22 = sld [smem:[#allocation120_spill]] }
 0x1f8   : > { %p19667_p5 = scmp.ne.s32.totalorder %s19646_s18, 0 }
 0x1f9   : > { %s931_s10 = scalar_select %p930_p0, %s19646_s18, 1 }
 0x1fa   : > { %938 = sbr.rel (%p19667_p5) target bundleno = 1079 (0x437), region = 164  ;;  %s19668_s26 = sld [smem:[#allocation108_spill]] (!%p19667_p5)  ;;  %v13999_v24 = vld [vmem:[#allocation8 + $0x4] ss:$8 sps:$4 sm:$0xff] (!%p19667_p5)   ;;  %v14001_v25 = vld [vmem:[#allocation8] ss:$8 sps:$4 sm:$0xff] (!%p19667_p5)  }
 0x1fb   : > { %s13827_s2 = smul.u32 50, %s931_s10  ;;  %s19669_s19 = sld [smem:[#allocation109_spill]] (!%p19667_p5)  ;;  %v14002_v26 = vld [vmem:[#allocation8 + $0x14] ss:$8 sps:$4 sm:$0xff] (!%p19667_p5)   ;;  %1196 = vmatprep.subr.bf16.mxu0 (!%p19667_p5), %v13999_v24  ;;  %v14004_v27 = vld [vmem:[#allocation8 + $0x10] ss:$8 sps:$4 sm:$0xff] (!%p19667_p5)  }
 0x1fc   : > { %1197 = vmatpush1.bf16.msra.mxu0 (!%p19667_p5), %v14001_v25  ;;  %v14005_v28 = vld [vmem:[#allocation8 + $0x24] ss:$8 sps:$4 sm:$0xff] (!%p19667_p5)   ;;  %v14007_v29 = vld [vmem:[#allocation8 + $0x20] ss:$8 sps:$4 sm:$0xff] (!%p19667_p5)   ;;  %v14008_v30 = vld [vmem:[#allocation8 + $0x34] ss:$8 sps:$4 sm:$0xff] (!%p19667_p5)  }
 0x1fd   : > { %s16749_s21 = scalar_lea.vmem %s19666_s22, %s13827_s2  ;;  %1198 = vmatprep.subr.bf16.mxu0 (!%p19667_p5), %v14002_v26  ;;  %v14010_v31 = vld [vmem:[#allocation8 + $0x30] ss:$8 sps:$4 sm:$0xff] (!%p19667_p5)   ;;  %v14011_v32 = vld [vmem:[#allocation8 + $0x44] ss:$8 sps:$4 sm:$0xff] (!%p19667_p5)   ;;  %v14013_v33 = vld [vmem:[#allocation8 + $0x40] ss:$8 sps:$4 sm:$0xff] (!%p19667_p5)  }
 0x1fe   : > { %v14014_v34 = vld [vmem:[#allocation8 + $0x54] ss:$8 sps:$4 sm:$0xff] (!%p19667_p5)   ;;  %v14016_v35 = vld [vmem:[#allocation8 + $0x50] ss:$8 sps:$4 sm:$0xff] (!%p19667_p5)   ;;  %v14017_v36 = vld [vmem:[#allocation8 + $0x64] ss:$8 sps:$4 sm:$0xff] (!%p19667_p5)  }
 0x1ff   : > { %s19670_s5 = sld [smem:[#allocation110_spill]] (!%p19667_p5)  ;;  %v14019_v39 = vld [vmem:[#allocation8 + $0x60] ss:$8 sps:$4 sm:$0xff] (!%p19667_p5)   ;;  %v14020_v41 = vld [vmem:[#allocation8 + $0x74] ss:$8 sps:$4 sm:$0xff] (!%p19667_p5)   ;;  %s19671_s20 = sld [smem:[#allocation111_spill]] (!%p19667_p5) }
 0x200   : > { %v939_v0 = vld [vmem:[%s19668_s26] sm:$0xff] (!%p19667_p5)  ;;  %v940_v1 = vld [vmem:[%s19668_s26 + $0x8] sm:$0xff] (!%p19667_p5)  ;;  %v941_v2 = vld [vmem:[%s19668_s26 + $0x10] sm:$0xff] (!%p19667_p5)  ;;  %1199 = vmatpush1.bf16.msra.mxu0 (!%p19667_p5), %v14004_v27 }
 0x201   : > { %v942_v3 = vld [vmem:[%s19668_s26 + $0x18] sm:$0xff]  ;;  %v943_v4 = vld [vmem:[%s19668_s26 + $0x20] sm:$0xff]  ;;  %v944_v5 = vld [vmem:[%s19668_s26 + $0x28] sm:$0xff]  ;;  %1200 = vmatprep.subr.bf16.mxu0 %v14005_v28 }
 0x202   : > { %v945_v6 = vld [vmem:[%s19668_s26 + $0x30] sm:$0xff]  ;;  %v946_v7 = vld [vmem:[%s19668_s26 + $0x38] sm:$0xff]  ;;  %v947_v8 = vld [vmem:[%s19669_s19] sm:$0xff] }
 0x203   : > { %v948_v9 = vld [vmem:[%s19669_s19 + $0x8] sm:$0xff]  ;;  %v949_v10 = vld [vmem:[%s19669_s19 + $0x10] sm:$0xff]  ;;  %v950_v11 = vld [vmem:[%s19669_s19 + $0x18] sm:$0xff]  ;;  %v955_v12 = vadd.f32 %v947_v8, %v939_v0 }
 0x204   : > { %v951_v13 = vld [vmem:[%s19669_s19 + $0x20] sm:$0xff]  ;;  %v952_v14 = vld [vmem:[%s19669_s19 + $0x28] sm:$0xff]  ;;  %v953_v15 = vld [vmem:[%s19669_s19 + $0x30] sm:$0xff]  ;;  %v956_v16 = vadd.f32 %v948_v9, %v940_v1  ;;  %v957_v17 = vadd.f32 %v949_v10, %v941_v2  ;;  %v958_v18 = vadd.f32 %v950_v11, %v942_v3  ;;  %1201 = vmatpush1.bf16.msra.mxu0 %v14007_v29 }
 0x205   : > { %v954_v19 = vld [vmem:[%s19669_s19 + $0x38] sm:$0xff]  ;;  %v959_v20 = vadd.f32 %v951_v13, %v943_v4  ;;  %v960_v21 = vadd.f32 %v952_v14, %v944_v5  ;;  %v961_v22 = vadd.f32 %v953_v15, %v945_v6  ;;  %963 = vst [vmem:[#allocation2] sm:$0xff] %v955_v12  ;;  %1202 = vmatprep.subr.bf16.mxu0 %v14008_v30  ;;  %v972_v37 = vld [vmem:[%s19670_s5 + $0x8] sm:$0xff]  ;;  %v971_v8 = vld [vmem:[%s19670_s5] sm:$0xff] }
 0x206   : > { %v962_v23 = vadd.f32 %v954_v19, %v946_v7  ;;  %964 = vst [vmem:[#allocation2 + $0x8] sm:$0xff] %v956_v16  ;;  %965 = vst [vmem:[#allocation2 + $0x10] sm:$0xff] %v957_v17  ;;  %v974_v38 = vld [vmem:[%s19670_s5 + $0x18] sm:$0xff]  ;;  %v14047_v42 = vld [vmem:[#allocation11 + $0x4] ss:$8 sps:$4 sm:$0xff]  }
 0x207   : > { %966 = vst [vmem:[#allocation2 + $0x18] sm:$0xff] %v958_v18  ;;  %967 = vst [vmem:[#allocation2 + $0x20] sm:$0xff] %v959_v20  ;;  %v1012_v40 = vpack.c.bf16 %v974_v38, %v972_v37  ;;  %v14049_v43 = vld [vmem:[#allocation11] ss:$8 sps:$4 sm:$0xff]   ;;  %v14050_v44 = vld [vmem:[#allocation11 + $0x14] ss:$8 sps:$4 sm:$0xff]   ;;  %1514 = vmatprep.subr.bf16.mxu1 %v14047_v42 }
 0x208   : > { %968 = vst [vmem:[#allocation2 + $0x28] sm:$0xff] %v960_v21  ;;  %969 = vst [vmem:[#allocation2 + $0x30] sm:$0xff] %v961_v22  ;;  %1203 = vmatpush1.bf16.msra.mxu0 %v14010_v31  ;;  %v14022_v45 = vld [vmem:[#allocation8 + $0x70] ss:$8 sps:$4 sm:$0xff]   ;;  %1515 = vmatpush1.bf16.msra.mxu1 %v14049_v43  ;;  %v14023_v47 = vld [vmem:[#allocation8 + $0x84] ss:$8 sps:$4 sm:$0xff]  }
 0x209   : > { %970 = vst [vmem:[#allocation2 + $0x38] sm:$0xff] %v962_v23  ;;  %1204 = vmatprep.subr.bf16.mxu0 %v14011_v32  ;;  %1228 = vmatprep.mubr.bf16.mxu0 %v1012_v40  ;;  %v14052_v46 = vld [vmem:[#allocation11 + $0x10] ss:$8 sps:$4 sm:$0xff]   ;;  %v14053_v48 = vld [vmem:[#allocation11 + $0x24] ss:$8 sps:$4 sm:$0xff]  }
 0x20a   : > { %1516 = vmatprep.subr.bf16.mxu1 %v14050_v44  ;;  %v14025_v49 = vld [vmem:[#allocation8 + $0x80] ss:$8 sps:$4 sm:$0xff]   ;;  %v14026_v51 = vld [vmem:[#allocation8 + $0x94] ss:$8 sps:$4 sm:$0xff]   ;;  %v14028_v53 = vld [vmem:[#allocation8 + $0x90] ss:$8 sps:$4 sm:$0xff]  }
 0x20b   : > { %v14055_v50 = vld [vmem:[#allocation11 + $0x20] ss:$8 sps:$4 sm:$0xff]   ;;  %v14056_v52 = vld [vmem:[#allocation11 + $0x34] ss:$8 sps:$4 sm:$0xff]   ;;  %v14058_v54 = vld [vmem:[#allocation11 + $0x30] ss:$8 sps:$4 sm:$0xff]  }
 0x20c   : > { %1205 = vmatpush1.bf16.msra.mxu0 %v14013_v33  ;;  %1517 = vmatpush1.bf16.msra.mxu1 %v14052_v46  ;;  %v14029_v55 = vld [vmem:[#allocation8 + $0xa4] ss:$8 sps:$4 sm:$0xff]   ;;  %v14031_v57 = vld [vmem:[#allocation8 + $0xa0] ss:$8 sps:$4 sm:$0xff]   ;;  %v14032_v59 = vld [vmem:[#allocation8 + $0xb4] ss:$8 sps:$4 sm:$0xff]  }
 0x20d   : > { %1206 = vmatprep.subr.bf16.mxu0 %v14014_v34  ;;  %1518 = vmatprep.subr.bf16.mxu1 %v14053_v48  ;;  %v14059_v56 = vld [vmem:[#allocation11 + $0x44] ss:$8 sps:$4 sm:$0xff]   ;;  %v14061_v58 = vld [vmem:[#allocation11 + $0x40] ss:$8 sps:$4 sm:$0xff]   ;;  %v14062_v60 = vld [vmem:[#allocation11 + $0x54] ss:$8 sps:$4 sm:$0xff]  }
 0x20e   : > { %v14034_v61 = vld [vmem:[#allocation8 + $0xb0] ss:$8 sps:$4 sm:$0xff]   ;;  %v14035_v63 = vld [vmem:[#allocation8 + $0xc4] ss:$8 sps:$4 sm:$0xff]   ;;  %v14037_v1 = vld [vmem:[#allocation8 + $0xc0] ss:$8 sps:$4 sm:$0xff]  }
 0x20f   : > { %v14064_v62 = vld [vmem:[#allocation11 + $0x50] ss:$8 sps:$4 sm:$0xff]   ;;  %v14065_v0 = vld [vmem:[#allocation11 + $0x64] ss:$8 sps:$4 sm:$0xff]   ;;  %v14067_v17 = vld [vmem:[#allocation11 + $0x60] ss:$8 sps:$4 sm:$0xff]  }
 0x210   : > { %1207 = vmatpush1.bf16.msra.mxu0 %v14016_v35  ;;  %1519 = vmatpush1.bf16.msra.mxu1 %v14055_v50  ;;  %v14038_v2 = vld [vmem:[#allocation8 + $0xd4] ss:$8 sps:$4 sm:$0xff]   ;;  %v14040_v3 = vld [vmem:[#allocation8 + $0xd0] ss:$8 sps:$4 sm:$0xff]   ;;  %v14041_v4 = vld [vmem:[#allocation8 + $0xe4] ss:$8 sps:$4 sm:$0xff]  }
 0x211   : > { %1208 = vmatprep.subr.bf16.mxu0 %v14017_v36  ;;  %1520 = vmatprep.subr.bf16.mxu1 %v14056_v52  ;;  %v14043_v5 = vld [vmem:[#allocation8 + $0xe0] ss:$8 sps:$4 sm:$0xff]   ;;  %v14044_v6 = vld [vmem:[#allocation8 + $0xf4] ss:$8 sps:$4 sm:$0xff]   ;;  %v14046_v7 = vld [vmem:[#allocation8 + $0xf0] ss:$8 sps:$4 sm:$0xff]   ;;  %v1018_v36 = vlaneseq }
 0x212   : > { %v973_v9 = vld [vmem:[%s19670_s5 + $0x10] sm:$0xff]  ;;  %v976_v10 = vld [vmem:[%s19670_s5 + $0x28] sm:$0xff]  ;;  %v978_v11 = vld [vmem:[%s19670_s5 + $0x38] sm:$0xff] }
 0x213   : > { %v1011_v12 = vpack.c.bf16 %v973_v9, %v971_v8  ;;  %v1014_v13 = vpack.c.bf16 %v978_v11, %v976_v10  ;;  %v975_v14 = vld [vmem:[%s19670_s5 + $0x20] sm:$0xff]  ;;  %v977_v15 = vld [vmem:[%s19670_s5 + $0x30] sm:$0xff]  ;;  %v16825_v37 = vshrl.u32 %v1018_v36, 7 }
 0x214   : > { %1209 = vmatpush1.bf16.msra.mxu0 %v14019_v39  ;;  %1521 = vmatpush1.bf16.msra.mxu1 %v14058_v54  ;;  %v1013_v16 = vpack.c.bf16 %v977_v15, %v975_v14  ;;  %v14068_v18 = vld [vmem:[#allocation11 + $0x74] ss:$8 sps:$4 sm:$0xff]   ;;  %v14070_v19 = vld [vmem:[#allocation11 + $0x70] ss:$8 sps:$4 sm:$0xff]   ;;  %v14071_v20 = vld [vmem:[#allocation11 + $0x84] ss:$8 sps:$4 sm:$0xff]  }
 0x215   : > { %1210 = vmatprep.subr.bf16.mxu0 %v14020_v41  ;;  %1522 = vmatprep.subr.bf16.mxu1 %v14059_v56  ;;  %v14073_v21 = vld [vmem:[#allocation11 + $0x80] ss:$8 sps:$4 sm:$0xff]   ;;  %v14074_v22 = vld [vmem:[#allocation11 + $0x94] ss:$8 sps:$4 sm:$0xff]   ;;  %v14076_v23 = vld [vmem:[#allocation11 + $0x90] ss:$8 sps:$4 sm:$0xff]  }
 0x216   : > { %v14077_v24 = vld [vmem:[#allocation11 + $0xa4] ss:$8 sps:$4 sm:$0xff]   ;;  %v14079_v25 = vld [vmem:[#allocation11 + $0xa0] ss:$8 sps:$4 sm:$0xff]   ;;  %v14080_v26 = vld [vmem:[#allocation11 + $0xb4] ss:$8 sps:$4 sm:$0xff]  }
 0x217   : > { %v14082_v27 = vld [vmem:[#allocation11 + $0xb0] ss:$8 sps:$4 sm:$0xff]   ;;  %v14083_v28 = vld [vmem:[#allocation11 + $0xc4] ss:$8 sps:$4 sm:$0xff]   ;;  %v14085_v29 = vld [vmem:[#allocation11 + $0xc0] ss:$8 sps:$4 sm:$0xff]  }
 0x218   : > { %1211 = vmatpush1.bf16.msra.mxu0 %v14022_v45  ;;  %1523 = vmatpush1.bf16.msra.mxu1 %v14061_v58  ;;  %v14086_v30 = vld [vmem:[#allocation11 + $0xd4] ss:$8 sps:$4 sm:$0xff]   ;;  %v14088_v31 = vld [vmem:[#allocation11 + $0xd0] ss:$8 sps:$4 sm:$0xff]   ;;  %v14089_v32 = vld [vmem:[#allocation11 + $0xe4] ss:$8 sps:$4 sm:$0xff]  }
 0x219   : > { %1212 = vmatprep.subr.bf16.mxu0 %v14023_v47  ;;  %1524 = vmatprep.subr.bf16.mxu1 %v14062_v60  ;;  %v14091_v33 = vld [vmem:[#allocation11 + $0xe0] ss:$8 sps:$4 sm:$0xff]   ;;  %v14092_v34 = vld [vmem:[#allocation11 + $0xf4] ss:$8 sps:$4 sm:$0xff]   ;;  %v14094_v35 = vld [vmem:[#allocation11 + $0xf0] ss:$8 sps:$4 sm:$0xff]  }
 0x21a   : > { %v1015_v38 = vld [vmem:[#allocation9] sm:$0x3]  ;;  %v16828_v40 = vsub.s32 0, %v16825_v37  ;;  %v1024_v41 = vsub.s32 2, %v16825_v37  ;;  %v1569_v37 = vld [vmem:[%s19671_s20 + $0x10] sm:$0xff] }
 0x21b   : > { %v1016_v39 = vunpack.c.l.bf16 %v1015_v38 }
 0x21c   : > { %1213 = vmatpush1.bf16.msra.mxu0 %v14025_v49  ;;  %1525 = vmatpush1.bf16.msra.mxu1 %v14064_v62 }
 0x21d   : > { %1214 = vmatprep.subr.bf16.mxu0 %v14026_v51  ;;  %1526 = vmatprep.subr.bf16.mxu1 %v14065_v0  ;;  %v1021_v42 = vrot.slane %v1016_v39, %v16828_v40  ;;  %v1025_v43 = vrot.slane %v1016_v39, %v1024_v41 }
 0x21f   : > { %v1031_v44 = vrot.slane %v1021_v42, %v16828_v40  ;;  %v1035_v45 = vrot.slane %v1025_v43, %v16828_v40 }
 0x220   : > { %1215 = vmatpush1.bf16.msra.mxu0 %v14028_v53  ;;  %1527 = vmatpush1.bf16.msra.mxu1 %v14067_v17 }
 0x221   : > { %1216 = vmatprep.subr.bf16.mxu0 %v14029_v55  ;;  %1528 = vmatprep.subr.bf16.mxu1 %v14068_v18 }
 0x224   : > { %1217 = vmatpush1.bf16.msra.mxu0 %v14031_v57  ;;  %1529 = vmatpush1.bf16.msra.mxu1 %v14070_v19 }
 0x225   : > { %1218 = vmatprep.subr.bf16.mxu0 %v14032_v59  ;;  %1530 = vmatprep.subr.bf16.mxu1 %v14071_v20 }
 0x228   : > { %1219 = vmatpush1.bf16.msra.mxu0 %v14034_v61  ;;  %1531 = vmatpush1.bf16.msra.mxu1 %v14073_v21 }
 0x229   : > { %1220 = vmatprep.subr.bf16.mxu0 %v14035_v63  ;;  %1532 = vmatprep.subr.bf16.mxu1 %v14074_v22 }
 0x22c   : > { %1221 = vmatpush1.bf16.msra.mxu0 %v14037_v1  ;;  %1533 = vmatpush1.bf16.msra.mxu1 %v14076_v23 }
 0x22d   : > { %1222 = vmatprep.subr.bf16.mxu0 %v14038_v2  ;;  %1534 = vmatprep.subr.bf16.mxu1 %v14077_v24 }
 0x230   : > { %1223 = vmatpush1.bf16.msra.mxu0 %v14040_v3  ;;  %1535 = vmatpush1.bf16.msra.mxu1 %v14079_v25 }
 0x231   : > { %1224 = vmatprep.subr.bf16.mxu0 %v14041_v4  ;;  %1536 = vmatprep.subr.bf16.mxu1 %v14080_v26 }
 0x234   : > { %1225 = vmatpush1.bf16.msra.mxu0 %v14043_v5  ;;  %1537 = vmatpush1.bf16.msra.mxu1 %v14082_v27 }
 0x235   : > { %1226 = vmatprep.subr.bf16.mxu0 %v14044_v6  ;;  %1538 = vmatprep.subr.bf16.mxu1 %v14083_v28 }
 0x238   : > { %1227 = vmatpush1.bf16.msra.mxu0 %v14046_v7  ;;  %1539 = vmatpush1.bf16.msra.mxu1 %v14085_v29 }
 0x239   : > { %1540 = vmatprep.subr.bf16.mxu1 %v14086_v30 }
 0x23b   : > { %1229 = vmatmul.mubr.bf16.vlgmr.msra.gmra.mrb[0].mxu0 %v1011_v12 }
 0x23c   : > { %1238 = vmatprep.mubr.bf16.mxu0 %v1014_v13  ;;  %1541 = vmatpush1.bf16.msra.mxu1 %v14088_v31 }
 0x23d   : > { %1542 = vmatprep.subr.bf16.mxu1 %v14089_v32 }
 0x240   : > { %1543 = vmatpush1.bf16.msra.mxu1 %v14091_v33 }
 0x241   : > { %1544 = vmatprep.subr.bf16.mxu1 %v14092_v34 }
 0x243   : > { %1239 = vmatmul.mubr.bf16.gmra.mrb[4].mxu0 %v1013_v16 }
 0x244   : > { %1545 = vmatpush1.bf16.msra.mxu1 %v14094_v35 }
 0x30e   : > { %v1230_v46 = vpop.f32.mrb[0].mxu0 }
 0x30f   : > { %v16836_v47 = vadd.f32 %v1230_v46, %v1031_v44  ;;  %v1232_v48 = vpop.f32.mrb[1].mxu0 }
 0x310   : > { %v16838_v49 = vadd.f32 %v1232_v48, %v1035_v45  ;;  %v1234_v50 = vpop.f32.mrb[2].mxu0 }
 0x311   : > { %v1249_v51 = vsub.f32 0.0, %v16836_v47  ;;  %v16841_v52 = vadd.f32 %v1234_v50, %v1031_v44  ;;  %v1236_v53 = vpop.f32.mrb[3].mxu0 }
 0x312   : > { %v1250_v54 = vsub.f32 0.0, %v16838_v49  ;;  %v1237_v55 = vadd.f32 %v1236_v53, %v1035_v45 }
 0x313   : > { %v1257_v56 = vmul.f32 1.442695, %v1249_v51  ;;  %v1251_v57 = vsub.f32 0.0, %v16841_v52 }
 0x314   : > { %v1259_v58 = vmul.f32 1.442695, %v1250_v54  ;;  %v1252_v59 = vsub.f32 0.0, %v1237_v55 }
 0x315   : > { %14095 = vpow2.f32 %v1257_v56  ;;  %v1261_v60 = vmul.f32 1.442695, %v1251_v57 }
 0x316   : > { %14097 = vpow2.f32 %v1259_v58  ;;  %v1263_v61 = vmul.f32 1.442695, %v1252_v59  ;;  %v1240_v62 = vpop.f32.mrb[4].mxu0 }
 0x317   : > { %14099 = vpow2.f32 %v1261_v60  ;;  %v1241_v63 = vadd.f32 %v1240_v62, %v1031_v44  ;;  %v1242_v0 = vpop.f32.mrb[5].mxu0  ;;  %v1567_v60 = vld [vmem:[%s19671_s20] sm:$0xff] }
 0x318   : > { %14101 = vpow2.f32 %v1263_v61  ;;  %v1243_v1 = vadd.f32 %v1242_v0, %v1035_v45  ;;  %v1244_v2 = vpop.f32.mrb[6].mxu0 }
 0x319   : > { %v1253_v3 = vsub.f32 0.0, %v1241_v63  ;;  %v1245_v4 = vadd.f32 %v1244_v2, %v1031_v44  ;;  %v1246_v5 = vpop.f32.mrb[7].mxu0 }
 0x31a   : > { %v1254_v6 = vsub.f32 0.0, %v1243_v1  ;;  %v1247_v7 = vadd.f32 %v1246_v5, %v1035_v45 }
 0x31b   : > { %v1265_v8 = vmul.f32 1.442695, %v1253_v3  ;;  %v1255_v9 = vsub.f32 0.0, %v1245_v4  ;;  %v1570_v3 = vld [vmem:[%s19671_s20 + $0x18] sm:$0xff] }
 0x31c   : > { %v1267_v10 = vmul.f32 1.442695, %v1254_v6  ;;  %v1256_v11 = vsub.f32 0.0, %v1247_v7 }
 0x31d   : > { %14103 = vpow2.f32 %v1265_v8  ;;  %v1269_v12 = vmul.f32 1.442695, %v1255_v9 }
 0x31e   : > { %14105 = vpow2.f32 %v1267_v10  ;;  %v1271_v13 = vmul.f32 1.442695, %v1256_v11 }
 0x31f   : > { %v14096_v14 = vpop.eup %14095  ;;  %14107 = vpow2.f32 %v1269_v12 }
 0x320   : > { %v14098_v15 = vpop.eup %14097  ;;  %v1273_v16 = vadd.f32 1.0, %v14096_v14  ;;  %14109 = vpow2.f32 %v1271_v13 }
 0x321   : > { %v14100_v17 = vpop.eup %14099  ;;  %v1274_v18 = vadd.f32 1.0, %v14098_v15  ;;  %v1571_v15 = vld [vmem:[%s19671_s20 + $0x20] sm:$0xff] }
 0x322   : > { %v14102_v19 = vpop.eup %14101  ;;  %14111 = vrcp.f32 %v1273_v16  ;;  %v1275_v20 = vadd.f32 1.0, %v14100_v17 }
 0x323   : > { %14113 = vrcp.f32 %v1274_v18  ;;  %v1276_v21 = vadd.f32 1.0, %v14102_v19  ;;  %v1572_v19 = vld [vmem:[%s19671_s20 + $0x28] sm:$0xff] }
 0x324   : > { %14115 = vrcp.f32 %v1275_v20 }
 0x325   : > { %14117 = vrcp.f32 %v1276_v21 }
 0x327   : > { %v14104_v22 = vpop.eup %14103 }
 0x328   : > { %v14106_v23 = vpop.eup %14105  ;;  %v1277_v24 = vadd.f32 1.0, %v14104_v22 }
 0x329   : > { %v14108_v25 = vpop.eup %14107  ;;  %v1278_v26 = vadd.f32 1.0, %v14106_v23  ;;  %v1573_v23 = vld [vmem:[%s19671_s20 + $0x30] sm:$0xff] }
 0x32a   : > { %v14110_v27 = vpop.eup %14109  ;;  %14119 = vrcp.f32 %v1277_v24  ;;  %v1279_v28 = vadd.f32 1.0, %v14108_v25 }
 0x32b   : > { %14121 = vrcp.f32 %v1278_v26  ;;  %v1280_v29 = vadd.f32 1.0, %v14110_v27  ;;  %v1574_v27 = vld [vmem:[%s19671_s20 + $0x38] sm:$0xff] }
 0x32c   : > { %v14112_v30 = vpop.eup %14111  ;;  %14123 = vrcp.f32 %v1279_v28 }
 0x32d   : > { %v14114_v31 = vpop.eup %14113  ;;  %14125 = vrcp.f32 %v1280_v29  ;;  %v1282_v34 = vmul.f32 %v14112_v30, %v16836_v47  ;;  %v1333_v47 = vld [vmem:[#allocation12] sm:$0x3] }
 0x32e   : > { %v14116_v32 = vpop.eup %14115  ;;  %v1284_v36 = vmul.f32 %v14114_v31, %v16838_v49 }
 0x32f   : > { %v14118_v33 = vpop.eup %14117  ;;  %v1286_v35 = vmul.f32 %v14116_v32, %v16841_v52  ;;  %v1334_v52 = vunpack.c.l.bf16 %v1333_v47 }
 0x330   : > { %v1288_v38 = vmul.f32 %v14118_v33, %v1237_v55 }
 0x331   : > { %v1329_v39 = vpack.c.bf16 %v1286_v35, %v1282_v34  ;;  %v1339_v49 = vrot.slane %v1334_v52, %v16828_v40  ;;  %v1343_v55 = vrot.slane %v1334_v52, %v1024_v41 }
 0x332   : > { %v1330_v42 = vpack.c.bf16 %v1288_v38, %v1284_v36 }
 0x333   : > { %v1349_v57 = vrot.slane %v1339_v49, %v16828_v40  ;;  %v1353_v58 = vrot.slane %v1343_v55, %v16828_v40 }
 0x334   : > { %v14120_v43 = vpop.eup %14119  ;;  %1546 = vmatprep.mubr.bf16.mxu1 %v1330_v42 }
 0x335   : > { %v14122_v44 = vpop.eup %14121  ;;  %1547 = vmatmul.mubr.bf16.vlgmr.msra.gmra.mrb[0].mxu1 %v1329_v39  ;;  %v1290_v48 = vmul.f32 %v14120_v43, %v1241_v63  ;;  %v1568_v63 = vld [vmem:[%s19671_s20 + $0x8] sm:$0xff] }
 0x336   : > { %v14124_v45 = vpop.eup %14123  ;;  %v1292_v51 = vmul.f32 %v14122_v44, %v1243_v1 }
 0x337   : > { %v14126_v46 = vpop.eup %14125  ;;  %v1294_v50 = vmul.f32 %v14124_v45, %v1245_v4 }
 0x338   : > { %v1296_v53 = vmul.f32 %v14126_v46, %v1247_v7 }
 0x339   : > { %v1331_v54 = vpack.c.bf16 %v1294_v50, %v1290_v48 }
 0x33a   : > { %v1332_v56 = vpack.c.bf16 %v1296_v53, %v1292_v51 }
 0x33c   : > { %1556 = vmatprep.mubr.bf16.mxu1 %v1332_v56 }
 0x33d   : > { %1557 = vmatmul.mubr.bf16.gmra.mrb[4].mxu1 %v1331_v54 }
 0x408   : > { %v1548_v59 = vpop.f32.mrb[0].mxu1 }
 0x409   : > { %v1549_v61 = vadd.f32 %v1548_v59, %v1349_v57  ;;  %v1550_v62 = vpop.f32.mrb[1].mxu1 }
 0x40a   : > { %v1551_v0 = vadd.f32 %v1550_v62, %v1353_v58  ;;  %v1552_v1 = vpop.f32.mrb[2].mxu1 }
 0x40b   : > { %v16862_v41 = vadd.f32 %v1567_v60, %v1549_v61  ;;  %v1553_v40 = vadd.f32 %v1552_v1, %v1349_v57  ;;  %v1554_v2 = vpop.f32.mrb[3].mxu1 }
 0x40c   : > { %v16867_v4 = vadd.f32 %v1568_v63, %v1551_v0  ;;  %v1555_v5 = vadd.f32 %v1554_v2, %v1353_v58 }
 0x40d   : > { %v1583_v6 = vsub.f32 0.0, %v16862_v41  ;;  %v16870_v7 = vadd.f32 %v1569_v37, %v1553_v40 }
 0x40e   : > { %v1584_v8 = vsub.f32 0.0, %v16867_v4  ;;  %v16873_v9 = vadd.f32 %v1570_v3, %v1555_v5 }
 0x40f   : > { %v1591_v10 = vmul.f32 1.442695, %v1583_v6  ;;  %v1585_v11 = vsub.f32 0.0, %v16870_v7 }
 0x410   : > { %v1593_v12 = vmul.f32 1.442695, %v1584_v8  ;;  %v1586_v13 = vsub.f32 0.0, %v16873_v9  ;;  %v1558_v14 = vpop.f32.mrb[4].mxu1 }
 0x411   : > { %14127 = vpow2.f32 %v1591_v10  ;;  %v1595_v16 = vmul.f32 1.442695, %v1585_v11  ;;  %v1559_v17 = vadd.f32 %v1558_v14, %v1349_v57  ;;  %v1560_v18 = vpop.f32.mrb[5].mxu1 }
 0x412   : > { %14129 = vpow2.f32 %v1593_v12  ;;  %v1597_v20 = vmul.f32 1.442695, %v1586_v13  ;;  %v1561_v21 = vadd.f32 %v1560_v18, %v1353_v58  ;;  %v1562_v22 = vpop.f32.mrb[6].mxu1 }
 0x413   : > { %14131 = vpow2.f32 %v1595_v16  ;;  %v1579_v24 = vadd.f32 %v1571_v15, %v1559_v17  ;;  %v1563_v25 = vadd.f32 %v1562_v22, %v1349_v57  ;;  %v1564_v26 = vpop.f32.mrb[7].mxu1 }
 0x414   : > { %14133 = vpow2.f32 %v1597_v20  ;;  %v1580_v28 = vadd.f32 %v1572_v19, %v1561_v21  ;;  %v1565_v29 = vadd.f32 %v1564_v26, %v1353_v58 }
 0x415   : > { %v1587_v30 = vsub.f32 0.0, %v1579_v24  ;;  %v1581_v31 = vadd.f32 %v1573_v23, %v1563_v25 }
 0x416   : > { %v1588_v32 = vsub.f32 0.0, %v1580_v28  ;;  %v1582_v33 = vadd.f32 %v1574_v27, %v1565_v29 }
 0x417   : > { %v1599_v34 = vmul.f32 1.442695, %v1587_v30  ;;  %v1589_v35 = vsub.f32 0.0, %v1581_v31 }
 0x418   : > { %v1601_v36 = vmul.f32 1.442695, %v1588_v32  ;;  %v1590_v38 = vsub.f32 0.0, %v1582_v33 }
 0x419   : > { %14135 = vpow2.f32 %v1599_v34  ;;  %v1603_v39 = vmul.f32 1.442695, %v1589_v35 }
 0x41a   : > { %14137 = vpow2.f32 %v1601_v36  ;;  %v1605_v42 = vmul.f32 1.442695, %v1590_v38 }
 0x41b   : > { %v14128_v43 = vpop.eup %14127  ;;  %14139 = vpow2.f32 %v1603_v39 }
 0x41c   : > { %v14130_v44 = vpop.eup %14129  ;;  %v1607_v45 = vadd.f32 1.0, %v14128_v43  ;;  %14141 = vpow2.f32 %v1605_v42 }
 0x41d   : > { %v14132_v46 = vpop.eup %14131  ;;  %v1608_v48 = vadd.f32 1.0, %v14130_v44 }
 0x41e   : > { %v14134_v50 = vpop.eup %14133  ;;  %14143 = vrcp.f32 %v1607_v45  ;;  %v1609_v51 = vadd.f32 1.0, %v14132_v46 }
 0x41f   : > { %14145 = vrcp.f32 %v1608_v48  ;;  %v1610_v53 = vadd.f32 1.0, %v14134_v50 }
 0x420   : > { %14147 = vrcp.f32 %v1609_v51 }
 0x421   : > { %14149 = vrcp.f32 %v1610_v53 }
 0x423   : > { %v14136_v54 = vpop.eup %14135 }
 0x424   : > { %v14138_v56 = vpop.eup %14137  ;;  %v1611_v47 = vadd.f32 1.0, %v14136_v54 }
 0x425   : > { %v14140_v52 = vpop.eup %14139  ;;  %v1612_v49 = vadd.f32 1.0, %v14138_v56 }
 0x426   : > { %v14142_v55 = vpop.eup %14141  ;;  %14151 = vrcp.f32 %v1611_v47  ;;  %v1613_v57 = vadd.f32 1.0, %v14140_v52 }
 0x427   : > { %14153 = vrcp.f32 %v1612_v49  ;;  %v1614_v58 = vadd.f32 1.0, %v14142_v55 }
 0x428   : > { %v14144_v59 = vpop.eup %14143  ;;  %14155 = vrcp.f32 %v1613_v57 }
 0x429   : > { %v14146_v60 = vpop.eup %14145  ;;  %v1616_v61 = vmul.f32 %v14144_v59, %v16862_v41  ;;  %14157 = vrcp.f32 %v1614_v58 }
 0x42a   : > { %v14148_v62 = vpop.eup %14147  ;;  %v1618_v63 = vmul.f32 %v14146_v60, %v16867_v4 }
 0x42b   : > { %v14150_v0 = vpop.eup %14149  ;;  %1631 = vst [vmem:[#allocation3] sm:$0xff] %v1616_v61  ;;  %v1620_v1 = vmul.f32 %v14148_v62, %v16870_v7 }
 0x42c   : > { %1632 = vst [vmem:[#allocation3 + $0x8] sm:$0xff] %v1618_v63  ;;  %v1622_v37 = vmul.f32 %v14150_v0, %v16873_v9 }
 0x42d   : > { %1633 = vst [vmem:[#allocation3 + $0x10] sm:$0xff] %v1620_v1 }
 0x42e   : > { %1634 = vst [vmem:[#allocation3 + $0x18] sm:$0xff] %v1622_v37 }
 0x430   : > { %v14152_v40 = vpop.eup %14151 }
 0x431   : > { %v14154_v2 = vpop.eup %14153  ;;  %v1624_v3 = vmul.f32 %v14152_v40, %v1579_v24 }
 0x432   : > { %v14156_v5 = vpop.eup %14155  ;;  %v1626_v6 = vmul.f32 %v14154_v2, %v1580_v28 }
 0x433   : > { %v14158_v8 = vpop.eup %14157  ;;  %1635 = vst [vmem:[#allocation3 + $0x20] sm:$0xff] %v1624_v3  ;;  %v1628_v41 = vmul.f32 %v14156_v5, %v1581_v31 }
 0x434   : > { %1636 = vst [vmem:[#allocation3 + $0x28] sm:$0xff] %v1626_v6  ;;  %v1630_v10 = vmul.f32 %v14158_v8, %v1582_v33 }
 0x435   : > { %1637 = vst [vmem:[#allocation3 + $0x30] sm:$0xff] %v1628_v41 }
 0x436   : > { %1638 = vst [vmem:[#allocation3 + $0x38] sm:$0xff] %v1630_v10 }
 0x437 PF: > { %v14159_v4 = vld [vmem:[%s16714_s7 + $0x4] ss:$120 sps:$4 sm:$0xff]   ;;  %v14161_v7 = vld [vmem:[%s16714_s7 + $0x14] ss:$120 sps:$4 sm:$0xff]   ;;  %v14163_v12 = vld [vmem:[%s16714_s7] ss:$120 sps:$4 sm:$0xff]  }
 0x438   : > { %4638 = vmatprep.subr.bf16.mxu1 %v14159_v4  ;;  %v1639_v9 = vld [vmem:[#allocation2] sm:$0xff]  ;;  %v1640_v11 = vld [vmem:[#allocation2 + $0x8] sm:$0xff]  ;;  %4744 = vmatprep.subr.bf16.mxu0 %v14161_v7  ;;  %v14165_v15 = vld [vmem:[%s16714_s7 + $0xf4] ss:$120 sps:$4 sm:$0xff]   ;;  %vm5994_vm0 = vcmask 261120   ;;  %vm6542_vm1 = vcmask 1041408  }
 0x439   : > { %v5221_v13 = vadd.f32 %v1640_v11, %v1639_v9  ;;  %v14164_v14 = vld [vmem:[%s16714_s7 + $0x10] ss:$120 sps:$4 sm:$0xff]   ;;  %4639 = vmatpush1.bf16.msra.mxu1 %v14163_v12  ;;  %v14167_v16 = vld [vmem:[%s16714_s7 + $0x104] ss:$120 sps:$4 sm:$0xff]   ;;  %v1642_v21 = vld [vmem:[#allocation2 + $0x18] sm:$0xff] }
 0x43a   : > { %4745 = vmatpush1.bf16.msra.mxu0 %v14164_v14  ;;  %v1643_v17 = vld [vmem:[#allocation2 + $0x20] sm:$0xff]  ;;  %v1644_v18 = vld [vmem:[#allocation2 + $0x28] sm:$0xff]  ;;  %4640 = vmatprep.subr.bf16.mxu1 %v14165_v15  ;;  %v1641_v20 = vld [vmem:[#allocation2 + $0x10] sm:$0xff] }
 0x43b   : > { %5222 = vadd.xlane.f32.xlu0 %v5221_v13  ;;  %v5227_v19 = vadd.f32 %v1644_v18, %v1643_v17  ;;  %v14169_v22 = vld [vmem:[%s16714_s7 + $0xf0] ss:$120 sps:$4 sm:$0xff]   ;;  %4746 = vmatprep.subr.bf16.mxu0 %v14167_v16  ;;  %v5224_v23 = vadd.f32 %v1642_v21, %v1641_v20  ;;  %v14170_v24 = vld [vmem:[%s16714_s7 + $0x100] ss:$120 sps:$4 sm:$0xff]   ;;  %v14171_v25 = vld [vmem:[%s16714_s7 + $0x1e4] ss:$120 sps:$4 sm:$0xff]  }
 0x43c   : > { %v14173_v26 = vld [vmem:[%s16714_s7 + $0x1f4] ss:$120 sps:$4 sm:$0xff]   ;;  %v14175_v30 = vld [vmem:[%s16714_s7 + $0x1e0] ss:$120 sps:$4 sm:$0xff]   ;;  %v14176_v31 = vld [vmem:[%s16714_s7 + $0x1f0] ss:$120 sps:$4 sm:$0xff]  }
 0x43d   : > { %5228 = vadd.xlane.f32.xlu1 %v5227_v19  ;;  %4641 = vmatpush1.bf16.msra.mxu1 %v14169_v22  ;;  %v1645_v27 = vld [vmem:[#allocation2 + $0x30] sm:$0xff]  ;;  %v1646_v28 = vld [vmem:[#allocation2 + $0x38] sm:$0xff]  ;;  %v14179_v33 = vld [vmem:[%s16714_s7 + $0x2e4] ss:$120 sps:$4 sm:$0xff]  }
 0x43e   : > { %4747 = vmatpush1.bf16.msra.mxu0 %v14170_v24  ;;  %4642 = vmatprep.subr.bf16.mxu1 %v14171_v25  ;;  %v5230_v29 = vadd.f32 %v1646_v28, %v1645_v27  ;;  %v14177_v32 = vld [vmem:[%s16714_s7 + $0x2d4] ss:$120 sps:$4 sm:$0xff]   ;;  %v14181_v34 = vld [vmem:[%s16714_s7 + $0x2d0] ss:$120 sps:$4 sm:$0xff]   ;;  %v14182_v35 = vld [vmem:[%s16714_s7 + $0x2e0] ss:$120 sps:$4 sm:$0xff]  }
 0x43f   : > { %5225 = vadd.xlane.f32.xlu0 %v5224_v23  ;;  %4748 = vmatprep.subr.bf16.mxu0 %v14173_v26  ;;  %v14183_v36 = vld [vmem:[%s16714_s7 + $0x3c4] ss:$120 sps:$4 sm:$0xff]   ;;  %v14185_v38 = vld [vmem:[%s16714_s7 + $0x3d4] ss:$120 sps:$4 sm:$0xff]   ;;  %v14187_v39 = vld [vmem:[%s16714_s7 + $0x3c0] ss:$120 sps:$4 sm:$0xff]  }
 0x440   : > { %v14188_v42 = vld [vmem:[%s16714_s7 + $0x3d0] ss:$120 sps:$4 sm:$0xff]   ;;  %v14189_v43 = vld [vmem:[%s16714_s7 + $0x4b4] ss:$120 sps:$4 sm:$0xff]   ;;  %v14191_v44 = vld [vmem:[%s16714_s7 + $0x4c4] ss:$120 sps:$4 sm:$0xff]  }
 0x441   : > { %5231 = vadd.xlane.f32.xlu1 %v5230_v29  ;;  %4643 = vmatpush1.bf16.msra.mxu1 %v14175_v30  ;;  %v14193_v45 = vld [vmem:[%s16714_s7 + $0x4b0] ss:$120 sps:$4 sm:$0xff]   ;;  %v14194_v46 = vld [vmem:[%s16714_s7 + $0x4c0] ss:$120 sps:$4 sm:$0xff]   ;;  %v14195_v48 = vld [vmem:[%s16714_s7 + $0x5a4] ss:$120 sps:$4 sm:$0xff]  }
 0x442   : > { %4749 = vmatpush1.bf16.msra.mxu0 %v14176_v31  ;;  %4644 = vmatprep.subr.bf16.mxu1 %v14177_v32  ;;  %v14197_v50 = vld [vmem:[%s16714_s7 + $0x5b4] ss:$120 sps:$4 sm:$0xff]   ;;  %v14199_v51 = vld [vmem:[%s16714_s7 + $0x5a0] ss:$120 sps:$4 sm:$0xff]   ;;  %v14200_v53 = vld [vmem:[%s16714_s7 + $0x5b0] ss:$120 sps:$4 sm:$0xff]  }
 0x443   : > { %4750 = vmatprep.subr.bf16.mxu0 %v14179_v33  ;;  %v14201_v54 = vld [vmem:[%s16714_s7 + $0x694] ss:$120 sps:$4 sm:$0xff]   ;;  %v14203_v56 = vld [vmem:[%s16714_s7 + $0x6a4] ss:$120 sps:$4 sm:$0xff]   ;;  %v14205_v47 = vld [vmem:[%s16714_s7 + $0x690] ss:$120 sps:$4 sm:$0xff]  }
 0x444   : > { %v14206_v52 = vld [vmem:[%s16714_s7 + $0x6a0] ss:$120 sps:$4 sm:$0xff]   ;;  %v14207_v49 = vld [vmem:[%s16714_s7 + $0x784] ss:$120 sps:$4 sm:$0xff]   ;;  %v14209_v55 = vld [vmem:[%s16714_s7 + $0x794] ss:$120 sps:$4 sm:$0xff]  }
 0x445   : > { %4645 = vmatpush1.bf16.msra.mxu1 %v14181_v34  ;;  %v14211_v57 = vld [vmem:[%s16714_s7 + $0x780] ss:$120 sps:$4 sm:$0xff]   ;;  %v14212_v58 = vld [vmem:[%s16714_s7 + $0x790] ss:$120 sps:$4 sm:$0xff]   ;;  %v14213_v59 = vld [vmem:[%s16714_s7 + $0x874] ss:$120 sps:$4 sm:$0xff]  }
 0x446   : > { %4751 = vmatpush1.bf16.msra.mxu0 %v14182_v35  ;;  %4646 = vmatprep.subr.bf16.mxu1 %v14183_v36  ;;  %v14215_v60 = vld [vmem:[%s16714_s7 + $0x884] ss:$120 sps:$4 sm:$0xff]   ;;  %v14217_v61 = vld [vmem:[%s16714_s7 + $0x870] ss:$120 sps:$4 sm:$0xff]   ;;  %v14218_v62 = vld [vmem:[%s16714_s7 + $0x880] ss:$120 sps:$4 sm:$0xff]  }
 0x447   : > { %4752 = vmatprep.subr.bf16.mxu0 %v14185_v38  ;;  %v14219_v63 = vld [vmem:[%s16714_s7 + $0x964] ss:$120 sps:$4 sm:$0xff]   ;;  %v14221_v0 = vld [vmem:[%s16714_s7 + $0x974] ss:$120 sps:$4 sm:$0xff]   ;;  %v14223_v1 = vld [vmem:[%s16714_s7 + $0x960] ss:$120 sps:$4 sm:$0xff]  }
 0x448   : > { %v14224_v37 = vld [vmem:[%s16714_s7 + $0x970] ss:$120 sps:$4 sm:$0xff]   ;;  %v14225_v40 = vld [vmem:[%s16714_s7 + $0xa54] ss:$120 sps:$4 sm:$0xff]   ;;  %v14227_v2 = vld [vmem:[%s16714_s7 + $0xa64] ss:$120 sps:$4 sm:$0xff]  }
 0x449   : > { %4647 = vmatpush1.bf16.msra.mxu1 %v14187_v39  ;;  %v14229_v3 = vld [vmem:[%s16714_s7 + $0xa50] ss:$120 sps:$4 sm:$0xff]   ;;  %v14230_v5 = vld [vmem:[%s16714_s7 + $0xa60] ss:$120 sps:$4 sm:$0xff]   ;;  %v14231_v6 = vld [vmem:[%s16714_s7 + $0xb44] ss:$120 sps:$4 sm:$0xff]  }
 0x44a   : > { %4753 = vmatpush1.bf16.msra.mxu0 %v14188_v42  ;;  %4648 = vmatprep.subr.bf16.mxu1 %v14189_v43  ;;  %v1648_v8 = vld [vmem:[#allocation3 + $0x8] sm:$0xff]  ;;  %v1650_v41 = vld [vmem:[#allocation3 + $0x18] sm:$0xff]  ;;  %v1647_v23 = vld [vmem:[#allocation3] sm:$0xff] }
 0x44b   : > { %4754 = vmatprep.subr.bf16.mxu0 %v14191_v44  ;;  %v14233_v10 = vld [vmem:[%s16714_s7 + $0xb54] ss:$120 sps:$4 sm:$0xff]   ;;  %v16943_v4 = vpack.c.bf16 %v1650_v41, %v1648_v8  ;;  %v14235_v7 = vld [vmem:[%s16714_s7 + $0xb40] ss:$120 sps:$4 sm:$0xff]   ;;  %v14236_v9 = vld [vmem:[%s16714_s7 + $0xb50] ss:$120 sps:$4 sm:$0xff]  }
 0x44c   : > { %v14237_v11 = vld [vmem:[%s16714_s7 + $0xc34] ss:$120 sps:$4 sm:$0xff]   ;;  %v14239_v12 = vld [vmem:[%s16714_s7 + $0xc44] ss:$120 sps:$4 sm:$0xff]   ;;  %v14241_v13 = vld [vmem:[%s16714_s7 + $0xc30] ss:$120 sps:$4 sm:$0xff]  }
 0x44d   : > { %4649 = vmatpush1.bf16.msra.mxu1 %v14193_v45  ;;  %4670 = vmatprep.mubr.bf16.mxu1 %v16943_v4  ;;  %v14242_v14 = vld [vmem:[%s16714_s7 + $0xc40] ss:$120 sps:$4 sm:$0xff]   ;;  %v14243_v15 = vld [vmem:[%s16714_s7 + $0xd24] ss:$120 sps:$4 sm:$0xff]   ;;  %v14245_v16 = vld [vmem:[%s16714_s7 + $0xd34] ss:$120 sps:$4 sm:$0xff]  }
 0x44e   : > { %4755 = vmatpush1.bf16.msra.mxu0 %v14194_v46  ;;  %4650 = vmatprep.subr.bf16.mxu1 %v14195_v48  ;;  %v14247_v17 = vld [vmem:[%s16714_s7 + $0xd20] ss:$120 sps:$4 sm:$0xff]   ;;  %v14248_v18 = vld [vmem:[%s16714_s7 + $0xd30] ss:$120 sps:$4 sm:$0xff]   ;;  %v14249_v19 = vld [vmem:[%s16714_s7 + $0xe14] ss:$120 sps:$4 sm:$0xff]  }
 0x44f   : > { %4756 = vmatprep.subr.bf16.mxu0 %v14197_v50  ;;  %4776 = vmatprep.mubr.bf16.mxu0 %v16943_v4  ;;  %v14251_v20 = vld [vmem:[%s16714_s7 + $0xe24] ss:$120 sps:$4 sm:$0xff]   ;;  %v14253_v21 = vld [vmem:[%s16714_s7 + $0xe10] ss:$120 sps:$4 sm:$0xff]   ;;  %v14254_v22 = vld [vmem:[%s16714_s7 + $0xe20] ss:$120 sps:$4 sm:$0xff]  }
 0x450   : > { %v1649_v24 = vld [vmem:[#allocation3 + $0x10] sm:$0xff]  ;;  %v14255_v28 = vld [vmem:[%s16714_s7 + $0x8] ss:$120 sps:$4 sm:$0xff]   ;;  %v14263_v30 = vld [vmem:[%s16714_s7 + $0xfc] ss:$120 sps:$4 sm:$0xff]  }
 0x451   : > { %4651 = vmatpush1.bf16.msra.mxu1 %v14199_v51  ;;  %v14257_v25 = vld [vmem:[%s16714_s7 + $0xc] ss:$120 sps:$4 sm:$0xff]   ;;  %v16963_v27 = vpack.c.bf16 %v1649_v24, %v1647_v23  ;;  %v14258_v29 = vld [vmem:[%s16714_s7 + $0x30] ss:$120 sps:$4 sm:$0xff]   ;;  %v14264_v33 = vld [vmem:[%s16714_s7 + $0x120] ss:$120 sps:$4 sm:$0xff]  }
 0x452   : > { %4757 = vmatpush1.bf16.msra.mxu0 %v14200_v53  ;;  %4652 = vmatprep.subr.bf16.mxu1 %v14201_v54  ;;  %v14260_v26 = vld [vmem:[%s16714_s7 + $0x34] ss:$120 sps:$4 sm:$0xff]   ;;  %v14266_v31 = vld [vmem:[%s16714_s7 + $0x124] ss:$120 sps:$4 sm:$0xff]   ;;  %v14261_v32 = vld [vmem:[%s16714_s7 + $0xf8] ss:$120 sps:$4 sm:$0xff]  }
 0x453   : > { %4758 = vmatprep.subr.bf16.mxu0 %v14203_v56  ;;  %v14269_v34 = vld [vmem:[%s16714_s7 + $0x1ec] ss:$120 sps:$4 sm:$0xff]   ;;  %v14267_v36 = vld [vmem:[%s16714_s7 + $0x1e8] ss:$120 sps:$4 sm:$0xff]   ;;  %v14275_v39 = vld [vmem:[%s16714_s7 + $0x2dc] ss:$120 sps:$4 sm:$0xff]  }
 0x454   : > { %v14272_v35 = vld [vmem:[%s16714_s7 + $0x214] ss:$120 sps:$4 sm:$0xff]   ;;  %v14270_v38 = vld [vmem:[%s16714_s7 + $0x210] ss:$120 sps:$4 sm:$0xff]   ;;  %v14278_v42 = vld [vmem:[%s16714_s7 + $0x304] ss:$120 sps:$4 sm:$0xff]  }
 0x455   : > { %4653 = vmatpush1.bf16.msra.mxu1 %v14205_v47  ;;  %v14273_v43 = vld [vmem:[%s16714_s7 + $0x2d8] ss:$120 sps:$4 sm:$0xff]   ;;  %v14281_v45 = vld [vmem:[%s16714_s7 + $0x3cc] ss:$120 sps:$4 sm:$0xff]   ;;  %v14279_v48 = vld [vmem:[%s16714_s7 + $0x3c8] ss:$120 sps:$4 sm:$0xff]  }
 0x456   : > { %4759 = vmatpush1.bf16.msra.mxu0 %v14206_v52  ;;  %4654 = vmatprep.subr.bf16.mxu1 %v14207_v49  ;;  %v14276_v44 = vld [vmem:[%s16714_s7 + $0x300] ss:$120 sps:$4 sm:$0xff]   ;;  %v14284_v46 = vld [vmem:[%s16714_s7 + $0x3f4] ss:$120 sps:$4 sm:$0xff]   ;;  %v14282_v50 = vld [vmem:[%s16714_s7 + $0x3f0] ss:$120 sps:$4 sm:$0xff]  }
 0x457   : > { %4760 = vmatprep.subr.bf16.mxu0 %v14209_v55  ;;  %v14287_v51 = vld [vmem:[%s16714_s7 + $0x4bc] ss:$120 sps:$4 sm:$0xff]   ;;  %v14285_v53 = vld [vmem:[%s16714_s7 + $0x4b8] ss:$120 sps:$4 sm:$0xff]   ;;  %v14293_v47 = vld [vmem:[%s16714_s7 + $0x5ac] ss:$120 sps:$4 sm:$0xff]  }
 0x458   : > { %v14290_v54 = vld [vmem:[%s16714_s7 + $0x4e4] ss:$120 sps:$4 sm:$0xff]   ;;  %v14288_v56 = vld [vmem:[%s16714_s7 + $0x4e0] ss:$120 sps:$4 sm:$0xff]  }
 0x459   : > { %4655 = vmatpush1.bf16.msra.mxu1 %v14211_v57  ;;  %v1652_v52 = vld [vmem:[#allocation3 + $0x28] sm:$0xff]  ;;  %v1654_v49 = vld [vmem:[#allocation3 + $0x38] sm:$0xff]  ;;  %v1651_v55 = vld [vmem:[#allocation3 + $0x20] sm:$0xff] }
 0x45a   : > { %4761 = vmatpush1.bf16.msra.mxu0 %v14212_v58  ;;  %4656 = vmatprep.subr.bf16.mxu1 %v14213_v59  ;;  %v16990_v57 = vpack.c.bf16 %v1654_v49, %v1652_v52  ;;  %v1653_v58 = vld [vmem:[#allocation3 + $0x30] sm:$0xff]  ;;  %v14314_v8 = vld [vmem:[%s16714_s7 + $0x8a4] ss:$120 sps:$4 sm:$0xff]   ;;  %v14336_v24 = vld [vmem:[%s16714_s7 + $0xc60] ss:$120 sps:$4 sm:$0xff]  }
 0x45b   : > { %4762 = vmatprep.subr.bf16.mxu0 %v14215_v60  ;;  %v14296_v59 = vld [vmem:[%s16714_s7 + $0x5d4] ss:$120 sps:$4 sm:$0xff]   ;;  %v16993_v60 = vpack.c.bf16 %v1653_v58, %v1651_v55  ;;  %v14309_v41 = vld [vmem:[%s16714_s7 + $0x878] ss:$120 sps:$4 sm:$0xff]   ;;  %v14380_v52 = vld [vmem:[%s16714_s7 + $0x404] ss:$120 sps:$4 sm:$0xff]  }
 0x45c   : > { %v14333_v23 = vld [vmem:[%s16714_s7 + $0xc38] ss:$120 sps:$4 sm:$0xff]   ;;  %v14375_v49 = vld [vmem:[%s16714_s7 + $0x3e8] ss:$120 sps:$4 sm:$0xff]   ;;  %v14383_v58 = vld [vmem:[%s16714_s7 + $0x4dc] ss:$120 sps:$4 sm:$0xff]  }
 0x45d   : > { %4657 = vmatpush1.bf16.msra.mxu1 %v14217_v61  ;;  %v14291_v61 = vld [vmem:[%s16714_s7 + $0x5a8] ss:$120 sps:$4 sm:$0xff]  }
 0x45e   : > { %4763 = vmatpush1.bf16.msra.mxu0 %v14218_v62  ;;  %4658 = vmatprep.subr.bf16.mxu1 %v14219_v63  ;;  %v14294_v62 = vld [vmem:[%s16714_s7 + $0x5d0] ss:$120 sps:$4 sm:$0xff]   ;;  %v14299_v63 = vld [vmem:[%s16714_s7 + $0x69c] ss:$120 sps:$4 sm:$0xff]   ;;  %v14378_v55 = vld [vmem:[%s16714_s7 + $0x400] ss:$120 sps:$4 sm:$0xff]  }
 0x45f   : > { %4764 = vmatprep.subr.bf16.mxu0 %v14221_v0  ;;  %v14302_v0 = vld [vmem:[%s16714_s7 + $0x6c4] ss:$120 sps:$4 sm:$0xff]  }
 0x461   : > { %4659 = vmatpush1.bf16.msra.mxu1 %v14223_v1  ;;  %v14297_v1 = vld [vmem:[%s16714_s7 + $0x698] ss:$120 sps:$4 sm:$0xff]  }
 0x462   : > { %4765 = vmatpush1.bf16.msra.mxu0 %v14224_v37  ;;  %4660 = vmatprep.subr.bf16.mxu1 %v14225_v40  ;;  %v14300_v37 = vld [vmem:[%s16714_s7 + $0x6c0] ss:$120 sps:$4 sm:$0xff]   ;;  %v14305_v40 = vld [vmem:[%s16714_s7 + $0x78c] ss:$120 sps:$4 sm:$0xff]  }
 0x463   : > { %4766 = vmatprep.subr.bf16.mxu0 %v14227_v2  ;;  %v14308_v2 = vld [vmem:[%s16714_s7 + $0x7b4] ss:$120 sps:$4 sm:$0xff]  }
 0x465   : > { %4661 = vmatpush1.bf16.msra.mxu1 %v14229_v3  ;;  %v14303_v3 = vld [vmem:[%s16714_s7 + $0x788] ss:$120 sps:$4 sm:$0xff]  }
 0x466   : > { %4767 = vmatpush1.bf16.msra.mxu0 %v14230_v5  ;;  %4662 = vmatprep.subr.bf16.mxu1 %v14231_v6  ;;  %v14306_v5 = vld [vmem:[%s16714_s7 + $0x7b0] ss:$120 sps:$4 sm:$0xff]   ;;  %v14311_v6 = vld [vmem:[%s16714_s7 + $0x87c] ss:$120 sps:$4 sm:$0xff]  }
 0x467   : > { %4768 = vmatprep.subr.bf16.mxu0 %v14233_v10  ;;  %v14312_v10 = vld [vmem:[%s16714_s7 + $0x8a0] ss:$120 sps:$4 sm:$0xff]  }
 0x469   : > { %4663 = vmatpush1.bf16.msra.mxu1 %v14235_v7  ;;  %v14317_v7 = vld [vmem:[%s16714_s7 + $0x96c] ss:$120 sps:$4 sm:$0xff]  }
 0x46a   : > { %4769 = vmatpush1.bf16.msra.mxu0 %v14236_v9  ;;  %4664 = vmatprep.subr.bf16.mxu1 %v14237_v11  ;;  %v14320_v9 = vld [vmem:[%s16714_s7 + $0x994] ss:$120 sps:$4 sm:$0xff]   ;;  %v14315_v11 = vld [vmem:[%s16714_s7 + $0x968] ss:$120 sps:$4 sm:$0xff]  }
 0x46b   : > { %4770 = vmatprep.subr.bf16.mxu0 %v14239_v12  ;;  %v14318_v12 = vld [vmem:[%s16714_s7 + $0x990] ss:$120 sps:$4 sm:$0xff]  }
 0x46d   : > { %4665 = vmatpush1.bf16.msra.mxu1 %v14241_v13  ;;  %v14323_v13 = vld [vmem:[%s16714_s7 + $0xa5c] ss:$120 sps:$4 sm:$0xff]  }
 0x46e   : > { %4771 = vmatpush1.bf16.msra.mxu0 %v14242_v14  ;;  %4666 = vmatprep.subr.bf16.mxu1 %v14243_v15  ;;  %v14326_v14 = vld [vmem:[%s16714_s7 + $0xa84] ss:$120 sps:$4 sm:$0xff]   ;;  %v14321_v15 = vld [vmem:[%s16714_s7 + $0xa58] ss:$120 sps:$4 sm:$0xff]  }
 0x46f   : > { %4772 = vmatprep.subr.bf16.mxu0 %v14245_v16  ;;  %v14324_v16 = vld [vmem:[%s16714_s7 + $0xa80] ss:$120 sps:$4 sm:$0xff]  }
 0x471   : > { %4667 = vmatpush1.bf16.msra.mxu1 %v14247_v17  ;;  %v14329_v17 = vld [vmem:[%s16714_s7 + $0xb4c] ss:$120 sps:$4 sm:$0xff]  }
 0x472   : > { %4773 = vmatpush1.bf16.msra.mxu0 %v14248_v18  ;;  %4668 = vmatprep.subr.bf16.mxu1 %v14249_v19  ;;  %v14332_v18 = vld [vmem:[%s16714_s7 + $0xb74] ss:$120 sps:$4 sm:$0xff]   ;;  %v14327_v19 = vld [vmem:[%s16714_s7 + $0xb48] ss:$120 sps:$4 sm:$0xff]  }
 0x473   : > { %4774 = vmatprep.subr.bf16.mxu0 %v14251_v20  ;;  %v14330_v20 = vld [vmem:[%s16714_s7 + $0xb70] ss:$120 sps:$4 sm:$0xff]  }
 0x475   : > { %4669 = vmatpush1.bf16.msra.mxu1 %v14253_v21  ;;  %v14335_v21 = vld [vmem:[%s16714_s7 + $0xc3c] ss:$120 sps:$4 sm:$0xff]  }
 0x476   : > { %4775 = vmatpush1.bf16.msra.mxu0 %v14254_v22  ;;  %4691 = vmatprep.subr.bf16.mxu1 %v14257_v25  ;;  %v14338_v22 = vld [vmem:[%s16714_s7 + $0xc64] ss:$120 sps:$4 sm:$0xff]  }
 0x477   : > { %4850 = vmatprep.subr.bf16.mxu0 %v14260_v26  ;;  %v14341_v25 = vld [vmem:[%s16714_s7 + $0xd2c] ss:$120 sps:$4 sm:$0xff]  }
 0x478   : > { %4671 = vmatmul.mubr.bf16.vlgmr.msra.gmra.mrb[0].mxu1 %v16963_v27  ;;  %v14344_v26 = vld [vmem:[%s16714_s7 + $0xd54] ss:$120 sps:$4 sm:$0xff]  }
 0x479   : > { %4692 = vmatpush1.bf16.msra.mxu1 %v14255_v28  ;;  %4777 = vmatmul.mubr.bf16.vlgmr.msra.gmra.mrb[0].mxu0 %v16963_v27  ;;  %v14339_v28 = vld [vmem:[%s16714_s7 + $0xd28] ss:$120 sps:$4 sm:$0xff]  }
 0x47a   : > { %4851 = vmatpush1.bf16.msra.mxu0 %v14258_v29  ;;  %4693 = vmatprep.subr.bf16.mxu1 %v14263_v30  ;;  %v14342_v29 = vld [vmem:[%s16714_s7 + $0xd50] ss:$120 sps:$4 sm:$0xff]   ;;  %v14347_v30 = vld [vmem:[%s16714_s7 + $0xe1c] ss:$120 sps:$4 sm:$0xff]  }
 0x47b   : > { %4852 = vmatprep.subr.bf16.mxu0 %v14266_v31  ;;  %4680 = vmatprep.mubr.bf16.mxu1 %v16990_v57  ;;  %v14350_v31 = vld [vmem:[%s16714_s7 + $0xe44] ss:$120 sps:$4 sm:$0xff]  }
 0x47c   : > { %4786 = vmatprep.mubr.bf16.mxu0 %v16990_v57 }
 0x47d   : > { %4694 = vmatpush1.bf16.msra.mxu1 %v14261_v32  ;;  %v14345_v32 = vld [vmem:[%s16714_s7 + $0xe18] ss:$120 sps:$4 sm:$0xff]  }
 0x47e   : > { %4853 = vmatpush1.bf16.msra.mxu0 %v14264_v33  ;;  %4695 = vmatprep.subr.bf16.mxu1 %v14269_v34  ;;  %v14348_v33 = vld [vmem:[%s16714_s7 + $0xe40] ss:$120 sps:$4 sm:$0xff]   ;;  %v14353_v34 = vld [vmem:[%s16714_s7 + $0x2c] ss:$120 sps:$4 sm:$0xff]  }
 0x47f   : > { %4854 = vmatprep.subr.bf16.mxu0 %v14272_v35  ;;  %v14356_v35 = vld [vmem:[%s16714_s7 + $0x44] ss:$120 sps:$4 sm:$0xff]  }
 0x480   : > { %4681 = vmatmul.mubr.bf16.gmra.mrb[4].mxu1 %v16993_v60 }
 0x481   : > { %4696 = vmatpush1.bf16.msra.mxu1 %v14267_v36  ;;  %4787 = vmatmul.mubr.bf16.gmra.mrb[4].mxu0 %v16993_v60  ;;  %v14351_v36 = vld [vmem:[%s16714_s7 + $0x28] ss:$120 sps:$4 sm:$0xff]  }
 0x482   : > { %4855 = vmatpush1.bf16.msra.mxu0 %v14270_v38  ;;  %4697 = vmatprep.subr.bf16.mxu1 %v14275_v39  ;;  %v14354_v38 = vld [vmem:[%s16714_s7 + $0x40] ss:$120 sps:$4 sm:$0xff]   ;;  %v14359_v39 = vld [vmem:[%s16714_s7 + $0x11c] ss:$120 sps:$4 sm:$0xff]  }
 0x483   : > { %4856 = vmatprep.subr.bf16.mxu0 %v14278_v42  ;;  %4723 = vmatprep.mubr.bf16.mxu1 %v16943_v4  ;;  %v14362_v42 = vld [vmem:[%s16714_s7 + $0x134] ss:$120 sps:$4 sm:$0xff]  }
 0x484   : > { %4882 = vmatprep.mubr.bf16.mxu0 %v16943_v4 }
 0x485   : > { %4698 = vmatpush1.bf16.msra.mxu1 %v14273_v43  ;;  %v14357_v43 = vld [vmem:[%s16714_s7 + $0x118] ss:$120 sps:$4 sm:$0xff]  }
 0x486   : > { %4857 = vmatpush1.bf16.msra.mxu0 %v14276_v44  ;;  %4699 = vmatprep.subr.bf16.mxu1 %v14281_v45  ;;  %v14360_v44 = vld [vmem:[%s16714_s7 + $0x130] ss:$120 sps:$4 sm:$0xff]   ;;  %v14365_v45 = vld [vmem:[%s16714_s7 + $0x20c] ss:$120 sps:$4 sm:$0xff]  }
 0x487   : > { %4858 = vmatprep.subr.bf16.mxu0 %v14284_v46  ;;  %v14368_v46 = vld [vmem:[%s16714_s7 + $0x224] ss:$120 sps:$4 sm:$0xff]  }
 0x489   : > { %4700 = vmatpush1.bf16.msra.mxu1 %v14279_v48  ;;  %v14363_v48 = vld [vmem:[%s16714_s7 + $0x208] ss:$120 sps:$4 sm:$0xff]  }
 0x48a   : > { %4859 = vmatpush1.bf16.msra.mxu0 %v14282_v50  ;;  %4701 = vmatprep.subr.bf16.mxu1 %v14287_v51  ;;  %v14366_v50 = vld [vmem:[%s16714_s7 + $0x220] ss:$120 sps:$4 sm:$0xff]   ;;  %v14371_v51 = vld [vmem:[%s16714_s7 + $0x2fc] ss:$120 sps:$4 sm:$0xff]  }
 0x48b   : > { %4860 = vmatprep.subr.bf16.mxu0 %v14290_v54  ;;  %v14369_v54 = vld [vmem:[%s16714_s7 + $0x2f8] ss:$120 sps:$4 sm:$0xff]  }
 0x48d   : > { %4702 = vmatpush1.bf16.msra.mxu1 %v14285_v53  ;;  %v14374_v53 = vld [vmem:[%s16714_s7 + $0x314] ss:$120 sps:$4 sm:$0xff]  }
 0x48e   : > { %4861 = vmatpush1.bf16.msra.mxu0 %v14288_v56  ;;  %4703 = vmatprep.subr.bf16.mxu1 %v14293_v47  ;;  %v14372_v56 = vld [vmem:[%s16714_s7 + $0x310] ss:$120 sps:$4 sm:$0xff]   ;;  %v14377_v47 = vld [vmem:[%s16714_s7 + $0x3ec] ss:$120 sps:$4 sm:$0xff]  }
 0x48f   : > { %4862 = vmatprep.subr.bf16.mxu0 %v14296_v59 }
 0x491   : > { %4704 = vmatpush1.bf16.msra.mxu1 %v14291_v61  ;;  %v14386_v61 = vld [vmem:[%s16714_s7 + $0x4f4] ss:$120 sps:$4 sm:$0xff]  }
 0x492   : > { %4863 = vmatpush1.bf16.msra.mxu0 %v14294_v62  ;;  %4705 = vmatprep.subr.bf16.mxu1 %v14299_v63  ;;  %v14381_v63 = vld [vmem:[%s16714_s7 + $0x4d8] ss:$120 sps:$4 sm:$0xff]  }
 0x493   : > { %4864 = vmatprep.subr.bf16.mxu0 %v14302_v0  ;;  %v14384_v0 = vld [vmem:[%s16714_s7 + $0x4f0] ss:$120 sps:$4 sm:$0xff]  }
 0x495   : > { %4706 = vmatpush1.bf16.msra.mxu1 %v14297_v1  ;;  %v15407_v1 = vld [vmem:[#allocation2] sm:$0xff] }
 0x496   : > { %4865 = vmatpush1.bf16.msra.mxu0 %v14300_v37  ;;  %4707 = vmatprep.subr.bf16.mxu1 %v14305_v40  ;;  %v15408_v40 = vld [vmem:[#allocation2 + $0x8] sm:$0xff] }
 0x497   : > { %4866 = vmatprep.subr.bf16.mxu0 %v14308_v2 }
 0x499   : > { %4708 = vmatpush1.bf16.msra.mxu1 %v14303_v3 }
 0x49a   : > { %4867 = vmatpush1.bf16.msra.mxu0 %v14306_v5  ;;  %4709 = vmatprep.subr.bf16.mxu1 %v14311_v6  ;;  %v14389_v5 = vld [vmem:[%s16714_s7 + $0x5cc] ss:$120 sps:$4 sm:$0xff]  }
 0x49b   : > { %4868 = vmatprep.subr.bf16.mxu0 %v14314_v8 }
 0x49d   : > { %4710 = vmatpush1.bf16.msra.mxu1 %v14309_v41  ;;  %v14392_v41 = vld [vmem:[%s16714_s7 + $0x5e4] ss:$120 sps:$4 sm:$0xff]  }
 0x49e   : > { %4869 = vmatpush1.bf16.msra.mxu0 %v14312_v10  ;;  %4711 = vmatprep.subr.bf16.mxu1 %v14317_v7 }
 0x49f   : > { %4870 = vmatprep.subr.bf16.mxu0 %v14320_v9 }
 0x4a1   : > { %4712 = vmatpush1.bf16.msra.mxu1 %v14315_v11  ;;  %v14387_v11 = vld [vmem:[%s16714_s7 + $0x5c8] ss:$120 sps:$4 sm:$0xff]  }
 0x4a2   : > { %4871 = vmatpush1.bf16.msra.mxu0 %v14318_v12  ;;  %4713 = vmatprep.subr.bf16.mxu1 %v14323_v13  ;;  %v15409_v12 = vld [vmem:[#allocation2 + $0x20] sm:$0xff] }
 0x4a3   : > { %4872 = vmatprep.subr.bf16.mxu0 %v14326_v14  ;;  %v15410_v14 = vld [vmem:[#allocation2 + $0x28] sm:$0xff] }
 0x4a5   : > { %4714 = vmatpush1.bf16.msra.mxu1 %v14321_v15 }
 0x4a6   : > { %4873 = vmatpush1.bf16.msra.mxu0 %v14324_v16  ;;  %4715 = vmatprep.subr.bf16.mxu1 %v14329_v17  ;;  %v14390_v16 = vld [vmem:[%s16714_s7 + $0x5e0] ss:$120 sps:$4 sm:$0xff]   ;;  %v15411_v17 = vld [vmem:[#allocation2 + $0x10] sm:$0xff] }
 0x4a7   : > { %4874 = vmatprep.subr.bf16.mxu0 %v14332_v18 }
 0x4a9   : > { %4716 = vmatpush1.bf16.msra.mxu1 %v14327_v19  ;;  %v15412_v19 = vld [vmem:[#allocation2 + $0x18] sm:$0xff] }
 0x4aa   : > { %4875 = vmatpush1.bf16.msra.mxu0 %v14330_v20  ;;  %4717 = vmatprep.subr.bf16.mxu1 %v14335_v21 }
 0x4ab   : > { %4876 = vmatprep.subr.bf16.mxu0 %v14338_v22 }
 0x4ad   : > { %4718 = vmatpush1.bf16.msra.mxu1 %v14333_v23  ;;  %v14395_v23 = vld [vmem:[%s16714_s7 + $0x6bc] ss:$120 sps:$4 sm:$0xff]  }
 0x4ae   : > { %4877 = vmatpush1.bf16.msra.mxu0 %v14336_v24  ;;  %4719 = vmatprep.subr.bf16.mxu1 %v14341_v25 }
 0x4af   : > { %4878 = vmatprep.subr.bf16.mxu0 %v14344_v26 }
 0x4b1   : > { %4720 = vmatpush1.bf16.msra.mxu1 %v14339_v28  ;;  %v14398_v28 = vld [vmem:[%s16714_s7 + $0x6d4] ss:$120 sps:$4 sm:$0xff]  }
 0x4b2   : > { %4879 = vmatpush1.bf16.msra.mxu0 %v14342_v29  ;;  %4721 = vmatprep.subr.bf16.mxu1 %v14347_v30 }
 0x4b3   : > { %4880 = vmatprep.subr.bf16.mxu0 %v14350_v31  ;;  %v14393_v31 = vld [vmem:[%s16714_s7 + $0x6b8] ss:$120 sps:$4 sm:$0xff]  }
 0x4b5   : > { %4722 = vmatpush1.bf16.msra.mxu1 %v14345_v32  ;;  %v15413_v32 = vld [vmem:[#allocation2 + $0x30] sm:$0xff] }
 0x4b6   : > { %4881 = vmatpush1.bf16.msra.mxu0 %v14348_v33  ;;  %4797 = vmatprep.subr.bf16.mxu1 %v14353_v34  ;;  %v15414_v34 = vld [vmem:[#allocation2 + $0x38] sm:$0xff] }
 0x4b7   : > { %4956 = vmatprep.subr.bf16.mxu0 %v14356_v35 }
 0x4b8   : > { %4724 = vmatmul.mubr.bf16.vlgmr.msra.gmra.mrb[8].mxu1 %v16963_v27 }
 0x4b9   : > { %4798 = vmatpush1.bf16.msra.mxu1 %v14351_v36  ;;  %4883 = vmatmul.mubr.bf16.vlgmr.msra.gmra.mrb[8].mxu0 %v16963_v27 }
 0x4ba   : > { %4957 = vmatpush1.bf16.msra.mxu0 %v14354_v38  ;;  %4799 = vmatprep.subr.bf16.mxu1 %v14359_v39  ;;  %v14396_v38 = vld [vmem:[%s16714_s7 + $0x6d0] ss:$120 sps:$4 sm:$0xff]  }
 0x4bb   : > { %4958 = vmatprep.subr.bf16.mxu0 %v14362_v42  ;;  %4733 = vmatprep.mubr.bf16.mxu1 %v16990_v57  ;;  %v14401_v42 = vld [vmem:[%s16714_s7 + $0x7ac] ss:$120 sps:$4 sm:$0xff]  }
 0x4bc   : > { %4892 = vmatprep.mubr.bf16.mxu0 %v16990_v57 }
 0x4bd   : > { %4800 = vmatpush1.bf16.msra.mxu1 %v14357_v43 }
 0x4be   : > { %4959 = vmatpush1.bf16.msra.mxu0 %v14360_v44  ;;  %4801 = vmatprep.subr.bf16.mxu1 %v14365_v45  ;;  %v14404_v45 = vld [vmem:[%s16714_s7 + $0x7c4] ss:$120 sps:$4 sm:$0xff]  }
 0x4bf   : > { %4960 = vmatprep.subr.bf16.mxu0 %v14368_v46  ;;  %v14399_v46 = vld [vmem:[%s16714_s7 + $0x7a8] ss:$120 sps:$4 sm:$0xff]  }
 0x4c0   : > { %4734 = vmatmul.mubr.bf16.gmra.mrb[12].mxu1 %v16993_v60 }
 0x4c1   : > { %4802 = vmatpush1.bf16.msra.mxu1 %v14363_v48  ;;  %4893 = vmatmul.mubr.bf16.gmra.mrb[12].mxu0 %v16993_v60 }
 0x4c2   : > { %4961 = vmatpush1.bf16.msra.mxu0 %v14366_v50  ;;  %4803 = vmatprep.subr.bf16.mxu1 %v14371_v51  ;;  %v14402_v50 = vld [vmem:[%s16714_s7 + $0x7c0] ss:$120 sps:$4 sm:$0xff]   ;;  %v14407_v51 = vld [vmem:[%s16714_s7 + $0x89c] ss:$120 sps:$4 sm:$0xff]  }
 0x4c3   : > { %4962 = vmatprep.subr.bf16.mxu0 %v14374_v53  ;;  %4829 = vmatprep.mubr.bf16.mxu1 %v16943_v4  ;;  %v14410_v53 = vld [vmem:[%s16714_s7 + $0x8b4] ss:$120 sps:$4 sm:$0xff]  }
 0x4c4   : > { %4988 = vmatprep.mubr.bf16.mxu0 %v16943_v4 }
 0x4c5   : > { %4804 = vmatpush1.bf16.msra.mxu1 %v14369_v54  ;;  %v14405_v54 = vld [vmem:[%s16714_s7 + $0x898] ss:$120 sps:$4 sm:$0xff]  }
 0x4c6   : > { %4963 = vmatpush1.bf16.msra.mxu0 %v14372_v56  ;;  %4805 = vmatprep.subr.bf16.mxu1 %v14377_v47  ;;  %v14408_v56 = vld [vmem:[%s16714_s7 + $0x8b0] ss:$120 sps:$4 sm:$0xff]   ;;  %v14413_v47 = vld [vmem:[%s16714_s7 + $0x98c] ss:$120 sps:$4 sm:$0xff]  }
 0x4c7   : > { %4964 = vmatprep.subr.bf16.mxu0 %v14380_v52  ;;  %v14416_v52 = vld [vmem:[%s16714_s7 + $0x9a4] ss:$120 sps:$4 sm:$0xff]  }
 0x4c8   : > { %v5223_v59 = vpop.xlane.xlu0 %5222 }
 0x4c9   : > { %v5234_v62 = vmul.f32 0.00390625, %v5223_v59  ;;  %4806 = vmatpush1.bf16.msra.mxu1 %v14375_v49  ;;  %v14411_v49 = vld [vmem:[%s16714_s7 + $0x988] ss:$120 sps:$4 sm:$0xff]   ;;  %v14422_v59 = vld [vmem:[%s16714_s7 + $0xa94] ss:$120 sps:$4 sm:$0xff]  }
 0x4ca   : > { %4965 = vmatpush1.bf16.msra.mxu0 %v14378_v55  ;;  %v5229_v3 = vpop.xlane.xlu1 %5228  ;;  %4807 = vmatprep.subr.bf16.mxu1 %v14383_v58  ;;  %v14414_v55 = vld [vmem:[%s16714_s7 + $0x9a0] ss:$120 sps:$4 sm:$0xff]   ;;  %v14419_v58 = vld [vmem:[%s16714_s7 + $0xa7c] ss:$120 sps:$4 sm:$0xff]  }
 0x4cb   : > { %v17071_v37 = vsub.f32 %v15407_v1, %v5234_v62  ;;  %v17073_v2 = vsub.f32 %v15408_v40, %v5234_v62  ;;  %v5236_v6 = vmul.f32 0.00390625, %v5229_v3  ;;  %4966 = vmatprep.subr.bf16.mxu0 %v14386_v61  ;;  %v14417_v61 = vld [vmem:[%s16714_s7 + $0xa78] ss:$120 sps:$4 sm:$0xff]   ;;  %v14423_v1 = vld [vmem:[%s16714_s7 + $0xb68] ss:$120 sps:$4 sm:$0xff]  }
 0x4cc   : > { %v5226_v8 = vpop.xlane.xlu0 %5225  ;;  %v14420_v62 = vld [vmem:[%s16714_s7 + $0xa90] ss:$120 sps:$4 sm:$0xff]   ;;  %v14426_v40 = vld [vmem:[%s16714_s7 + $0xb80] ss:$120 sps:$4 sm:$0xff]   ;;  %v14431_v3 = vld [vmem:[%s16714_s7 + $0xc5c] ss:$120 sps:$4 sm:$0xff]  }
 0x4cd   : > { %v5235_v10 = vmul.f32 0.00390625, %v5226_v8  ;;  %v5246_v7 = vmul.f32 %v17071_v37, %v17071_v37  ;;  %v5247_v9 = vmul.f32 %v17073_v2, %v17073_v2  ;;  %v17082_v13 = vsub.f32 %v15409_v12, %v5236_v6  ;;  %4808 = vmatpush1.bf16.msra.mxu1 %v14381_v63  ;;  %v14425_v63 = vld [vmem:[%s16714_s7 + $0xb6c] ss:$120 sps:$4 sm:$0xff]   ;;  %v14432_v8 = vld [vmem:[%s16714_s7 + $0xc70] ss:$120 sps:$4 sm:$0xff]  }
 0x4ce   : > { %v17084_v15 = vsub.f32 %v15410_v14, %v5236_v6  ;;  %4967 = vmatpush1.bf16.msra.mxu0 %v14384_v0  ;;  %v5232_v21 = vpop.xlane.xlu1 %5231  ;;  %4809 = vmatprep.subr.bf16.mxu1 %v14389_v5  ;;  %v14428_v0 = vld [vmem:[%s16714_s7 + $0xb84] ss:$120 sps:$4 sm:$0xff]   ;;  %v14434_v5 = vld [vmem:[%s16714_s7 + $0xc74] ss:$120 sps:$4 sm:$0xff]   ;;  %v14429_v6 = vld [vmem:[%s16714_s7 + $0xc58] ss:$120 sps:$4 sm:$0xff]  }
 0x4cf   : > { %v17087_v18 = vsub.f32 %v15411_v17, %v5235_v10  ;;  %v17089_v20 = vsub.f32 %v15412_v19, %v5235_v10  ;;  %v5254_v22 = vadd.f32 %v5247_v9, %v5246_v7  ;;  %v5237_v24 = vmul.f32 0.00390625, %v5232_v21  ;;  %4968 = vmatprep.subr.bf16.mxu0 %v14392_v41  ;;  %v14437_v41 = vld [vmem:[%s16714_s7 + $0xd4c] ss:$120 sps:$4 sm:$0xff]   ;;  %v14435_v7 = vld [vmem:[%s16714_s7 + $0xd48] ss:$120 sps:$4 sm:$0xff]  }
 0x4d0   : > { %v5250_v25 = vmul.f32 %v17082_v13, %v17082_v13  ;;  %v5251_v26 = vmul.f32 %v17084_v15, %v17084_v15  ;;  %v14440_v10 = vld [vmem:[%s16714_s7 + $0xd64] ss:$120 sps:$4 sm:$0xff]   ;;  %v14438_v9 = vld [vmem:[%s16714_s7 + $0xd60] ss:$120 sps:$4 sm:$0xff]   ;;  %v14446_v12 = vld [vmem:[%s16714_s7 + $0xe54] ss:$120 sps:$4 sm:$0xff]  }
 0x4d1   : > { %5255 = vadd.xlane.f32.xlu0 %v5254_v22  ;;  %v5248_v29 = vmul.f32 %v17087_v18, %v17087_v18  ;;  %v5249_v30 = vmul.f32 %v17089_v20, %v17089_v20  ;;  %v17102_v33 = vsub.f32 %v15413_v32, %v5237_v24  ;;  %v17104_v35 = vsub.f32 %v15414_v34, %v5237_v24  ;;  %v14441_v14 = vld [vmem:[%s16714_s7 + $0xe38] ss:$120 sps:$4 sm:$0xff]   ;;  %v14449_v17 = vld [vmem:[%s16714_s7 + $0x3c] ss:$120 sps:$4 sm:$0xff]   ;;  %v14467_v32 = vld [vmem:[%s16714_s7 + $0x30c] ss:$120 sps:$4 sm:$0xff]  }
 0x4d2   : > { %4810 = vmatpush1.bf16.msra.mxu1 %v14387_v11  ;;  %v5260_v36 = vadd.f32 %v5251_v26, %v5250_v25  ;;  %4969 = vmatpush1.bf16.msra.mxu0 %v14390_v16  ;;  %v14443_v11 = vld [vmem:[%s16714_s7 + $0xe3c] ss:$120 sps:$4 sm:$0xff]   ;;  %v14444_v16 = vld [vmem:[%s16714_s7 + $0xe50] ss:$120 sps:$4 sm:$0xff]   ;;  %v14456_v26 = vld [vmem:[%s16714_s7 + $0x140] ss:$120 sps:$4 sm:$0xff]  }
 0x4d3   : > { %v5257_v39 = vadd.f32 %v5249_v30, %v5248_v29  ;;  %4811 = vmatprep.subr.bf16.mxu1 %v14395_v23  ;;  %4970 = vmatprep.subr.bf16.mxu0 %v14398_v28  ;;  %v5252_v43 = vmul.f32 %v17102_v33, %v17102_v33  ;;  %v5253_v44 = vmul.f32 %v17104_v35, %v17104_v35  ;;  %v14452_v19 = vld [vmem:[%s16714_s7 + $0x54] ss:$120 sps:$4 sm:$0xff]   ;;  %v14447_v21 = vld [vmem:[%s16714_s7 + $0x38] ss:$120 sps:$4 sm:$0xff]   ;;  %v14458_v24 = vld [vmem:[%s16714_s7 + $0x144] ss:$120 sps:$4 sm:$0xff]  }
 0x4d4   : > { %v14450_v22 = vld [vmem:[%s16714_s7 + $0x50] ss:$120 sps:$4 sm:$0xff]   ;;  %v14455_v23 = vld [vmem:[%s16714_s7 + $0x12c] ss:$120 sps:$4 sm:$0xff]   ;;  %v14461_v28 = vld [vmem:[%s16714_s7 + $0x21c] ss:$120 sps:$4 sm:$0xff]  }
 0x4d5   : > { %5261 = vadd.xlane.f32.xlu0 %v5260_v36  ;;  %5258 = vadd.xlane.f32.xlu1 %v5257_v39  ;;  %v5263_v48 = vadd.f32 %v5253_v44, %v5252_v43  ;;  %v14453_v25 = vld [vmem:[%s16714_s7 + $0x128] ss:$120 sps:$4 sm:$0xff]   ;;  %v14464_v29 = vld [vmem:[%s16714_s7 + $0x234] ss:$120 sps:$4 sm:$0xff]   ;;  %v14459_v30 = vld [vmem:[%s16714_s7 + $0x218] ss:$120 sps:$4 sm:$0xff]  }
 0x4d6   : > { %4812 = vmatpush1.bf16.msra.mxu1 %v14393_v31  ;;  %4971 = vmatpush1.bf16.msra.mxu0 %v14396_v38  ;;  %v14462_v31 = vld [vmem:[%s16714_s7 + $0x230] ss:$120 sps:$4 sm:$0xff]   ;;  %v14470_v34 = vld [vmem:[%s16714_s7 + $0x324] ss:$120 sps:$4 sm:$0xff]   ;;  %v14468_v38 = vld [vmem:[%s16714_s7 + $0x320] ss:$120 sps:$4 sm:$0xff]  }
 0x4d7   : > { %4813 = vmatprep.subr.bf16.mxu1 %v14401_v42  ;;  %4972 = vmatprep.subr.bf16.mxu0 %v14404_v45  ;;  %v14465_v36 = vld [vmem:[%s16714_s7 + $0x308] ss:$120 sps:$4 sm:$0xff]   ;;  %v14473_v39 = vld [vmem:[%s16714_s7 + $0x3fc] ss:$120 sps:$4 sm:$0xff]   ;;  %v14471_v43 = vld [vmem:[%s16714_s7 + $0x3f8] ss:$120 sps:$4 sm:$0xff]  }
 0x4d8   : > { %v14476_v42 = vld [vmem:[%s16714_s7 + $0x414] ss:$120 sps:$4 sm:$0xff]   ;;  %v14474_v44 = vld [vmem:[%s16714_s7 + $0x410] ss:$120 sps:$4 sm:$0xff]  }
 0x4d9   : > { %5264 = vadd.xlane.f32.xlu1 %v5263_v48  ;;  %v14479_v45 = vld [vmem:[%s16714_s7 + $0x4ec] ss:$120 sps:$4 sm:$0xff]   ;;  %v14477_v48 = vld [vmem:[%s16714_s7 + $0x4e8] ss:$120 sps:$4 sm:$0xff]  }
 0x4da   : > { %4814 = vmatpush1.bf16.msra.mxu1 %v14399_v46  ;;  %4973 = vmatpush1.bf16.msra.mxu0 %v14402_v50  ;;  %v14482_v46 = vld [vmem:[%s16714_s7 + $0x504] ss:$120 sps:$4 sm:$0xff]   ;;  %v14480_v50 = vld [vmem:[%s16714_s7 + $0x500] ss:$120 sps:$4 sm:$0xff]  }
 0x4db   : > { %4815 = vmatprep.subr.bf16.mxu1 %v14407_v51  ;;  %4974 = vmatprep.subr.bf16.mxu0 %v14410_v53  ;;  %v14485_v51 = vld [vmem:[%s16714_s7 + $0x5dc] ss:$120 sps:$4 sm:$0xff]  }
 0x4dc   : > { %v14488_v53 = vld [vmem:[%s16714_s7 + $0x5f4] ss:$120 sps:$4 sm:$0xff]  }
 0x4de   : > { %4816 = vmatpush1.bf16.msra.mxu1 %v14405_v54  ;;  %4975 = vmatpush1.bf16.msra.mxu0 %v14408_v56  ;;  %v14483_v54 = vld [vmem:[%s16714_s7 + $0x5d8] ss:$120 sps:$4 sm:$0xff]  }
 0x4df   : > { %4817 = vmatprep.subr.bf16.mxu1 %v14413_v47  ;;  %4976 = vmatprep.subr.bf16.mxu0 %v14416_v52  ;;  %v14486_v56 = vld [vmem:[%s16714_s7 + $0x5f0] ss:$120 sps:$4 sm:$0xff]   ;;  %v14491_v47 = vld [vmem:[%s16714_s7 + $0x6cc] ss:$120 sps:$4 sm:$0xff]  }
 0x4e0   : > { %v14494_v52 = vld [vmem:[%s16714_s7 + $0x6e4] ss:$120 sps:$4 sm:$0xff]  }
 0x4e2   : > { %4818 = vmatpush1.bf16.msra.mxu1 %v14411_v49  ;;  %4977 = vmatpush1.bf16.msra.mxu0 %v14414_v55  ;;  %v14489_v49 = vld [vmem:[%s16714_s7 + $0x6c8] ss:$120 sps:$4 sm:$0xff]  }
 0x4e3   : > { %4819 = vmatprep.subr.bf16.mxu1 %v14419_v58  ;;  %4978 = vmatprep.subr.bf16.mxu0 %v14422_v59  ;;  %v14492_v55 = vld [vmem:[%s16714_s7 + $0x6e0] ss:$120 sps:$4 sm:$0xff]   ;;  %v14497_v58 = vld [vmem:[%s16714_s7 + $0x7bc] ss:$120 sps:$4 sm:$0xff]  }
 0x4e4   : > { %v14500_v59 = vld [vmem:[%s16714_s7 + $0x7d4] ss:$120 sps:$4 sm:$0xff]  }
 0x4e6   : > { %4820 = vmatpush1.bf16.msra.mxu1 %v14417_v61  ;;  %4979 = vmatpush1.bf16.msra.mxu0 %v14420_v62  ;;  %v14495_v61 = vld [vmem:[%s16714_s7 + $0x7b8] ss:$120 sps:$4 sm:$0xff]  }
 0x4e7   : > { %4821 = vmatprep.subr.bf16.mxu1 %v14425_v63  ;;  %4980 = vmatprep.subr.bf16.mxu0 %v14428_v0  ;;  %v14498_v62 = vld [vmem:[%s16714_s7 + $0x7d0] ss:$120 sps:$4 sm:$0xff]   ;;  %v14503_v63 = vld [vmem:[%s16714_s7 + $0x8ac] ss:$120 sps:$4 sm:$0xff]  }
 0x4e8   : > { %v14506_v0 = vld [vmem:[%s16714_s7 + $0x8c4] ss:$120 sps:$4 sm:$0xff]  }
 0x4ea   : > { %4822 = vmatpush1.bf16.msra.mxu1 %v14423_v1  ;;  %4981 = vmatpush1.bf16.msra.mxu0 %v14426_v40  ;;  %v14501_v1 = vld [vmem:[%s16714_s7 + $0x8a8] ss:$120 sps:$4 sm:$0xff]  }
 0x4eb   : > { %4823 = vmatprep.subr.bf16.mxu1 %v14431_v3  ;;  %4982 = vmatprep.subr.bf16.mxu0 %v14434_v5  ;;  %v14504_v40 = vld [vmem:[%s16714_s7 + $0x8c0] ss:$120 sps:$4 sm:$0xff]   ;;  %v14509_v3 = vld [vmem:[%s16714_s7 + $0x99c] ss:$120 sps:$4 sm:$0xff]  }
 0x4ec   : > { %v14512_v5 = vld [vmem:[%s16714_s7 + $0x9b4] ss:$120 sps:$4 sm:$0xff]  }
 0x4ee   : > { %4824 = vmatpush1.bf16.msra.mxu1 %v14429_v6  ;;  %4983 = vmatpush1.bf16.msra.mxu0 %v14432_v8  ;;  %v14507_v6 = vld [vmem:[%s16714_s7 + $0x998] ss:$120 sps:$4 sm:$0xff]  }
 0x4ef   : > { %4825 = vmatprep.subr.bf16.mxu1 %v14437_v41  ;;  %4984 = vmatprep.subr.bf16.mxu0 %v14440_v10  ;;  %v14510_v8 = vld [vmem:[%s16714_s7 + $0x9b0] ss:$120 sps:$4 sm:$0xff]   ;;  %v14515_v41 = vld [vmem:[%s16714_s7 + $0xa8c] ss:$120 sps:$4 sm:$0xff]  }
 0x4f0   : > { %v14518_v10 = vld [vmem:[%s16714_s7 + $0xaa4] ss:$120 sps:$4 sm:$0xff]  }
 0x4f2   : > { %4826 = vmatpush1.bf16.msra.mxu1 %v14435_v7  ;;  %4985 = vmatpush1.bf16.msra.mxu0 %v14438_v9  ;;  %v14513_v7 = vld [vmem:[%s16714_s7 + $0xa88] ss:$120 sps:$4 sm:$0xff]  }
 0x4f3   : > { %4827 = vmatprep.subr.bf16.mxu1 %v14443_v11  ;;  %4986 = vmatprep.subr.bf16.mxu0 %v14446_v12  ;;  %v14516_v9 = vld [vmem:[%s16714_s7 + $0xaa0] ss:$120 sps:$4 sm:$0xff]   ;;  %v14521_v11 = vld [vmem:[%s16714_s7 + $0xb7c] ss:$120 sps:$4 sm:$0xff]  }
 0x4f4   : > { %v14524_v12 = vld [vmem:[%s16714_s7 + $0xb94] ss:$120 sps:$4 sm:$0xff]  }
 0x4f6   : > { %4828 = vmatpush1.bf16.msra.mxu1 %v14441_v14  ;;  %4987 = vmatpush1.bf16.msra.mxu0 %v14444_v16  ;;  %v14519_v14 = vld [vmem:[%s16714_s7 + $0xb78] ss:$120 sps:$4 sm:$0xff]  }
 0x4f7   : > { %4903 = vmatprep.subr.bf16.mxu1 %v14449_v17  ;;  %5062 = vmatprep.subr.bf16.mxu0 %v14452_v19  ;;  %v14522_v16 = vld [vmem:[%s16714_s7 + $0xb90] ss:$120 sps:$4 sm:$0xff]   ;;  %v14527_v17 = vld [vmem:[%s16714_s7 + $0xc6c] ss:$120 sps:$4 sm:$0xff]  }
 0x4f8   : > { %v14530_v19 = vld [vmem:[%s16714_s7 + $0xc84] ss:$120 sps:$4 sm:$0xff]  }
 0x4f9   : > { %4830 = vmatmul.mubr.bf16.vlgmr.msra.gmra.mrb[16].mxu1 %v16963_v27  ;;  %4989 = vmatmul.mubr.bf16.vlgmr.msra.gmra.mrb[16].mxu0 %v16963_v27 }
 0x4fa   : > { %4904 = vmatpush1.bf16.msra.mxu1 %v14447_v21  ;;  %5063 = vmatpush1.bf16.msra.mxu0 %v14450_v22  ;;  %v14525_v21 = vld [vmem:[%s16714_s7 + $0xc68] ss:$120 sps:$4 sm:$0xff]  }
 0x4fb   : > { %4905 = vmatprep.subr.bf16.mxu1 %v14455_v23  ;;  %5064 = vmatprep.subr.bf16.mxu0 %v14458_v24  ;;  %v14528_v22 = vld [vmem:[%s16714_s7 + $0xc80] ss:$120 sps:$4 sm:$0xff]   ;;  %v14533_v23 = vld [vmem:[%s16714_s7 + $0xd5c] ss:$120 sps:$4 sm:$0xff]  }
 0x4fc   : > { %4839 = vmatprep.mubr.bf16.mxu1 %v16990_v57  ;;  %4998 = vmatprep.mubr.bf16.mxu0 %v16990_v57  ;;  %v14536_v24 = vld [vmem:[%s16714_s7 + $0xd74] ss:$120 sps:$4 sm:$0xff]  }
 0x4fe   : > { %4906 = vmatpush1.bf16.msra.mxu1 %v14453_v25  ;;  %5065 = vmatpush1.bf16.msra.mxu0 %v14456_v26  ;;  %v14531_v25 = vld [vmem:[%s16714_s7 + $0xd58] ss:$120 sps:$4 sm:$0xff]  }
 0x4ff   : > { %4907 = vmatprep.subr.bf16.mxu1 %v14461_v28  ;;  %5066 = vmatprep.subr.bf16.mxu0 %v14464_v29  ;;  %v14534_v26 = vld [vmem:[%s16714_s7 + $0xd70] ss:$120 sps:$4 sm:$0xff]   ;;  %v14539_v28 = vld [vmem:[%s16714_s7 + $0xe4c] ss:$120 sps:$4 sm:$0xff]  }
 0x500   : > { %v14542_v29 = vld [vmem:[%s16714_s7 + $0xe64] ss:$120 sps:$4 sm:$0xff]  }
 0x501   : > { %4840 = vmatmul.mubr.bf16.gmra.mrb[20].mxu1 %v16993_v60  ;;  %4999 = vmatmul.mubr.bf16.gmra.mrb[20].mxu0 %v16993_v60 }
 0x502   : > { %4908 = vmatpush1.bf16.msra.mxu1 %v14459_v30  ;;  %5067 = vmatpush1.bf16.msra.mxu0 %v14462_v31  ;;  %v14537_v30 = vld [vmem:[%s16714_s7 + $0xe48] ss:$120 sps:$4 sm:$0xff]  }
 0x503   : > { %4909 = vmatprep.subr.bf16.mxu1 %v14467_v32  ;;  %5068 = vmatprep.subr.bf16.mxu0 %v14470_v34  ;;  %v14540_v31 = vld [vmem:[%s16714_s7 + $0xe60] ss:$120 sps:$4 sm:$0xff]   ;;  %v14545_v32 = vld [vmem:[%s16714_s7 + $0x4c] ss:$120 sps:$4 sm:$0xff]  }
 0x504   : > { %4935 = vmatprep.mubr.bf16.mxu1 %v16943_v4  ;;  %5094 = vmatprep.mubr.bf16.mxu0 %v16943_v4  ;;  %v14548_v34 = vld [vmem:[%s16714_s7 + $0x64] ss:$120 sps:$4 sm:$0xff]  }
 0x506   : > { %4910 = vmatpush1.bf16.msra.mxu1 %v14465_v36  ;;  %5069 = vmatpush1.bf16.msra.mxu0 %v14468_v38  ;;  %v14543_v36 = vld [vmem:[%s16714_s7 + $0x48] ss:$120 sps:$4 sm:$0xff]  }
 0x507   : > { %4911 = vmatprep.subr.bf16.mxu1 %v14473_v39  ;;  %5070 = vmatprep.subr.bf16.mxu0 %v14476_v42  ;;  %v14546_v38 = vld [vmem:[%s16714_s7 + $0x60] ss:$120 sps:$4 sm:$0xff]   ;;  %v14551_v39 = vld [vmem:[%s16714_s7 + $0x13c] ss:$120 sps:$4 sm:$0xff]  }
 0x508   : > { %v14554_v42 = vld [vmem:[%s16714_s7 + $0x154] ss:$120 sps:$4 sm:$0xff]  }
 0x50a   : > { %4912 = vmatpush1.bf16.msra.mxu1 %v14471_v43  ;;  %5071 = vmatpush1.bf16.msra.mxu0 %v14474_v44  ;;  %v14549_v43 = vld [vmem:[%s16714_s7 + $0x138] ss:$120 sps:$4 sm:$0xff]  }
 0x50b   : > { %4913 = vmatprep.subr.bf16.mxu1 %v14479_v45  ;;  %5072 = vmatprep.subr.bf16.mxu0 %v14482_v46  ;;  %v14552_v44 = vld [vmem:[%s16714_s7 + $0x150] ss:$120 sps:$4 sm:$0xff]   ;;  %v14557_v45 = vld [vmem:[%s16714_s7 + $0x22c] ss:$120 sps:$4 sm:$0xff]  }
 0x50c   : > { %v14555_v46 = vld [vmem:[%s16714_s7 + $0x228] ss:$120 sps:$4 sm:$0xff]  }
 0x50e   : > { %4914 = vmatpush1.bf16.msra.mxu1 %v14477_v48  ;;  %5073 = vmatpush1.bf16.msra.mxu0 %v14480_v50  ;;  %v14560_v48 = vld [vmem:[%s16714_s7 + $0x244] ss:$120 sps:$4 sm:$0xff]   ;;  %v2680_v50 = vlaneseq }
 0x50f   : > { %4915 = vmatprep.subr.bf16.mxu1 %v14485_v51  ;;  %5074 = vmatprep.subr.bf16.mxu0 %v14488_v53  ;;  %v14558_v51 = vld [vmem:[%s16714_s7 + $0x240] ss:$120 sps:$4 sm:$0xff]   ;;  %v14563_v53 = vld [vmem:[%s16714_s7 + $0x31c] ss:$120 sps:$4 sm:$0xff]  }
 0x512   : > { %4916 = vmatpush1.bf16.msra.mxu1 %v14483_v54  ;;  %5075 = vmatpush1.bf16.msra.mxu0 %v14486_v56  ;;  %v14566_v54 = vld [vmem:[%s16714_s7 + $0x334] ss:$120 sps:$4 sm:$0xff]   ;;  %v14561_v56 = vld [vmem:[%s16714_s7 + $0x318] ss:$120 sps:$4 sm:$0xff]  }
 0x513   : > { %4917 = vmatprep.subr.bf16.mxu1 %v14491_v47  ;;  %5076 = vmatprep.subr.bf16.mxu0 %v14494_v52  ;;  %v17234_v47 = vshrl.u32 %v2680_v50, 7  ;;  %v14564_v52 = vld [vmem:[%s16714_s7 + $0x330] ss:$120 sps:$4 sm:$0xff]   ;;  %v14608_v50 = vld [vmem:[%s16714_s7 + $0x9c4] ss:$120 sps:$4 sm:$0xff]  }
 0x516   : > { %4918 = vmatpush1.bf16.msra.mxu1 %v14489_v49  ;;  %5077 = vmatpush1.bf16.msra.mxu0 %v14492_v55  ;;  %v2647_v49 = vld [vmem:[%s16749_s21] sm:$0xff] }
 0x517   : > { %4919 = vmatprep.subr.bf16.mxu1 %v14497_v58  ;;  %5078 = vmatprep.subr.bf16.mxu0 %v14500_v59  ;;  %v2667_v55 = vunpack.c.h.bf16 %v2647_v49  ;;  %v14569_v58 = vld [vmem:[%s16714_s7 + $0x40c] ss:$120 sps:$4 sm:$0xff]  }
 0x518   : > { %v14572_v59 = vld [vmem:[%s16714_s7 + $0x424] ss:$120 sps:$4 sm:$0xff]  }
 0x51a   : > { %4920 = vmatpush1.bf16.msra.mxu1 %v14495_v61  ;;  %5079 = vmatpush1.bf16.msra.mxu0 %v14498_v62  ;;  %v14567_v61 = vld [vmem:[%s16714_s7 + $0x408] ss:$120 sps:$4 sm:$0xff]   ;;  %v17244_v62 = vsub.s32 0, %v17234_v47 }
 0x51b   : > { %4921 = vmatprep.subr.bf16.mxu1 %v14503_v63  ;;  %5080 = vmatprep.subr.bf16.mxu0 %v14506_v0  ;;  %v14570_v63 = vld [vmem:[%s16714_s7 + $0x420] ss:$120 sps:$4 sm:$0xff]   ;;  %v17249_v0 = vsub.s32 2, %v17234_v47 }
 0x51c   : > { %19672 = vst [vmem:[#allocation40_spill] sm:$0xff] %v17244_v62 }
 0x51d   : > { %19673 = vst [vmem:[#allocation41_spill] sm:$0xff] %v17249_v0 }
 0x51e   : > { %4922 = vmatpush1.bf16.msra.mxu1 %v14501_v1  ;;  %5081 = vmatpush1.bf16.msra.mxu0 %v14504_v40  ;;  %v14575_v1 = vld [vmem:[%s16714_s7 + $0x4fc] ss:$120 sps:$4 sm:$0xff]  }
 0x51f   : > { %4923 = vmatprep.subr.bf16.mxu1 %v14509_v3  ;;  %5082 = vmatprep.subr.bf16.mxu0 %v14512_v5  ;;  %v14578_v40 = vld [vmem:[%s16714_s7 + $0x514] ss:$120 sps:$4 sm:$0xff]   ;;  %v2699_v3 = vrot.slane %v2667_v55, %v17244_v62  ;;  %v2703_v5 = vrot.slane %v2667_v55, %v17249_v0 }
 0x522   : > { %4924 = vmatpush1.bf16.msra.mxu1 %v14507_v6  ;;  %5083 = vmatpush1.bf16.msra.mxu0 %v14510_v8  ;;  %v14573_v6 = vld [vmem:[%s16714_s7 + $0x4f8] ss:$120 sps:$4 sm:$0xff]  }
 0x523   : > { %4925 = vmatprep.subr.bf16.mxu1 %v14515_v41  ;;  %5084 = vmatprep.subr.bf16.mxu0 %v14518_v10  ;;  %v14576_v8 = vld [vmem:[%s16714_s7 + $0x510] ss:$120 sps:$4 sm:$0xff]   ;;  %v14581_v41 = vld [vmem:[%s16714_s7 + $0x5ec] ss:$120 sps:$4 sm:$0xff]  }
 0x524   : > { %v14584_v10 = vld [vmem:[%s16714_s7 + $0x604] ss:$120 sps:$4 sm:$0xff]  }
 0x526   : > { %4926 = vmatpush1.bf16.msra.mxu1 %v14513_v7  ;;  %5085 = vmatpush1.bf16.msra.mxu0 %v14516_v9  ;;  %v17261_v7 = vrot.slane %v2699_v3, %v17244_v62  ;;  %v17264_v9 = vrot.slane %v2703_v5, %v17244_v62 }
 0x527   : > { %4927 = vmatprep.subr.bf16.mxu1 %v14521_v11  ;;  %5086 = vmatprep.subr.bf16.mxu0 %v14524_v12  ;;  %v14579_v12 = vld [vmem:[%s16714_s7 + $0x5e8] ss:$120 sps:$4 sm:$0xff]  }
 0x52a   : > { %4928 = vmatpush1.bf16.msra.mxu1 %v14519_v14  ;;  %5087 = vmatpush1.bf16.msra.mxu0 %v14522_v16  ;;  %v14582_v16 = vld [vmem:[%s16714_s7 + $0x600] ss:$120 sps:$4 sm:$0xff]  }
 0x52b   : > { %4929 = vmatprep.subr.bf16.mxu1 %v14527_v17  ;;  %5088 = vmatprep.subr.bf16.mxu0 %v14530_v19 }
 0x52e   : > { %4930 = vmatpush1.bf16.msra.mxu1 %v14525_v21  ;;  %5089 = vmatpush1.bf16.msra.mxu0 %v14528_v22  ;;  %v14587_v21 = vld [vmem:[%s16714_s7 + $0x6dc] ss:$120 sps:$4 sm:$0xff]  }
 0x52f   : > { %4931 = vmatprep.subr.bf16.mxu1 %v14533_v23  ;;  %5090 = vmatprep.subr.bf16.mxu0 %v14536_v24 }
 0x532   : > { %4932 = vmatpush1.bf16.msra.mxu1 %v14531_v25  ;;  %5091 = vmatpush1.bf16.msra.mxu0 %v14534_v26 }
 0x533   : > { %4933 = vmatprep.subr.bf16.mxu1 %v14539_v28  ;;  %5092 = vmatprep.subr.bf16.mxu0 %v14542_v29  ;;  %v14585_v28 = vld [vmem:[%s16714_s7 + $0x6d8] ss:$120 sps:$4 sm:$0xff]   ;;  %v14590_v29 = vld [vmem:[%s16714_s7 + $0x6f4] ss:$120 sps:$4 sm:$0xff]  }
 0x536   : > { %4934 = vmatpush1.bf16.msra.mxu1 %v14537_v30  ;;  %5093 = vmatpush1.bf16.msra.mxu0 %v14540_v31 }
 0x537   : > { %5009 = vmatprep.subr.bf16.mxu1 %v14545_v32  ;;  %5168 = vmatprep.subr.bf16.mxu0 %v14548_v34  ;;  %v14588_v32 = vld [vmem:[%s16714_s7 + $0x6f0] ss:$120 sps:$4 sm:$0xff]  }
 0x539   : > { %4936 = vmatmul.mubr.bf16.vlgmr.msra.gmra.mrb[24].mxu1 %v16963_v27  ;;  %5095 = vmatmul.mubr.bf16.vlgmr.msra.gmra.mrb[24].mxu0 %v16963_v27 }
 0x53a   : > { %5010 = vmatpush1.bf16.msra.mxu1 %v14543_v36  ;;  %5169 = vmatpush1.bf16.msra.mxu0 %v14546_v38  ;;  %v14593_v36 = vld [vmem:[%s16714_s7 + $0x7cc] ss:$120 sps:$4 sm:$0xff]  }
 0x53b   : > { %5011 = vmatprep.subr.bf16.mxu1 %v14551_v39  ;;  %5170 = vmatprep.subr.bf16.mxu0 %v14554_v42  ;;  %v14596_v38 = vld [vmem:[%s16714_s7 + $0x7e4] ss:$120 sps:$4 sm:$0xff]   ;;  %v14591_v39 = vld [vmem:[%s16714_s7 + $0x7c8] ss:$120 sps:$4 sm:$0xff]  }
 0x53c   : > { %4945 = vmatprep.mubr.bf16.mxu1 %v16990_v57  ;;  %5104 = vmatprep.mubr.bf16.mxu0 %v16990_v57  ;;  %v14594_v42 = vld [vmem:[%s16714_s7 + $0x7e0] ss:$120 sps:$4 sm:$0xff]  }
 0x53e   : > { %5012 = vmatpush1.bf16.msra.mxu1 %v14549_v43  ;;  %5171 = vmatpush1.bf16.msra.mxu0 %v14552_v44  ;;  %v14599_v43 = vld [vmem:[%s16714_s7 + $0x8bc] ss:$120 sps:$4 sm:$0xff]  }
 0x53f   : > { %5013 = vmatprep.subr.bf16.mxu1 %v14557_v45  ;;  %5172 = vmatprep.subr.bf16.mxu0 %v14560_v48  ;;  %v14602_v44 = vld [vmem:[%s16714_s7 + $0x8d4] ss:$120 sps:$4 sm:$0xff]   ;;  %v14597_v45 = vld [vmem:[%s16714_s7 + $0x8b8] ss:$120 sps:$4 sm:$0xff]  }
 0x540   : > { %v14605_v48 = vld [vmem:[%s16714_s7 + $0x9ac] ss:$120 sps:$4 sm:$0xff]  }
 0x541   : > { %4946 = vmatmul.mubr.bf16.gmra.mrb[28].mxu1 %v16993_v60  ;;  %5105 = vmatmul.mubr.bf16.gmra.mrb[28].mxu0 %v16993_v60 }
 0x542   : > { %5014 = vmatpush1.bf16.msra.mxu1 %v14555_v46  ;;  %5173 = vmatpush1.bf16.msra.mxu0 %v14558_v51  ;;  %v14600_v46 = vld [vmem:[%s16714_s7 + $0x8d0] ss:$120 sps:$4 sm:$0xff]  }
 0x543   : > { %5015 = vmatprep.subr.bf16.mxu1 %v14563_v53  ;;  %5174 = vmatprep.subr.bf16.mxu0 %v14566_v54  ;;  %v14603_v51 = vld [vmem:[%s16714_s7 + $0x9a8] ss:$120 sps:$4 sm:$0xff]   ;;  %v14611_v54 = vld [vmem:[%s16714_s7 + $0xa9c] ss:$120 sps:$4 sm:$0xff]  }
 0x544   : > { %5041 = vmatprep.mubr.bf16.mxu1 %v16943_v4  ;;  %5200 = vmatprep.mubr.bf16.mxu0 %v16943_v4  ;;  %v14606_v53 = vld [vmem:[%s16714_s7 + $0x9c0] ss:$120 sps:$4 sm:$0xff]  }
 0x546   : > { %5016 = vmatpush1.bf16.msra.mxu1 %v14561_v56  ;;  %5175 = vmatpush1.bf16.msra.mxu0 %v14564_v52  ;;  %v14614_v56 = vld [vmem:[%s16714_s7 + $0xab4] ss:$120 sps:$4 sm:$0xff]   ;;  %v14609_v52 = vld [vmem:[%s16714_s7 + $0xa98] ss:$120 sps:$4 sm:$0xff]  }
 0x547   : > { %5017 = vmatprep.subr.bf16.mxu1 %v14569_v58  ;;  %5176 = vmatprep.subr.bf16.mxu0 %v14572_v59  ;;  %v14612_v58 = vld [vmem:[%s16714_s7 + $0xab0] ss:$120 sps:$4 sm:$0xff]   ;;  %v14617_v59 = vld [vmem:[%s16714_s7 + $0xb8c] ss:$120 sps:$4 sm:$0xff]  }
 0x54a   : > { %5018 = vmatpush1.bf16.msra.mxu1 %v14567_v61  ;;  %5177 = vmatpush1.bf16.msra.mxu0 %v14570_v63  ;;  %v14620_v63 = vld [vmem:[%s16714_s7 + $0xba4] ss:$120 sps:$4 sm:$0xff]  }
 0x54b   : > { %5019 = vmatprep.subr.bf16.mxu1 %v14575_v1  ;;  %v17266_v11 = vpop.f32.mrb[0].mxu1  ;;  %5178 = vmatprep.subr.bf16.mxu0 %v14578_v40 }
 0x54c   : > { %v17269_v14 = vpop.f32.mrb[1].mxu1  ;;  %v4778_v17 = vpop.f32.mrb[0].mxu0 }
 0x54d   : > { %v17272_v19 = vpop.f32.mrb[2].mxu1  ;;  %v17276_v22 = vadd.f32 %v4778_v17, %v17261_v7  ;;  %v4780_v23 = vpop.f32.mrb[1].mxu0  ;;  %v14623_v17 = vld [vmem:[%s16714_s7 + $0xc7c] ss:$120 sps:$4 sm:$0xff]  }
 0x54e   : > { %5020 = vmatpush1.bf16.msra.mxu1 %v14573_v6  ;;  %5179 = vmatpush1.bf16.msra.mxu0 %v14576_v8  ;;  %v17278_v24 = vpop.f32.mrb[3].mxu1  ;;  %v17281_v25 = vadd.f32 %v4780_v23, %v17264_v9  ;;  %v4782_v26 = vpop.f32.mrb[2].mxu0  ;;  %v14615_v8 = vld [vmem:[%s16714_s7 + $0xb88] ss:$120 sps:$4 sm:$0xff]  }
 0x54f   : > { %19674 = vst [vmem:[#allocation42_spill] sm:$0xff] %v17276_v22  ;;  %5021 = vmatprep.subr.bf16.mxu1 %v14581_v41  ;;  %5180 = vmatprep.subr.bf16.mxu0 %v14584_v10  ;;  %v17286_v30 = vadd.f32 %v4782_v26, %v17261_v7  ;;  %v4784_v31 = vpop.f32.mrb[3].mxu0  ;;  %v14618_v41 = vld [vmem:[%s16714_s7 + $0xba0] ss:$120 sps:$4 sm:$0xff]  }
 0x550   : > { %19675 = vst [vmem:[#allocation43_spill] sm:$0xff] %v17281_v25  ;;  %v17290_v34 = vadd.f32 %v4784_v31, %v17264_v9  ;;  %v14624_v31 = vld [vmem:[%s16714_s7 + $0xc90] ss:$120 sps:$4 sm:$0xff]  }
 0x551   : > { %19676 = vst [vmem:[#allocation44_spill] sm:$0xff] %v17286_v30  ;;  %v14813_v22 = vld [vmem:[%s16720_s27 + $0x3e8] ss:$48 sps:$4 sm:$0xff]  }
 0x552   : > { %19677 = vst [vmem:[#allocation45_spill] sm:$0xff] %v17290_v34  ;;  %5022 = vmatpush1.bf16.msra.mxu1 %v14579_v12  ;;  %5181 = vmatpush1.bf16.msra.mxu0 %v14582_v16 }
 0x553   : > { %5023 = vmatprep.subr.bf16.mxu1 %v14587_v21  ;;  %5182 = vmatprep.subr.bf16.mxu0 %v14590_v29  ;;  %v17313_v1 = vpop.f32.mrb[4].mxu1  ;;  %v14626_v21 = vld [vmem:[%s16714_s7 + $0xc94] ss:$120 sps:$4 sm:$0xff]  }
 0x554   : > { %v4788_v49 = vpop.f32.mrb[4].mxu0  ;;  %v17315_v3 = vpop.f32.mrb[5].mxu1 }
 0x555   : > { %v17310_v61 = vadd.f32 %v4788_v49, %v17261_v7  ;;  %v4790_v40 = vpop.f32.mrb[5].mxu0  ;;  %v17322_v10 = vpop.f32.mrb[6].mxu1  ;;  %v14645_v49 = vld [vmem:[%s16714_s7 + $0x148] ss:$120 sps:$4 sm:$0xff]  }
 0x556   : > { %5024 = vmatpush1.bf16.msra.mxu1 %v14585_v28  ;;  %5183 = vmatpush1.bf16.msra.mxu0 %v14588_v32  ;;  %v17318_v5 = vadd.f32 %v4790_v40, %v17264_v9  ;;  %v4792_v6 = vpop.f32.mrb[6].mxu0  ;;  %v17329_v23 = vpop.f32.mrb[7].mxu1 }
 0x557   : > { %5025 = vmatprep.subr.bf16.mxu1 %v14593_v36  ;;  %5184 = vmatprep.subr.bf16.mxu0 %v14596_v38  ;;  %19678 = vst [vmem:[#allocation46_spill] sm:$0xff] %v17310_v61  ;;  %v17325_v12 = vadd.f32 %v4792_v6, %v17261_v7  ;;  %v4794_v16 = vpop.f32.mrb[7].mxu0  ;;  %v14621_v7 = vld [vmem:[%s16714_s7 + $0xc78] ss:$120 sps:$4 sm:$0xff]   ;;  %v14629_v36 = vld [vmem:[%s16714_s7 + $0xd6c] ss:$120 sps:$4 sm:$0xff]  }
 0x558   : > { %19679 = vst [vmem:[#allocation47_spill] sm:$0xff] %v17318_v5  ;;  %v17332_v26 = vadd.f32 %v4794_v16, %v17264_v9  ;;  %v14632_v38 = vld [vmem:[%s16714_s7 + $0xd84] ss:$120 sps:$4 sm:$0xff]   ;;  %v14651_v6 = vld [vmem:[%s16714_s7 + $0x238] ss:$120 sps:$4 sm:$0xff]  }
 0x559   : > { %19680 = vst [vmem:[#allocation48_spill] sm:$0xff] %v17325_v12  ;;  %v14659_v16 = vld [vmem:[%s16714_s7 + $0x32c] ss:$120 sps:$4 sm:$0xff]   ;;  %v14714_v12 = vld [vmem:[%s16720_s27 + $0x4a0] ss:$48 sps:$4 sm:$0xff]  }
 0x55a   : > { %5026 = vmatpush1.bf16.msra.mxu1 %v14591_v39  ;;  %5185 = vmatpush1.bf16.msra.mxu0 %v14594_v42  ;;  %19681 = vst [vmem:[#allocation49_spill] sm:$0xff] %v17332_v26  ;;  %v14627_v39 = vld [vmem:[%s16714_s7 + $0xd68] ss:$120 sps:$4 sm:$0xff]   ;;  %v14716_v26 = vld [vmem:[%s16720_s27 + $0x4a4] ss:$48 sps:$4 sm:$0xff]  }
 0x55b   : > { %5027 = vmatprep.subr.bf16.mxu1 %v14599_v43  ;;  %5186 = vmatprep.subr.bf16.mxu0 %v14602_v44  ;;  %v14630_v42 = vld [vmem:[%s16714_s7 + $0xd80] ss:$120 sps:$4 sm:$0xff]   ;;  %v14635_v43 = vld [vmem:[%s16714_s7 + $0xe5c] ss:$120 sps:$4 sm:$0xff]  }
 0x55c   : > { %v14804_v61 = vld [vmem:[%s16720_s27 + $0x2c8] ss:$48 sps:$4 sm:$0xff]  }
 0x55e   : > { %5028 = vmatpush1.bf16.msra.mxu1 %v14597_v45  ;;  %5187 = vmatpush1.bf16.msra.mxu0 %v14600_v46  ;;  %v5256_v28 = vpop.xlane.xlu0 %5255  ;;  %v14638_v45 = vld [vmem:[%s16714_s7 + $0xe74] ss:$120 sps:$4 sm:$0xff]   ;;  %v14633_v46 = vld [vmem:[%s16714_s7 + $0xe58] ss:$120 sps:$4 sm:$0xff]  }
 0x55f   : > { %5029 = vmatprep.subr.bf16.mxu1 %v14605_v48  ;;  %5188 = vmatprep.subr.bf16.mxu0 %v14608_v50  ;;  %v5266_v32 = vmul.f32 0.00390625, %v5256_v28  ;;  %v14636_v48 = vld [vmem:[%s16714_s7 + $0xe70] ss:$120 sps:$4 sm:$0xff]   ;;  %v14641_v50 = vld [vmem:[%s16714_s7 + $0x5c] ss:$120 sps:$4 sm:$0xff]  }
 0x560   : > { %v14657_v28 = vld [vmem:[%s16714_s7 + $0x328] ss:$120 sps:$4 sm:$0xff]  }
 0x561   : > { %v5270_v44 = vadd.f32 1e-06, %v5266_v32  ;;  %v14666_v32 = vld [vmem:[%s16720_s27 + $0x1a0] ss:$48 sps:$4 sm:$0xff]  }
 0x562   : > { %v5259_v55 = vpop.xlane.xlu1 %5258  ;;  %5030 = vmatpush1.bf16.msra.mxu1 %v14603_v51  ;;  %5189 = vmatpush1.bf16.msra.mxu0 %v14606_v53  ;;  %v14644_v51 = vld [vmem:[%s16720_s27 + $0x24] ss:$48 sps:$4 sm:$0xff]   ;;  %v14639_v53 = vld [vmem:[%s16714_s7 + $0x58] ss:$120 sps:$4 sm:$0xff]  }
 0x563   : > { %5031 = vmatprep.subr.bf16.mxu1 %v14611_v54  ;;  %5190 = vmatprep.subr.bf16.mxu0 %v14614_v56  ;;  %v5267_v29 = vmul.f32 0.00390625, %v5259_v55  ;;  %v14642_v54 = vld [vmem:[%s16720_s27 + $0x20] ss:$48 sps:$4 sm:$0xff]   ;;  %v14647_v56 = vld [vmem:[%s16714_s7 + $0x14c] ss:$120 sps:$4 sm:$0xff]  }
 0x565   : > { %v5271_v9 = vadd.f32 1e-06, %v5267_v29  ;;  %v14660_v29 = vld [vmem:[%s16720_s27 + $0x140] ss:$48 sps:$4 sm:$0xff]  }
 0x566   : > { %5032 = vmatpush1.bf16.msra.mxu1 %v14609_v52  ;;  %5191 = vmatpush1.bf16.msra.mxu0 %v14612_v58  ;;  %v14650_v52 = vld [vmem:[%s16720_s27 + $0x84] ss:$48 sps:$4 sm:$0xff]   ;;  %v14648_v58 = vld [vmem:[%s16720_s27 + $0x80] ss:$48 sps:$4 sm:$0xff]  }
 0x567   : > { %5033 = vmatprep.subr.bf16.mxu1 %v14617_v59  ;;  %5192 = vmatprep.subr.bf16.mxu0 %v14620_v63  ;;  %15263 = vrsqrt.f32 %v5271_v9  ;;  %v14653_v59 = vld [vmem:[%s16714_s7 + $0x23c] ss:$120 sps:$4 sm:$0xff]   ;;  %v14669_v9 = vld [vmem:[%s16714_s7 + $0x508] ss:$120 sps:$4 sm:$0xff]  }
 0x568   : > { %15265 = vrsqrt.f32 %v5270_v44  ;;  %v14656_v63 = vld [vmem:[%s16720_s27 + $0xe4] ss:$48 sps:$4 sm:$0xff]  }
 0x56a   : > { %5034 = vmatpush1.bf16.msra.mxu1 %v14615_v8  ;;  %5193 = vmatpush1.bf16.msra.mxu0 %v14618_v41  ;;  %v14654_v41 = vld [vmem:[%s16720_s27 + $0xe0] ss:$48 sps:$4 sm:$0xff]  }
 0x56b   : > { %5035 = vmatprep.subr.bf16.mxu1 %v14623_v17  ;;  %5194 = vmatprep.subr.bf16.mxu0 %v14626_v21  ;;  %v14662_v17 = vld [vmem:[%s16720_s27 + $0x144] ss:$48 sps:$4 sm:$0xff]  }
 0x56e   : > { %5036 = vmatpush1.bf16.msra.mxu1 %v14621_v7  ;;  %5195 = vmatpush1.bf16.msra.mxu0 %v14624_v31  ;;  %v14668_v7 = vld [vmem:[%s16720_s27 + $0x1a4] ss:$48 sps:$4 sm:$0xff]   ;;  %v14663_v31 = vld [vmem:[%s16714_s7 + $0x418] ss:$120 sps:$4 sm:$0xff]  }
 0x56f   : > { %5037 = vmatprep.subr.bf16.mxu1 %v14629_v36  ;;  %5196 = vmatprep.subr.bf16.mxu0 %v14632_v38  ;;  %v14671_v36 = vld [vmem:[%s16714_s7 + $0x50c] ss:$120 sps:$4 sm:$0xff]  }
 0x570   : > { %v14674_v38 = vld [vmem:[%s16720_s27 + $0x204] ss:$48 sps:$4 sm:$0xff]  }
 0x571   : > { %v17352_v55 = vpop.eup %15263 }
 0x572   : > { %5038 = vmatpush1.bf16.msra.mxu1 %v14627_v39  ;;  %5197 = vmatpush1.bf16.msra.mxu0 %v14630_v42  ;;  %v17358_v40 = vpop.eup %15265  ;;  %v17364_v8 = vmul.f32 %v17352_v55, %v17089_v20  ;;  %v14672_v39 = vld [vmem:[%s16720_s27 + $0x200] ss:$48 sps:$4 sm:$0xff]   ;;  %v14677_v42 = vld [vmem:[%s16714_s7 + $0x5fc] ss:$120 sps:$4 sm:$0xff]  }
 0x573   : > { %5039 = vmatprep.subr.bf16.mxu1 %v14635_v43  ;;  %5198 = vmatprep.subr.bf16.mxu0 %v14638_v45  ;;  %v17372_v21 = vmul.f32 %v17358_v40, %v17073_v2  ;;  %v14665_v2 = vld [vmem:[%s16714_s7 + $0x41c] ss:$120 sps:$4 sm:$0xff]  }
 0x574   : > { %19682 = vst [vmem:[#allocation50_spill] sm:$0xff] %v17364_v8  ;;  %v14680_v43 = vld [vmem:[%s16720_s27 + $0x264] ss:$48 sps:$4 sm:$0xff]  }
 0x575   : > { %19683 = vst [vmem:[#allocation51_spill] sm:$0xff] %v17372_v21  ;;  %v17376_v20 = vpack.c.bf16 %v17364_v8, %v17372_v21 }
 0x576   : > { %5040 = vmatpush1.bf16.msra.mxu1 %v14633_v46  ;;  %5199 = vmatpush1.bf16.msra.mxu0 %v14636_v48  ;;  %v14678_v46 = vld [vmem:[%s16720_s27 + $0x260] ss:$48 sps:$4 sm:$0xff]   ;;  %v14683_v48 = vld [vmem:[%s16714_s7 + $0x6ec] ss:$120 sps:$4 sm:$0xff]  }
 0x577   : > { %5115 = vmatprep.subr.bf16.mxu1 %v14641_v50  ;;  %5823 = vmatprep.subr.bf16.mxu0 %v14644_v51 }
 0x579   : > { %5042 = vmatmul.mubr.bf16.vlgmr.msra.gmra.mrb[32].mxu1 %v16963_v27  ;;  %5201 = vmatmul.mubr.bf16.vlgmr.msra.gmra.mrb[32].mxu0 %v16963_v27 }
 0x57a   : > { %5116 = vmatpush1.bf16.msra.mxu1 %v14639_v53  ;;  %5824 = vmatpush1.bf16.msra.mxu0 %v14642_v54  ;;  %v14686_v53 = vld [vmem:[%s16720_s27 + $0x2c4] ss:$48 sps:$4 sm:$0xff]  }
 0x57b   : > { %5117 = vmatprep.subr.bf16.mxu1 %v14647_v56  ;;  %5825 = vmatprep.subr.bf16.mxu0 %v14650_v52 }
 0x57c   : > { %5210 = vmatprep.mubr.bf16.mxu0 %v16990_v57  ;;  %5051 = vmatprep.mubr.bf16.mxu1 %v16990_v57 }
 0x57e   : > { %5118 = vmatpush1.bf16.msra.mxu1 %v14645_v49  ;;  %5826 = vmatpush1.bf16.msra.mxu0 %v14648_v58  ;;  %v14681_v58 = vld [vmem:[%s16714_s7 + $0x6e8] ss:$120 sps:$4 sm:$0xff]  }
 0x57f   : > { %5119 = vmatprep.subr.bf16.mxu1 %v14653_v59  ;;  %5827 = vmatprep.subr.bf16.mxu0 %v14656_v63  ;;  %v14684_v59 = vld [vmem:[%s16720_s27 + $0x2c0] ss:$48 sps:$4 sm:$0xff]   ;;  %v14689_v63 = vld [vmem:[%s16714_s7 + $0x7dc] ss:$120 sps:$4 sm:$0xff]  }
 0x581   : > { %5052 = vmatmul.mubr.bf16.gmra.mrb[36].mxu1 %v16993_v60  ;;  %5211 = vmatmul.mubr.bf16.gmra.mrb[36].mxu0 %v16993_v60 }
 0x582   : > { %5120 = vmatpush1.bf16.msra.mxu1 %v14651_v6  ;;  %5828 = vmatpush1.bf16.msra.mxu0 %v14654_v41  ;;  %v14692_v6 = vld [vmem:[%s16720_s27 + $0x324] ss:$48 sps:$4 sm:$0xff]   ;;  %v14687_v41 = vld [vmem:[%s16714_s7 + $0x7d8] ss:$120 sps:$4 sm:$0xff]  }
 0x583   : > { %5855 = vmatprep.mubr.bf16.mxu0 %v17376_v20  ;;  %5121 = vmatprep.subr.bf16.mxu1 %v14659_v16 }
 0x584   : > { %5829 = vmatprep.subr.bf16.mxu0 %v14662_v17  ;;  %5147 = vmatprep.mubr.bf16.mxu1 %v16943_v4  ;;  %v14675_v4 = vld [vmem:[%s16714_s7 + $0x5f8] ss:$120 sps:$4 sm:$0xff]  }
 0x585   : > { %v14690_v17 = vld [vmem:[%s16720_s27 + $0x320] ss:$48 sps:$4 sm:$0xff]  }
 0x586   : > { %5122 = vmatpush1.bf16.msra.mxu1 %v14657_v28  ;;  %5830 = vmatpush1.bf16.msra.mxu0 %v14660_v29 }
 0x587   : > { %5123 = vmatprep.subr.bf16.mxu1 %v14665_v2  ;;  %5831 = vmatprep.subr.bf16.mxu0 %v14668_v7  ;;  %v14695_v2 = vld [vmem:[%s16714_s7 + $0x8cc] ss:$120 sps:$4 sm:$0xff]  }
 0x588   : > { %v14698_v7 = vld [vmem:[%s16720_s27 + $0x384] ss:$48 sps:$4 sm:$0xff]  }
 0x58a   : > { %5124 = vmatpush1.bf16.msra.mxu1 %v14663_v31  ;;  %5832 = vmatpush1.bf16.msra.mxu0 %v14666_v32 }
 0x58b   : > { %5125 = vmatprep.subr.bf16.mxu1 %v14671_v36  ;;  %v17394_v44 = vpop.f32.mrb[8].mxu1  ;;  %5833 = vmatprep.subr.bf16.mxu0 %v14674_v38 }
 0x58c   : > { %v17397_v45 = vpop.f32.mrb[9].mxu1  ;;  %v17401_v50 = vpop.f32.mrb[8].mxu0 }
 0x58d   : > { %v17403_v51 = vpop.f32.mrb[10].mxu1  ;;  %v17406_v54 = vpop.f32.mrb[9].mxu0 }
 0x58e   : > { %5126 = vmatpush1.bf16.msra.mxu1 %v14669_v9  ;;  %5834 = vmatpush1.bf16.msra.mxu0 %v14672_v39  ;;  %v17408_v56 = vpop.f32.mrb[11].mxu1  ;;  %v17410_v52 = vpop.f32.mrb[10].mxu0  ;;  %v14693_v9 = vld [vmem:[%s16714_s7 + $0x8c8] ss:$120 sps:$4 sm:$0xff]  }
 0x58f   : > { %5127 = vmatprep.subr.bf16.mxu1 %v14677_v42  ;;  %5835 = vmatprep.subr.bf16.mxu0 %v14680_v43  ;;  %v17412_v49 = vpop.f32.mrb[11].mxu0  ;;  %v14696_v42 = vld [vmem:[%s16720_s27 + $0x380] ss:$48 sps:$4 sm:$0xff]   ;;  %v14701_v43 = vld [vmem:[%s16714_s7 + $0x9bc] ss:$120 sps:$4 sm:$0xff]  }
 0x592   : > { %5128 = vmatpush1.bf16.msra.mxu1 %v14675_v4  ;;  %5836 = vmatpush1.bf16.msra.mxu0 %v14678_v46  ;;  %v14704_v4 = vld [vmem:[%s16720_s27 + $0x3e4] ss:$48 sps:$4 sm:$0xff]   ;;  %v14699_v46 = vld [vmem:[%s16714_s7 + $0x9b8] ss:$120 sps:$4 sm:$0xff]  }
 0x593   : > { %5129 = vmatprep.subr.bf16.mxu1 %v14683_v48  ;;  %5837 = vmatprep.subr.bf16.mxu0 %v14686_v53  ;;  %v17419_v16 = vpop.f32.mrb[12].mxu1  ;;  %v5265_v48 = vpop.xlane.xlu1 %5264  ;;  %v14702_v53 = vld [vmem:[%s16720_s27 + $0x3e0] ss:$48 sps:$4 sm:$0xff]  }
 0x594   : > { %v17422_v28 = vpop.f32.mrb[13].mxu1  ;;  %v17424_v29 = vpop.f32.mrb[12].mxu0 }
 0x595   : > { %v17428_v31 = vpop.f32.mrb[14].mxu1  ;;  %v17430_v32 = vpop.f32.mrb[13].mxu0 }
 0x596   : > { %5130 = vmatpush1.bf16.msra.mxu1 %v14681_v58  ;;  %5838 = vmatpush1.bf16.msra.mxu0 %v14684_v59  ;;  %v17432_v36 = vpop.f32.mrb[15].mxu1  ;;  %v17434_v38 = vpop.f32.mrb[14].mxu0  ;;  %v14707_v58 = vld [vmem:[%s16714_s7 + $0xaac] ss:$120 sps:$4 sm:$0xff]  }
 0x597   : > { %5131 = vmatprep.subr.bf16.mxu1 %v14689_v63  ;;  %5839 = vmatprep.subr.bf16.mxu0 %v14692_v6  ;;  %v17437_v39 = vpop.f32.mrb[15].mxu0  ;;  %v14710_v59 = vld [vmem:[%s16720_s27 + $0x444] ss:$48 sps:$4 sm:$0xff]   ;;  %v5262_v63 = vpop.xlane.xlu0 %5261  ;;  %v5269_v6 = vmul.f32 0.00390625, %v5265_v48 }
 0x59a   : > { %5132 = vmatpush1.bf16.msra.mxu1 %v14687_v41  ;;  %5840 = vmatpush1.bf16.msra.mxu0 %v14690_v17  ;;  %v14705_v41 = vld [vmem:[%s16714_s7 + $0xaa8] ss:$120 sps:$4 sm:$0xff]  }
 0x59b   : > { %5133 = vmatprep.subr.bf16.mxu1 %v14695_v2  ;;  %5841 = vmatprep.subr.bf16.mxu0 %v14698_v7  ;;  %v14708_v17 = vld [vmem:[%s16720_s27 + $0x440] ss:$48 sps:$4 sm:$0xff]   ;;  %v5268_v2 = vmul.f32 0.00390625, %v5262_v63  ;;  %v14713_v7 = vld [vmem:[%s16714_s7 + $0xb9c] ss:$120 sps:$4 sm:$0xff]  }
 0x59c   : > { %v14723_v63 = vld [vmem:[%s16714_s7 + $0xd78] ss:$120 sps:$4 sm:$0xff]  }
 0x59d   : > { %v5272_v48 = vadd.f32 1e-06, %v5268_v2 }
 0x59e   : > { %5134 = vmatpush1.bf16.msra.mxu1 %v14693_v9  ;;  %5842 = vmatpush1.bf16.msra.mxu0 %v14696_v42  ;;  %v5273_v9 = vadd.f32 1e-06, %v5269_v6  ;;  %v14711_v42 = vld [vmem:[%s16714_s7 + $0xb98] ss:$120 sps:$4 sm:$0xff]  }
 0x59f   : > { %5135 = vmatprep.subr.bf16.mxu1 %v14701_v43  ;;  %5843 = vmatprep.subr.bf16.mxu0 %v14704_v4  ;;  %v14719_v43 = vld [vmem:[%s16714_s7 + $0xc8c] ss:$120 sps:$4 sm:$0xff]   ;;  %v14726_v6 = vld [vmem:[%s16720_s27 + $0x560] ss:$48 sps:$4 sm:$0xff]  }
 0x5a0   : > { %v14722_v4 = vld [vmem:[%s16720_s27 + $0x504] ss:$48 sps:$4 sm:$0xff]   ;;  %15267 = vrsqrt.f32 %v5273_v9  ;;  %v14737_v9 = vld [vmem:[%s16720_s27 + $0x1c] ss:$48 sps:$4 sm:$0xff]  }
 0x5a1   : > { %15269 = vrsqrt.f32 %v5272_v48 }
 0x5a2   : > { %5136 = vmatpush1.bf16.msra.mxu1 %v14699_v46  ;;  %5844 = vmatpush1.bf16.msra.mxu0 %v14702_v53  ;;  %v14717_v46 = vld [vmem:[%s16714_s7 + $0xc88] ss:$120 sps:$4 sm:$0xff]  }
 0x5a3   : > { %5137 = vmatprep.subr.bf16.mxu1 %v14707_v58  ;;  %5845 = vmatprep.subr.bf16.mxu0 %v14710_v59  ;;  %v14720_v53 = vld [vmem:[%s16720_s27 + $0x500] ss:$48 sps:$4 sm:$0xff]   ;;  %v14725_v58 = vld [vmem:[%s16714_s7 + $0xd7c] ss:$120 sps:$4 sm:$0xff]  }
 0x5a4   : > { %v14728_v59 = vld [vmem:[%s16720_s27 + $0x564] ss:$48 sps:$4 sm:$0xff]  }
 0x5a6   : > { %5138 = vmatpush1.bf16.msra.mxu1 %v14705_v41  ;;  %5846 = vmatpush1.bf16.msra.mxu0 %v14708_v17  ;;  %v14731_v41 = vld [vmem:[%s16714_s7 + $0xe6c] ss:$120 sps:$4 sm:$0xff]  }
 0x5a7   : > { %5139 = vmatprep.subr.bf16.mxu1 %v14713_v7  ;;  %5847 = vmatprep.subr.bf16.mxu0 %v14716_v26  ;;  %v14734_v17 = vld [vmem:[%s16720_s27 + $0x5c4] ss:$48 sps:$4 sm:$0xff]   ;;  %v14729_v26 = vld [vmem:[%s16714_s7 + $0xe68] ss:$120 sps:$4 sm:$0xff]   ;;  %s19822_s7 = sld [smem:[#allocation35_spill]] }
 0x5a8   : > { %v14732_v7 = vld [vmem:[%s16720_s27 + $0x5c0] ss:$48 sps:$4 sm:$0xff]  }
 0x5aa   : > { %5140 = vmatpush1.bf16.msra.mxu1 %v14711_v42  ;;  %5848 = vmatpush1.bf16.msra.mxu0 %v14714_v12  ;;  %v15268_v2 = vpop.eup %15267  ;;  %v17467_v42 = vmul.f32 %v17352_v55, %v17087_v18  ;;  %v14743_v55 = vld [vmem:[%s16720_s27 + $0xdc] ss:$48 sps:$4 sm:$0xff]  }
 0x5ab   : > { %5141 = vmatprep.subr.bf16.mxu1 %v14719_v43  ;;  %5849 = vmatprep.subr.bf16.mxu0 %v14722_v4  ;;  %v15270_v12 = vpop.eup %15269  ;;  %v14735_v43 = vld [vmem:[%s16720_s27 + $0x18] ss:$48 sps:$4 sm:$0xff]   ;;  %v17471_v48 = vmul.f32 %v15268_v2, %v17104_v35  ;;  %v14740_v4 = vld [vmem:[%s16720_s27 + $0x7c] ss:$48 sps:$4 sm:$0xff]  }
 0x5ac   : > { %19684 = vst [vmem:[#allocation52_spill] sm:$0xff] %v17467_v42  ;;  %v14738_v35 = vld [vmem:[%s16720_s27 + $0x78] ss:$48 sps:$4 sm:$0xff]  }
 0x5ad   : > { %19685 = vst [vmem:[#allocation53_spill] sm:$0xff] %v17471_v48  ;;  %p13535_p13 = scmp.ne.s32.totalorder %s19822_s7, 1 }
 0x5ae   : > { %5142 = vmatpush1.bf16.msra.mxu1 %v14717_v46  ;;  %5850 = vmatpush1.bf16.msra.mxu0 %v14720_v53  ;;  %v17476_v46 = vmul.f32 %v17358_v40, %v17071_v37  ;;  %v17479_v53 = vmul.f32 %v15270_v12, %v17084_v15  ;;  %v17495_v15 = vmul.f32 %v15268_v2, %v17102_v33  ;;  %v14741_v40 = vld [vmem:[%s16720_s27 + $0xd8] ss:$48 sps:$4 sm:$0xff]   ;;  %v14749_v33 = vld [vmem:[%s16720_s27 + $0x19c] ss:$48 sps:$4 sm:$0xff]  }
 0x5af   : > { %5143 = vmatprep.subr.bf16.mxu1 %v14725_v58  ;;  %5851 = vmatprep.subr.bf16.mxu0 %v14728_v59  ;;  %v17501_v58 = vmul.f32 %v15270_v12, %v17082_v13  ;;  %v2648_v59 = vld [vmem:[%s16749_s21 + $0x8] sm:$0xff]  ;;  %v17517_v13 = vsub.s32 6, %v17234_v47 }
 0x5b0   : > { %19686 = vst [vmem:[#allocation54_spill] sm:$0xff] %v17476_v46  ;;  %19687 = vst [vmem:[#allocation55_spill] sm:$0xff] %v17479_v53  ;;  %v17483_v18 = vpack.c.bf16 %v17467_v42, %v17476_v46  ;;  %v17489_v37 = vpack.c.bf16 %v17471_v48, %v17479_v53  ;;  %v14750_v12 = vld [vmem:[%s16720_s27 + $0x1f8] ss:$48 sps:$4 sm:$0xff]  }
 0x5b1   : > { %19688 = vst [vmem:[#allocation56_spill] sm:$0xff] %v17495_v15  ;;  %19689 = vst [vmem:[#allocation57_spill] sm:$0xff] %v17501_v58 }
 0x5b2   : > { %5144 = vmatpush1.bf16.msra.mxu1 %v14723_v63  ;;  %5852 = vmatpush1.bf16.msra.mxu0 %v14726_v6  ;;  %v17506_v63 = vpack.c.bf16 %v17495_v15, %v17501_v58  ;;  %v14744_v6 = vld [vmem:[%s16720_s27 + $0x138] ss:$48 sps:$4 sm:$0xff]   ;;  %19691 = vst [vmem:[#allocation59_spill] sm:$0xff] %v17517_v13 }
 0x5b3   : > { %5145 = vmatprep.subr.bf16.mxu1 %v14731_v41  ;;  %5853 = vmatprep.subr.bf16.mxu0 %v14734_v17  ;;  %v2668_v41 = vunpack.c.l.bf16 %v2648_v59  ;;  %v14747_v17 = vld [vmem:[%s16720_s27 + $0x198] ss:$48 sps:$4 sm:$0xff]  }
 0x5b4   : > { %v14753_v59 = vld [vmem:[%s16720_s27 + $0x258] ss:$48 sps:$4 sm:$0xff]  }
 0x5b5   : > { %v2711_v2 = vrot.slane %v2668_v41, %v17517_v13 }
 0x5b6   : > { %5146 = vmatpush1.bf16.msra.mxu1 %v14729_v26  ;;  %5854 = vmatpush1.bf16.msra.mxu0 %v14732_v7 }
 0x5b7   : > { %5770 = vmatprep.subr.bf16.mxu1 %v14737_v9  ;;  %v2821_v9 = vrot.slane %v2711_v2, %v17244_v62 }
 0x5b9   : > { %5148 = vmatmul.mubr.bf16.vlgmr.msra.gmra.mrb[40].mxu1 %v16963_v27  ;;  %5856 = vmatmul.mubr.bf16.vlgmr.msra.gmra.mrb[40].mxu0 %v17483_v18  ;;  %v14746_v27 = vld [vmem:[%s16720_s27 + $0x13c] ss:$48 sps:$4 sm:$0xff]  }
 0x5ba   : > { %5771 = vmatpush1.bf16.msra.mxu1 %v14735_v43  ;;  %5865 = vmatprep.mubr.bf16.mxu0 %v17489_v37  ;;  %v14755_v43 = vld [vmem:[%s16720_s27 + $0x25c] ss:$48 sps:$4 sm:$0xff]  }
 0x5bb   : > { %5772 = vmatprep.subr.bf16.mxu1 %v14740_v4  ;;  %5157 = vmatprep.mubr.bf16.mxu1 %v16990_v57  ;;  %v17513_v57 = vsub.s32 4, %v17234_v47 }
 0x5bd   : > { %19690 = vst [vmem:[#allocation58_spill] sm:$0xff] %v17513_v57  ;;  %v2707_v26 = vrot.slane %v2668_v41, %v17513_v57 }
 0x5be   : > { %5773 = vmatpush1.bf16.msra.mxu1 %v14738_v35 }
 0x5bf   : > { %5774 = vmatprep.subr.bf16.mxu1 %v14743_v55  ;;  %v2817_v7 = vrot.slane %v2707_v26, %v17244_v62 }
 0x5c1   : > { %5158 = vmatmul.mubr.bf16.gmra.mrb[44].mxu1 %v16993_v60  ;;  %5866 = vmatmul.mubr.bf16.gmra.mrb[44].mxu0 %v17506_v63  ;;  %v14752_v60 = vld [vmem:[%s16720_s27 + $0x1fc] ss:$48 sps:$4 sm:$0xff]  }
 0x5c2   : > { %5775 = vmatpush1.bf16.msra.mxu1 %v14741_v40  ;;  %5802 = vmatprep.mubr.bf16.mxu1 %v17376_v20 }
 0x5c3   : > { %5776 = vmatprep.subr.bf16.mxu1 %v14746_v27 }
 0x5c6   : > { %5777 = vmatpush1.bf16.msra.mxu1 %v14744_v6 }
 0x5c7   : > { %5778 = vmatprep.subr.bf16.mxu1 %v14749_v33 }
 0x5ca   : > { %5779 = vmatpush1.bf16.msra.mxu1 %v14747_v17  ;;  %v14758_v17 = vld [vmem:[%s16720_s27 + $0x2bc] ss:$48 sps:$4 sm:$0xff]  }
 0x5cb   : > { %5780 = vmatprep.subr.bf16.mxu1 %v14752_v60 }
 0x5cc   : > { %v4831_v47 = vpop.f32.mrb[16].mxu1  ;;  %v17529_v55 = vpop.f32.mrb[16].mxu0 }
 0x5cd   : > { %v17527_v4 = vadd.f32 %v4831_v47, %v2817_v7  ;;  %v4833_v35 = vpop.f32.mrb[17].mxu1  ;;  %v17534_v6 = vpop.f32.mrb[17].mxu0  ;;  %v14756_v47 = vld [vmem:[%s16720_s27 + $0x2b8] ss:$48 sps:$4 sm:$0xff]  }
 0x5ce   : > { %v17531_v40 = vadd.f32 %v4833_v35, %v2821_v9  ;;  %v4835_v27 = vpop.f32.mrb[18].mxu1  ;;  %5781 = vmatpush1.bf16.msra.mxu1 %v14750_v12  ;;  %v17539_v26 = vpop.f32.mrb[18].mxu0  ;;  %v14761_v12 = vld [vmem:[%s16720_s27 + $0x31c] ss:$48 sps:$4 sm:$0xff]  }
 0x5cf   : > { %19692 = vst [vmem:[#allocation60_spill] sm:$0xff] %v17527_v4  ;;  %v17536_v33 = vadd.f32 %v4835_v27, %v2817_v7  ;;  %v4837_v41 = vpop.f32.mrb[19].mxu1  ;;  %5782 = vmatprep.subr.bf16.mxu1 %v14755_v43  ;;  %19695 = vst [vmem:[#allocation63_spill] sm:$0xff] %v17539_v26  ;;  %v17543_v2 = vpop.f32.mrb[19].mxu0  ;;  %v14759_v43 = vld [vmem:[%s16720_s27 + $0x318] ss:$48 sps:$4 sm:$0xff]  }
 0x5d0   : > { %19693 = vst [vmem:[#allocation61_spill] sm:$0xff] %v17531_v40  ;;  %v17541_v60 = vadd.f32 %v4837_v41, %v2821_v9  ;;  %19697 = vst [vmem:[#allocation65_spill] sm:$0xff] %v17543_v2 }
 0x5d1   : > { %19694 = vst [vmem:[#allocation62_spill] sm:$0xff] %v17536_v33 }
 0x5d2   : > { %19696 = vst [vmem:[#allocation64_spill] sm:$0xff] %v17541_v60  ;;  %5783 = vmatpush1.bf16.msra.mxu1 %v14753_v59  ;;  %v14764_v59 = vld [vmem:[%s16720_s27 + $0x37c] ss:$48 sps:$4 sm:$0xff]  }
 0x5d3   : > { %5784 = vmatprep.subr.bf16.mxu1 %v14758_v17 }
 0x5d4   : > { %v4841_v35 = vpop.f32.mrb[20].mxu1  ;;  %v17549_v33 = vpop.f32.mrb[20].mxu0 }
 0x5d5   : > { %v17547_v40 = vadd.f32 %v4841_v35, %v2817_v7  ;;  %v4843_v27 = vpop.f32.mrb[21].mxu1  ;;  %19699 = vst [vmem:[#allocation67_spill] sm:$0xff] %v17549_v33  ;;  %v17554_v4 = vpop.f32.mrb[21].mxu0 }
 0x5d6   : > { %5785 = vmatpush1.bf16.msra.mxu1 %v14756_v47  ;;  %v17552_v41 = vadd.f32 %v4843_v27, %v2821_v9  ;;  %v4845_v60 = vpop.f32.mrb[22].mxu1  ;;  %19701 = vst [vmem:[#allocation69_spill] sm:$0xff] %v17554_v4  ;;  %v14762_v27 = vld [vmem:[%s16720_s27 + $0x378] ss:$48 sps:$4 sm:$0xff]  }
 0x5d7   : > { %19698 = vst [vmem:[#allocation66_spill] sm:$0xff] %v17547_v40  ;;  %5786 = vmatprep.subr.bf16.mxu1 %v14761_v12  ;;  %v17557_v17 = vadd.f32 %v4845_v60, %v2817_v7  ;;  %v4847_v35 = vpop.f32.mrb[23].mxu1  ;;  %v17559_v40 = vpop.f32.mrb[22].mxu0  ;;  %v14765_v12 = vld [vmem:[%s16720_s27 + $0x3d8] ss:$48 sps:$4 sm:$0xff]  }
 0x5d8   : > { %19700 = vst [vmem:[#allocation68_spill] sm:$0xff] %v17552_v41  ;;  %19703 = vst [vmem:[#allocation71_spill] sm:$0xff] %v17559_v40  ;;  %v17561_v5 = vadd.f32 %v4847_v35, %v2821_v9  ;;  %v17563_v47 = vpop.f32.mrb[23].mxu0  ;;  %v14767_v41 = vld [vmem:[%s16720_s27 + $0x3dc] ss:$48 sps:$4 sm:$0xff]  }
 0x5d9   : > { %19702 = vst [vmem:[#allocation70_spill] sm:$0xff] %v17557_v17  ;;  %19705 = vst [vmem:[#allocation73_spill] sm:$0xff] %v17563_v47  ;;  %v14770_v7 = vld [vmem:[%s16720_s27 + $0x43c] ss:$48 sps:$4 sm:$0xff]   ;;  %v14768_v60 = vld [vmem:[%s16720_s27 + $0x438] ss:$48 sps:$4 sm:$0xff]  }
 0x5da   : > { %19704 = vst [vmem:[#allocation72_spill] sm:$0xff] %v17561_v5  ;;  %5787 = vmatpush1.bf16.msra.mxu1 %v14759_v43  ;;  %v14773_v9 = vld [vmem:[%s16720_s27 + $0x49c] ss:$48 sps:$4 sm:$0xff]   ;;  %v14771_v35 = vld [vmem:[%s16720_s27 + $0x498] ss:$48 sps:$4 sm:$0xff]  }
 0x5db   : > { %5788 = vmatprep.subr.bf16.mxu1 %v14764_v59  ;;  %v14776_v43 = vld [vmem:[%s16720_s27 + $0x4fc] ss:$48 sps:$4 sm:$0xff]   ;;  %v14774_v59 = vld [vmem:[%s16720_s27 + $0x4f8] ss:$48 sps:$4 sm:$0xff]  }
 0x5dc   : > { %v14827_v47 = vld [vmem:[%s16720_s27 + $0x56c] ss:$48 sps:$4 sm:$0xff]   ;;  %v14828_v40 = vld [vmem:[%s16720_s27 + $0x5c8] ss:$48 sps:$4 sm:$0xff]  }
 0x5de   : > { %5789 = vmatpush1.bf16.msra.mxu1 %v14762_v27  ;;  %v14779_v27 = vld [vmem:[%s16720_s27 + $0x55c] ss:$48 sps:$4 sm:$0xff]  }
 0x5df   : > { %5790 = vmatprep.subr.bf16.mxu1 %v14767_v41  ;;  %v14777_v41 = vld [vmem:[%s16720_s27 + $0x558] ss:$48 sps:$4 sm:$0xff]  }
 0x5e2   : > { %5791 = vmatpush1.bf16.msra.mxu1 %v14765_v12  ;;  %v14782_v12 = vld [vmem:[%s16720_s27 + $0x5bc] ss:$48 sps:$4 sm:$0xff]  }
 0x5e3   : > { %5792 = vmatprep.subr.bf16.mxu1 %v14770_v7  ;;  %v14780_v7 = vld [vmem:[%s16720_s27 + $0x5b8] ss:$48 sps:$4 sm:$0xff]  }
 0x5e6   : > { %5793 = vmatpush1.bf16.msra.mxu1 %v14768_v60  ;;  %v14785_v60 = vld [vmem:[%s16720_s27 + $0x2c] ss:$48 sps:$4 sm:$0xff]  }
 0x5e7   : > { %5794 = vmatprep.subr.bf16.mxu1 %v14773_v9  ;;  %v14783_v9 = vld [vmem:[%s16720_s27 + $0x28] ss:$48 sps:$4 sm:$0xff]  }
 0x5ea   : > { %5795 = vmatpush1.bf16.msra.mxu1 %v14771_v35  ;;  %v14788_v35 = vld [vmem:[%s16720_s27 + $0x8c] ss:$48 sps:$4 sm:$0xff]  }
 0x5eb   : > { %5796 = vmatprep.subr.bf16.mxu1 %v14776_v43  ;;  %v14786_v43 = vld [vmem:[%s16720_s27 + $0x88] ss:$48 sps:$4 sm:$0xff]  }
 0x5ee   : > { %5797 = vmatpush1.bf16.msra.mxu1 %v14774_v59  ;;  %v14791_v59 = vld [vmem:[%s16720_s27 + $0xec] ss:$48 sps:$4 sm:$0xff]  }
 0x5ef   : > { %5798 = vmatprep.subr.bf16.mxu1 %v14779_v27  ;;  %v14789_v27 = vld [vmem:[%s16720_s27 + $0xe8] ss:$48 sps:$4 sm:$0xff]  }
 0x5f2   : > { %5799 = vmatpush1.bf16.msra.mxu1 %v14777_v41  ;;  %v14794_v41 = vld [vmem:[%s16720_s27 + $0x14c] ss:$48 sps:$4 sm:$0xff]  }
 0x5f3   : > { %5800 = vmatprep.subr.bf16.mxu1 %v14782_v12  ;;  %v14792_v12 = vld [vmem:[%s16720_s27 + $0x148] ss:$48 sps:$4 sm:$0xff]  }
 0x5f6   : > { %5801 = vmatpush1.bf16.msra.mxu1 %v14780_v7  ;;  %v14797_v7 = vld [vmem:[%s16720_s27 + $0x1ac] ss:$48 sps:$4 sm:$0xff]  }
 0x5f7   : > { %5876 = vmatprep.subr.bf16.mxu1 %v14785_v60  ;;  %v14795_v60 = vld [vmem:[%s16720_s27 + $0x1a8] ss:$48 sps:$4 sm:$0xff]  }
 0x5f9   : > { %5803 = vmatmul.mubr.bf16.vlgmr.msra.gmra.mrb[48].mxu1 %v17483_v18 }
 0x5fa   : > { %5812 = vmatprep.mubr.bf16.mxu1 %v17489_v37  ;;  %5877 = vmatpush1.bf16.msra.mxu1 %v14783_v9  ;;  %v14800_v9 = vld [vmem:[%s16720_s27 + $0x20c] ss:$48 sps:$4 sm:$0xff]  }
 0x5fb   : > { %5878 = vmatprep.subr.bf16.mxu1 %v14788_v35  ;;  %v14798_v35 = vld [vmem:[%s16720_s27 + $0x208] ss:$48 sps:$4 sm:$0xff]  }
 0x5fe   : > { %5879 = vmatpush1.bf16.msra.mxu1 %v14786_v43  ;;  %v14803_v43 = vld [vmem:[%s16720_s27 + $0x26c] ss:$48 sps:$4 sm:$0xff]  }
 0x5ff   : > { %5880 = vmatprep.subr.bf16.mxu1 %v14791_v59 }
 0x601   : > { %5813 = vmatmul.mubr.bf16.gmra.mrb[52].mxu1 %v17506_v63 }
 0x602   : > { %5881 = vmatpush1.bf16.msra.mxu1 %v14789_v27  ;;  %5908 = vmatprep.mubr.bf16.mxu1 %v17376_v20 }
 0x603   : > { %5882 = vmatprep.subr.bf16.mxu1 %v14794_v41  ;;  %v14801_v41 = vld [vmem:[%s16720_s27 + $0x268] ss:$48 sps:$4 sm:$0xff]  }
 0x606   : > { %5883 = vmatpush1.bf16.msra.mxu1 %v14792_v12 }
 0x607   : > { %5884 = vmatprep.subr.bf16.mxu1 %v14797_v7 }
 0x60a   : > { %5885 = vmatpush1.bf16.msra.mxu1 %v14795_v60  ;;  %v14806_v60 = vld [vmem:[%s16720_s27 + $0x2cc] ss:$48 sps:$4 sm:$0xff]  }
 0x60b   : > { %5886 = vmatprep.subr.bf16.mxu1 %v14800_v9 }
 0x60c   : > { %v17595_v59 = vpop.f32.mrb[24].mxu1  ;;  %v17599_v20 = vpop.f32.mrb[24].mxu0 }
 0x60d   : > { %v17597_v27 = vpop.f32.mrb[25].mxu1  ;;  %19706 = vst [vmem:[#allocation74_spill] sm:$0xff] %v17599_v20  ;;  %v17604_v12 = vpop.f32.mrb[25].mxu0  ;;  %v14809_v20 = vld [vmem:[%s16720_s27 + $0x32c] ss:$48 sps:$4 sm:$0xff]  }
 0x60e   : > { %v17601_v5 = vpop.f32.mrb[26].mxu1  ;;  %5887 = vmatpush1.bf16.msra.mxu1 %v14798_v35  ;;  %19707 = vst [vmem:[#allocation75_spill] sm:$0xff] %v17604_v12  ;;  %v17609_v9 = vpop.f32.mrb[26].mxu0 }
 0x60f   : > { %v17606_v7 = vpop.f32.mrb[27].mxu1  ;;  %5888 = vmatprep.subr.bf16.mxu1 %v14803_v43  ;;  %19708 = vst [vmem:[#allocation76_spill] sm:$0xff] %v17609_v9  ;;  %v17611_v17 = vpop.f32.mrb[27].mxu0  ;;  %v14807_v43 = vld [vmem:[%s16720_s27 + $0x328] ss:$48 sps:$4 sm:$0xff]  }
 0x610   : > { %19709 = vst [vmem:[#allocation77_spill] sm:$0xff] %v17611_v17 }
 0x612   : > { %5889 = vmatpush1.bf16.msra.mxu1 %v14801_v41  ;;  %v14812_v41 = vld [vmem:[%s16720_s27 + $0x38c] ss:$48 sps:$4 sm:$0xff]  }
 0x613   : > { %5890 = vmatprep.subr.bf16.mxu1 %v14806_v60 }
 0x614   : > { %v17615_v35 = vpop.f32.mrb[28].mxu1  ;;  %v17619_v12 = vpop.f32.mrb[28].mxu0 }
 0x615   : > { %v17617_v34 = vpop.f32.mrb[29].mxu1  ;;  %19710 = vst [vmem:[#allocation78_spill] sm:$0xff] %v17619_v12  ;;  %v17624_v17 = vpop.f32.mrb[29].mxu0  ;;  %v14815_v12 = vld [vmem:[%s16720_s27 + $0x3ec] ss:$48 sps:$4 sm:$0xff]  }
 0x616   : > { %5891 = vmatpush1.bf16.msra.mxu1 %v14804_v61  ;;  %v17622_v30 = vpop.f32.mrb[30].mxu1  ;;  %19712 = vst [vmem:[#allocation80_spill] sm:$0xff] %v17624_v17  ;;  %v17629_v9 = vpop.f32.mrb[30].mxu0  ;;  %v14810_v61 = vld [vmem:[%s16720_s27 + $0x388] ss:$48 sps:$4 sm:$0xff]  }
 0x617   : > { %19711 = vst [vmem:[#allocation79_spill] sm:$0xff] %v17622_v30  ;;  %5892 = vmatprep.subr.bf16.mxu1 %v14809_v20  ;;  %v17627_v60 = vpop.f32.mrb[31].mxu1  ;;  %19714 = vst [vmem:[#allocation82_spill] sm:$0xff] %v17629_v9  ;;  %v17631_v25 = vpop.f32.mrb[31].mxu0  ;;  %v14818_v20 = vld [vmem:[%s16720_s27 + $0x44c] ss:$48 sps:$4 sm:$0xff]  }
 0x618   : > { %19713 = vst [vmem:[#allocation81_spill] sm:$0xff] %v17627_v60  ;;  %19715 = vst [vmem:[#allocation83_spill] sm:$0xff] %v17631_v25  ;;  %v14816_v17 = vld [vmem:[%s16720_s27 + $0x448] ss:$48 sps:$4 sm:$0xff]   ;;  %v14821_v9 = vld [vmem:[%s16720_s27 + $0x4ac] ss:$48 sps:$4 sm:$0xff]  }
 0x619   : > { %v14819_v25 = vld [vmem:[%s16720_s27 + $0x4a8] ss:$48 sps:$4 sm:$0xff]  }
 0x61a   : > { %5893 = vmatpush1.bf16.msra.mxu1 %v14807_v43  ;;  %v14824_v43 = vld [vmem:[%s16720_s27 + $0x50c] ss:$48 sps:$4 sm:$0xff]  }
 0x61b   : > { %5894 = vmatprep.subr.bf16.mxu1 %v14812_v41  ;;  %v14822_v41 = vld [vmem:[%s16720_s27 + $0x508] ss:$48 sps:$4 sm:$0xff]  }
 0x61e   : > { %5895 = vmatpush1.bf16.msra.mxu1 %v14810_v61  ;;  %v14825_v61 = vld [vmem:[%s16720_s27 + $0x568] ss:$48 sps:$4 sm:$0xff]  }
 0x61f   : > { %5896 = vmatprep.subr.bf16.mxu1 %v14815_v12  ;;  %v14830_v12 = vld [vmem:[%s16720_s27 + $0x5cc] ss:$48 sps:$4 sm:$0xff]  }
 0x622   : > { %5897 = vmatpush1.bf16.msra.mxu1 %v14813_v22  ;;  %v2650_v22 = vld [vmem:[%s16749_s21 + $0x18] sm:$0xff] }
 0x623   : > { %5898 = vmatprep.subr.bf16.mxu1 %v14818_v20 }
 0x626   : > { %5899 = vmatpush1.bf16.msra.mxu1 %v14816_v17  ;;  %v2672_v17 = vunpack.c.l.bf16 %v2650_v22 }
 0x627   : > { %5900 = vmatprep.subr.bf16.mxu1 %v14821_v9 }
 0x628   : > { %v2767_v9 = vrot.slane %v2672_v17, %v17249_v0 }
 0x62a   : > { %5901 = vmatpush1.bf16.msra.mxu1 %v14819_v25  ;;  %v2763_v25 = vrot.slane %v2672_v17, %v17244_v62 }
 0x62b   : > { %5902 = vmatprep.subr.bf16.mxu1 %v14824_v43 }
 0x62c   : > { %v2873_v20 = vrot.slane %v2763_v25, %v17244_v62 }
 0x62e   : > { %5903 = vmatpush1.bf16.msra.mxu1 %v14822_v41 }
 0x62f   : > { %5904 = vmatprep.subr.bf16.mxu1 %v14827_v47  ;;  %v2877_v47 = vrot.slane %v2767_v9, %v17244_v62 }
 0x632   : > { %5905 = vmatpush1.bf16.msra.mxu1 %v14825_v61 }
 0x633   : > { %5906 = vmatprep.subr.bf16.mxu1 %v14830_v12 }
 0x636   : > { %5907 = vmatpush1.bf16.msra.mxu1 %v14828_v40 }
 0x639   : > { %5909 = vmatmul.mubr.bf16.vlgmr.msra.gmra.mrb[56].mxu1 %v17483_v18 }
 0x63a   : > { %5918 = vmatprep.mubr.bf16.mxu1 %v17489_v37 }
 0x641   : > { %5919 = vmatmul.mubr.bf16.gmra.mrb[60].mxu1 %v17506_v63 }
 0x64c   : > { %v17654_v43 = vpop.f32.mrb[32].mxu1  ;;  %v5202_v40 = vpop.f32.mrb[32].mxu0 }
 0x64d   : > { %19716 = vst [vmem:[#allocation84_spill] sm:$0xff] %v17654_v43  ;;  %v17656_v41 = vpop.f32.mrb[33].mxu1  ;;  %v17660_v37 = vadd.f32 %v5202_v40, %v2873_v20  ;;  %v5204_v61 = vpop.f32.mrb[33].mxu0 }
 0x64e   : > { %19717 = vst [vmem:[#allocation85_spill] sm:$0xff] %v17656_v41  ;;  %v17658_v18 = vpop.f32.mrb[34].mxu1  ;;  %v17664_v12 = vadd.f32 %v5204_v61, %v2877_v47  ;;  %v5206_v22 = vpop.f32.mrb[34].mxu0 }
 0x64f   : > { %19718 = vst [vmem:[#allocation86_spill] sm:$0xff] %v17658_v18  ;;  %19719 = vst [vmem:[#allocation87_spill] sm:$0xff] %v17660_v37  ;;  %v17662_v63 = vpop.f32.mrb[35].mxu1  ;;  %v17666_v17 = vadd.f32 %v5206_v22, %v2873_v20  ;;  %v5208_v25 = vpop.f32.mrb[35].mxu0 }
 0x650   : > { %19720 = vst [vmem:[#allocation88_spill] sm:$0xff] %v17662_v63  ;;  %19721 = vst [vmem:[#allocation89_spill] sm:$0xff] %v17664_v12  ;;  %v17668_v4 = vadd.f32 %v5208_v25, %v2877_v47 }
 0x651   : > { %19722 = vst [vmem:[#allocation90_spill] sm:$0xff] %v17666_v17 }
 0x652   : > { %19723 = vst [vmem:[#allocation91_spill] sm:$0xff] %v17668_v4 }
 0x654   : > { %v17670_v9 = vpop.f32.mrb[36].mxu1  ;;  %v5212_v41 = vpop.f32.mrb[36].mxu0 }
 0x655   : > { %19724 = vst [vmem:[#allocation92_spill] sm:$0xff] %v17670_v9  ;;  %v17672_v43 = vpop.f32.mrb[37].mxu1  ;;  %v17676_v40 = vadd.f32 %v5212_v41, %v2873_v20  ;;  %v5214_v37 = vpop.f32.mrb[37].mxu0 }
 0x656   : > { %19725 = vst [vmem:[#allocation93_spill] sm:$0xff] %v17672_v43  ;;  %v17674_v33 = vpop.f32.mrb[38].mxu1  ;;  %v17680_v61 = vadd.f32 %v5214_v37, %v2877_v47  ;;  %v5216_v12 = vpop.f32.mrb[38].mxu0 }
 0x657   : > { %19726 = vst [vmem:[#allocation94_spill] sm:$0xff] %v17674_v33  ;;  %19727 = vst [vmem:[#allocation95_spill] sm:$0xff] %v17676_v40  ;;  %v17678_v18 = vpop.f32.mrb[39].mxu1  ;;  %v17682_v22 = vadd.f32 %v5216_v12, %v2873_v20  ;;  %v5218_v17 = vpop.f32.mrb[39].mxu0 }
 0x658   : > { %19728 = vst [vmem:[#allocation96_spill] sm:$0xff] %v17678_v18  ;;  %19729 = vst [vmem:[#allocation97_spill] sm:$0xff] %v17680_v61  ;;  %v17684_v25 = vadd.f32 %v5218_v17, %v2877_v47 }
 0x659   : > { %19730 = vst [vmem:[#allocation98_spill] sm:$0xff] %v17682_v22 }
 0x65a   : > { %19731 = vst [vmem:[#allocation99_spill] sm:$0xff] %v17684_v25 }
 0x68c   : > { %v17686_v4 = vpop.f32.mrb[40].mxu1  ;;  %v5857_v9 = vpop.f32.mrb[40].mxu0 }
 0x68d   : > { %19732 = vst [vmem:[#allocation100_spill] sm:$0xff] %v17686_v4  ;;  %v17688_v43 = vpop.f32.mrb[41].mxu1  ;;  %v5859_v63 = vpop.f32.mrb[41].mxu0 }
 0x68e   : > { %19733 = vst [vmem:[#allocation101_spill] sm:$0xff] %v17688_v43  ;;  %v17690_v33 = vpop.f32.mrb[42].mxu1  ;;  %v5861_v41 = vpop.f32.mrb[42].mxu0 }
 0x68f   : > { %19734 = vst [vmem:[#allocation102_spill] sm:$0xff] %v17690_v33  ;;  %v17692_v40 = vpop.f32.mrb[43].mxu1  ;;  %v5933_v18 = vpack.c.bf16 %v5861_v41, %v5857_v9  ;;  %v5863_v37 = vpop.f32.mrb[43].mxu0 }
 0x690   : > { %19735 = vst [vmem:[#allocation103_spill] sm:$0xff] %v17692_v40  ;;  %v5934_v61 = vpack.c.bf16 %v5863_v37, %v5859_v63 }
 0x692   : > { %5937 = vmatprep.subr.bf16.mxu1 %v5934_v61 }
 0x693   : > { %5938 = vmatpush1.bf16.xpose.msra.mxu1 %v5933_v18 }
 0x694   : > { %v17694_v20 = vpop.f32.mrb[44].mxu1  ;;  %v5867_v47 = vpop.f32.mrb[44].mxu0 }
 0x695   : > { %19736 = vst [vmem:[#allocation104_spill] sm:$0xff] %v17694_v20  ;;  %v17696_v12 = vpop.f32.mrb[45].mxu1  ;;  %v5869_v17 = vpop.f32.mrb[45].mxu0 }
 0x696   : > { %19737 = vst [vmem:[#allocation105_spill] sm:$0xff] %v17696_v12  ;;  %v17698_v22 = vpop.f32.mrb[46].mxu1  ;;  %v5871_v25 = vpop.f32.mrb[46].mxu0 }
 0x697   : > { %19738 = vst [vmem:[#allocation106_spill] sm:$0xff] %v17698_v22  ;;  %v17700_v43 = vpop.f32.mrb[47].mxu1  ;;  %v5935_v33 = vpack.c.bf16 %v5871_v25, %v5867_v47  ;;  %v5873_v4 = vpop.f32.mrb[47].mxu0 }
 0x698   : > { %19739 = vst [vmem:[#allocation107_spill] sm:$0xff] %v17700_v43  ;;  %v5936_v60 = vpack.c.bf16 %v5873_v4, %v5869_v17 }
 0x69a   : > { %5939 = vmatprep.subr.bf16.mxu1 %v5936_v60 }
 0x69b   : > { %5940 = vmatpush1.bf16.xpose.msra.mxu1 %v5935_v33 }
 0x6cc   : > { %v5804_v9 = vpop.f32.mrb[48].mxu1 }
 0x6cd   : > { %v5806_v63 = vpop.f32.mrb[49].mxu1 }
 0x6ce   : > { %v5808_v61 = vpop.f32.mrb[50].mxu1 }
 0x6cf   : > { %v5929_v18 = vpack.c.bf16 %v5808_v61, %v5804_v9  ;;  %v5810_v41 = vpop.f32.mrb[51].mxu1 }
 0x6d0   : > { %v5930_v37 = vpack.c.bf16 %v5810_v41, %v5806_v63 }
 0x6d2   : > { %5969 = vmatprep.mubr.bf16.mxu1 %v5930_v37 }
 0x6d3   : > { %5970 = vmatmul.mubr.bf16.vlgmr.msra.gmra.mrb[64].mxu1 %v5929_v18 }
 0x6d4   : > { %v5814_v12 = vpop.f32.mrb[52].mxu1 }
 0x6d5   : > { %v5816_v20 = vpop.f32.mrb[53].mxu1 }
 0x6d6   : > { %v5818_v40 = vpop.f32.mrb[54].mxu1 }
 0x6d7   : > { %v5931_v22 = vpack.c.bf16 %v5818_v40, %v5814_v12  ;;  %v5820_v30 = vpop.f32.mrb[55].mxu1  ;;  %v2655_v12 = vld [vmem:[#allocation4 + $0x8] sm:$0xff] }
 0x6d8   : > { %v5932_v2 = vpack.c.bf16 %v5820_v30, %v5816_v20  ;;  %v2654_v30 = vld [vmem:[#allocation4] sm:$0xff] }
 0x6da   : > { %5977 = vmatprep.mubr.bf16.mxu1 %v5932_v2 }
 0x6db   : > { %5978 = vmatmul.mubr.bf16.gmra.mrb[68].mxu1 %v5931_v22 }
 0x70c   : > { %v5910_v25 = vpop.f32.mrb[56].mxu1 }
 0x70d   : > { %v5912_v4 = vpop.f32.mrb[57].mxu1 }
 0x70e   : > { %v5914_v60 = vpop.f32.mrb[58].mxu1 }
 0x70f   : > { %v6041_v33 = vpack.c.bf16 %v5914_v60, %v5910_v25  ;;  %v5916_v47 = vpop.f32.mrb[59].mxu1 }
 0x710   : > { %v6042_v17 = vpack.c.bf16 %v5916_v47, %v5912_v4 }
 0x712   : > { %6051 = vmatprep.subr.bf16.mxu1 %v6042_v17 }
 0x713   : > { %6052 = vmatpush1.bf16.msra.mxu1 %v6041_v33 }
 0x714   : > { %v5920_v9 = vpop.f32.mrb[60].mxu1 }
 0x715   : > { %v5922_v63 = vpop.f32.mrb[61].mxu1 }
 0x716   : > { %v5924_v61 = vpop.f32.mrb[62].mxu1 }
 0x717   : > { %v6043_v18 = vpack.c.bf16 %v5924_v61, %v5920_v9  ;;  %v5926_v41 = vpop.f32.mrb[63].mxu1 }
 0x718   : > { %v6044_v37 = vpack.c.bf16 %v5926_v41, %v5922_v63  ;;  %v2656_v63 = vld [vmem:[#allocation4 + $0x10] sm:$0xff] }
 0x71a   : > { %6053 = vmatprep.subr.bf16.mxu1 %v6044_v37  ;;  %v2657_v37 = vld [vmem:[#allocation4 + $0x18] sm:$0xff] }
 0x71b   : > { %6054 = vmatpush1.bf16.msra.mxu1 %v6043_v18 }
 0x7a6   : > { %v5971_v40 = vpop.f32.mrb[64].mxu1 }
 0x7a7   : > { %v5986_v2 = vmul.f32 0.0625, %v5971_v40  ;;  %v5973_v22 = vpop.f32.mrb[65].mxu1 }
 0x7a8   : > { %v5974_v20 = vpop.f32.mrb[66].mxu1 }
 0x7a9   : > { %v5987_v25 = vmul.f32 0.0625, %v5974_v20  ;;  %v5976_v60 = vpop.f32.mrb[67].mxu1  ;;  %v5990_v4 = vadd.f32 %v5986_v2, %v2654_v30 }
 0x7ab   : > { %v5995_v33 = vsel %vm5994_vm0, %v5990_v4, -inf  ;;  %v5991_v47 = vadd.f32 %v5987_v25, %v2655_v12 }
 0x7ac   : > { %5996 = vmax.xlane.f32.xlu0 %v5995_v33 }
 0x7ad   : > { %v5998_v17 = vsel %vm5994_vm0, %v5991_v47, -inf }
 0x7ae   : > { %5999 = vmax.xlane.f32.xlu1 %v5998_v17  ;;  %v5979_v9 = vpop.f32.mrb[68].mxu1 }
 0x7af   : > { %v5988_v61 = vmul.f32 0.0625, %v5979_v9  ;;  %v5981_v18 = vpop.f32.mrb[69].mxu1 }
 0x7b0   : > { %v5982_v41 = vpop.f32.mrb[70].mxu1 }
 0x7b1   : > { %v5989_v40 = vmul.f32 0.0625, %v5982_v41  ;;  %v5984_v22 = vpop.f32.mrb[71].mxu1  ;;  %v5992_v43 = vadd.f32 %v5988_v61, %v2656_v63 }
 0x7b3   : > { %v6001_v20 = vsel %vm5994_vm0, %v5992_v43, -inf  ;;  %v5993_v60 = vadd.f32 %v5989_v40, %v2657_v37 }
 0x7b4   : > { %6002 = vmax.xlane.f32.xlu0 %v6001_v20 }
 0x7b5   : > { %v6004_v30 = vsel %vm5994_vm0, %v5993_v60, -inf }
 0x7b6   : > { %6005 = vmax.xlane.f32.xlu1 %v6004_v30 }
 0x839   : > { %v5997_v2 = vpop.xlane.xlu0 %5996 }
 0x83a   : > { %v6007_v12 = vsub.f32 %v5990_v4, %v5997_v2  ;;  %v6451_v2 = vadd.f32 %v17364_v8, %v17467_v42 }
 0x83b   : > { %v6000_v25 = vpop.xlane.xlu1 %5999 }
 0x83c   : > { %v6011_v33 = vmul.f32 1.442695, %v6007_v12  ;;  %v6008_v17 = vsub.f32 %v5991_v47, %v6000_v25  ;;  %v6454_v12 = vadd.f32 %v17479_v53, %v17501_v58  ;;  %v6457_v25 = vadd.f32 %v17471_v48, %v17495_v15 }
 0x83e   : > { %15271 = vpow2.f32 %v6011_v33  ;;  %v6013_v9 = vmul.f32 1.442695, %v6008_v17  ;;  %v19561_v33 = vmov 0   ;;  %v14833_v17 = vld [vmem:[%s16720_s27 + $0x4] ss:$48 sps:$4 sm:$0xff]  }
 0x83f   : > { %6083 = vmatprep.mubr.bf16.mxu1 %v19561_v33  ;;  %7083 = vmatprep.subr.bf16.mxu1 %v14833_v17  ;;  %v14831_v17 = vld [vmem:[%s16720_s27] ss:$48 sps:$4 sm:$0xff]  }
 0x840   : > { %15273 = vpow2.f32 %v6013_v9 }
 0x841   : > { %v6003_v18 = vpop.xlane.xlu0 %6002 }
 0x842   : > { %v6009_v26 = vsub.f32 %v5992_v43, %v6003_v18 }
 0x843   : > { %v6006_v41 = vpop.xlane.xlu1 %6005 }
 0x844   : > { %v6015_v22 = vmul.f32 1.442695, %v6009_v26  ;;  %v6010_v63 = vsub.f32 %v5993_v60, %v6006_v41  ;;  %v6448_v60 = vadd.f32 %v17372_v21, %v17476_v46 }
 0x846   : > { %15275 = vpow2.f32 %v6015_v22  ;;  %v6017_v61 = vmul.f32 1.442695, %v6010_v63 }
 0x848   : > { %v15272_v37 = vpop.eup %15271  ;;  %15277 = vpow2.f32 %v6017_v61 }
 0x849   : > { %v6019_v40 = vsel %vm5994_vm0, %v15272_v37, 0.0 }
 0x84a   : > { %v15274_v20 = vpop.eup %15273  ;;  %6020 = vadd.xlane.f32.xlu0 %v6019_v40 }
 0x84b   : > { %v6022_v4 = vsel %vm5994_vm0, %v15274_v20, 0.0 }
 0x84c   : > { %6023 = vadd.xlane.f32.xlu1 %v6022_v4 }
 0x850   : > { %v17708_v47 = vpop.eup %15275 }
 0x851   : > { %v6025_v43 = vsel %vm5994_vm0, %v17708_v47, 0.0 }
 0x852   : > { %v17712_v30 = vpop.eup %15277  ;;  %6026 = vadd.xlane.f32.xlu0 %v6025_v43 }
 0x853   : > { %v6028_v26 = vsel %vm5994_vm0, %v17712_v30, 0.0 }
 0x854   : > { %6029 = vadd.xlane.f32.xlu1 %v6028_v26 }
 0x856   : > { %6449 = vadd.xlane.f32.xlu0 %v6448_v60 }
 0x858   : > { %6452 = vadd.xlane.f32.xlu1 %v6451_v2 }
 0x85a   : > { %6455 = vadd.xlane.f32.xlu0 %v6454_v12 }
 0x85c   : > { %6458 = vadd.xlane.f32.xlu1 %v6457_v25 }
 0x8d7   : > { %v6021_v9 = vpop.xlane.xlu0 %6020 }
 0x8d8   : > { %15279 = vrcp.f32 %v6021_v9 }
 0x8d9   : > { %v6024_v18 = vpop.xlane.xlu1 %6023 }
 0x8da   : > { %15281 = vrcp.f32 %v6024_v18 }
 0x8df   : > { %v6027_v41 = vpop.xlane.xlu0 %6026 }
 0x8e0   : > { %15283 = vrcp.f32 %v6027_v41  ;;  %v14836_v41 = vld [vmem:[%s16720_s27 + $0x64] ss:$48 sps:$4 sm:$0xff]  }
 0x8e1   : > { %v6030_v22 = vpop.xlane.xlu1 %6029 }
 0x8e2   : > { %v15280_v63 = vpop.eup %15279  ;;  %15285 = vrcp.f32 %v6030_v22 }
 0x8e3   : > { %v6450_v61 = vpop.xlane.xlu0 %6449  ;;  %v6032_v43 = vmul.f32 %v15280_v63, %v15272_v37 }
 0x8e4   : > { %v15282_v40 = vpop.eup %15281  ;;  %v6460_v4 = vmul.f32 0.00390625, %v6450_v61 }
 0x8e5   : > { %v6034_v26 = vmul.f32 %v15282_v40, %v15274_v20  ;;  %v6453_v60 = vpop.xlane.xlu1 %6452 }
 0x8e6   : > { %v17727_v2 = vsub.f32 %v17476_v46, %v6460_v4  ;;  %v17730_v12 = vsub.f32 %v17372_v21, %v6460_v4  ;;  %v6461_v25 = vmul.f32 0.00390625, %v6453_v60 }
 0x8e7   : > { %v6039_v9 = vpack.c.bf16 %v6034_v26, %v6032_v43  ;;  %v6456_v18 = vpop.xlane.xlu0 %6455 }
 0x8e8   : > { %v17735_v22 = vsub.f32 %v17467_v42, %v6461_v25  ;;  %v17738_v61 = vsub.f32 %v17364_v8, %v6461_v25  ;;  %v6462_v37 = vmul.f32 0.00390625, %v6456_v18  ;;  %v6472_v20 = vmul.f32 %v17727_v2, %v17727_v2  ;;  %v14834_v18 = vld [vmem:[%s16720_s27 + $0x60] ss:$48 sps:$4 sm:$0xff]   ;;  %v14839_v42 = vld [vmem:[%s16720_s27 + $0xc4] ss:$48 sps:$4 sm:$0xff]  }
 0x8e9   : > { %12985 = vmatmul.mubr.msk.bf16.vlgmr.msra.gmra.mrb[72].mxu1 %vm5994_vm0, %v6039_v9  ;;  %v6459_v63 = vpop.xlane.xlu1 %6458  ;;  %v6473_v40 = vmul.f32 %v17730_v12, %v17730_v12 }
 0x8ea   : > { %v15284_v4 = vpop.eup %15283  ;;  %v17746_v43 = vsub.f32 %v17501_v58, %v6462_v37  ;;  %v17749_v26 = vsub.f32 %v17479_v53, %v6462_v37  ;;  %v6463_v60 = vmul.f32 0.00390625, %v6459_v63  ;;  %v6474_v25 = vmul.f32 %v17735_v22, %v17735_v22  ;;  %6093 = vmatprep.mubr.bf16.mxu1 %v19561_v33  ;;  %7084 = vmatpush1.bf16.msra.mxu1 %v14831_v17 }
 0x8eb   : > { %v6480_v9 = vadd.f32 %v6473_v40, %v6472_v20  ;;  %v6475_v8 = vmul.f32 %v17738_v61, %v17738_v61  ;;  %7085 = vmatprep.subr.bf16.mxu1 %v14836_v41  ;;  %v6036_v41 = vmul.f32 %v15284_v4, %v17708_v47  ;;  %v14843_v4 = vld [vmem:[%s16720_s27 + $0x180] ss:$48 sps:$4 sm:$0xff]  }
 0x8ec   : > { %v15286_v58 = vpop.eup %15285  ;;  %v17759_v21 = vsub.f32 %v17495_v15, %v6463_v60  ;;  %v17762_v37 = vsub.f32 %v17471_v48, %v6463_v60  ;;  %v6476_v63 = vmul.f32 %v17746_v43, %v17746_v43  ;;  %v6477_v17 = vmul.f32 %v17749_v26, %v17749_v26  ;;  %v14837_v48 = vld [vmem:[%s16720_s27 + $0xc0] ss:$48 sps:$4 sm:$0xff]  }
 0x8ed   : > { %6481 = vadd.xlane.f32.xlu0 %v6480_v9  ;;  %v6483_v20 = vadd.f32 %v6475_v8, %v6474_v25  ;;  %v6038_v40 = vmul.f32 %v15286_v58, %v17712_v30  ;;  %v14842_v8 = vld [vmem:[%s16720_s27 + $0x124] ss:$48 sps:$4 sm:$0xff]   ;;  %v14840_v58 = vld [vmem:[%s16720_s27 + $0x120] ss:$48 sps:$4 sm:$0xff]  }
 0x8ee   : > { %v6486_v33 = vadd.f32 %v6477_v17, %v6476_v63  ;;  %v6478_v15 = vmul.f32 %v17759_v21, %v17759_v21  ;;  %v6479_v60 = vmul.f32 %v17762_v37, %v17762_v37  ;;  %7086 = vmatpush1.bf16.msra.mxu1 %v14834_v18  ;;  %v14845_v30 = vld [vmem:[%s16720_s27 + $0x184] ss:$48 sps:$4 sm:$0xff]   ;;  %v14852_v18 = vld [vmem:[%s16720_s27 + $0x2a0] ss:$48 sps:$4 sm:$0xff]   ;;  %v14869_v63 = vld [vmem:[%s16722_s0 + $0xc] ss:$16 sps:$4 sm:$0xff]  }
 0x8ef   : > { %6484 = vadd.xlane.f32.xlu1 %v6483_v20  ;;  %v6040_v9 = vpack.c.bf16 %v6038_v40, %v6036_v41  ;;  %7087 = vmatprep.subr.bf16.mxu1 %v14839_v42  ;;  %v14848_v42 = vld [vmem:[%s16720_s27 + $0x1e4] ss:$48 sps:$4 sm:$0xff]   ;;  %v14867_v20 = vld [vmem:[%s16722_s0 + $0x8] ss:$16 sps:$4 sm:$0xff]   ;;  %v14855_v41 = vld [vmem:[%s16720_s27 + $0x300] ss:$48 sps:$4 sm:$0xff]  }
 0x8f0   : > { %v6489_v47 = vadd.f32 %v6479_v60, %v6478_v15  ;;  %v14846_v15 = vld [vmem:[%s16720_s27 + $0x1e0] ss:$48 sps:$4 sm:$0xff]   ;;  %v14854_v25 = vld [vmem:[%s16720_s27 + $0x2a4] ss:$48 sps:$4 sm:$0xff]   ;;  %6291 = vmatprep.subr.bf16.mxu0 %v14869_v63  ;;  %v14875_v40 = vld [vmem:[%s16722_s0 + $0x2c] ss:$16 sps:$4 sm:$0xff]  }
 0x8f1   : > { %6487 = vadd.xlane.f32.xlu0 %v6486_v33  ;;  %12986 = vmatmul.mubr.msk.bf16.gmra.mrb[76].mxu1 %vm5994_vm0, %v6040_v9  ;;  %v14851_v33 = vld [vmem:[%s16720_s27 + $0x244] ss:$48 sps:$4 sm:$0xff]   ;;  %v14873_v9 = vld [vmem:[%s16722_s0 + $0x28] ss:$16 sps:$4 sm:$0xff]  }
 0x8f2   : > { %7088 = vmatpush1.bf16.msra.mxu1 %v14837_v48  ;;  %v14849_v48 = vld [vmem:[%s16720_s27 + $0x240] ss:$48 sps:$4 sm:$0xff]   ;;  %v14857_v17 = vld [vmem:[%s16720_s27 + $0x304] ss:$48 sps:$4 sm:$0xff]   ;;  %6292 = vmatpush1.bf16.msra.mxu0 %v14867_v20  ;;  %v14897_v20 = vld [vmem:[%s16722_s0 + $0xa8] ss:$16 sps:$4 sm:$0xff]  }
 0x8f3   : > { %6490 = vadd.xlane.f32.xlu1 %v6489_v47  ;;  %7089 = vmatprep.subr.bf16.mxu1 %v14842_v8  ;;  %v14860_v60 = vld [vmem:[%s16720_s27 + $0x364] ss:$48 sps:$4 sm:$0xff]   ;;  %v14858_v8 = vld [vmem:[%s16720_s27 + $0x360] ss:$48 sps:$4 sm:$0xff]   ;;  %v14881_v47 = vld [vmem:[%s16722_s0 + $0x4c] ss:$16 sps:$4 sm:$0xff]  }
 0x8f4   : > { %6293 = vmatprep.subr.bf16.mxu0 %v14875_v40  ;;  %v14872_v63 = vld [vmem:[%s16720_s27 + $0x484] ss:$48 sps:$4 sm:$0xff]  }
 0x8f5   : > { %v14878_v40 = vld [vmem:[%s16720_s27 + $0x4e4] ss:$48 sps:$4 sm:$0xff]  }
 0x8f6   : > { %7090 = vmatpush1.bf16.msra.mxu1 %v14840_v58  ;;  %6294 = vmatpush1.bf16.msra.mxu0 %v14873_v9  ;;  %v14863_v58 = vld [vmem:[%s16720_s27 + $0x3c4] ss:$48 sps:$4 sm:$0xff]   ;;  %v14903_v9 = vld [vmem:[%s16722_s0 + $0xc8] ss:$16 sps:$4 sm:$0xff]  }
 0x8f7   : > { %7091 = vmatprep.subr.bf16.mxu1 %v14845_v30  ;;  %v14879_v30 = vld [vmem:[%s16722_s0 + $0x48] ss:$16 sps:$4 sm:$0xff]   ;;  %6295 = vmatprep.subr.bf16.mxu0 %v14881_v47  ;;  %v14884_v47 = vld [vmem:[%s16720_s27 + $0x544] ss:$48 sps:$4 sm:$0xff]  }
 0x8fa   : > { %7092 = vmatpush1.bf16.msra.mxu1 %v14843_v4  ;;  %6296 = vmatpush1.bf16.msra.mxu0 %v14879_v30  ;;  %v14861_v4 = vld [vmem:[%s16720_s27 + $0x3c0] ss:$48 sps:$4 sm:$0xff]   ;;  %v14909_v30 = vld [vmem:[%s16722_s0 + $0xe8] ss:$16 sps:$4 sm:$0xff]  }
 0x8fb   : > { %7093 = vmatprep.subr.bf16.mxu1 %v14848_v42  ;;  %v14885_v42 = vld [vmem:[%s16722_s0 + $0x68] ss:$16 sps:$4 sm:$0xff]  }
 0x8fe   : > { %7094 = vmatpush1.bf16.msra.mxu1 %v14846_v15  ;;  %v14887_v15 = vld [vmem:[%s16722_s0 + $0x6c] ss:$16 sps:$4 sm:$0xff]  }
 0x8ff   : > { %7095 = vmatprep.subr.bf16.mxu1 %v14851_v33  ;;  %v14866_v33 = vld [vmem:[%s16720_s27 + $0x424] ss:$48 sps:$4 sm:$0xff]   ;;  %6297 = vmatprep.subr.bf16.mxu0 %v14887_v15  ;;  %v14888_v15 = vld [vmem:[%s16720_s27 + $0x5a0] ss:$48 sps:$4 sm:$0xff]  }
 0x900   : > { %6298 = vmatpush1.bf16.msra.mxu0 %v14885_v42  ;;  %v14890_v42 = vld [vmem:[%s16720_s27 + $0x5a4] ss:$48 sps:$4 sm:$0xff]  }
 0x902   : > { %7096 = vmatpush1.bf16.msra.mxu1 %v14849_v48  ;;  %v14893_v48 = vld [vmem:[%s16722_s0 + $0x8c] ss:$16 sps:$4 sm:$0xff]  }
 0x903   : > { %7097 = vmatprep.subr.bf16.mxu1 %v14854_v25  ;;  %v14891_v25 = vld [vmem:[%s16722_s0 + $0x88] ss:$16 sps:$4 sm:$0xff]   ;;  %6299 = vmatprep.subr.bf16.mxu0 %v14893_v48  ;;  %v14917_v48 = vld [vmem:[%s16722_s0 + $0x10c] ss:$16 sps:$4 sm:$0xff]  }
 0x904   : > { %6300 = vmatpush1.bf16.msra.mxu0 %v14891_v25  ;;  %v14896_v25 = vld [vmem:[%s16720_s27 + $0x14] ss:$48 sps:$4 sm:$0xff]  }
 0x906   : > { %7098 = vmatpush1.bf16.msra.mxu1 %v14852_v18  ;;  %v14864_v18 = vld [vmem:[%s16720_s27 + $0x420] ss:$48 sps:$4 sm:$0xff]  }
 0x907   : > { %7099 = vmatprep.subr.bf16.mxu1 %v14857_v17  ;;  %v14870_v17 = vld [vmem:[%s16720_s27 + $0x480] ss:$48 sps:$4 sm:$0xff]  }
 0x90a   : > { %7100 = vmatpush1.bf16.msra.mxu1 %v14855_v41  ;;  %v14899_v41 = vld [vmem:[%s16722_s0 + $0xac] ss:$16 sps:$4 sm:$0xff]  }
 0x90b   : > { %7101 = vmatprep.subr.bf16.mxu1 %v14860_v60  ;;  %6301 = vmatprep.subr.bf16.mxu0 %v14899_v41  ;;  %v14876_v60 = vld [vmem:[%s16720_s27 + $0x4e0] ss:$48 sps:$4 sm:$0xff]   ;;  %v14933_v41 = vld [vmem:[%s16722_s0 + $0x168] ss:$16 sps:$4 sm:$0xff]  }
 0x90c   : > { %6302 = vmatpush1.bf16.msra.mxu0 %v14897_v20  ;;  %v14929_v20 = vld [vmem:[%s16722_s0 + $0x14c] ss:$16 sps:$4 sm:$0xff]  }
 0x90e   : > { %7102 = vmatpush1.bf16.msra.mxu1 %v14858_v8  ;;  %v14905_v8 = vld [vmem:[%s16722_s0 + $0xcc] ss:$16 sps:$4 sm:$0xff]  }
 0x90f   : > { %7103 = vmatprep.subr.bf16.mxu1 %v14863_v58  ;;  %6303 = vmatprep.subr.bf16.mxu0 %v14905_v8  ;;  %v14882_v58 = vld [vmem:[%s16720_s27 + $0x540] ss:$48 sps:$4 sm:$0xff]   ;;  %v14945_v8 = vld [vmem:[%s16722_s0 + $0x1a8] ss:$16 sps:$4 sm:$0xff]  }
 0x910   : > { %6304 = vmatpush1.bf16.msra.mxu0 %v14903_v9  ;;  %v14941_v9 = vld [vmem:[%s16722_s0 + $0x18c] ss:$16 sps:$4 sm:$0xff]  }
 0x912   : > { %7104 = vmatpush1.bf16.msra.mxu1 %v14861_v4  ;;  %v14911_v4 = vld [vmem:[%s16722_s0 + $0xec] ss:$16 sps:$4 sm:$0xff]  }
 0x913   : > { %7105 = vmatprep.subr.bf16.mxu1 %v14866_v33  ;;  %6305 = vmatprep.subr.bf16.mxu0 %v14911_v4  ;;  %v14915_v33 = vld [vmem:[%s16722_s0 + $0x108] ss:$16 sps:$4 sm:$0xff]   ;;  %v14959_v4 = vld [vmem:[%s16722_s0 + $0x1ec] ss:$16 sps:$4 sm:$0xff]  }
 0x914   : > { %6306 = vmatpush1.bf16.msra.mxu0 %v14909_v30  ;;  %v14953_v30 = vld [vmem:[%s16722_s0 + $0x1cc] ss:$16 sps:$4 sm:$0xff]  }
 0x915   : > { %6307 = vmatprep.subr.bf16.mxu0 %v14917_v48 }
 0x916   : > { %7106 = vmatpush1.bf16.msra.mxu1 %v14864_v18  ;;  %v14921_v18 = vld [vmem:[%s16722_s0 + $0x128] ss:$16 sps:$4 sm:$0xff]  }
 0x917   : > { %7107 = vmatprep.subr.bf16.mxu1 %v14872_v63  ;;  %v14923_v63 = vld [vmem:[%s16722_s0 + $0x12c] ss:$16 sps:$4 sm:$0xff]  }
 0x918   : > { %6308 = vmatpush1.bf16.msra.mxu0 %v14915_v33 }
 0x919   : > { %6309 = vmatprep.subr.bf16.mxu0 %v14923_v63 }
 0x91a   : > { %7108 = vmatpush1.bf16.msra.mxu1 %v14870_v17  ;;  %v14927_v17 = vld [vmem:[%s16722_s0 + $0x148] ss:$16 sps:$4 sm:$0xff]  }
 0x91b   : > { %7109 = vmatprep.subr.bf16.mxu1 %v14878_v40  ;;  %v14935_v40 = vld [vmem:[%s16722_s0 + $0x16c] ss:$16 sps:$4 sm:$0xff]  }
 0x91c   : > { %6310 = vmatpush1.bf16.msra.mxu0 %v14921_v18 }
 0x91d   : > { %6311 = vmatprep.subr.bf16.mxu0 %v14929_v20 }
 0x91e   : > { %7110 = vmatpush1.bf16.msra.mxu1 %v14876_v60  ;;  %v14939_v60 = vld [vmem:[%s16722_s0 + $0x188] ss:$16 sps:$4 sm:$0xff]  }
 0x91f   : > { %7111 = vmatprep.subr.bf16.mxu1 %v14884_v47  ;;  %v14947_v47 = vld [vmem:[%s16722_s0 + $0x1ac] ss:$16 sps:$4 sm:$0xff]  }
 0x920   : > { %6312 = vmatpush1.bf16.msra.mxu0 %v14927_v17 }
 0x921   : > { %6313 = vmatprep.subr.bf16.mxu0 %v14935_v40 }
 0x922   : > { %7112 = vmatpush1.bf16.msra.mxu1 %v14882_v58  ;;  %v14951_v58 = vld [vmem:[%s16722_s0 + $0x1c8] ss:$16 sps:$4 sm:$0xff]  }
 0x923   : > { %7113 = vmatprep.subr.bf16.mxu1 %v14890_v42  ;;  %v14957_v42 = vld [vmem:[%s16722_s0 + $0x1e8] ss:$16 sps:$4 sm:$0xff]  }
 0x924   : > { %6314 = vmatpush1.bf16.msra.mxu0 %v14933_v41 }
 0x925   : > { %6315 = vmatprep.subr.bf16.mxu0 %v14941_v9 }
 0x926   : > { %7114 = vmatpush1.bf16.msra.mxu1 %v14888_v15  ;;  %v14965_v15 = vld [vmem:[%s16720_s27 + $0xc] ss:$48 sps:$4 sm:$0xff]  }
 0x927   : > { %7189 = vmatprep.subr.bf16.mxu1 %v14896_v25  ;;  %v15415_v25 = vld [vmem:[%s16749_s21] sm:$0xff] }
 0x928   : > { %6316 = vmatpush1.bf16.msra.mxu0 %v14939_v60  ;;  %v2666_v18 = vunpack.c.l.bf16 %v15415_v25 }
 0x929   : > { %6317 = vmatprep.subr.bf16.mxu0 %v14947_v47 }
 0x92a   : > { %v2691_v41 = vrot.slane %v2666_v18, %v17513_v57  ;;  %v2695_v40 = vrot.slane %v2666_v18, %v17517_v13  ;;  %v2683_v47 = vrot.slane %v2666_v18, %v17244_v62 }
 0x92c   : > { %6318 = vmatpush1.bf16.msra.mxu0 %v14945_v8  ;;  %v2793_v25 = vrot.slane %v2683_v47, %v17244_v62 }
 0x92d   : > { %6319 = vmatprep.subr.bf16.mxu0 %v14953_v30 }
 0x930   : > { %6320 = vmatpush1.bf16.msra.mxu0 %v14951_v58  ;;  %v2687_v58 = vrot.slane %v2666_v18, %v17249_v0 }
 0x931   : > { %6321 = vmatprep.subr.bf16.mxu0 %v14959_v4 }
 0x934   : > { %6322 = vmatpush1.bf16.msra.mxu0 %v14957_v42 }
 0x935   : > { %7136 = vmatprep.subr.bf16.mxu0 %v14965_v15  ;;  %v2801_v15 = vrot.slane %v2691_v41, %v17244_v62 }
 0x937   : > { %v4730_v18 = vadd.f32 %v17403_v51, %v2801_v15 }
 0x97a   : > { %v6482_v33 = vpop.xlane.xlu0 %6481 }
 0x97b   : > { %v6492_v48 = vmul.f32 0.00390625, %v6482_v33  ;;  %v2805_v33 = vrot.slane %v2695_v40, %v17244_v62 }
 0x97c   : > { %v6485_v63 = vpop.xlane.xlu1 %6484 }
 0x97d   : > { %v6496_v17 = vadd.f32 1e-06, %v6492_v48  ;;  %v6493_v20 = vmul.f32 0.00390625, %v6485_v63  ;;  %v2797_v63 = vrot.slane %v2687_v58, %v17244_v62  ;;  %v4736_v58 = vadd.f32 %v17419_v16, %v2801_v15 }
 0x97e   : > { %v6488_v60 = vpop.xlane.xlu0 %6487 }
 0x97f   : > { %15287 = vrsqrt.f32 %v6496_v17  ;;  %v6497_v9 = vadd.f32 1e-06, %v6493_v20  ;;  %v6494_v8 = vmul.f32 0.00390625, %v6488_v60  ;;  %v4726_v17 = vadd.f32 %v17394_v44, %v2801_v15 }
 0x980   : > { %v6491_v30 = vpop.xlane.xlu1 %6490  ;;  %v4728_v20 = vadd.f32 %v17397_v45, %v2805_v33  ;;  %v4732_v60 = vadd.f32 %v17408_v56, %v2805_v33  ;;  %v4675_v41 = vadd.f32 %v17269_v14, %v2797_v63  ;;  %v4679_v47 = vadd.f32 %v17278_v24, %v2797_v63 }
 0x981   : > { %15289 = vrsqrt.f32 %v6497_v9  ;;  %v6498_v4 = vadd.f32 1e-06, %v6494_v8  ;;  %v6495_v42 = vmul.f32 0.00390625, %v6491_v30  ;;  %v4673_v9 = vadd.f32 %v17266_v11, %v2793_v25 }
 0x982   : > { %v4677_v8 = vadd.f32 %v17272_v19, %v2793_v25  ;;  %v4738_v30 = vadd.f32 %v17422_v28, %v2805_v33  ;;  %v6512_v44 = vadd.f32 1.0, %v4726_v17  ;;  %v6515_v11 = vadd.f32 1.0, %v4732_v60 }
 0x983   : > { %15291 = vrsqrt.f32 %v6498_v4  ;;  %v6499_v48 = vadd.f32 1e-06, %v6495_v42  ;;  %v6513_v4 = vadd.f32 1.0, %v4728_v20  ;;  %v6514_v42 = vadd.f32 1.0, %v4730_v18 }
 0x984   : > { %v4740_v14 = vadd.f32 %v17428_v31, %v2801_v15  ;;  %v4683_v17 = vadd.f32 %v17313_v1, %v2793_v25  ;;  %v6516_v20 = vadd.f32 1.0, %v4736_v58  ;;  %v4687_v58 = vadd.f32 %v17322_v10, %v2793_v25 }
 0x985   : > { %15293 = vrsqrt.f32 %v6499_v48  ;;  %v4742_v48 = vadd.f32 %v17432_v36, %v2805_v33 }
 0x986   : > { %v6518_v36 = vadd.f32 1.0, %v4740_v14  ;;  %v14912_v14 = vld [vmem:[%s16720_s27 + $0x130] ss:$48 sps:$4 sm:$0xff]  }
 0x987   : > { %v6519_v33 = vadd.f32 1.0, %v4742_v48  ;;  %v14920_v48 = vld [vmem:[%s16720_s27 + $0x194] ss:$48 sps:$4 sm:$0xff]  }
 0x989   : > { %v15288_v40 = vpop.eup %15287 }
 0x98a   : > { %v6504_v45 = vmul.f32 %v15288_v40, %v17727_v2  ;;  %v6505_v51 = vmul.f32 %v15288_v40, %v17730_v12  ;;  %v4685_v2 = vadd.f32 %v17315_v3, %v2797_v63  ;;  %v6517_v12 = vadd.f32 1.0, %v4738_v30 }
 0x98b   : > { %v15290_v56 = vpop.eup %15289 }
 0x98c   : > { %v6520_v19 = vmul.f32 %v6512_v44, %v6504_v45  ;;  %v6506_v24 = vmul.f32 %v15290_v56, %v17735_v22  ;;  %v6507_v16 = vmul.f32 %v15290_v56, %v17738_v61  ;;  %v6521_v53 = vmul.f32 %v6513_v4, %v6505_v51  ;;  %v14894_v45 = vld [vmem:[%s16720_s27 + $0x10] ss:$48 sps:$4 sm:$0xff]   ;;  %v14908_v56 = vld [vmem:[%s16720_s27 + $0xd4] ss:$48 sps:$4 sm:$0xff]  }
 0x98d   : > { %v15292_v28 = vpop.eup %15291 }
 0x98e   : > { %v6522_v40 = vmul.f32 %v6514_v42, %v6506_v24  ;;  %v6523_v18 = vmul.f32 %v6515_v11, %v6507_v16  ;;  %v6529_v60 = vadd.f32 %v6521_v53, %v4675_v41  ;;  %v6528_v31 = vadd.f32 %v6520_v19, %v4673_v9  ;;  %v14906_v42 = vld [vmem:[%s16720_s27 + $0xd0] ss:$48 sps:$4 sm:$0xff]   ;;  %v14914_v11 = vld [vmem:[%s16720_s27 + $0x134] ss:$48 sps:$4 sm:$0xff]  }
 0x98f   : > { %v15294_v15 = vpop.eup %15293  ;;  %v6509_v22 = vmul.f32 %v15292_v28, %v17749_v26  ;;  %v6508_v61 = vmul.f32 %v15292_v28, %v17746_v43  ;;  %v4689_v53 = vadd.f32 %v17329_v23, %v2797_v63  ;;  %v14900_v63 = vld [vmem:[%s16720_s27 + $0x70] ss:$48 sps:$4 sm:$0xff]   ;;  %v14926_v24 = vld [vmem:[%s16720_s27 + $0x1f4] ss:$48 sps:$4 sm:$0xff]  }
 0x990   : > { %v6531_v44 = vadd.f32 %v6523_v18, %v4679_v47  ;;  %v6530_v4 = vadd.f32 %v6522_v40, %v4677_v8  ;;  %v6511_v1 = vmul.f32 %v15294_v15, %v17762_v37  ;;  %v6510_v3 = vmul.f32 %v15294_v15, %v17759_v21  ;;  %v14902_v37 = vld [vmem:[%s16720_s27 + $0x74] ss:$48 sps:$4 sm:$0xff]   ;;  %v14918_v19 = vld [vmem:[%s16720_s27 + $0x190] ss:$48 sps:$4 sm:$0xff]  }
 0x991   : > { %v6525_v41 = vmul.f32 %v6517_v12, %v6509_v22  ;;  %v6524_v9 = vmul.f32 %v6516_v20, %v6508_v61  ;;  %v14924_v16 = vld [vmem:[%s16720_s27 + $0x1f0] ss:$48 sps:$4 sm:$0xff]   ;;  %v14932_v28 = vld [vmem:[%s16720_s27 + $0x254] ss:$48 sps:$4 sm:$0xff]  }
 0x992   : > { %v17869_v30 = vpack.c.bf16 %v6531_v44, %v6529_v60  ;;  %v17872_v26 = vpack.c.bf16 %v6530_v4, %v6528_v31  ;;  %v6527_v43 = vmul.f32 %v6519_v33, %v6511_v1  ;;  %v6526_v47 = vmul.f32 %v6518_v36, %v6510_v3  ;;  %v14936_v20 = vld [vmem:[%s16720_s27 + $0x2b0] ss:$48 sps:$4 sm:$0xff]   ;;  %v14944_v12 = vld [vmem:[%s16720_s27 + $0x314] ss:$48 sps:$4 sm:$0xff]  }
 0x993   : > { %v6533_v8 = vadd.f32 %v6525_v41, %v4685_v2  ;;  %v6532_v21 = vadd.f32 %v6524_v9, %v4683_v17  ;;  %v14930_v17 = vld [vmem:[%s16720_s27 + $0x250] ss:$48 sps:$4 sm:$0xff]   ;;  %v14938_v2 = vld [vmem:[%s16720_s27 + $0x2b4] ss:$48 sps:$4 sm:$0xff]   ;;  %v14971_v41 = vld [vmem:[%s16720_s27 + $0x6c] ss:$48 sps:$4 sm:$0xff]  }
 0x994   : > { %7115 = vmatprep.mubr.bf16.mxu1 %v17869_v30  ;;  %v6535_v10 = vadd.f32 %v6527_v43, %v4689_v53  ;;  %v6534_v23 = vadd.f32 %v6526_v47, %v4687_v58  ;;  %v14942_v40 = vld [vmem:[%s16720_s27 + $0x310] ss:$48 sps:$4 sm:$0xff]   ;;  %v14950_v18 = vld [vmem:[%s16720_s27 + $0x374] ss:$48 sps:$4 sm:$0xff]   ;;  %v14963_v53 = vld [vmem:[%s16720_s27 + $0x8] ss:$48 sps:$4 sm:$0xff]  }
 0x995   : > { %7116 = vmatmul.mubr.bf16.vlgmr.msra.gmra.mrb[80].mxu1 %v17872_v26  ;;  %v14948_v60 = vld [vmem:[%s16720_s27 + $0x370] ss:$48 sps:$4 sm:$0xff]   ;;  %v14956_v31 = vld [vmem:[%s16720_s27 + $0x3d4] ss:$48 sps:$4 sm:$0xff]   ;;  %v14969_v47 = vld [vmem:[%s16720_s27 + $0x68] ss:$48 sps:$4 sm:$0xff]  }
 0x996   : > { %7190 = vmatpush1.bf16.msra.mxu1 %v14894_v45  ;;  %v17877_v25 = vpack.c.bf16 %v6535_v10, %v6533_v8  ;;  %v17880_v51 = vpack.c.bf16 %v6534_v23, %v6532_v21  ;;  %v14954_v15 = vld [vmem:[%s16720_s27 + $0x3d0] ss:$48 sps:$4 sm:$0xff]   ;;  %v14962_v36 = vld [vmem:[%s16720_s27 + $0x434] ss:$48 sps:$4 sm:$0xff]  }
 0x997   : > { %7191 = vmatprep.subr.bf16.mxu1 %v14902_v37  ;;  %v14960_v44 = vld [vmem:[%s16720_s27 + $0x430] ss:$48 sps:$4 sm:$0xff]   ;;  %v14968_v3 = vld [vmem:[%s16720_s27 + $0x494] ss:$48 sps:$4 sm:$0xff]   ;;  %v14977_v37 = vld [vmem:[%s16720_s27 + $0xcc] ss:$48 sps:$4 sm:$0xff]  }
 0x998   : > { %7125 = vmatprep.mubr.bf16.mxu1 %v17877_v25  ;;  %v14966_v9 = vld [vmem:[%s16720_s27 + $0x490] ss:$48 sps:$4 sm:$0xff]   ;;  %v14974_v45 = vld [vmem:[%s16720_s27 + $0x4f4] ss:$48 sps:$4 sm:$0xff]  }
 0x999   : > { %v14972_v10 = vld [vmem:[%s16720_s27 + $0x4f0] ss:$48 sps:$4 sm:$0xff]  }
 0x99a   : > { %7192 = vmatpush1.bf16.msra.mxu1 %v14900_v63 }
 0x99b   : > { %7193 = vmatprep.subr.bf16.mxu1 %v14908_v56  ;;  %v14980_v56 = vld [vmem:[%s16720_s27 + $0x554] ss:$48 sps:$4 sm:$0xff]  }
 0x99d   : > { %7126 = vmatmul.mubr.bf16.gmra.mrb[84].mxu1 %v17880_v51 }
 0x99e   : > { %7194 = vmatpush1.bf16.msra.mxu1 %v14906_v42  ;;  %7221 = vmatprep.mubr.bf16.mxu1 %v17869_v30 }
 0x99f   : > { %7195 = vmatprep.subr.bf16.mxu1 %v14914_v11  ;;  %v14975_v11 = vld [vmem:[%s16720_s27 + $0xc8] ss:$48 sps:$4 sm:$0xff]  }
 0x9a2   : > { %7196 = vmatpush1.bf16.msra.mxu1 %v14912_v14  ;;  %v14983_v14 = vld [vmem:[%s16720_s27 + $0x12c] ss:$48 sps:$4 sm:$0xff]  }
 0x9a3   : > { %7197 = vmatprep.subr.bf16.mxu1 %v14920_v48  ;;  %v14978_v48 = vld [vmem:[%s16720_s27 + $0x550] ss:$48 sps:$4 sm:$0xff]  }
 0x9a6   : > { %7198 = vmatpush1.bf16.msra.mxu1 %v14918_v19  ;;  %v14986_v19 = vld [vmem:[%s16720_s27 + $0x5b4] ss:$48 sps:$4 sm:$0xff]  }
 0x9a7   : > { %7199 = vmatprep.subr.bf16.mxu1 %v14926_v24  ;;  %v14981_v24 = vld [vmem:[%s16720_s27 + $0x128] ss:$48 sps:$4 sm:$0xff]  }
 0x9aa   : > { %7200 = vmatpush1.bf16.msra.mxu1 %v14924_v16  ;;  %v14989_v16 = vld [vmem:[%s16720_s27 + $0x18c] ss:$48 sps:$4 sm:$0xff]  }
 0x9ab   : > { %7201 = vmatprep.subr.bf16.mxu1 %v14932_v28  ;;  %v14984_v28 = vld [vmem:[%s16720_s27 + $0x5b0] ss:$48 sps:$4 sm:$0xff]  }
 0x9ae   : > { %7202 = vmatpush1.bf16.msra.mxu1 %v14930_v17  ;;  %v14987_v17 = vld [vmem:[%s16720_s27 + $0x188] ss:$48 sps:$4 sm:$0xff]  }
 0x9af   : > { %7203 = vmatprep.subr.bf16.mxu1 %v14938_v2  ;;  %v14992_v2 = vld [vmem:[%s16720_s27 + $0x1ec] ss:$48 sps:$4 sm:$0xff]  }
 0x9b2   : > { %7204 = vmatpush1.bf16.msra.mxu1 %v14936_v20  ;;  %v14990_v20 = vld [vmem:[%s16720_s27 + $0x1e8] ss:$48 sps:$4 sm:$0xff]  }
 0x9b3   : > { %7205 = vmatprep.subr.bf16.mxu1 %v14944_v12  ;;  %v14993_v12 = vld [vmem:[%s16720_s27 + $0x248] ss:$48 sps:$4 sm:$0xff]  }
 0x9b6   : > { %7206 = vmatpush1.bf16.msra.mxu1 %v14942_v40  ;;  %v14998_v40 = vld [vmem:[%s16720_s27 + $0x2ac] ss:$48 sps:$4 sm:$0xff]  }
 0x9b7   : > { %7207 = vmatprep.subr.bf16.mxu1 %v14950_v18  ;;  %v14996_v18 = vld [vmem:[%s16720_s27 + $0x2a8] ss:$48 sps:$4 sm:$0xff]  }
 0x9ba   : > { %7208 = vmatpush1.bf16.msra.mxu1 %v14948_v60  ;;  %v15001_v60 = vld [vmem:[%s16720_s27 + $0x30c] ss:$48 sps:$4 sm:$0xff]  }
 0x9bb   : > { %7209 = vmatprep.subr.bf16.mxu1 %v14956_v31  ;;  %v14999_v31 = vld [vmem:[%s16720_s27 + $0x308] ss:$48 sps:$4 sm:$0xff]  }
 0x9bc   : > { %v6085_v33 = vpop.f32.mrb[72].mxu1 }
 0x9bd   : > { %v6087_v22 = vpop.f32.mrb[73].mxu1 }
 0x9be   : > { %7210 = vmatpush1.bf16.msra.mxu1 %v14954_v15  ;;  %v6089_v61 = vpop.f32.mrb[74].mxu1  ;;  %v15004_v15 = vld [vmem:[%s16720_s27 + $0x36c] ss:$48 sps:$4 sm:$0xff]  }
 0x9bf   : > { %v6104_v4 = vpack.c.bf16 %v6089_v61, %v6085_v33  ;;  %v6091_v1 = vpop.f32.mrb[75].mxu1  ;;  %7211 = vmatprep.subr.bf16.mxu1 %v14962_v36  ;;  %v15002_v36 = vld [vmem:[%s16720_s27 + $0x368] ss:$48 sps:$4 sm:$0xff]   ;;  %v15007_v33 = vld [vmem:[%s16720_s27 + $0x3cc] ss:$48 sps:$4 sm:$0xff]  }
 0x9c0   : > { %v6105_v58 = vpack.c.bf16 %v6091_v1, %v6087_v22  ;;  %v15005_v22 = vld [vmem:[%s16720_s27 + $0x3c8] ss:$48 sps:$4 sm:$0xff]   ;;  %v15010_v61 = vld [vmem:[%s16720_s27 + $0x42c] ss:$48 sps:$4 sm:$0xff]  }
 0x9c1   : > { %v15011_v1 = vld [vmem:[%s16720_s27 + $0x488] ss:$48 sps:$4 sm:$0xff]  }
 0x9c2   : > { %7212 = vmatpush1.bf16.msra.mxu1 %v14960_v44  ;;  %6323 = vmatprep.mubr.bf16.mxu0 %v6105_v58  ;;  %v15008_v44 = vld [vmem:[%s16720_s27 + $0x428] ss:$48 sps:$4 sm:$0xff]  }
 0x9c3   : > { %6324 = vmatmul.mubr.bf16.vlgmr.msra.gmra.mrb[48].mxu0 %v6104_v4  ;;  %7213 = vmatprep.subr.bf16.mxu1 %v14968_v3  ;;  %v15013_v4 = vld [vmem:[%s16720_s27 + $0x48c] ss:$48 sps:$4 sm:$0xff]   ;;  %v15014_v58 = vld [vmem:[%s16720_s27 + $0x4e8] ss:$48 sps:$4 sm:$0xff]  }
 0x9c4   : > { %7137 = vmatpush1.bf16.msra.mxu0 %v14963_v53  ;;  %v6095_v43 = vpop.f32.mrb[76].mxu1  ;;  %v15016_v3 = vld [vmem:[%s16720_s27 + $0x4ec] ss:$48 sps:$4 sm:$0xff]  }
 0x9c5   : > { %v6097_v8 = vpop.f32.mrb[77].mxu1  ;;  %7138 = vmatprep.subr.bf16.mxu0 %v14971_v41  ;;  %v15019_v53 = vld [vmem:[%s16720_s27 + $0x54c] ss:$48 sps:$4 sm:$0xff]   ;;  %v15017_v41 = vld [vmem:[%s16720_s27 + $0x548] ss:$48 sps:$4 sm:$0xff]  }
 0x9c6   : > { %7214 = vmatpush1.bf16.msra.mxu1 %v14966_v9  ;;  %v6099_v21 = vpop.f32.mrb[78].mxu1  ;;  %v15022_v9 = vld [vmem:[%s16720_s27 + $0x5ac] ss:$48 sps:$4 sm:$0xff]  }
 0x9c7   : > { %v6106_v23 = vpack.c.bf16 %v6099_v21, %v6095_v43  ;;  %v6101_v63 = vpop.f32.mrb[79].mxu1  ;;  %7215 = vmatprep.subr.bf16.mxu1 %v14974_v45  ;;  %v15020_v45 = vld [vmem:[%s16720_s27 + $0x5a8] ss:$48 sps:$4 sm:$0xff]   ;;  %v17952_v43 = vld [vmem:[%s16749_s21 + $0x20] sm:$0xff] }
 0x9c8   : > { %v6107_v42 = vpack.c.bf16 %v6101_v63, %v6097_v8  ;;  %7139 = vmatpush1.bf16.msra.mxu0 %v14969_v47  ;;  %v6109_v47 = vrot.slane %v17952_v43, 6  ;;  %v15416_v8 = vld [vmem:[%s16749_s21 + $0x18] sm:$0xff] }
 0x9c9   : > { %7140 = vmatprep.subr.bf16.mxu0 %v14977_v37  ;;  %v6541_v37 = vrot.slane %v15416_v8, 6 }
 0x9ca   : > { %7216 = vmatpush1.bf16.msra.mxu1 %v14972_v10  ;;  %6333 = vmatprep.mubr.bf16.mxu0 %v6107_v42 }
 0x9cb   : > { %6334 = vmatmul.mubr.bf16.gmra.mrb[52].mxu0 %v6106_v23  ;;  %7217 = vmatprep.subr.bf16.mxu1 %v14980_v56  ;;  %v6543_v21 = vsel %vm6542_vm1, %v6541_v37, %v6109_v47 }
 0x9cc   : > { %7141 = vmatpush1.bf16.msra.mxu0 %v14975_v11  ;;  %7168 = vmatprep.mubr.bf16.mxu0 %v17869_v30  ;;  %v14995_v30 = vld [vmem:[%s16720_s27 + $0x24c] ss:$48 sps:$4 sm:$0xff]   ;;  %v17958_v10 = vunpack.c.l.bf16 %v6543_v21 }
 0x9cd   : > { %7142 = vmatprep.subr.bf16.mxu0 %v14983_v14 }
 0x9ce   : > { %7218 = vmatpush1.bf16.msra.mxu1 %v14978_v48  ;;  %v6552_v23 = vrot.slane %v17958_v10, %v17244_v62 }
 0x9cf   : > { %7219 = vmatprep.subr.bf16.mxu1 %v14986_v19 }
 0x9d0   : > { %7143 = vmatpush1.bf16.msra.mxu0 %v14981_v24 }
 0x9d1   : > { %7144 = vmatprep.subr.bf16.mxu0 %v14989_v16 }
 0x9d2   : > { %7220 = vmatpush1.bf16.msra.mxu1 %v14984_v28 }
 0x9d4   : > { %7145 = vmatpush1.bf16.msra.mxu0 %v14987_v17 }
 0x9d5   : > { %7222 = vmatmul.mubr.bf16.vlgmr.msra.gmra.mrb[88].mxu1 %v17872_v26  ;;  %7146 = vmatprep.subr.bf16.mxu0 %v14992_v2 }
 0x9d6   : > { %7231 = vmatprep.mubr.bf16.mxu1 %v17877_v25 }
 0x9d8   : > { %7147 = vmatpush1.bf16.msra.mxu0 %v14990_v20 }
 0x9d9   : > { %7148 = vmatprep.subr.bf16.mxu0 %v14995_v30 }
 0x9dc   : > { %7149 = vmatpush1.bf16.msra.mxu0 %v14993_v12 }
 0x9dd   : > { %7232 = vmatmul.mubr.bf16.gmra.mrb[92].mxu1 %v17880_v51  ;;  %7150 = vmatprep.subr.bf16.mxu0 %v14998_v40 }
 0x9e0   : > { %7151 = vmatpush1.bf16.msra.mxu0 %v14996_v18 }
 0x9e1   : > { %7152 = vmatprep.subr.bf16.mxu0 %v15001_v60 }
 0x9e4   : > { %7153 = vmatpush1.bf16.msra.mxu0 %v14999_v31 }
 0x9e5   : > { %7154 = vmatprep.subr.bf16.mxu0 %v15004_v15 }
 0x9e8   : > { %7155 = vmatpush1.bf16.msra.mxu0 %v15002_v36 }
 0x9e9   : > { %7156 = vmatprep.subr.bf16.mxu0 %v15007_v33 }
 0x9ec   : > { %7157 = vmatpush1.bf16.msra.mxu0 %v15005_v22 }
 0x9ed   : > { %7158 = vmatprep.subr.bf16.mxu0 %v15010_v61 }
 0x9f0   : > { %7159 = vmatpush1.bf16.msra.mxu0 %v15008_v44 }
 0x9f1   : > { %7160 = vmatprep.subr.bf16.mxu0 %v15013_v4 }
 0x9f4   : > { %7161 = vmatpush1.bf16.msra.mxu0 %v15011_v1  ;;  %v6546_v1 = vunpack.c.h.bf16 %v6543_v21 }
 0x9f5   : > { %7162 = vmatprep.subr.bf16.mxu0 %v15016_v3 }
 0x9f8   : > { %7163 = vmatpush1.bf16.msra.mxu0 %v15014_v58 }
 0x9f9   : > { %7164 = vmatprep.subr.bf16.mxu0 %v15019_v53  ;;  %v6568_v53 = vrot.slane %v6546_v1, %v17244_v62 }
 0x9fc   : > { %7165 = vmatpush1.bf16.msra.mxu0 %v15017_v41  ;;  %v6572_v41 = vrot.slane %v6546_v1, %v17249_v0  ;;  %v6564_v1 = vrot.slane %v17958_v10, %v17517_v13 }
 0x9fd   : > { %7166 = vmatprep.subr.bf16.mxu0 %v15022_v9  ;;  %v6598_v9 = vrot.slane %v6568_v53, %v17244_v62 }
 0x9fe   : > { %v6602_v8 = vrot.slane %v6572_v41, %v17244_v62 }
 0xa00   : > { %7167 = vmatpush1.bf16.msra.mxu0 %v15020_v45 }
 0xa03   : > { %7169 = vmatmul.mubr.bf16.vlgmr.msra.gmra.mrb[56].mxu0 %v17872_v26  ;;  %v6556_v26 = vrot.slane %v17958_v10, %v17249_v0 }
 0xa04   : > { %7178 = vmatprep.mubr.bf16.mxu0 %v17877_v25  ;;  %v6582_v25 = vrot.slane %v6552_v23, %v17244_v62 }
 0xa05   : > { %v6586_v63 = vrot.slane %v6556_v26, %v17244_v62 }
 0xa0b   : > { %7179 = vmatmul.mubr.bf16.gmra.mrb[60].mxu0 %v17880_v51 }
 0xa68   : > { %v7117_v51 = vpop.f32.mrb[80].mxu1 }
 0xa69   : > { %v7119_v56 = vpop.f32.mrb[81].mxu1  ;;  %v7118_v11 = vadd.f32 %v7117_v51, %v6582_v25 }
 0xa6a   : > { %v7121_v42 = vpop.f32.mrb[82].mxu1  ;;  %v7120_v19 = vadd.f32 %v7119_v56, %v6586_v63 }
 0xa6b   : > { %v7122_v14 = vadd.f32 %v7121_v42, %v6582_v25  ;;  %v7123_v48 = vpop.f32.mrb[83].mxu1 }
 0xa6c   : > { %v7124_v24 = vadd.f32 %v7123_v48, %v6586_v63 }
 0xa6d   : > { %v7242_v16 = vpack.c.bf16 %v7122_v14, %v7118_v11 }
 0xa6e   : > { %v7408_v28 = vpack.c.bf16 %v7124_v24, %v7120_v19 }
 0xa6f   : > { %13689 = vmatprep.mubr.bf16.mxu1 %v7242_v16 }
 0xa70   : > { %v7127_v17 = vpop.f32.mrb[84].mxu1  ;;  %13705 = vmatprep.mubr.bf16.mxu0 %v7408_v28 }
 0xa71   : > { %v17966_v2 = vadd.f32 %v7127_v17, %v6582_v25  ;;  %v7129_v20 = vpop.f32.mrb[85].mxu1 }
 0xa72   : > { %v17968_v30 = vadd.f32 %v7129_v20, %v6586_v63  ;;  %v7131_v12 = vpop.f32.mrb[86].mxu1 }
 0xa73   : > { %v17970_v40 = vadd.f32 %v7131_v12, %v6582_v25  ;;  %v7133_v18 = vpop.f32.mrb[87].mxu1 }
 0xa74   : > { %v17972_v60 = vadd.f32 %v7133_v18, %v6586_v63  ;;  %v6560_v18 = vrot.slane %v17958_v10, %v17513_v57 }
 0xa75   : > { %v7243_v31 = vpack.c.bf16 %v17970_v40, %v17966_v2  ;;  %v2659_v40 = vld [vmem:[#allocation6 + $0x8] sm:$0xff] }
 0xa76   : > { %v7409_v15 = vpack.c.bf16 %v17972_v60, %v17968_v30  ;;  %v6590_v53 = vrot.slane %v6560_v18, %v17244_v62 }
 0xa96   : > { %v17978_v36 = vpop.f32.mrb[48].mxu0 }
 0xa97   : > { %v17980_v33 = vpop.f32.mrb[49].mxu0 }
 0xa98   : > { %v17982_v22 = vpop.f32.mrb[50].mxu0 }
 0xa99   : > { %v17984_v61 = vpop.f32.mrb[51].mxu0 }
 0xa9e   : > { %v17986_v44 = vpop.f32.mrb[52].mxu0 }
 0xa9f   : > { %v17988_v4 = vpop.f32.mrb[53].mxu0 }
 0xaa0   : > { %v17990_v3 = vpop.f32.mrb[54].mxu0 }
 0xaa1   : > { %v17992_v58 = vpop.f32.mrb[55].mxu0 }
 0xaa8   : > { %v7223_v45 = vpop.f32.mrb[88].mxu1 }
 0xaa9   : > { %v7225_v37 = vpop.f32.mrb[89].mxu1  ;;  %v7224_v26 = vadd.f32 %v7223_v45, %v6598_v9  ;;  %v6594_v45 = vrot.slane %v6564_v1, %v17244_v62 }
 0xaaa   : > { %v7227_v23 = vpop.f32.mrb[90].mxu1  ;;  %v7226_v63 = vadd.f32 %v7225_v37, %v6602_v8 }
 0xaab   : > { %v7228_v25 = vadd.f32 %v7227_v23, %v6598_v9  ;;  %v7229_v51 = vpop.f32.mrb[91].mxu1 }
 0xaac   : > { %v7230_v21 = vadd.f32 %v7229_v51, %v6602_v8 }
 0xaad   : > { %v7349_v56 = vpack.c.bf16 %v7228_v25, %v7224_v26 }
 0xaae   : > { %v17998_v42 = vpack.c.bf16 %v7230_v21, %v7226_v63 }
 0xab0   : > { %v7233_v11 = vpop.f32.mrb[92].mxu1 }
 0xab1   : > { %v7235_v14 = vpop.f32.mrb[93].mxu1  ;;  %v7234_v24 = vadd.f32 %v7233_v11, %v6598_v9 }
 0xab2   : > { %v7236_v48 = vadd.f32 %v7235_v14, %v6602_v8  ;;  %v7237_v19 = vpop.f32.mrb[94].mxu1 }
 0xab3   : > { %v7238_v16 = vadd.f32 %v7237_v19, %v6598_v9  ;;  %v7239_v28 = vpop.f32.mrb[95].mxu1 }
 0xab4   : > { %v7240_v17 = vadd.f32 %v7239_v28, %v6602_v8 }
 0xab5   : > { %v7350_v20 = vpack.c.bf16 %v7238_v16, %v7234_v24 }
 0xab6   : > { %v18000_v12 = vpack.c.bf16 %v7240_v17, %v7236_v48 }
 0xad6   : > { %v7170_v41 = vpop.f32.mrb[56].mxu0 }
 0xad7   : > { %v7172_v37 = vpop.f32.mrb[57].mxu0  ;;  %v7171_v26 = vadd.f32 %v7170_v41, %v6590_v53 }
 0xad8   : > { %v7174_v23 = vpop.f32.mrb[58].mxu0  ;;  %v7173_v8 = vadd.f32 %v7172_v37, %v6594_v45 }
 0xad9   : > { %v7175_v9 = vadd.f32 %v7174_v23, %v6590_v53  ;;  %v7176_v25 = vpop.f32.mrb[59].mxu0 }
 0xada   : > { %v7177_v51 = vadd.f32 %v7176_v25, %v6594_v45 }
 0xadb   : > { %v7244_v63 = vpack.c.bf16 %v7175_v9, %v7171_v26 }
 0xadc   : > { %v7410_v21 = vpack.c.bf16 %v7177_v51, %v7173_v8 }
 0xadd   : > { %13685 = vmatprep.subr.bf16.mxu1 %v7244_v63 }
 0xade   : > { %v7180_v11 = vpop.f32.mrb[60].mxu0  ;;  %13686 = vmatpush3.bf16.xpose.msra.mxu1 %v7244_v63  ;;  %13701 = vmatprep.subr.bf16.mxu0 %v7410_v21 }
 0xadf   : > { %v7182_v14 = vpop.f32.mrb[61].mxu0  ;;  %13702 = vmatpush3.bf16.xpose.msra.mxu0 %v7410_v21  ;;  %v7181_v48 = vadd.f32 %v7180_v11, %v6590_v53 }
 0xae0   : > { %v7184_v10 = vpop.f32.mrb[62].mxu0  ;;  %v7183_v16 = vadd.f32 %v7182_v14, %v6594_v45 }
 0xae1   : > { %v7185_v19 = vadd.f32 %v7184_v10, %v6590_v53  ;;  %v7186_v24 = vpop.f32.mrb[63].mxu0 }
 0xae2   : > { %v7187_v28 = vadd.f32 %v7186_v24, %v6594_v45  ;;  %v2658_v45 = vld [vmem:[#allocation6] sm:$0xff] }
 0xae3   : > { %v7245_v17 = vpack.c.bf16 %v7185_v19, %v7181_v48 }
 0xae4   : > { %v7411_v18 = vpack.c.bf16 %v7187_v28, %v7183_v16 }
 0xae5   : > { %13687 = vmatprep.subr.bf16.mxu1 %v7245_v17 }
 0xae6   : > { %13688 = vmatpush3.bf16.xpose.msra.mxu1 %v7245_v17  ;;  %13703 = vmatprep.subr.bf16.mxu0 %v7411_v18 }
 0xae7   : > { %13693 = vmatprep.subr.bf16.mxu1 %v7349_v56  ;;  %13704 = vmatpush3.bf16.xpose.msra.mxu0 %v7411_v18 }
 0xaed   : > { %13690 = vmatmul.mubr.bf16.vlgmr.msra.gmra.mrb[96].mxu1 %v7243_v31  ;;  %v2660_v31 = vld [vmem:[#allocation6 + $0x10] sm:$0xff] }
 0xaee   : > { %13694 = vmatpush3.bf16.msra.mxu1 %v7349_v56  ;;  %13706 = vmatmul.mubr.bf16.vlgmr.msra.gmra.mrb[64].mxu0 %v7409_v15  ;;  %v2661_v15 = vld [vmem:[#allocation6 + $0x18] sm:$0xff] }
 0xaef   : > { %13695 = vmatprep.subr.bf16.mxu1 %v7350_v20 }
 0xaf2   : > { %13696 = vmatpush3.bf16.msra.mxu1 %v7350_v20 }
 0xaf3   : > { %13709 = vmatprep.subr.bf16.mxu1 %v17998_v42 }
 0xbc0   : > { %v13691_v1 = vpop.f32.mrb[96].mxu1 }
 0xbc1   : > { %v7280_v53 = vpop.f32.mrb[97].mxu1  ;;  %v13707_v41 = vpop.f32.mrb[64].mxu0  ;;  %v7297_v37 = vmul.f32 0.088388346, %v13691_v1 }
 0xbc2   : > { %v7295_v23 = vmul.f32 0.088388346, %v7280_v53  ;;  %v13692_v26 = vpop.f32.mrb[98].mxu1  ;;  %v7446_v9 = vpop.f32.mrb[65].mxu0  ;;  %v7463_v48 = vmul.f32 0.088388346, %v13707_v41 }
 0xbc3   : > { %v7283_v25 = vpop.f32.mrb[99].mxu1  ;;  %v13708_v2 = vpop.f32.mrb[66].mxu0  ;;  %v7298_v56 = vmul.f32 0.088388346, %v13692_v26  ;;  %v7461_v20 = vmul.f32 0.088388346, %v7446_v9  ;;  %v7301_v21 = vadd.f32 %v7297_v37, %v2660_v31 }
 0xbc4   : > { %v7296_v8 = vmul.f32 0.088388346, %v7283_v25  ;;  %v7449_v30 = vpop.f32.mrb[67].mxu0  ;;  %v7299_v60 = vadd.f32 %v7295_v23, %v2658_v45  ;;  %v7464_v16 = vmul.f32 0.088388346, %v13708_v2  ;;  %v7467_v1 = vadd.f32 %v7463_v48, %v2660_v31 }
 0xbc5   : > { %v7462_v11 = vmul.f32 0.088388346, %v7449_v30  ;;  %v7302_v10 = vadd.f32 %v7298_v56, %v2661_v15  ;;  %v7309_v19 = vsel %vm5994_vm0, %v7301_v21, -inf  ;;  %v7465_v24 = vadd.f32 %v7461_v20, %v2658_v45 }
 0xbc6   : > { %v7303_v51 = vsel %vm5994_vm0, %v7299_v60, -inf  ;;  %v7300_v63 = vadd.f32 %v7296_v8, %v2659_v40  ;;  %v7468_v37 = vadd.f32 %v7464_v16, %v2661_v15  ;;  %v7475_v23 = vsel %vm5994_vm0, %v7467_v1, -inf }
 0xbc7   : > { %7304 = vmax.xlane.f32.xlu0 %v7303_v51  ;;  %v7312_v28 = vsel %vm5994_vm0, %v7302_v10, -inf  ;;  %v7466_v17 = vadd.f32 %v7462_v11, %v2659_v40  ;;  %v7469_v18 = vsel %vm5994_vm0, %v7465_v24, -inf }
 0xbc8   : > { %v7306_v14 = vsel %vm5994_vm0, %v7300_v63, -inf  ;;  %v7478_v41 = vsel %vm5994_vm0, %v7468_v37, -inf }
 0xbc9   : > { %7307 = vmax.xlane.f32.xlu1 %v7306_v14  ;;  %v7472_v53 = vsel %vm5994_vm0, %v7466_v17, -inf }
 0xbcb   : > { %7310 = vmax.xlane.f32.xlu0 %v7309_v19 }
 0xbcd   : > { %7313 = vmax.xlane.f32.xlu1 %v7312_v28 }
 0xbcf   : > { %7470 = vmax.xlane.f32.xlu0 %v7469_v18 }
 0xbd1   : > { %7473 = vmax.xlane.f32.xlu1 %v7472_v53 }
 0xbd3   : > { %7476 = vmax.xlane.f32.xlu0 %v7475_v23 }
 0xbd5   : > { %7479 = vmax.xlane.f32.xlu1 %v7478_v41 }
 0xc54   : > { %v7305_v45 = vpop.xlane.xlu0 %7304 }
 0xc55   : > { %v7315_v26 = vsub.f32 %v7299_v60, %v7305_v45 }
 0xc56   : > { %v7308_v9 = vpop.xlane.xlu1 %7307 }
 0xc57   : > { %v7319_v25 = vmul.f32 1.442695, %v7315_v26  ;;  %v7316_v2 = vsub.f32 %v7300_v63, %v7308_v9 }
 0xc58   : > { %v7311_v40 = vpop.xlane.xlu0 %7310 }
 0xc59   : > { %15295 = vpow2.f32 %v7319_v25  ;;  %v7321_v56 = vmul.f32 1.442695, %v7316_v2  ;;  %v7317_v31 = vsub.f32 %v7301_v21, %v7311_v40  ;;  %v6111_v21 = vunpack.c.l.bf16 %v6109_v47 }
 0xc5a   : > { %v7314_v8 = vpop.xlane.xlu1 %7313 }
 0xc5b   : > { %15297 = vpow2.f32 %v7321_v56  ;;  %v7323_v30 = vmul.f32 1.442695, %v7317_v31  ;;  %v7318_v15 = vsub.f32 %v7302_v10, %v7314_v8  ;;  %v6116_v45 = vrot.slane %v6111_v21, %v17244_v62 }
 0xc5c   : > { %v7471_v20 = vpop.xlane.xlu0 %7470  ;;  %v6120_v47 = vrot.slane %v6111_v21, %v17249_v0 }
 0xc5d   : > { %15299 = vpow2.f32 %v7323_v30  ;;  %v7325_v51 = vmul.f32 1.442695, %v7318_v15  ;;  %v7481_v11 = vsub.f32 %v7465_v24, %v7471_v20  ;;  %v6126_v2 = vrot.slane %v6116_v45, %v17244_v62 }
 0xc5e   : > { %v7474_v14 = vpop.xlane.xlu1 %7473  ;;  %v6130_v40 = vrot.slane %v6120_v47, %v17244_v62 }
 0xc5f   : > { %15301 = vpow2.f32 %v7325_v51  ;;  %v7485_v48 = vmul.f32 1.442695, %v7481_v11  ;;  %v7482_v19 = vsub.f32 %v7466_v17, %v7474_v14  ;;  %v6326_v15 = vadd.f32 %v17978_v36, %v6126_v2 }
 0xc60   : > { %v7477_v60 = vpop.xlane.xlu0 %7476  ;;  %v6328_v20 = vadd.f32 %v17980_v33, %v6130_v40  ;;  %v6330_v14 = vadd.f32 %v17982_v22, %v6126_v2  ;;  %v6338_v36 = vadd.f32 %v17988_v4, %v6130_v40 }
 0xc61   : > { %15303 = vpow2.f32 %v7485_v48  ;;  %v7487_v16 = vmul.f32 1.442695, %v7482_v19  ;;  %v7483_v63 = vsub.f32 %v7467_v1, %v7477_v60  ;;  %v6332_v48 = vadd.f32 %v17984_v61, %v6130_v40 }
 0xc62   : > { %v7480_v28 = vpop.xlane.xlu1 %7479  ;;  %v6336_v60 = vadd.f32 %v17986_v44, %v6126_v2  ;;  %v6344_v33 = vadd.f32 %v6328_v20, %v6326_v15 }
 0xc63   : > { %v18023_v18 = vpop.eup %15295  ;;  %15305 = vpow2.f32 %v7487_v16  ;;  %v7489_v10 = vmul.f32 1.442695, %v7483_v63  ;;  %v7484_v53 = vsub.f32 %v7468_v37, %v7480_v28  ;;  %v18065_v16 = vadd.f32 %v17990_v3, %v6126_v2 }
 0xc64   : > { %v7327_v24 = vsel %vm5994_vm0, %v18023_v18, 0.0  ;;  %v18068_v63 = vadd.f32 %v17992_v58, %v6130_v40  ;;  %v6347_v22 = vadd.f32 %v6332_v48, %v6330_v14  ;;  %v6350_v61 = vadd.f32 %v6338_v36, %v6336_v60 }
 0xc65   : > { %v18029_v23 = vpop.eup %15297  ;;  %15307 = vpow2.f32 %v7489_v10  ;;  %v7491_v17 = vmul.f32 1.442695, %v7484_v53  ;;  %7328 = vadd.xlane.f32.xlu0 %v7327_v24 }
 0xc66   : > { %v7330_v1 = vsel %vm5994_vm0, %v18029_v23, 0.0  ;;  %v6353_v28 = vadd.f32 %v18068_v63, %v18065_v16 }
 0xc67   : > { %v18033_v41 = vpop.eup %15299  ;;  %15309 = vpow2.f32 %v7491_v17  ;;  %7331 = vadd.xlane.f32.xlu1 %v7330_v1 }
 0xc68   : > { %v7333_v37 = vsel %vm5994_vm0, %v18033_v41, 0.0 }
 0xc69   : > { %v15302_v26 = vpop.eup %15301  ;;  %7334 = vadd.xlane.f32.xlu0 %v7333_v37 }
 0xc6a   : > { %v7336_v9 = vsel %vm5994_vm0, %v15302_v26, 0.0 }
 0xc6b   : > { %v18040_v25 = vpop.eup %15303  ;;  %7337 = vadd.xlane.f32.xlu1 %v7336_v9 }
 0xc6c   : > { %v7493_v56 = vsel %vm5994_vm0, %v18040_v25, 0.0 }
 0xc6d   : > { %v18046_v31 = vpop.eup %15305  ;;  %7494 = vadd.xlane.f32.xlu0 %v7493_v56 }
 0xc6e   : > { %v7496_v8 = vsel %vm5994_vm0, %v18046_v31, 0.0 }
 0xc6f   : > { %v18050_v30 = vpop.eup %15307  ;;  %7497 = vadd.xlane.f32.xlu1 %v7496_v8 }
 0xc70   : > { %v7499_v51 = vsel %vm5994_vm0, %v18050_v30, 0.0 }
 0xc71   : > { %v18056_v11 = vpop.eup %15309  ;;  %7500 = vadd.xlane.f32.xlu0 %v7499_v51 }
 0xc72   : > { %v7502_v19 = vsel %vm5994_vm0, %v18056_v11, 0.0 }
 0xc73   : > { %7503 = vadd.xlane.f32.xlu1 %v7502_v19 }
 0xc75   : > { %6345 = vadd.xlane.f32.xlu0 %v6344_v33 }
 0xc77   : > { %6348 = vadd.xlane.f32.xlu1 %v6347_v22 }
 0xc79   : > { %6351 = vadd.xlane.f32.xlu0 %v6350_v61 }
 0xc7b   : > { %6354 = vadd.xlane.f32.xlu1 %v6353_v28 }
 0xcf2   : > { %v7329_v44 = vpop.xlane.xlu0 %7328 }
 0xcf3   : > { %15311 = vrcp.f32 %v7329_v44 }
 0xcf4   : > { %v7332_v4 = vpop.xlane.xlu1 %7331 }
 0xcf5   : > { %15313 = vrcp.f32 %v7332_v4 }
 0xcf6   : > { %v7335_v21 = vpop.xlane.xlu0 %7334 }
 0xcf7   : > { %15315 = vrcp.f32 %v7335_v21 }
 0xcf8   : > { %v7338_v3 = vpop.xlane.xlu1 %7337 }
 0xcf9   : > { %15317 = vrcp.f32 %v7338_v3 }
 0xcfa   : > { %v7495_v10 = vpop.xlane.xlu0 %7494 }
 0xcfb   : > { %15319 = vrcp.f32 %v7495_v10 }
 0xcfc   : > { %v7498_v58 = vpop.xlane.xlu1 %7497 }
 0xcfd   : > { %v15312_v53 = vpop.eup %15311  ;;  %15321 = vrcp.f32 %v7498_v58 }
 0xcfe   : > { %v7501_v24 = vpop.xlane.xlu0 %7500  ;;  %v7340_v45 = vmul.f32 %v15312_v53, %v18023_v18 }
 0xcff   : > { %v15314_v17 = vpop.eup %15313  ;;  %15323 = vrcp.f32 %v7501_v24 }
 0xd00   : > { %v7504_v1 = vpop.xlane.xlu1 %7503  ;;  %v7342_v47 = vmul.f32 %v15314_v17, %v18029_v23 }
 0xd01   : > { %v15316_v37 = vpop.eup %15315  ;;  %15325 = vrcp.f32 %v7504_v1 }
 0xd02   : > { %v6346_v9 = vpop.xlane.xlu0 %6345  ;;  %v7347_v2 = vpack.c.bf16 %v7342_v47, %v7340_v45  ;;  %v7344_v8 = vmul.f32 %v15316_v37, %v18033_v41 }
 0xd03   : > { %v15318_v40 = vpop.eup %15317  ;;  %v6356_v56 = vmul.f32 0.00390625, %v6346_v9 }
 0xd04   : > { %v7346_v51 = vmul.f32 %v15318_v40, %v15302_v26  ;;  %13697 = vmatprep.mubr.msk.bf16.mxu1 %vm5994_vm0, %v7347_v2  ;;  %v6349_v19 = vpop.xlane.xlu1 %6348  ;;  %v19740_v40 = vmov 0  }
 0xd05   : > { %v15320_v33 = vpop.eup %15319  ;;  %v18076_v22 = vsub.f32 %v6326_v15, %v6356_v56  ;;  %v18078_v61 = vsub.f32 %v6328_v20, %v6356_v56  ;;  %v6357_v18 = vmul.f32 0.00390625, %v6349_v19  ;;  %v15025_v56 = vld [vmem:[%s16722_s0 + $0x104] ss:$16 sps:$4 sm:$0xff]  }
 0xd06   : > { %v6352_v28 = vpop.xlane.xlu0 %6351  ;;  %v7348_v23 = vpack.c.bf16 %v7346_v51, %v7344_v8  ;;  %v7506_v20 = vmul.f32 %v15320_v33, %v18040_v25  ;;  %v15028_v8 = vld [vmem:[%s16722_s0 + $0x124] ss:$16 sps:$4 sm:$0xff]   ;;  %v15026_v51 = vld [vmem:[%s16722_s0 + $0x120] ss:$16 sps:$4 sm:$0xff]  }
 0xd07   : > { %v15322_v44 = vpop.eup %15321  ;;  %v18080_v4 = vsub.f32 %v6330_v14, %v6357_v18  ;;  %v18082_v21 = vsub.f32 %v6332_v48, %v6357_v18  ;;  %v6358_v3 = vmul.f32 0.00390625, %v6352_v28  ;;  %v6368_v41 = vmul.f32 %v18076_v22, %v18076_v22  ;;  %v15031_v19 = vld [vmem:[%s16722_s0 + $0x144] ss:$16 sps:$4 sm:$0xff]   ;;  %v15029_v33 = vld [vmem:[%s16722_s0 + $0x140] ss:$16 sps:$4 sm:$0xff]  }
 0xd08   : > { %13698 = vmatmul.mubr.msk.bf16.vlgmr.msra.gmra.mrb[100].mxu1 %vm5994_vm0, %v7348_v23  ;;  %v6355_v26 = vpop.xlane.xlu1 %6354  ;;  %v6369_v15 = vmul.f32 %v18078_v61, %v18078_v61  ;;  %v7508_v10 = vmul.f32 %v15322_v44, %v18046_v31  ;;  %v15034_v18 = vld [vmem:[%s16722_s0 + $0x164] ss:$16 sps:$4 sm:$0xff]   ;;  %v15032_v28 = vld [vmem:[%s16722_s0 + $0x160] ss:$16 sps:$4 sm:$0xff]  }
 0xd09   : > { %v15324_v58 = vpop.eup %15323  ;;  %v18091_v53 = vsub.f32 %v6336_v60, %v6358_v3  ;;  %v18093_v14 = vsub.f32 %v6338_v36, %v6358_v3  ;;  %13710 = vmatpush3.bf16.msra.mxu1 %v17998_v42  ;;  %v6359_v48 = vmul.f32 0.00390625, %v6355_v26  ;;  %v6370_v24 = vmul.f32 %v18080_v4, %v18080_v4  ;;  %v15037_v23 = vld [vmem:[%s16722_s0 + $0x184] ss:$16 sps:$4 sm:$0xff]   ;;  %v15035_v44 = vld [vmem:[%s16722_s0 + $0x180] ss:$16 sps:$4 sm:$0xff]  }
 0xd0a   : > { %13711 = vmatprep.subr.bf16.mxu1 %v18000_v12  ;;  %v6376_v17 = vadd.f32 %v6369_v15, %v6368_v41  ;;  %v7513_v1 = vpack.c.bf16 %v7508_v10, %v7506_v20  ;;  %v6371_v25 = vmul.f32 %v18082_v21, %v18082_v21  ;;  %v7510_v47 = vmul.f32 %v15324_v58, %v18050_v30  ;;  %v15040_v3 = vld [vmem:[%s16722_s0 + $0x1a4] ss:$16 sps:$4 sm:$0xff]   ;;  %v15038_v41 = vld [vmem:[%s16722_s0 + $0x1a0] ss:$16 sps:$4 sm:$0xff]  }
 0xd0b   : > { %v15326_v45 = vpop.eup %15325  ;;  %v18102_v31 = vsub.f32 %v18065_v16, %v6359_v48  ;;  %v18105_v60 = vsub.f32 %v18068_v63, %v6359_v48  ;;  %v6372_v42 = vmul.f32 %v18091_v53, %v18091_v53  ;;  %v6373_v36 = vmul.f32 %v18093_v14, %v18093_v14  ;;  %v15041_v26 = vld [vmem:[%s16722_s0 + $0x1c0] ss:$16 sps:$4 sm:$0xff]   ;;  %v15043_v15 = vld [vmem:[%s16722_s0 + $0x1c4] ss:$16 sps:$4 sm:$0xff]  }
 0xd0c   : > { %v7512_v37 = vmul.f32 %v15326_v45, %v18056_v11  ;;  %6377 = vadd.xlane.f32.xlu0 %v6376_v17  ;;  %13713 = vmatprep.mubr.msk.bf16.mxu1 %vm5994_vm0, %v7513_v1  ;;  %v6379_v16 = vadd.f32 %v6371_v25, %v6370_v24  ;;  %v15046_v20 = vld [vmem:[%s16722_s0 + $0x1e4] ss:$16 sps:$4 sm:$0xff]   ;;  %v15044_v10 = vld [vmem:[%s16722_s0 + $0x1e0] ss:$16 sps:$4 sm:$0xff]  }
 0xd0d   : > { %13712 = vmatpush3.bf16.msra.mxu1 %v18000_v12  ;;  %v6382_v63 = vadd.f32 %v6373_v36, %v6372_v42  ;;  %v6374_v9 = vmul.f32 %v18102_v31, %v18102_v31  ;;  %v6375_v30 = vmul.f32 %v18105_v60, %v18105_v60  ;;  %v15023_v12 = vld [vmem:[%s16722_s0 + $0x100] ss:$16 sps:$4 sm:$0xff]   ;;  %v15049_v58 = vld [vmem:[%s16722_s0 + $0x4] ss:$16 sps:$4 sm:$0xff]  }
 0xd0e   : > { %6380 = vadd.xlane.f32.xlu1 %v6379_v16  ;;  %v7514_v11 = vpack.c.bf16 %v7512_v37, %v7510_v47  ;;  %7654 = vmatprep.subr.bf16.mxu1 %v15025_v56  ;;  %v18139_v48 = vld [vmem:[%s16749_s21 + $0x10] sm:$0xff]  ;;  %v15417_v24 = vld [vmem:[%s16749_s21 + $0x8] sm:$0xff] }
 0xd0f   : > { %v6385_v2 = vadd.f32 %v6375_v30, %v6374_v9  ;;  %v2669_v17 = vunpack.c.h.bf16 %v15417_v24  ;;  %v18143_v45 = vunpack.c.l.bf16 %v18139_v48 }
 0xd10   : > { %6383 = vadd.xlane.f32.xlu0 %v6382_v63  ;;  %13714 = vmatmul.mubr.msk.bf16.vlgmr.msra.gmra.mrb[104].mxu1 %vm5994_vm0, %v7514_v11 }
 0xd11   : > { %7686 = vmatprep.mubr.bf16.mxu1 %v19740_v40  ;;  %7655 = vmatpush1.bf16.msra.mxu1 %v15023_v12  ;;  %v2715_v37 = vrot.slane %v2669_v17, %v17244_v62  ;;  %v2719_v16 = vrot.slane %v2669_v17, %v17249_v0  ;;  %v2723_v63 = vrot.slane %v2669_v17, %v17513_v57 }
 0xd12   : > { %6386 = vadd.xlane.f32.xlu1 %v6385_v2  ;;  %7656 = vmatprep.subr.bf16.mxu1 %v15028_v8  ;;  %v2727_v9 = vrot.slane %v2669_v17, %v17517_v13  ;;  %v2731_v12 = vrot.slane %v18143_v45, %v17244_v62  ;;  %v2735_v56 = vrot.slane %v18143_v45, %v17249_v0 }
 0xd15   : > { %7657 = vmatpush1.bf16.msra.mxu1 %v15026_v51 }
 0xd16   : > { %7658 = vmatprep.subr.bf16.mxu1 %v15031_v19 }
 0xd19   : > { %7659 = vmatpush1.bf16.msra.mxu1 %v15029_v33  ;;  %v2825_v33 = vrot.slane %v2715_v37, %v17244_v62 }
 0xd1a   : > { %7660 = vmatprep.subr.bf16.mxu1 %v15034_v18  ;;  %v2829_v18 = vrot.slane %v2719_v16, %v17244_v62 }
 0xd1b   : > { %v4895_v17 = vadd.f32 %v17424_v29, %v2825_v33 }
 0xd1c   : > { %v4891_v24 = vadd.f32 %v17412_v49, %v2829_v18 }
 0xd1d   : > { %7661 = vmatpush1.bf16.msra.mxu1 %v15032_v28  ;;  %v2833_v28 = vrot.slane %v2723_v63, %v17244_v62 }
 0xd1e   : > { %7662 = vmatprep.subr.bf16.mxu1 %v15037_v23  ;;  %v2837_v23 = vrot.slane %v2727_v9, %v17244_v62 }
 0xd1f   : > { %v4948_v49 = vadd.f32 %v17615_v35, %v2833_v28 }
 0xd20   : > { %v4950_v29 = vadd.f32 %v17617_v34, %v2837_v23 }
 0xd21   : > { %7663 = vmatpush1.bf16.msra.mxu1 %v15035_v44 }
 0xd22   : > { %7664 = vmatprep.subr.bf16.mxu1 %v15040_v3  ;;  %v18158_v3 = vrot.slane %v2731_v12, %v17244_v62  ;;  %v6412_v12 = vadd.f32 1.0, %v4948_v49 }
 0xd25   : > { %7665 = vmatpush1.bf16.msra.mxu1 %v15038_v41  ;;  %v18161_v41 = vrot.slane %v2735_v56, %v17244_v62  ;;  %v6413_v56 = vadd.f32 1.0, %v4950_v29 }
 0xd26   : > { %7666 = vmatprep.subr.bf16.mxu1 %v15043_v15  ;;  %v4887_v15 = vadd.f32 %v17406_v54, %v2829_v18 }
 0xd27   : > { %v4993_v54 = vadd.f32 %v17534_v6, %v18161_v41  ;;  %v19742_v6 = vld [vmem:[#allocation65_spill] sm:$0xff] }
 0xd28   : > { %v4997_v16 = vadd.f32 %v19742_v6, %v18161_v41 }
 0xd29   : > { %7667 = vmatpush1.bf16.msra.mxu1 %v15041_v26  ;;  %v4885_v26 = vadd.f32 %v17401_v50, %v2825_v33  ;;  %v4991_v50 = vadd.f32 %v17529_v55, %v18158_v3  ;;  %v19741_v55 = vld [vmem:[#allocation63_spill] sm:$0xff] }
 0xd2a   : > { %7668 = vmatprep.subr.bf16.mxu1 %v15046_v20  ;;  %v4938_v20 = vadd.f32 %v17595_v59, %v2833_v28  ;;  %v4995_v37 = vadd.f32 %v19741_v55, %v18158_v3 }
 0xd2d   : > { %7669 = vmatpush1.bf16.msra.mxu1 %v15044_v10  ;;  %v4940_v10 = vadd.f32 %v17597_v27, %v2837_v23  ;;  %v4942_v27 = vadd.f32 %v17601_v5, %v2833_v28  ;;  %v19743_v5 = vld [vmem:[#allocation79_spill] sm:$0xff] }
 0xd2e   : > { %7787 = vmatprep.subr.bf16.mxu1 %v15049_v58  ;;  %v4889_v58 = vadd.f32 %v17410_v52, %v2825_v33  ;;  %v4944_v52 = vadd.f32 %v17606_v7, %v2837_v23  ;;  %v4952_v63 = vadd.f32 %v19743_v5, %v2833_v28  ;;  %v19744_v7 = vld [vmem:[#allocation81_spill] sm:$0xff] }
 0xd2f   : > { %v4954_v9 = vadd.f32 %v19744_v7, %v2837_v23 }
 0xd30   : > { %v6414_v28 = vadd.f32 1.0, %v4952_v63 }
 0xd31   : > { %v6415_v23 = vadd.f32 1.0, %v4954_v9 }
 0xd99   : > { %v6378_v1 = vpop.xlane.xlu0 %6377 }
 0xd9a   : > { %v6388_v25 = vmul.f32 0.00390625, %v6378_v1  ;;  %v4897_v1 = vadd.f32 %v17430_v32, %v2829_v18  ;;  %v6408_v32 = vadd.f32 1.0, %v4938_v20 }
 0xd9b   : > { %v6381_v42 = vpop.xlane.xlu1 %6380 }
 0xd9c   : > { %v6392_v36 = vadd.f32 1e-06, %v6388_v25  ;;  %v6389_v47 = vmul.f32 0.00390625, %v6381_v42  ;;  %v4899_v25 = vadd.f32 %v17434_v38, %v2825_v33  ;;  %v4901_v42 = vadd.f32 %v17437_v39, %v2829_v18 }
 0xd9d   : > { %v6384_v30 = vpop.xlane.xlu0 %6383 }
 0xd9e   : > { %15327 = vrsqrt.f32 %v6392_v36  ;;  %v6393_v11 = vadd.f32 1e-06, %v6389_v47  ;;  %v6390_v2 = vmul.f32 0.00390625, %v6384_v30  ;;  %v6409_v36 = vadd.f32 1.0, %v4940_v10 }
 0xd9f   : > { %v6387_v8 = vpop.xlane.xlu1 %6386 }
 0xda0   : > { %15329 = vrsqrt.f32 %v6393_v11  ;;  %v6394_v51 = vadd.f32 1e-06, %v6390_v2  ;;  %v6391_v19 = vmul.f32 0.00390625, %v6387_v8  ;;  %v6410_v2 = vadd.f32 1.0, %v4942_v27 }
 0xda2   : > { %15331 = vrsqrt.f32 %v6394_v51  ;;  %v6395_v44 = vadd.f32 1e-06, %v6391_v19 }
 0xda4   : > { %15333 = vrsqrt.f32 %v6395_v44 }
 0xda8   : > { %v15328_v59 = vpop.eup %15327 }
 0xda9   : > { %v6400_v38 = vmul.f32 %v15328_v59, %v18076_v22  ;;  %v6401_v39 = vmul.f32 %v15328_v59, %v18078_v61  ;;  %v6411_v61 = vadd.f32 1.0, %v4944_v52 }
 0xdaa   : > { %v15330_v47 = vpop.eup %15329 }
 0xdab   : > { %v6402_v35 = vmul.f32 %v15330_v47, %v18080_v4  ;;  %v6403_v34 = vmul.f32 %v15330_v47, %v18082_v21  ;;  %v6416_v30 = vmul.f32 %v6408_v32, %v6400_v38  ;;  %v6417_v11 = vmul.f32 %v6409_v36, %v6401_v39 }
 0xdac   : > { %v15332_v22 = vpop.eup %15331 }
 0xdad   : > { %v6404_v8 = vmul.f32 %v15332_v22, %v18091_v53  ;;  %v6405_v51 = vmul.f32 %v15332_v22, %v18093_v14  ;;  %v6424_v19 = vadd.f32 %v6416_v30, %v4885_v26  ;;  %v6425_v33 = vadd.f32 %v6417_v11, %v4887_v15  ;;  %v19745_v14 = vld [vmem:[#allocation67_spill] sm:$0xff]  ;;  %v19746_v15 = vld [vmem:[#allocation69_spill] sm:$0xff] }
 0xdae   : > { %v15334_v18 = vpop.eup %15333  ;;  %v6418_v44 = vmul.f32 %v6410_v2, %v6402_v35  ;;  %v6419_v4 = vmul.f32 %v6411_v61, %v6403_v34  ;;  %v5001_v26 = vadd.f32 %v19745_v14, %v18158_v3  ;;  %v5003_v29 = vadd.f32 %v19746_v15, %v18161_v41  ;;  %v15047_v30 = vld [vmem:[%s16722_s0] ss:$16 sps:$4 sm:$0xff]   ;;  %v15052_v22 = vld [vmem:[%s16722_s0 + $0x24] ss:$16 sps:$4 sm:$0xff]  }
 0xdaf   : > { %v6406_v21 = vmul.f32 %v15334_v18, %v18102_v31  ;;  %v6407_v20 = vmul.f32 %v15334_v18, %v18105_v60  ;;  %v18195_v10 = vmul.f32 %v6424_v19, %v4991_v50  ;;  %v18197_v59 = vmul.f32 %v6425_v33, %v4993_v54  ;;  %v19747_v54 = vld [vmem:[#allocation71_spill] sm:$0xff] }
 0xdb0   : > { %v6426_v27 = vadd.f32 %v6418_v44, %v4889_v58  ;;  %v6427_v52 = vadd.f32 %v6419_v4, %v4891_v24  ;;  %v6420_v53 = vmul.f32 %v6412_v12, %v6404_v8  ;;  %v6421_v49 = vmul.f32 %v6413_v56, %v6405_v51  ;;  %v19748_v24 = vld [vmem:[#allocation73_spill] sm:$0xff] }
 0xdb1   : > { %v6422_v32 = vmul.f32 %v6414_v28, %v6406_v21  ;;  %v6423_v36 = vmul.f32 %v6415_v23, %v6407_v20  ;;  %v5005_v58 = vadd.f32 %v19747_v54, %v18158_v3  ;;  %v5007_v39 = vadd.f32 %v19748_v24, %v18161_v41  ;;  %v15050_v2 = vld [vmem:[%s16722_s0 + $0x20] ss:$16 sps:$4 sm:$0xff]   ;;  %v15055_v61 = vld [vmem:[%s16722_s0 + $0x44] ss:$16 sps:$4 sm:$0xff]   ;;  %v19751_v24 = vld [vmem:[#allocation52_spill] sm:$0xff] }
 0xdb2   : > { %v18203_v38 = vmul.f32 %v6426_v27, %v4995_v37  ;;  %v18205_v31 = vmul.f32 %v6427_v52, %v4997_v16  ;;  %v6428_v60 = vadd.f32 %v6420_v53, %v4895_v17  ;;  %v6429_v50 = vadd.f32 %v6421_v49, %v4897_v1  ;;  %v15053_v12 = vld [vmem:[%s16722_s0 + $0x40] ss:$16 sps:$4 sm:$0xff]   ;;  %v15058_v56 = vld [vmem:[%s16722_s0 + $0x64] ss:$16 sps:$4 sm:$0xff]  }
 0xdb3   : > { %v6430_v47 = vadd.f32 %v6422_v32, %v4899_v25  ;;  %v6431_v55 = vadd.f32 %v6423_v36, %v4901_v42  ;;  %v15056_v8 = vld [vmem:[%s16722_s0 + $0x60] ss:$16 sps:$4 sm:$0xff]   ;;  %v15061_v51 = vld [vmem:[%s16722_s0 + $0x84] ss:$16 sps:$4 sm:$0xff]   ;;  %v7840_v21 = vrot.slane %v17952_v43, 4 }
 0xdb4   : > { %v18211_v6 = vmul.f32 %v6428_v60, %v5001_v26  ;;  %v18213_v5 = vmul.f32 %v6429_v50, %v5003_v29  ;;  %v15059_v19 = vld [vmem:[%s16722_s0 + $0x80] ss:$16 sps:$4 sm:$0xff]   ;;  %v15064_v33 = vld [vmem:[%s16722_s0 + $0xa4] ss:$16 sps:$4 sm:$0xff]   ;;  %v18244_v29 = vadd.f32 %v18195_v10, %v17476_v46  ;;  %v19750_v60 = vld [vmem:[#allocation42_spill] sm:$0xff] }
 0xdb5   : > { %v18215_v37 = vmul.f32 %v6430_v47, %v5005_v58  ;;  %v18217_v16 = vmul.f32 %v6431_v55, %v5007_v39  ;;  %v15062_v18 = vld [vmem:[%s16722_s0 + $0xa0] ss:$16 sps:$4 sm:$0xff]   ;;  %v15067_v28 = vld [vmem:[%s16722_s0 + $0xc4] ss:$16 sps:$4 sm:$0xff]   ;;  %v7842_v20 = vunpack.c.l.bf16 %v7840_v21  ;;  %v18253_v39 = vadd.f32 %v18203_v38, %v19751_v24  ;;  %v19752_v47 = vld [vmem:[#allocation50_spill] sm:$0xff] }
 0xdb6   : > { %v15065_v23 = vld [vmem:[%s16722_s0 + $0xc0] ss:$16 sps:$4 sm:$0xff]   ;;  %v15070_v44 = vld [vmem:[%s16722_s0 + $0xe4] ss:$16 sps:$4 sm:$0xff]   ;;  %v18257_v55 = vadd.f32 %v18205_v31, %v19752_v47 }
 0xdb7   : > { %v15068_v4 = vld [vmem:[%s16722_s0 + $0xe0] ss:$16 sps:$4 sm:$0xff]   ;;  %v7847_v27 = vrot.slane %v7842_v20, %v17244_v62  ;;  %v7851_v52 = vrot.slane %v7842_v20, %v17249_v0 }
 0xdb8   : > { %v19753_v10 = vld [vmem:[#allocation43_spill] sm:$0xff]  ;;  %v19760_v21 = vld [vmem:[#allocation53_spill] sm:$0xff] }
 0xdb9   : > { %v7857_v53 = vrot.slane %v7847_v27, %v17244_v62  ;;  %v7861_v49 = vrot.slane %v7851_v52, %v17244_v62  ;;  %v18297_v20 = vadd.f32 %v18217_v16, %v19760_v21  ;;  %v19761_v27 = vld [vmem:[#allocation47_spill] sm:$0xff] }
 0xddb   : > { %v13699_v17 = vpop.f32.mrb[100].mxu1 }
 0xddc   : > { %v7391_v1 = vpop.f32.mrb[101].mxu1 }
 0xddd   : > { %v13700_v63 = vpop.f32.mrb[102].mxu1 }
 0xdde   : > { %v7407_v3 = vpack.c.bf16 %v13700_v63, %v13699_v17  ;;  %v7394_v7 = vpop.f32.mrb[103].mxu1  ;;  %v19754_v63 = vld [vmem:[#allocation44_spill] sm:$0xff] }
 0xddf   : > { %v7406_v41 = vpack.c.bf16 %v7394_v7, %v7391_v1 }
 0xde3   : > { %v13715_v25 = vpop.f32.mrb[104].mxu1 }
 0xde4   : > { %v7557_v42 = vpop.f32.mrb[105].mxu1 }
 0xde5   : > { %v13716_v9 = vpop.f32.mrb[106].mxu1 }
 0xde6   : > { %v7573_v35 = vpack.c.bf16 %v13716_v9, %v13715_v25  ;;  %v7560_v34 = vpop.f32.mrb[107].mxu1  ;;  %v7891_v9 = vadd.f32 %v18257_v55, %v18253_v39 }
 0xde7   : > { %v7572_v11 = vpack.c.bf16 %v7560_v34, %v7557_v42 }
 0xde9   : > { %7687 = vmatmul.mubr.bf16.vlgmr.msra.gmra.mrb[108].mxu1 %v7572_v11 }
 0xdea   : > { %7788 = vmatpush1.bf16.msra.mxu1 %v15047_v30  ;;  %7696 = vmatprep.mubr.bf16.mxu1 %v19740_v40  ;;  %v19756_v30 = vld [vmem:[#allocation57_spill] sm:$0xff] }
 0xdeb   : > { %7789 = vmatprep.subr.bf16.mxu1 %v15052_v22  ;;  %v18281_v11 = vadd.f32 %v18211_v6, %v19756_v30 }
 0xdee   : > { %7790 = vmatpush1.bf16.msra.mxu1 %v15050_v2 }
 0xdef   : > { %7791 = vmatprep.subr.bf16.mxu1 %v15055_v61 }
 0xdf1   : > { %7697 = vmatmul.mubr.bf16.gmra.mrb[112].mxu1 %v7573_v35 }
 0xdf2   : > { %7792 = vmatpush1.bf16.msra.mxu1 %v15053_v12  ;;  %7819 = vmatprep.mubr.bf16.mxu1 %v19740_v40 }
 0xdf3   : > { %7793 = vmatprep.subr.bf16.mxu1 %v15058_v56  ;;  %v19757_v56 = vld [vmem:[#allocation55_spill] sm:$0xff] }
 0xdf6   : > { %7794 = vmatpush1.bf16.msra.mxu1 %v15056_v8  ;;  %v18287_v8 = vadd.f32 %v18213_v5, %v19757_v56 }
 0xdf7   : > { %7795 = vmatprep.subr.bf16.mxu1 %v15061_v51 }
 0xdfa   : > { %7796 = vmatpush1.bf16.msra.mxu1 %v15059_v19 }
 0xdfb   : > { %7797 = vmatprep.subr.bf16.mxu1 %v15064_v33  ;;  %v19758_v33 = vld [vmem:[#allocation56_spill] sm:$0xff] }
 0xdfe   : > { %7798 = vmatpush1.bf16.msra.mxu1 %v15062_v18  ;;  %v18291_v18 = vadd.f32 %v18215_v37, %v19758_v33  ;;  %v19762_v37 = vld [vmem:[#allocation48_spill] sm:$0xff] }
 0xdff   : > { %7799 = vmatprep.subr.bf16.mxu1 %v15067_v28  ;;  %v19759_v28 = vld [vmem:[#allocation46_spill] sm:$0xff] }
 0xe02   : > { %7800 = vmatpush1.bf16.msra.mxu1 %v15065_v23 }
 0xe03   : > { %7801 = vmatprep.subr.bf16.mxu1 %v15070_v44 }
 0xe06   : > { %7802 = vmatpush1.bf16.msra.mxu1 %v15068_v4 }
 0xe09   : > { %7820 = vmatmul.mubr.bf16.vlgmr.msra.gmra.mrb[108].mxu1 %v7406_v41  ;;  %v19755_v41 = vld [vmem:[#allocation45_spill] sm:$0xff] }
 0xe0a   : > { %7829 = vmatprep.mubr.bf16.mxu1 %v19740_v40  ;;  %v19749_v40 = vld [vmem:[#allocation51_spill] sm:$0xff] }
 0xe0b   : > { %v18248_v32 = vadd.f32 %v18197_v59, %v19749_v40 }
 0xe0d   : > { %v7886_v7 = vadd.f32 %v18248_v32, %v18244_v29 }
 0xe11   : > { %7830 = vmatmul.mubr.bf16.gmra.mrb[112].mxu1 %v7407_v3 }
 0xedc   : > { %v7821_v14 = vpop.f32.mrb[108].mxu1 }
 0xedd   : > { %v7862_v26 = vadd.f32 %v7857_v53, %v7821_v14  ;;  %v7823_v15 = vpop.f32.mrb[109].mxu1 }
 0xede   : > { %v7863_v43 = vadd.f32 %v7861_v49, %v7823_v15  ;;  %v7825_v36 = vpop.f32.mrb[110].mxu1  ;;  %v19763_v15 = vld [vmem:[#allocation49_spill] sm:$0xff] }
 0xedf   : > { %v7870_v50 = vmul.f32 %v7862_v26, %v19750_v60  ;;  %v7864_v54 = vadd.f32 %v7857_v53, %v7825_v36  ;;  %v7827_v58 = vpop.f32.mrb[111].mxu1  ;;  %v7901_v60 = vadd.f32 %v18297_v20, %v18291_v18 }
 0xee0   : > { %v7871_v17 = vmul.f32 %v7863_v43, %v19753_v10  ;;  %v7865_v1 = vadd.f32 %v7861_v49, %v7827_v58 }
 0xee1   : > { %v18261_v59 = vadd.f32 %v7870_v50, %v17476_v46  ;;  %v7872_v3 = vmul.f32 %v7864_v54, %v19754_v63  ;;  %v2264_v63 = vld [vmem:[%s16724_s24 + $0x8] sm:$0xff]  ;;  %v19790_v46 = vld [vmem:[#allocation106_spill] sm:$0xff] }
 0xee2   : > { %v7873_v25 = vmul.f32 %v7865_v1, %v19755_v41  ;;  %v18268_v38 = vadd.f32 %v7871_v17, %v19749_v40  ;;  %v2263_v17 = vld [vmem:[%s16724_s24] sm:$0xff]  ;;  %v2268_v41 = vld [vmem:[%s16724_s24 + $0x28] sm:$0xff] }
 0xee3   : > { %v18271_v42 = vadd.f32 %v7872_v3, %v19751_v24  ;;  %v7887_v31 = vadd.f32 %v7886_v7, %v18261_v59  ;;  %v2267_v1 = vld [vmem:[%s16724_s24 + $0x20] sm:$0xff]  ;;  %v19786_v24 = vld [vmem:[#allocation92_spill] sm:$0xff] }
 0xee4   : > { %v7831_v35 = vpop.f32.mrb[112].mxu1  ;;  %v18277_v34 = vadd.f32 %v7873_v25, %v19752_v47  ;;  %v13151_v3 = vcombine.low %v2263_v17, %v2267_v1  ;;  %v13152_v7 = vcombine.high %v2263_v17, %v2267_v1  ;;  %v2271_v25 = vld [vmem:[%s16724_s24 + $0x40] sm:$0xff] }
 0xee5   : > { %v7866_v22 = vadd.f32 %v7857_v53, %v7831_v35  ;;  %v7833_v2 = vpop.f32.mrb[113].mxu1  ;;  %v7888_v61 = vadd.f32 %v7887_v31, %v18268_v38  ;;  %v7892_v12 = vadd.f32 %v7891_v9, %v18271_v42  ;;  %v2275_v31 = vld [vmem:[%s16724_s24 + $0x60] sm:$0xff]  ;;  %v13153_v9 = vcombine.low %v2264_v63, %v2268_v41 }
 0xee6   : > { %v7867_v51 = vadd.f32 %v7861_v49, %v7833_v2  ;;  %v7835_v19 = vpop.f32.mrb[114].mxu1  ;;  %v13154_v35 = vcombine.high %v2264_v63, %v2268_v41  ;;  %v2272_v2 = vld [vmem:[%s16724_s24 + $0x48] sm:$0xff]  ;;  %9403 = vmatprep.subr.bf16.mxu0 %v13152_v7  ;;  %v2303_v7 = vld [vmem:[%s16724_s24 + $0x140] sm:$0xff] }
 0xee7   : > { %v7874_v23 = vmul.f32 %v7866_v22, %v19759_v28  ;;  %v7868_v6 = vadd.f32 %v7857_v53, %v7835_v19  ;;  %v7837_v44 = vpop.f32.mrb[115].mxu1  ;;  %7889 = vadd.xlane.f32.xlu0 %v7888_v61  ;;  %v7893_v4 = vadd.f32 %v7892_v12, %v18277_v34  ;;  %v7896_v53 = vadd.f32 %v18287_v8, %v18281_v11  ;;  %v2276_v61 = vld [vmem:[%s16724_s24 + $0x68] sm:$0xff]  ;;  %v2279_v12 = vld [vmem:[%s16724_s24 + $0x80] sm:$0xff] }
 0xee8   : > { %v7875_v5 = vmul.f32 %v7867_v51, %v19761_v27  ;;  %v7869_v52 = vadd.f32 %v7861_v49, %v7837_v44  ;;  %v13160_v22 = vcombine.high %v2271_v25, %v2275_v31  ;;  %v13162_v51 = vcombine.high %v2272_v2, %v2276_v61  ;;  %v2283_v19 = vld [vmem:[%s16724_s24 + $0xa0] sm:$0xff]  ;;  %v2280_v28 = vld [vmem:[%s16724_s24 + $0x88] sm:$0xff]  ;;  %9509 = vmatprep.subr.bf16.mxu1 %v13154_v35 }
 0xee9   : > { %v18301_v14 = vadd.f32 %v7874_v23, %v19756_v30  ;;  %v7876_v26 = vmul.f32 %v7868_v6, %v19762_v37  ;;  %7894 = vadd.xlane.f32.xlu1 %v7893_v4  ;;  %v2284_v23 = vld [vmem:[%s16724_s24 + $0xa8] sm:$0xff]  ;;  %9404 = vmatpush1.bf16.msra.mxu0 %v13151_v3  ;;  %v13159_v6 = vcombine.low %v2271_v25, %v2275_v31  ;;  %v2307_v41 = vld [vmem:[%s16724_s24 + $0x160] sm:$0xff] }
 0xeea   : > { %v7877_v43 = vmul.f32 %v7869_v52, %v19763_v15  ;;  %v18308_v16 = vadd.f32 %v7875_v5, %v19757_v56  ;;  %9510 = vmatpush1.bf16.msra.mxu1 %v13153_v9  ;;  %9405 = vmatprep.subr.bf16.mxu0 %v13160_v22  ;;  %v13161_v44 = vcombine.low %v2272_v2, %v2276_v61  ;;  %v2287_v5 = vld [vmem:[%s16724_s24 + $0xc0] sm:$0xff]  ;;  %v2288_v37 = vld [vmem:[%s16724_s24 + $0xc8] sm:$0xff] }
 0xeeb   : > { %v18311_v49 = vadd.f32 %v7876_v26, %v19758_v33  ;;  %v7897_v36 = vadd.f32 %v7896_v53, %v18301_v14  ;;  %v13168_v4 = vcombine.high %v2279_v12, %v2283_v19  ;;  %9511 = vmatprep.subr.bf16.mxu1 %v13162_v51  ;;  %v13170_v27 = vcombine.high %v2280_v28, %v2284_v23  ;;  %v2291_v52 = vld [vmem:[%s16724_s24 + $0xe0] sm:$0xff]  ;;  %v2292_v26 = vld [vmem:[%s16724_s24 + $0xe8] sm:$0xff] }
 0xeec   : > { %v18317_v50 = vadd.f32 %v7877_v43, %v19760_v21  ;;  %v13167_v53 = vcombine.low %v2279_v12, %v2283_v19  ;;  %v13169_v15 = vcombine.low %v2280_v28, %v2284_v23  ;;  %v13176_v43 = vcombine.high %v2287_v5, %v2291_v52  ;;  %v2304_v25 = vld [vmem:[%s16724_s24 + $0x148] sm:$0xff]  ;;  %v2311_v61 = vld [vmem:[%s16724_s24 + $0x180] sm:$0xff] }
 0xeed   : > { %v7898_v54 = vadd.f32 %v7897_v36, %v18308_v16  ;;  %v7902_v58 = vadd.f32 %v7901_v60, %v18311_v49  ;;  %9406 = vmatpush1.bf16.msra.mxu0 %v13159_v6  ;;  %v13178_v36 = vcombine.high %v2288_v37, %v2292_v26  ;;  %v2295_v60 = vld [vmem:[%s16724_s24 + $0x100] sm:$0xff]  ;;  %v13175_v17 = vcombine.low %v2287_v5, %v2291_v52  ;;  %v2308_v31 = vld [vmem:[%s16724_s24 + $0x168] sm:$0xff] }
 0xeee   : > { %9512 = vmatpush1.bf16.msra.mxu1 %v13161_v44  ;;  %9407 = vmatprep.subr.bf16.mxu0 %v13168_v4  ;;  %v13177_v1 = vcombine.low %v2288_v37, %v2292_v26  ;;  %v13192_v22 = vcombine.high %v2303_v7, %v2307_v41  ;;  %v13194_v2 = vcombine.high %v2304_v25, %v2308_v31  ;;  %v2315_v12 = vld [vmem:[%s16724_s24 + $0x1a0] sm:$0xff]  ;;  %v2312_v51 = vld [vmem:[%s16724_s24 + $0x188] sm:$0xff] }
 0xeef   : > { %7899 = vadd.xlane.f32.xlu0 %v7898_v54  ;;  %v7903_v10 = vadd.f32 %v7902_v58, %v18317_v50  ;;  %9513 = vmatprep.subr.bf16.mxu1 %v13170_v27  ;;  %v2299_v54 = vld [vmem:[%s16724_s24 + $0x120] sm:$0xff]  ;;  %v2296_v58 = vld [vmem:[%s16724_s24 + $0x108] sm:$0xff]  ;;  %v13191_v28 = vcombine.low %v2303_v7, %v2307_v41  ;;  %v13193_v23 = vcombine.low %v2304_v25, %v2308_v31 }
 0xef0   : > { %v13184_v63 = vcombine.high %v2295_v60, %v2299_v54  ;;  %v13183_v9 = vcombine.low %v2295_v60, %v2299_v54  ;;  %v2316_v19 = vld [vmem:[%s16724_s24 + $0x1a8] sm:$0xff]  ;;  %v13200_v6 = vcombine.high %v2311_v61, %v2315_v12  ;;  %v2319_v4 = vld [vmem:[%s16724_s24 + $0x1c0] sm:$0xff]  ;;  %v13199_v37 = vcombine.low %v2311_v61, %v2315_v12 }
 0xef1   : > { %7904 = vadd.xlane.f32.xlu1 %v7903_v10  ;;  %v2300_v10 = vld [vmem:[%s16724_s24 + $0x128] sm:$0xff]  ;;  %9408 = vmatpush1.bf16.msra.mxu0 %v13167_v53  ;;  %v13202_v44 = vcombine.high %v2312_v51, %v2316_v19  ;;  %v2323_v27 = vld [vmem:[%s16724_s24 + $0x1e0] sm:$0xff]  ;;  %v13201_v26 = vcombine.low %v2312_v51, %v2316_v19 }
 0xef2   : > { %9514 = vmatpush1.bf16.msra.mxu1 %v13169_v15  ;;  %9409 = vmatprep.subr.bf16.mxu0 %v13176_v43  ;;  %v13186_v3 = vcombine.high %v2296_v58, %v2300_v10  ;;  %v13185_v35 = vcombine.low %v2296_v58, %v2300_v10  ;;  %v2320_v5 = vld [vmem:[%s16724_s24 + $0x1c8] sm:$0xff]  ;;  %v13208_v53 = vcombine.high %v2319_v4, %v2323_v27  ;;  %v2327_v43 = vld [vmem:[%s16724_s24 + $0x200] sm:$0xff] }
 0xef3   : > { %9515 = vmatprep.subr.bf16.mxu1 %v13178_v36  ;;  %v2324_v52 = vld [vmem:[%s16724_s24 + $0x1e8] sm:$0xff]  ;;  %v2331_v36 = vld [vmem:[%s16724_s24 + $0x220] sm:$0xff]  ;;  %v13207_v58 = vcombine.low %v2319_v4, %v2323_v27 }
 0xef4   : > { %v13210_v15 = vcombine.high %v2320_v5, %v2324_v52  ;;  %v2328_v60 = vld [vmem:[%s16724_s24 + $0x208] sm:$0xff]  ;;  %v13209_v10 = vcombine.low %v2320_v5, %v2324_v52  ;;  %v13215_v25 = vcombine.low %v2327_v43, %v2331_v36 }
 0xef5   : > { %9410 = vmatpush1.bf16.msra.mxu0 %v13175_v17  ;;  %v2332_v54 = vld [vmem:[%s16724_s24 + $0x228] sm:$0xff]  ;;  %v13216_v17 = vcombine.high %v2327_v43, %v2331_v36 }
 0xef6   : > { %9516 = vmatpush1.bf16.msra.mxu1 %v13177_v1  ;;  %9411 = vmatprep.subr.bf16.mxu0 %v13184_v63  ;;  %v13218_v1 = vcombine.high %v2328_v60, %v2332_v54  ;;  %v2335_v63 = vld [vmem:[%s16724_s24 + $0x240] sm:$0xff]  ;;  %v2336_v7 = vld [vmem:[%s16724_s24 + $0x248] sm:$0xff]  ;;  %v13217_v31 = vcombine.low %v2328_v60, %v2332_v54 }
 0xef7   : > { %9517 = vmatprep.subr.bf16.mxu1 %v13186_v3  ;;  %v2339_v3 = vld [vmem:[%s16724_s24 + $0x260] sm:$0xff]  ;;  %v2340_v41 = vld [vmem:[%s16724_s24 + $0x268] sm:$0xff] }
 0xef9   : > { %9412 = vmatpush1.bf16.msra.mxu0 %v13183_v9  ;;  %v13224_v9 = vcombine.high %v2335_v63, %v2339_v3 }
 0xefa   : > { %9518 = vmatpush1.bf16.msra.mxu1 %v13185_v35  ;;  %9413 = vmatprep.subr.bf16.mxu0 %v13192_v22  ;;  %v13226_v35 = vcombine.high %v2336_v7, %v2340_v41  ;;  %v13223_v22 = vcombine.low %v2335_v63, %v2339_v3 }
 0xefb   : > { %9519 = vmatprep.subr.bf16.mxu1 %v13194_v2  ;;  %v13225_v2 = vcombine.low %v2336_v7, %v2340_v41 }
 0xefd   : > { %9414 = vmatpush1.bf16.msra.mxu0 %v13191_v28 }
 0xefe   : > { %9520 = vmatpush1.bf16.msra.mxu1 %v13193_v23  ;;  %9415 = vmatprep.subr.bf16.mxu0 %v13200_v6 }
 0xeff   : > { %9521 = vmatprep.subr.bf16.mxu1 %v13202_v44 }
 0xf01   : > { %9416 = vmatpush1.bf16.msra.mxu0 %v13199_v37 }
 0xf02   : > { %9522 = vmatpush1.bf16.msra.mxu1 %v13201_v26  ;;  %9417 = vmatprep.subr.bf16.mxu0 %v13208_v53 }
 0xf03   : > { %9523 = vmatprep.subr.bf16.mxu1 %v13210_v15 }
 0xf05   : > { %9418 = vmatpush1.bf16.msra.mxu0 %v13207_v58 }
 0xf06   : > { %9524 = vmatpush1.bf16.msra.mxu1 %v13209_v10  ;;  %9419 = vmatprep.subr.bf16.mxu0 %v13216_v17 }
 0xf07   : > { %9525 = vmatprep.subr.bf16.mxu1 %v13218_v1 }
 0xf09   : > { %9420 = vmatpush1.bf16.msra.mxu0 %v13215_v25 }
 0xf0a   : > { %9526 = vmatpush1.bf16.msra.mxu1 %v13217_v31  ;;  %9421 = vmatprep.subr.bf16.mxu0 %v13224_v9 }
 0xf0b   : > { %9527 = vmatprep.subr.bf16.mxu1 %v13226_v35 }
 0xf0d   : > { %9422 = vmatpush1.bf16.msra.mxu0 %v13223_v22 }
 0xf0e   : > { %9528 = vmatpush1.bf16.msra.mxu1 %v13225_v2 }
 0xf74   : > { %v7890_v61 = vpop.xlane.xlu0 %7889 }
 0xf75   : > { %v7907_v12 = vmul.f32 0.001953125, %v7890_v61 }
 0xf76   : > { %v7895_v51 = vpop.xlane.xlu1 %7894 }
 0xf77   : > { %v18363_v19 = vsub.f32 %v18244_v29, %v7907_v12  ;;  %v18366_v28 = vsub.f32 %v18248_v32, %v7907_v12  ;;  %v7908_v23 = vmul.f32 0.001953125, %v7895_v51  ;;  %v18369_v6 = vsub.f32 %v18261_v59, %v7907_v12  ;;  %v2343_v51 = vld [vmem:[%s16724_s24 + $0x280] sm:$0xff] }
 0xf78   : > { %v18372_v44 = vsub.f32 %v18268_v38, %v7907_v12 }
 0xf79   : > { %v18375_v4 = vsub.f32 %v18253_v39, %v7908_v23  ;;  %v18378_v27 = vsub.f32 %v18257_v55, %v7908_v23  ;;  %v7927_v29 = vmul.f32 %v18363_v19, %v18363_v19  ;;  %v7928_v32 = vmul.f32 %v18366_v28, %v18366_v28 }
 0xf7a   : > { %v18385_v5 = vsub.f32 %v18271_v42, %v7908_v23  ;;  %v7929_v59 = vmul.f32 %v18369_v6, %v18369_v6  ;;  %v18394_v37 = vsub.f32 %v18277_v34, %v7908_v23  ;;  %v7930_v53 = vmul.f32 %v18372_v44, %v18372_v44  ;;  %v2347_v23 = vld [vmem:[%s16724_s24 + $0x2a0] sm:$0xff] }
 0xf7b   : > { %v7943_v38 = vadd.f32 %v7928_v32, %v7927_v29  ;;  %v7931_v39 = vmul.f32 %v18375_v4, %v18375_v4  ;;  %v7932_v55 = vmul.f32 %v18378_v27, %v18378_v27  ;;  %v2344_v29 = vld [vmem:[%s16724_s24 + $0x288] sm:$0xff]  ;;  %v13232_v32 = vcombine.high %v2343_v51, %v2347_v23 }
 0xf7c   : > { %v7900_v52 = vpop.xlane.xlu0 %7899  ;;  %v7933_v36 = vmul.f32 %v18385_v5, %v18385_v5  ;;  %v7934_v34 = vmul.f32 %v18394_v37, %v18394_v37 }
 0xf7d   : > { %v7909_v26 = vmul.f32 0.001953125, %v7900_v52  ;;  %v7944_v42 = vadd.f32 %v7943_v38, %v7929_v59  ;;  %v7948_v15 = vadd.f32 %v7932_v55, %v7931_v39  ;;  %v2348_v59 = vld [vmem:[%s16724_s24 + $0x2a8] sm:$0xff]  ;;  %v13231_v38 = vcombine.low %v2343_v51, %v2347_v23  ;;  %9423 = vmatprep.subr.bf16.mxu0 %v13232_v32  ;;  %v2351_v52 = vld [vmem:[%s16724_s24 + $0x2c0] sm:$0xff] }
 0xf7e   : > { %v7905_v43 = vpop.xlane.xlu1 %7904  ;;  %v13233_v39 = vcombine.low %v2344_v29, %v2348_v59  ;;  %v13234_v55 = vcombine.high %v2344_v29, %v2348_v59  ;;  %v2376_v51 = vld [vmem:[%s16724_s24 + $0x388] sm:$0xff]  ;;  %v2383_v32 = vld [vmem:[%s16724_s24 + $0x3c0] sm:$0xff] }
 0xf7f   : > { %v18401_v60 = vsub.f32 %v18281_v11, %v7909_v26  ;;  %v18404_v54 = vsub.f32 %v18287_v8, %v7909_v26  ;;  %v7910_v58 = vmul.f32 0.001953125, %v7905_v43  ;;  %v7945_v10 = vadd.f32 %v7944_v42, %v7930_v53  ;;  %9424 = vmatpush1.bf16.msra.mxu0 %v13231_v38  ;;  %v2352_v53 = vld [vmem:[%s16724_s24 + $0x2c8] sm:$0xff]  ;;  %v2387_v59 = vld [vmem:[%s16724_s24 + $0x3e0] sm:$0xff] }
 0xf80   : > { %v7949_v17 = vadd.f32 %v7948_v15, %v7933_v36  ;;  %v18409_v1 = vsub.f32 %v18301_v14, %v7909_v26  ;;  %v18412_v63 = vsub.f32 %v18308_v16, %v7909_v26  ;;  %9529 = vmatprep.subr.bf16.mxu1 %v13234_v55  ;;  %v2355_v26 = vld [vmem:[%s16724_s24 + $0x2e0] sm:$0xff]  ;;  %v2356_v15 = vld [vmem:[%s16724_s24 + $0x2e8] sm:$0xff] }
 0xf81   : > { %v18415_v3 = vsub.f32 %v18291_v18, %v7910_v58  ;;  %v18418_v11 = vsub.f32 %v18297_v20, %v7910_v58  ;;  %7946 = vadd.xlane.f32.xlu0 %v7945_v10  ;;  %v7935_v8 = vmul.f32 %v18401_v60, %v18401_v60  ;;  %v7936_v7 = vmul.f32 %v18404_v54, %v18404_v54  ;;  %v2359_v10 = vld [vmem:[%s16724_s24 + $0x300] sm:$0xff]  ;;  %v2380_v29 = vld [vmem:[%s16724_s24 + $0x3a8] sm:$0xff] }
 0xf82   : > { %v7950_v41 = vadd.f32 %v7949_v17, %v7934_v34  ;;  %v7937_v14 = vmul.f32 %v18409_v1, %v18409_v1  ;;  %v18427_v16 = vsub.f32 %v18311_v49, %v7910_v58  ;;  %v18430_v20 = vsub.f32 %v18317_v50, %v7910_v58  ;;  %9530 = vmatpush1.bf16.msra.mxu1 %v13233_v39  ;;  %v2363_v34 = vld [vmem:[%s16724_s24 + $0x320] sm:$0xff]  ;;  %v2360_v17 = vld [vmem:[%s16724_s24 + $0x308] sm:$0xff] }
 0xf83   : > { %v7953_v18 = vadd.f32 %v7936_v7, %v7935_v8  ;;  %v7939_v25 = vmul.f32 %v18415_v3, %v18415_v3  ;;  %v7940_v31 = vmul.f32 %v18418_v11, %v18418_v11  ;;  %v7938_v9 = vmul.f32 %v18412_v63, %v18412_v63  ;;  %v2364_v7 = vld [vmem:[%s16724_s24 + $0x328] sm:$0xff] }
 0xf84   : > { %7951 = vadd.xlane.f32.xlu1 %v7950_v41  ;;  %v7941_v35 = vmul.f32 %v18427_v16, %v18427_v16  ;;  %v7942_v50 = vmul.f32 %v18430_v20, %v18430_v20  ;;  %v13240_v42 = vcombine.high %v2351_v52, %v2355_v26  ;;  %v13239_v43 = vcombine.low %v2351_v52, %v2355_v26  ;;  %v2384_v55 = vld [vmem:[%s16724_s24 + $0x3c8] sm:$0xff] }
 0xf85   : > { %v7954_v49 = vadd.f32 %v7953_v18, %v7937_v14  ;;  %v7958_v22 = vadd.f32 %v7940_v31, %v7939_v25  ;;  %v13241_v36 = vcombine.low %v2352_v53, %v2356_v15  ;;  %v13242_v58 = vcombine.high %v2352_v53, %v2356_v15  ;;  %v2367_v25 = vld [vmem:[%s16724_s24 + $0x340] sm:$0xff]  ;;  %v2388_v52 = vld [vmem:[%s16724_s24 + $0x3e8] sm:$0xff] }
 0xf86   : > { %9425 = vmatprep.subr.bf16.mxu0 %v13240_v42  ;;  %v13248_v8 = vcombine.high %v2359_v10, %v2363_v34  ;;  %v13247_v41 = vcombine.low %v2359_v10, %v2363_v34  ;;  %v13249_v14 = vcombine.low %v2360_v17, %v2364_v7  ;;  %v13250_v18 = vcombine.high %v2360_v17, %v2364_v7  ;;  %v2371_v31 = vld [vmem:[%s16724_s24 + $0x360] sm:$0xff]  ;;  %v18473_v10 = vld [vmem:[%s16724_s24 + $0x408] sm:$0xff] }
 0xf87   : > { %v7955_v2 = vadd.f32 %v7954_v49, %v7938_v9  ;;  %v7959_v61 = vadd.f32 %v7958_v22, %v7941_v35  ;;  %9531 = vmatprep.subr.bf16.mxu1 %v13242_v58  ;;  %9426 = vmatpush1.bf16.msra.mxu0 %v13239_v43  ;;  %v2368_v9 = vld [vmem:[%s16724_s24 + $0x348] sm:$0xff]  ;;  %v13256_v49 = vcombine.high %v2367_v25, %v2371_v31  ;;  %v18470_v58 = vld [vmem:[%s16724_s24 + $0x420] sm:$0xff] }
 0xf88   : > { %9532 = vmatpush1.bf16.msra.mxu1 %v13241_v36  ;;  %9427 = vmatprep.subr.bf16.mxu0 %v13248_v8  ;;  %v2372_v35 = vld [vmem:[%s16724_s24 + $0x368] sm:$0xff]  ;;  %v13255_v22 = vcombine.low %v2367_v25, %v2371_v31  ;;  %v13266_v39 = vcombine.high %v2376_v51, %v2380_v29  ;;  %v13265_v26 = vcombine.low %v2376_v51, %v2380_v29  ;;  %v18467_v36 = vld [vmem:[%s16724_s24 + $0x400] sm:$0xff] }
 0xf89   : > { %7956 = vadd.xlane.f32.xlu0 %v7955_v2  ;;  %v7960_v12 = vadd.f32 %v7959_v61, %v7942_v50  ;;  %9533 = vmatprep.subr.bf16.mxu1 %v13250_v18  ;;  %v13257_v2 = vcombine.low %v2368_v9, %v2372_v35  ;;  %v13258_v50 = vcombine.high %v2368_v9, %v2372_v35  ;;  %v2375_v61 = vld [vmem:[%s16724_s24 + $0x380] sm:$0xff]  ;;  %v18478_v17 = vld [vmem:[%s16724_s24 + $0x428] sm:$0xff] }
 0xf8a   : > { %v13272_v53 = vcombine.high %v2383_v32, %v2387_v59  ;;  %v13274_v42 = vcombine.high %v2384_v55, %v2388_v52  ;;  %v13271_v15 = vcombine.low %v2383_v32, %v2387_v59  ;;  %v13273_v43 = vcombine.low %v2384_v55, %v2388_v52  ;;  %v19766_v52 = vld [vmem:[#allocation76_spill] sm:$0xff]  ;;  %v19780_v7 = vld [vmem:[#allocation91_spill] sm:$0xff] }
 0xf8b   : > { %7961 = vadd.xlane.f32.xlu1 %v7960_v12  ;;  %9428 = vmatpush1.bf16.msra.mxu0 %v13247_v41  ;;  %v2379_v12 = vld [vmem:[%s16724_s24 + $0x3a0] sm:$0xff]  ;;  %v13280_v34 = vcombine.high %v18467_v36, %v18470_v58  ;;  %v13282_v41 = vcombine.high %v18473_v10, %v18478_v17  ;;  %v2739_v31 = vrot.slane %v18143_v45, %v17513_v57 }
 0xf8c   : > { %9534 = vmatpush1.bf16.msra.mxu1 %v13249_v14  ;;  %9429 = vmatprep.subr.bf16.mxu0 %v13256_v49  ;;  %v13264_v23 = vcombine.high %v2375_v61, %v2379_v12  ;;  %v13263_v38 = vcombine.low %v2375_v61, %v2379_v12  ;;  %v2671_v14 = vunpack.c.h.bf16 %v18139_v48  ;;  %v2743_v9 = vrot.slane %v18143_v45, %v17517_v13  ;;  %v19764_v45 = vld [vmem:[#allocation74_spill] sm:$0xff] }
 0xf8d   : > { %9535 = vmatprep.subr.bf16.mxu1 %v13258_v50  ;;  %v2849_v61 = vrot.slane %v2739_v31, %v17244_v62  ;;  %v19772_v31 = vld [vmem:[#allocation83_spill] sm:$0xff] }
 0xf8e   : > { %v2747_v18 = vrot.slane %v2671_v14, %v17244_v62  ;;  %v2751_v25 = vrot.slane %v2671_v14, %v17249_v0 }
 0xf8f   : > { %9430 = vmatpush1.bf16.msra.mxu0 %v13255_v22  ;;  %v2755_v22 = vrot.slane %v2671_v14, %v17513_v57  ;;  %v19792_v57 = vld [vmem:[#allocation96_spill] sm:$0xff] }
 0xf90   : > { %9536 = vmatpush1.bf16.msra.mxu1 %v13257_v2  ;;  %9431 = vmatprep.subr.bf16.mxu0 %v13264_v23  ;;  %v18494_v35 = vrot.slane %v2747_v18, %v17244_v62  ;;  %v2759_v2 = vrot.slane %v2671_v14, %v17517_v13  ;;  %v2861_v48 = vrot.slane %v2751_v25, %v17244_v62  ;;  %v19771_v18 = vld [vmem:[#allocation80_spill] sm:$0xff] }
 0xf91   : > { %9537 = vmatprep.subr.bf16.mxu1 %v13266_v39  ;;  %v2853_v23 = vrot.slane %v2743_v9, %v17244_v62  ;;  %v2865_v59 = vrot.slane %v2755_v22, %v17244_v62  ;;  %v19765_v39 = vld [vmem:[#allocation75_spill] sm:$0xff] }
 0xf92   : > { %v18503_v32 = vadd.f32 %v19764_v45, %v18494_v35  ;;  %v18508_v55 = vadd.f32 %v19765_v39, %v2861_v48  ;;  %v18525_v25 = vadd.f32 %v19771_v18, %v2861_v48  ;;  %v18528_v9 = vadd.f32 %v19772_v31, %v2861_v48  ;;  %v19777_v45 = vld [vmem:[#allocation87_spill] sm:$0xff]  ;;  %v19781_v31 = vld [vmem:[#allocation100_spill] sm:$0xff] }
 0xf93   : > { %9432 = vmatpush1.bf16.msra.mxu0 %v13263_v38  ;;  %v2869_v38 = vrot.slane %v2759_v2, %v17244_v62  ;;  %v19775_v2 = vld [vmem:[#allocation86_spill] sm:$0xff]  ;;  %v7993_v39 = vadd.f32 1.0, %v19777_v45  ;;  %v5150_v8 = vadd.f32 %v19781_v31, %v2865_v59  ;;  %v5164_v13 = vadd.f32 %v19790_v46, %v2865_v59 }
 0xf94   : > { %9538 = vmatpush1.bf16.msra.mxu1 %v13265_v26  ;;  %9433 = vmatprep.subr.bf16.mxu0 %v13272_v53  ;;  %v18512_v26 = vadd.f32 %v19766_v52, %v18494_v35  ;;  %v19767_v53 = vld [vmem:[#allocation77_spill] sm:$0xff]  ;;  %19773 = vst [vmem:[#allocation65_spill] sm:$0xff] %v18528_v9  ;;  %v19788_v31 = vld [vmem:[#allocation94_spill] sm:$0xff]  ;;  %v18582_v9 = vld [vmem:[%s16724_s24 + $0x468] sm:$0xff] }
 0xf95   : > { %9539 = vmatprep.subr.bf16.mxu1 %v13274_v42  ;;  %v18515_v42 = vadd.f32 %v19767_v53, %v2861_v48  ;;  %v19778_v52 = vld [vmem:[#allocation89_spill] sm:$0xff]  ;;  %v7998_v48 = vadd.f32 1.0, %v19780_v7  ;;  %v18553_v40 = vadd.f32 %v19788_v31, %v2849_v61  ;;  %v7991_v62 = vadd.f32 1.0, %v5150_v8 }
 0xf96   : > { %v7994_v53 = vadd.f32 1.0, %v19778_v52 }
 0xf97   : > { %9434 = vmatpush1.bf16.msra.mxu0 %v13271_v15 }
 0xf98   : > { %9540 = vmatpush1.bf16.msra.mxu1 %v13273_v43  ;;  %9456 = vmatprep.subr.bf16.mxu0 %v13280_v34  ;;  %v19768_v43 = vld [vmem:[#allocation84_spill] sm:$0xff] }
 0xf99   : > { %9562 = vmatprep.subr.bf16.mxu1 %v13282_v41  ;;  %v18518_v34 = vadd.f32 %v19768_v43, %v2849_v61  ;;  %v19769_v41 = vld [vmem:[#allocation78_spill] sm:$0xff] }
 0xf9a   : > { %v18522_v14 = vadd.f32 %v19769_v41, %v18494_v35  ;;  %v19779_v43 = vld [vmem:[#allocation90_spill] sm:$0xff] }
 0xf9b   : > { %v7997_v41 = vadd.f32 1.0, %v19779_v43  ;;  %v18547_v43 = vadd.f32 %v19786_v24, %v2849_v61 }
 0xf9c   : > { %19770 = vst [vmem:[#allocation63_spill] sm:$0xff] %v18522_v14  ;;  %v18565_v14 = vld [vmem:[%s16724_s24 + $0x440] sm:$0xff] }
0x100e   : > { %v7947_v49 = vpop.xlane.xlu0 %7946 }
0x100f   : > { %v7963_v50 = vmul.f32 0.001953125, %v7947_v49  ;;  %v19774_v49 = vld [vmem:[#allocation85_spill] sm:$0xff] }
0x1010   : > { %v5046_v22 = vadd.f32 %v19774_v49, %v2853_v23  ;;  %v19782_v49 = vld [vmem:[#allocation101_spill] sm:$0xff] }
0x1011   : > { %v7967_v12 = vadd.f32 1e-06, %v7963_v50  ;;  %v7952_v51 = vpop.xlane.xlu1 %7951  ;;  %v18532_v50 = vadd.f32 %v19775_v2, %v2849_v61  ;;  %v5152_v21 = vadd.f32 %v19782_v49, %v2869_v38  ;;  %v19783_v2 = vld [vmem:[#allocation102_spill] sm:$0xff]  ;;  %v19789_v49 = vld [vmem:[#allocation105_spill] sm:$0xff]  ;;  %v18568_v61 = vld [vmem:[%s16724_s24 + $0x460] sm:$0xff] }
0x1012   : > { %v7964_v29 = vmul.f32 0.001953125, %v7952_v51  ;;  %v5154_v33 = vadd.f32 %v19783_v2, %v2865_v59  ;;  %v5162_v2 = vadd.f32 %v19789_v49, %v2869_v38 }
0x1013   : > { %15335 = vrsqrt.f32 %v7967_v12  ;;  %v19776_v12 = vld [vmem:[#allocation88_spill] sm:$0xff] }
0x1014   : > { %v7968_v15 = vadd.f32 1e-06, %v7964_v29  ;;  %v18535_v51 = vadd.f32 %v19776_v12, %v2853_v23  ;;  %v19784_v12 = vld [vmem:[#allocation103_spill] sm:$0xff]  ;;  %v7995_v49 = vadd.f32 1.0, %v5154_v33  ;;  %v8000_v8 = vadd.f32 1.0, %v5162_v2 }
0x1015   : > { %v5156_v30 = vadd.f32 %v19784_v12, %v2869_v38  ;;  %v19791_v12 = vld [vmem:[#allocation107_spill] sm:$0xff]  ;;  %v13287_v33 = vcombine.low %v18565_v14, %v18568_v61 }
0x1016   : > { %15337 = vrsqrt.f32 %v7968_v15  ;;  %v7957_v29 = vpop.xlane.xlu0 %7956  ;;  %v19785_v15 = vld [vmem:[#allocation104_spill] sm:$0xff]  ;;  %v5166_v0 = vadd.f32 %v19791_v12, %v2869_v38 }
0x1017   : > { %v7965_v18 = vmul.f32 0.001953125, %v7957_v29  ;;  %v5160_v47 = vadd.f32 %v19785_v15, %v2865_v59  ;;  %v19787_v29 = vld [vmem:[#allocation93_spill] sm:$0xff]  ;;  %v7996_v46 = vadd.f32 1.0, %v5156_v30 }
0x1018   : > { %v7962_v56 = vpop.xlane.xlu1 %7961  ;;  %v18550_v7 = vadd.f32 %v19787_v29, %v2853_v23  ;;  %v7992_v29 = vadd.f32 1.0, %v5152_v21 }
0x1019   : > { %v7969_v45 = vadd.f32 1e-06, %v7965_v18  ;;  %v7966_v52 = vmul.f32 0.001953125, %v7962_v56  ;;  %v18559_v18 = vadd.f32 %v19792_v57, %v2853_v23  ;;  %v19793_v56 = vld [vmem:[#allocation97_spill] sm:$0xff]  ;;  %v7999_v59 = vadd.f32 1.0, %v5160_v47 }
0x101a   : > { %v18562_v24 = vadd.f32 1.0, %v19793_v56 }
0x101b   : > { %15339 = vrsqrt.f32 %v7969_v45  ;;  %v7970_v15 = vadd.f32 1e-06, %v7966_v52  ;;  %v8003_v45 = vadd.f32 1.0, %v5164_v13  ;;  %v8004_v52 = vadd.f32 1.0, %v5166_v0  ;;  %v18588_v13 = vld [vmem:[%s16724_s24 + $0x4a0] sm:$0xff] }
0x101d   : > { %v15336_v31 = vpop.eup %15335  ;;  %15341 = vrsqrt.f32 %v7970_v15  ;;  %v18577_v15 = vld [vmem:[%s16724_s24 + $0x448] sm:$0xff] }
0x101e   : > { %v7976_v38 = vmul.f32 %v15336_v31, %v18366_v28  ;;  %v7975_v57 = vmul.f32 %v15336_v31, %v18363_v19  ;;  %v7978_v23 = vmul.f32 %v15336_v31, %v18372_v44  ;;  %v7977_v21 = vmul.f32 %v15336_v31, %v18369_v6  ;;  %v18585_v6 = vld [vmem:[%s16724_s24 + $0x480] sm:$0xff] }
0x1020   : > { %v15338_v30 = vpop.eup %15337  ;;  %v8008_v47 = vmul.f32 %v7992_v29, %v7976_v38  ;;  %v8007_v12 = vmul.f32 %v7991_v62, %v7975_v57  ;;  %v8010_v28 = vmul.f32 %v7994_v53, %v7978_v23  ;;  %v8009_v56 = vmul.f32 %v7993_v39, %v7977_v21 }
0x1021   : > { %v7980_v19 = vmul.f32 %v15338_v30, %v18378_v27  ;;  %v7979_v44 = vmul.f32 %v15338_v30, %v18375_v4  ;;  %v7982_v0 = vmul.f32 %v15338_v30, %v18394_v37  ;;  %v7981_v2 = vmul.f32 %v15338_v30, %v18385_v5 }
0x1022   : > { %v8024_v29 = vadd.f32 %v8008_v47, %v5046_v22  ;;  %v8023_v62 = vadd.f32 %v8007_v12, %v18518_v34  ;;  %v8026_v53 = vadd.f32 %v8010_v28, %v18508_v55  ;;  %v8025_v39 = vadd.f32 %v8009_v56, %v18503_v32  ;;  %v19795_v56 = vld [vmem:[#allocation95_spill] sm:$0xff] }
0x1023   : > { %v8012_v27 = vmul.f32 %v7996_v46, %v7980_v19  ;;  %v8011_v31 = vmul.f32 %v7995_v49, %v7979_v44  ;;  %v8014_v4 = vmul.f32 %v7998_v48, %v7982_v0  ;;  %v8013_v38 = vmul.f32 %v7997_v41, %v7981_v2  ;;  %v19796_v0 = vld [vmem:[#allocation98_spill] sm:$0xff] }
0x1024   : > { %v13288_v57 = vcombine.high %v18565_v14, %v18568_v61  ;;  %v13289_v23 = vcombine.low %v18577_v15, %v18582_v9  ;;  %v13290_v5 = vcombine.high %v18577_v15, %v18582_v9  ;;  %v13296_v37 = vcombine.high %v18585_v6, %v18588_v13  ;;  %v2428_v14 = vld [vmem:[%s16724_s24 + $0x528] sm:$0xff] }
0x1025   : > { %v15340_v34 = vpop.eup %15339  ;;  %v8028_v55 = vadd.f32 %v8012_v27, %v18535_v51  ;;  %v8027_v32 = vadd.f32 %v8011_v31, %v18532_v50  ;;  %v8030_v22 = vadd.f32 %v8014_v4, %v18515_v42  ;;  %v8029_v41 = vadd.f32 %v8013_v38, %v18512_v26  ;;  %v2420_v4 = vld [vmem:[%s16724_s24 + $0x4e8] sm:$0xff]  ;;  %v19801_v38 = vld [vmem:[#allocation63_spill] sm:$0xff] }
0x1026   : > { %v7984_v48 = vmul.f32 %v15340_v34, %v18404_v54  ;;  %v7983_v49 = vmul.f32 %v15340_v34, %v18401_v60  ;;  %v7986_v46 = vmul.f32 %v15340_v34, %v18412_v63  ;;  %v7985_v9 = vmul.f32 %v15340_v34, %v18409_v1  ;;  %v19794_v63 = vld [vmem:[#allocation99_spill] sm:$0xff] }
0x1027   : > { %v15342_v21 = vpop.eup %15341  ;;  %v18611_v30 = vpack.c.bf16 %v8028_v55, %v8024_v29  ;;  %v18613_v47 = vpack.c.bf16 %v8027_v32, %v8023_v62  ;;  %v18615_v51 = vpack.c.bf16 %v8030_v22, %v8026_v53  ;;  %v18617_v50 = vpack.c.bf16 %v8029_v41, %v8025_v39  ;;  %v19800_v53 = vld [vmem:[#allocation65_spill] sm:$0xff]  ;;  %v2427_v32 = vld [vmem:[%s16724_s24 + $0x520] sm:$0xff]  ;;  %v2424_v22 = vld [vmem:[%s16724_s24 + $0x508] sm:$0xff] }
0x1028   : > { %v7988_v26 = vmul.f32 %v15342_v21, %v18418_v11  ;;  %v8016_v54 = vmul.f32 %v8000_v8, %v7984_v48  ;;  %v7987_v60 = vmul.f32 %v15342_v21, %v18415_v3  ;;  %v8015_v42 = vmul.f32 %v7999_v59, %v7983_v49  ;;  %v2408_v59 = vld [vmem:[%s16724_s24 + $0x488] sm:$0xff]  ;;  %v2431_v48 = vld [vmem:[%s16724_s24 + $0x540] sm:$0xff] }
0x1029   : > { %v8006_v12 = vadd.f32 1.0, %v19794_v63  ;;  %9435 = vmatprep.mubr.bf16.mxu0 %v18611_v30  ;;  %9541 = vmatprep.mubr.bf16.mxu1 %v18611_v30  ;;  %v7990_v1 = vmul.f32 %v15342_v21, %v18430_v20  ;;  %v8018_v15 = vmul.f32 %v18562_v24, %v7986_v46  ;;  %v7989_v28 = vmul.f32 %v15342_v21, %v18427_v16  ;;  %v2412_v8 = vld [vmem:[%s16724_s24 + $0x4a8] sm:$0xff]  ;;  %v2435_v49 = vld [vmem:[%s16724_s24 + $0x560] sm:$0xff] }
0x102a   : > { %v8001_v19 = vadd.f32 1.0, %v19795_v56  ;;  %9436 = vmatmul.mubr.bf16.vlgmr.msra.gmra.mrb[68].mxu0 %v18613_v47  ;;  %9542 = vmatmul.mubr.bf16.vlgmr.msra.gmra.mrb[116].mxu1 %v18613_v47  ;;  %v8020_v3 = vmul.f32 %v8004_v52, %v7988_v26  ;;  %v8032_v11 = vadd.f32 %v8016_v54, %v18550_v7  ;;  %v8019_v44 = vmul.f32 %v8003_v45, %v7987_v60  ;;  %v2432_v46 = vld [vmem:[%s16724_s24 + $0x548] sm:$0xff]  ;;  %v2443_v63 = vld [vmem:[%s16724_s24 + $0x5a0] sm:$0xff] }
0x102b   : > { %v8005_v2 = vadd.f32 1.0, %v19796_v0  ;;  %v19797_v20 = vcombine.low %v18467_v36, %v18470_v58  ;;  %v19798_v16 = vcombine.low %v18473_v10, %v18478_v17  ;;  %v8031_v24 = vadd.f32 %v8015_v42, %v18547_v43  ;;  %v19799_v58 = vld [vmem:[#allocation82_spill] sm:$0xff]  ;;  %v2415_v17 = vld [vmem:[%s16724_s24 + $0x4c0] sm:$0xff] }
0x102c   : > { %v8022_v52 = vmul.f32 %v8006_v12, %v7990_v1  ;;  %v8034_v7 = vadd.f32 %v8018_v15, %v18525_v25  ;;  %v8036_v45 = vadd.f32 %v8020_v3, %v18559_v18  ;;  %v8035_v29 = vadd.f32 %v8019_v44, %v18553_v40  ;;  %v2419_v18 = vld [vmem:[%s16724_s24 + $0x4e0] sm:$0xff]  ;;  %v2416_v40 = vld [vmem:[%s16724_s24 + $0x4c8] sm:$0xff] }
0x102d   : > { %9457 = vmatpush1.bf16.msra.mxu0 %v19797_v20  ;;  %9563 = vmatpush1.bf16.msra.mxu1 %v19798_v16  ;;  %v8017_v36 = vmul.f32 %v8001_v19, %v7985_v9  ;;  %v5111_v62 = vadd.f32 %v19799_v58, %v18494_v35  ;;  %v13298_v10 = vcombine.high %v2408_v59, %v2412_v8  ;;  %v2436_v9 = vld [vmem:[%s16724_s24 + $0x568] sm:$0xff]  ;;  %v2439_v42 = vld [vmem:[%s16724_s24 + $0x580] sm:$0xff] }
0x102e   : > { %9458 = vmatprep.subr.bf16.mxu0 %v13288_v57  ;;  %9564 = vmatprep.subr.bf16.mxu1 %v13290_v5  ;;  %v8038_v43 = vadd.f32 %v8022_v52, %v19800_v53  ;;  %v8021_v39 = vmul.f32 %v8005_v2, %v7989_v28  ;;  %v18648_v27 = vpack.c.bf16 %v8036_v45, %v8032_v11  ;;  %v2440_v12 = vld [vmem:[%s16724_s24 + $0x588] sm:$0xff]  ;;  %v2447_v3 = vld [vmem:[%s16724_s24 + $0x5c0] sm:$0xff] }
0x102f   : > { %v13295_v25 = vcombine.low %v18585_v6, %v18588_v13  ;;  %v18652_v31 = vpack.c.bf16 %v8035_v29, %v8031_v24  ;;  %v8033_v35 = vadd.f32 %v8017_v36, %v19801_v38  ;;  %v13297_v57 = vcombine.low %v2408_v59, %v2412_v8  ;;  %v2423_v6 = vld [vmem:[%s16724_s24 + $0x500] sm:$0xff]  ;;  %v2444_v1 = vld [vmem:[%s16724_s24 + $0x5a8] sm:$0xff] }
0x1030   : > { %v18661_v5 = vpack.c.bf16 %v8038_v43, %v8034_v7  ;;  %v8037_v34 = vadd.f32 %v8021_v39, %v5111_v62  ;;  %9445 = vmatprep.mubr.bf16.mxu0 %v18648_v27  ;;  %9551 = vmatprep.mubr.bf16.mxu1 %v18648_v27  ;;  %v13304_v13 = vcombine.high %v2415_v17, %v2419_v18  ;;  %v2451_v11 = vld [vmem:[%s16724_s24 + $0x5e0] sm:$0xff]  ;;  %v2448_v59 = vld [vmem:[%s16724_s24 + $0x5c8] sm:$0xff] }
0x1031   : > { %9459 = vmatpush1.bf16.msra.mxu0 %v13287_v33  ;;  %9565 = vmatpush1.bf16.msra.mxu1 %v13289_v23  ;;  %v13306_v55 = vcombine.high %v2416_v40, %v2420_v4  ;;  %v13303_v33 = vcombine.low %v2415_v17, %v2419_v18  ;;  %v13305_v23 = vcombine.low %v2416_v40, %v2420_v4  ;;  %v2452_v8 = vld [vmem:[%s16724_s24 + $0x5e8] sm:$0xff]  ;;  %v2455_v16 = vld [vmem:[%s16724_s24 + $0x600] sm:$0xff] }
0x1032   : > { %9460 = vmatprep.subr.bf16.mxu0 %v13296_v37  ;;  %9566 = vmatprep.subr.bf16.mxu1 %v13298_v10  ;;  %v18669_v61 = vpack.c.bf16 %v8037_v34, %v8033_v35  ;;  %v13312_v37 = vcombine.high %v2423_v6, %v2427_v32  ;;  %v13314_v41 = vcombine.high %v2424_v22, %v2428_v14  ;;  %v2459_v24 = vld [vmem:[%s16724_s24 + $0x620] sm:$0xff]  ;;  %v2456_v52 = vld [vmem:[%s16724_s24 + $0x608] sm:$0xff] }
0x1033   : > { %9446 = vmatmul.mubr.bf16.gmra.mrb[72].mxu0 %v18652_v31  ;;  %9552 = vmatmul.mubr.bf16.gmra.mrb[120].mxu1 %v18652_v31  ;;  %v13311_v21 = vcombine.low %v2423_v6, %v2427_v32  ;;  %v13313_v26 = vcombine.low %v2424_v22, %v2428_v14  ;;  %v13320_v54 = vcombine.high %v2431_v48, %v2435_v49  ;;  %v2460_v7 = vld [vmem:[%s16724_s24 + $0x628] sm:$0xff]  ;;  %v2463_v62 = vld [vmem:[%s16724_s24 + $0x640] sm:$0xff] }
0x1034   : > { %9488 = vmatprep.mubr.bf16.mxu0 %v18615_v51  ;;  %9594 = vmatprep.mubr.bf16.mxu1 %v18615_v51  ;;  %v13322_v60 = vcombine.high %v2432_v46, %v2436_v9  ;;  %v13319_v15 = vcombine.low %v2431_v48, %v2435_v49  ;;  %v13321_v28 = vcombine.low %v2432_v46, %v2436_v9  ;;  %v2467_v10 = vld [vmem:[%s16724_s24 + $0x660] sm:$0xff]  ;;  %v2464_v17 = vld [vmem:[%s16724_s24 + $0x648] sm:$0xff] }
0x1035   : > { %9461 = vmatpush1.bf16.msra.mxu0 %v13295_v25  ;;  %9567 = vmatpush1.bf16.msra.mxu1 %v13297_v57  ;;  %v13328_v56 = vcombine.high %v2439_v42, %v2443_v63  ;;  %v13330_v19 = vcombine.high %v2440_v12, %v2444_v1  ;;  %v13327_v44 = vcombine.low %v2439_v42, %v2443_v63  ;;  %v2468_v53 = vld [vmem:[%s16724_s24 + $0x668] sm:$0xff]  ;;  %v2471_v40 = vld [vmem:[%s16724_s24 + $0x680] sm:$0xff] }
0x1036   : > { %9462 = vmatprep.subr.bf16.mxu0 %v13304_v13  ;;  %9568 = vmatprep.subr.bf16.mxu1 %v13306_v55  ;;  %v13329_v0 = vcombine.low %v2440_v12, %v2444_v1  ;;  %v13336_v2 = vcombine.high %v2447_v3, %v2451_v11  ;;  %v13338_v20 = vcombine.high %v2448_v59, %v2452_v8  ;;  %v2475_v4 = vld [vmem:[%s16724_s24 + $0x6a0] sm:$0xff]  ;;  %v2472_v38 = vld [vmem:[%s16724_s24 + $0x688] sm:$0xff] }
0x1037   : > { %v13335_v45 = vcombine.low %v2447_v3, %v2451_v11  ;;  %v13337_v29 = vcombine.low %v2448_v59, %v2452_v8  ;;  %v13344_v36 = vcombine.high %v2455_v16, %v2459_v24  ;;  %v13346_v58 = vcombine.high %v2456_v52, %v2460_v7  ;;  %v2476_v35 = vld [vmem:[%s16724_s24 + $0x6a8] sm:$0xff]  ;;  %v2479_v55 = vld [vmem:[%s16724_s24 + $0x6c0] sm:$0xff] }
0x1038   : > { %v13343_v43 = vcombine.low %v2455_v16, %v2459_v24  ;;  %v13345_v39 = vcombine.low %v2456_v52, %v2460_v7  ;;  %v13352_v25 = vcombine.high %v2463_v62, %v2467_v10  ;;  %v13354_v18 = vcombine.high %v2464_v17, %v2468_v53  ;;  %v2483_v32 = vld [vmem:[%s16724_s24 + $0x6e0] sm:$0xff]  ;;  %v2480_v22 = vld [vmem:[%s16724_s24 + $0x6c8] sm:$0xff] }
0x1039   : > { %9463 = vmatpush1.bf16.msra.mxu0 %v13303_v33  ;;  %9569 = vmatpush1.bf16.msra.mxu1 %v13305_v23  ;;  %v13351_v57 = vcombine.low %v2463_v62, %v2467_v10  ;;  %v13353_v34 = vcombine.low %v2464_v17, %v2468_v53  ;;  %v13360_v6 = vcombine.high %v2471_v40, %v2475_v4  ;;  %v2484_v14 = vld [vmem:[%s16724_s24 + $0x6e8] sm:$0xff]  ;;  %v2487_v48 = vld [vmem:[%s16724_s24 + $0x700] sm:$0xff]  ;;  %v2265_v62 = vld [vmem:[%s16724_s24 + $0x10] sm:$0xff] }
0x103a   : > { %9464 = vmatprep.subr.bf16.mxu0 %v13312_v37  ;;  %9570 = vmatprep.subr.bf16.mxu1 %v13314_v41  ;;  %v13362_v13 = vcombine.high %v2472_v38, %v2476_v35  ;;  %v13359_v33 = vcombine.low %v2471_v40, %v2475_v4  ;;  %v13361_v23 = vcombine.low %v2472_v38, %v2476_v35  ;;  %v2491_v49 = vld [vmem:[%s16724_s24 + $0x720] sm:$0xff]  ;;  %v2488_v46 = vld [vmem:[%s16724_s24 + $0x708] sm:$0xff]  ;;  %v2269_v10 = vld [vmem:[%s16724_s24 + $0x30] sm:$0xff] }
0x103b   : > { %v13368_v37 = vcombine.high %v2479_v55, %v2483_v32  ;;  %v13370_v41 = vcombine.high %v2480_v22, %v2484_v14  ;;  %v2492_v9 = vld [vmem:[%s16724_s24 + $0x728] sm:$0xff]  ;;  %v2495_v42 = vld [vmem:[%s16724_s24 + $0x740] sm:$0xff]  ;;  %v2266_v17 = vld [vmem:[%s16724_s24 + $0x18] sm:$0xff] }
0x103c   : > { %v2499_v63 = vld [vmem:[%s16724_s24 + $0x760] sm:$0xff]  ;;  %v2496_v12 = vld [vmem:[%s16724_s24 + $0x748] sm:$0xff]  ;;  %v2270_v53 = vld [vmem:[%s16724_s24 + $0x38] sm:$0xff] }
0x103d   : > { %9465 = vmatpush1.bf16.msra.mxu0 %v13311_v21  ;;  %9571 = vmatpush1.bf16.msra.mxu1 %v13313_v26  ;;  %v13367_v21 = vcombine.low %v2479_v55, %v2483_v32  ;;  %v13369_v26 = vcombine.low %v2480_v22, %v2484_v14  ;;  %v2500_v1 = vld [vmem:[%s16724_s24 + $0x768] sm:$0xff]  ;;  %v2503_v3 = vld [vmem:[%s16724_s24 + $0x780] sm:$0xff]  ;;  %v2273_v40 = vld [vmem:[%s16724_s24 + $0x50] sm:$0xff] }
0x103e   : > { %9466 = vmatprep.subr.bf16.mxu0 %v13320_v54  ;;  %9572 = vmatprep.subr.bf16.mxu1 %v13322_v60  ;;  %v13376_v54 = vcombine.high %v2487_v48, %v2491_v49  ;;  %v13378_v60 = vcombine.high %v2488_v46, %v2492_v9  ;;  %v2507_v11 = vld [vmem:[%s16724_s24 + $0x7a0] sm:$0xff]  ;;  %v2504_v59 = vld [vmem:[%s16724_s24 + $0x788] sm:$0xff]  ;;  %v2277_v4 = vld [vmem:[%s16724_s24 + $0x70] sm:$0xff] }
0x103f   : > { %v2508_v8 = vld [vmem:[%s16724_s24 + $0x7a8] sm:$0xff]  ;;  %v2511_v16 = vld [vmem:[%s16724_s24 + $0x7c0] sm:$0xff]  ;;  %v2274_v38 = vld [vmem:[%s16724_s24 + $0x58] sm:$0xff] }
0x1040   : > { %v2515_v24 = vld [vmem:[%s16724_s24 + $0x7e0] sm:$0xff]  ;;  %v2512_v52 = vld [vmem:[%s16724_s24 + $0x7c8] sm:$0xff]  ;;  %v2278_v35 = vld [vmem:[%s16724_s24 + $0x78] sm:$0xff] }
0x1041   : > { %9467 = vmatpush1.bf16.msra.mxu0 %v13319_v15  ;;  %9573 = vmatpush1.bf16.msra.mxu1 %v13321_v28  ;;  %v13375_v15 = vcombine.low %v2487_v48, %v2491_v49  ;;  %v13377_v28 = vcombine.low %v2488_v46, %v2492_v9  ;;  %v2516_v7 = vld [vmem:[%s16724_s24 + $0x7e8] sm:$0xff]  ;;  %v2281_v55 = vld [vmem:[%s16724_s24 + $0x90] sm:$0xff]  ;;  %v2282_v22 = vld [vmem:[%s16724_s24 + $0x98] sm:$0xff] }
0x1042   : > { %9468 = vmatprep.subr.bf16.mxu0 %v13328_v56  ;;  %9574 = vmatprep.subr.bf16.mxu1 %v13330_v19  ;;  %v13384_v56 = vcombine.high %v2495_v42, %v2499_v63  ;;  %v13386_v19 = vcombine.high %v2496_v12, %v2500_v1  ;;  %v2285_v32 = vld [vmem:[%s16724_s24 + $0xb0] sm:$0xff]  ;;  %v2286_v14 = vld [vmem:[%s16724_s24 + $0xb8] sm:$0xff] }
0x1043   : > { %v2289_v48 = vld [vmem:[%s16724_s24 + $0xd0] sm:$0xff]  ;;  %v2290_v46 = vld [vmem:[%s16724_s24 + $0xd8] sm:$0xff] }
0x1044   : > { %v2293_v49 = vld [vmem:[%s16724_s24 + $0xf0] sm:$0xff]  ;;  %v2294_v9 = vld [vmem:[%s16724_s24 + $0xf8] sm:$0xff] }
0x1045   : > { %9469 = vmatpush1.bf16.msra.mxu0 %v13327_v44  ;;  %9575 = vmatpush1.bf16.msra.mxu1 %v13329_v0  ;;  %v13383_v44 = vcombine.low %v2495_v42, %v2499_v63  ;;  %v13385_v0 = vcombine.low %v2496_v12, %v2500_v1  ;;  %v2297_v42 = vld [vmem:[%s16724_s24 + $0x110] sm:$0xff]  ;;  %v2298_v12 = vld [vmem:[%s16724_s24 + $0x118] sm:$0xff] }
0x1046   : > { %9470 = vmatprep.subr.bf16.mxu0 %v13336_v2  ;;  %9576 = vmatprep.subr.bf16.mxu1 %v13338_v20  ;;  %v13392_v2 = vcombine.high %v2503_v3, %v2507_v11  ;;  %v13394_v20 = vcombine.high %v2504_v59, %v2508_v8  ;;  %v2301_v63 = vld [vmem:[%s16724_s24 + $0x130] sm:$0xff]  ;;  %v2302_v1 = vld [vmem:[%s16724_s24 + $0x138] sm:$0xff] }
0x1049   : > { %9471 = vmatpush1.bf16.msra.mxu0 %v13335_v45  ;;  %9577 = vmatpush1.bf16.msra.mxu1 %v13337_v29  ;;  %v13391_v45 = vcombine.low %v2503_v3, %v2507_v11  ;;  %v13393_v29 = vcombine.low %v2504_v59, %v2508_v8  ;;  %v2305_v3 = vld [vmem:[%s16724_s24 + $0x150] sm:$0xff]  ;;  %v2306_v59 = vld [vmem:[%s16724_s24 + $0x158] sm:$0xff] }
0x104a   : > { %9472 = vmatprep.subr.bf16.mxu0 %v13344_v36  ;;  %9578 = vmatprep.subr.bf16.mxu1 %v13346_v58  ;;  %v13400_v36 = vcombine.high %v2511_v16, %v2515_v24  ;;  %v13402_v58 = vcombine.high %v2512_v52, %v2516_v7  ;;  %v2309_v11 = vld [vmem:[%s16724_s24 + $0x170] sm:$0xff]  ;;  %v2310_v8 = vld [vmem:[%s16724_s24 + $0x178] sm:$0xff] }
0x104d   : > { %9473 = vmatpush1.bf16.msra.mxu0 %v13343_v43  ;;  %9579 = vmatpush1.bf16.msra.mxu1 %v13345_v39  ;;  %v13399_v43 = vcombine.low %v2511_v16, %v2515_v24  ;;  %v13401_v39 = vcombine.low %v2512_v52, %v2516_v7  ;;  %v2317_v16 = vld [vmem:[%s16724_s24 + $0x1b0] sm:$0xff]  ;;  %v2314_v24 = vld [vmem:[%s16724_s24 + $0x198] sm:$0xff]  ;;  %v13195_v7 = vcombine.low %v2305_v3, %v2309_v11 }
0x104e   : > { %9474 = vmatprep.subr.bf16.mxu0 %v13352_v25  ;;  %9580 = vmatprep.subr.bf16.mxu1 %v13354_v18  ;;  %v13156_v25 = vcombine.high %v2265_v62, %v2269_v10  ;;  %v13158_v18 = vcombine.high %v2266_v17, %v2270_v53  ;;  %v2318_v52 = vld [vmem:[%s16724_s24 + $0x1b8] sm:$0xff] }
0x1051   : > { %9475 = vmatpush1.bf16.msra.mxu0 %v13351_v57  ;;  %9581 = vmatpush1.bf16.msra.mxu1 %v13353_v34  ;;  %v13155_v57 = vcombine.low %v2265_v62, %v2269_v10  ;;  %v13157_v34 = vcombine.low %v2266_v17, %v2270_v53  ;;  %v2325_v62 = vld [vmem:[%s16724_s24 + $0x1f0] sm:$0xff]  ;;  %v2322_v10 = vld [vmem:[%s16724_s24 + $0x1d8] sm:$0xff] }
0x1052   : > { %9476 = vmatprep.subr.bf16.mxu0 %v13360_v6  ;;  %9582 = vmatprep.subr.bf16.mxu1 %v13362_v13  ;;  %v13164_v6 = vcombine.high %v2273_v40, %v2277_v4  ;;  %v13166_v13 = vcombine.high %v2274_v38, %v2278_v35  ;;  %v2326_v17 = vld [vmem:[%s16724_s24 + $0x1f8] sm:$0xff] }
0x1055   : > { %9477 = vmatpush1.bf16.msra.mxu0 %v13359_v33  ;;  %9583 = vmatpush1.bf16.msra.mxu1 %v13361_v23  ;;  %v13163_v33 = vcombine.low %v2273_v40, %v2277_v4  ;;  %v13165_v23 = vcombine.low %v2274_v38, %v2278_v35  ;;  %v2333_v40 = vld [vmem:[%s16724_s24 + $0x230] sm:$0xff]  ;;  %v2330_v4 = vld [vmem:[%s16724_s24 + $0x218] sm:$0xff] }
0x1056   : > { %9478 = vmatprep.subr.bf16.mxu0 %v13368_v37  ;;  %9584 = vmatprep.subr.bf16.mxu1 %v13370_v41  ;;  %v13172_v37 = vcombine.high %v2281_v55, %v2285_v32  ;;  %v13174_v41 = vcombine.high %v2282_v22, %v2286_v14  ;;  %v2334_v38 = vld [vmem:[%s16724_s24 + $0x238] sm:$0xff] }
0x1059   : > { %9479 = vmatpush1.bf16.msra.mxu0 %v13367_v21  ;;  %9585 = vmatpush1.bf16.msra.mxu1 %v13369_v26  ;;  %v13171_v21 = vcombine.low %v2281_v55, %v2285_v32  ;;  %v13173_v26 = vcombine.low %v2282_v22, %v2286_v14  ;;  %v2341_v55 = vld [vmem:[%s16724_s24 + $0x270] sm:$0xff]  ;;  %v2338_v32 = vld [vmem:[%s16724_s24 + $0x258] sm:$0xff] }
0x105a   : > { %9480 = vmatprep.subr.bf16.mxu0 %v13376_v54  ;;  %9586 = vmatprep.subr.bf16.mxu1 %v13378_v60  ;;  %v13180_v54 = vcombine.high %v2289_v48, %v2293_v49  ;;  %v13182_v60 = vcombine.high %v2290_v46, %v2294_v9  ;;  %v2342_v22 = vld [vmem:[%s16724_s24 + $0x278] sm:$0xff] }
0x105d   : > { %9481 = vmatpush1.bf16.msra.mxu0 %v13375_v15  ;;  %9587 = vmatpush1.bf16.msra.mxu1 %v13377_v28  ;;  %v13179_v15 = vcombine.low %v2289_v48, %v2293_v49  ;;  %v13181_v28 = vcombine.low %v2290_v46, %v2294_v9  ;;  %v2349_v48 = vld [vmem:[%s16724_s24 + $0x2b0] sm:$0xff]  ;;  %v2346_v49 = vld [vmem:[%s16724_s24 + $0x298] sm:$0xff] }
0x105e   : > { %9482 = vmatprep.subr.bf16.mxu0 %v13384_v56  ;;  %9588 = vmatprep.subr.bf16.mxu1 %v13386_v19  ;;  %v13188_v56 = vcombine.high %v2297_v42, %v2301_v63  ;;  %v13190_v19 = vcombine.high %v2298_v12, %v2302_v1  ;;  %v2350_v46 = vld [vmem:[%s16724_s24 + $0x2b8] sm:$0xff] }
0x1061   : > { %9483 = vmatpush1.bf16.msra.mxu0 %v13383_v44  ;;  %9589 = vmatpush1.bf16.msra.mxu1 %v13385_v0  ;;  %v13187_v44 = vcombine.low %v2297_v42, %v2301_v63  ;;  %v13196_v0 = vcombine.high %v2305_v3, %v2309_v11  ;;  %v2357_v42 = vld [vmem:[%s16724_s24 + $0x2f0] sm:$0xff]  ;;  %v2354_v63 = vld [vmem:[%s16724_s24 + $0x2d8] sm:$0xff] }
0x1062   : > { %9484 = vmatprep.subr.bf16.mxu0 %v13392_v2  ;;  %9590 = vmatprep.subr.bf16.mxu1 %v13394_v20  ;;  %v13198_v2 = vcombine.high %v2306_v59, %v2310_v8  ;;  %v2313_v20 = vld [vmem:[%s16724_s24 + $0x190] sm:$0xff]  ;;  %v2362_v11 = vld [vmem:[%s16724_s24 + $0x318] sm:$0xff] }
0x1063   : > { %v13203_v53 = vcombine.low %v2313_v20, %v2317_v16  ;;  %v2365_v3 = vld [vmem:[%s16724_s24 + $0x330] sm:$0xff] }
0x1065   : > { %9485 = vmatpush1.bf16.msra.mxu0 %v13391_v45  ;;  %9591 = vmatpush1.bf16.msra.mxu1 %v13393_v29  ;;  %v13197_v45 = vcombine.low %v2306_v59, %v2310_v8  ;;  %v13204_v29 = vcombine.high %v2313_v20, %v2317_v16  ;;  %v2366_v59 = vld [vmem:[%s16724_s24 + $0x338] sm:$0xff]  ;;  %v2373_v20 = vld [vmem:[%s16724_s24 + $0x370] sm:$0xff] }
0x1066   : > { %9486 = vmatprep.subr.bf16.mxu0 %v13400_v36  ;;  %9592 = vmatprep.subr.bf16.mxu1 %v13402_v58  ;;  %v13206_v36 = vcombine.high %v2314_v24, %v2318_v52  ;;  %v2321_v58 = vld [vmem:[%s16724_s24 + $0x1d0] sm:$0xff]  ;;  %v2370_v16 = vld [vmem:[%s16724_s24 + $0x358] sm:$0xff] }
0x1067   : > { %v13211_v35 = vcombine.low %v2321_v58, %v2325_v62 }
0x1069   : > { %9487 = vmatpush1.bf16.msra.mxu0 %v13399_v43  ;;  %9593 = vmatpush1.bf16.msra.mxu1 %v13401_v39  ;;  %v13205_v43 = vcombine.low %v2314_v24, %v2318_v52  ;;  %v13212_v39 = vcombine.high %v2321_v58, %v2325_v62  ;;  %v2374_v24 = vld [vmem:[%s16724_s24 + $0x378] sm:$0xff]  ;;  %v2381_v58 = vld [vmem:[%s16724_s24 + $0x3b0] sm:$0xff] }
0x106a   : > { %9615 = vmatprep.subr.bf16.mxu0 %v13156_v25  ;;  %9721 = vmatprep.subr.bf16.mxu1 %v13158_v18  ;;  %v13214_v25 = vcombine.high %v2322_v10, %v2326_v17  ;;  %v2329_v18 = vld [vmem:[%s16724_s24 + $0x210] sm:$0xff]  ;;  %v2378_v62 = vld [vmem:[%s16724_s24 + $0x398] sm:$0xff] }
0x106b   : > { %v13219_v14 = vcombine.low %v2329_v18, %v2333_v40 }
0x106c   : > { %9489 = vmatmul.mubr.bf16.vlgmr.msra.gmra.mrb[68].mxu0 %v18617_v50  ;;  %9595 = vmatmul.mubr.bf16.vlgmr.msra.gmra.mrb[116].mxu1 %v18617_v50 }
0x106d   : > { %9498 = vmatprep.mubr.bf16.mxu0 %v18661_v5  ;;  %9604 = vmatprep.mubr.bf16.mxu1 %v18661_v5 }
0x106e   : > { %9616 = vmatpush1.bf16.msra.mxu0 %v13155_v57  ;;  %9722 = vmatpush1.bf16.msra.mxu1 %v13157_v34  ;;  %v13213_v57 = vcombine.low %v2322_v10, %v2326_v17  ;;  %v13220_v34 = vcombine.high %v2329_v18, %v2333_v40  ;;  %v2382_v10 = vld [vmem:[%s16724_s24 + $0x3b8] sm:$0xff]  ;;  %v2389_v18 = vld [vmem:[%s16724_s24 + $0x3f0] sm:$0xff] }
0x106f   : > { %9617 = vmatprep.subr.bf16.mxu0 %v13164_v6  ;;  %9723 = vmatprep.subr.bf16.mxu1 %v13166_v13  ;;  %v13222_v6 = vcombine.high %v2330_v4, %v2334_v38  ;;  %v2337_v13 = vld [vmem:[%s16724_s24 + $0x250] sm:$0xff]  ;;  %v2386_v40 = vld [vmem:[%s16724_s24 + $0x3d8] sm:$0xff] }
0x1070   : > { %v13227_v9 = vcombine.low %v2337_v13, %v2341_v55 }
0x1072   : > { %9618 = vmatpush1.bf16.msra.mxu0 %v13163_v33  ;;  %9724 = vmatpush1.bf16.msra.mxu1 %v13165_v23  ;;  %v13221_v33 = vcombine.low %v2330_v4, %v2334_v38  ;;  %v13228_v23 = vcombine.high %v2337_v13, %v2341_v55  ;;  %v2390_v4 = vld [vmem:[%s16724_s24 + $0x3f8] sm:$0xff]  ;;  %v2397_v13 = vld [vmem:[%s16724_s24 + $0x430] sm:$0xff] }
0x1073   : > { %9619 = vmatprep.subr.bf16.mxu0 %v13172_v37  ;;  %9725 = vmatprep.subr.bf16.mxu1 %v13174_v41  ;;  %v13230_v37 = vcombine.high %v2338_v32, %v2342_v22  ;;  %v2345_v41 = vld [vmem:[%s16724_s24 + $0x290] sm:$0xff]  ;;  %v2394_v55 = vld [vmem:[%s16724_s24 + $0x418] sm:$0xff] }
0x1074   : > { %9499 = vmatmul.mubr.bf16.gmra.mrb[72].mxu0 %v18669_v61  ;;  %9605 = vmatmul.mubr.bf16.gmra.mrb[120].mxu1 %v18669_v61 }
0x1075   : > { %9647 = vmatprep.mubr.bf16.mxu0 %v18611_v30  ;;  %9753 = vmatprep.mubr.bf16.mxu1 %v18611_v30  ;;  %v13189_v30 = vcombine.low %v2298_v12, %v2302_v1  ;;  %v2358_v12 = vld [vmem:[%s16724_s24 + $0x2f8] sm:$0xff]  ;;  %v13235_v1 = vcombine.low %v2345_v41, %v2349_v48 }
0x1076   : > { %9620 = vmatpush1.bf16.msra.mxu0 %v13171_v21  ;;  %9726 = vmatpush1.bf16.msra.mxu1 %v13173_v26  ;;  %v13229_v21 = vcombine.low %v2338_v32, %v2342_v22  ;;  %v13236_v26 = vcombine.high %v2345_v41, %v2349_v48  ;;  %v2398_v32 = vld [vmem:[%s16724_s24 + $0x438] sm:$0xff]  ;;  %v2405_v41 = vld [vmem:[%s16724_s24 + $0x470] sm:$0xff] }
0x1077   : > { %9621 = vmatprep.subr.bf16.mxu0 %v13180_v54  ;;  %9727 = vmatprep.subr.bf16.mxu1 %v13182_v60  ;;  %v13238_v54 = vcombine.high %v2346_v49, %v2350_v46  ;;  %v2353_v60 = vld [vmem:[%s16724_s24 + $0x2d0] sm:$0xff]  ;;  %v2402_v48 = vld [vmem:[%s16724_s24 + $0x458] sm:$0xff] }
0x1078   : > { %v13243_v8 = vcombine.low %v2353_v60, %v2357_v42 }
0x107a   : > { %9622 = vmatpush1.bf16.msra.mxu0 %v13179_v15  ;;  %9728 = vmatpush1.bf16.msra.mxu1 %v13181_v28  ;;  %v13237_v15 = vcombine.low %v2346_v49, %v2350_v46  ;;  %v13244_v28 = vcombine.high %v2353_v60, %v2357_v42  ;;  %v2406_v49 = vld [vmem:[%s16724_s24 + $0x478] sm:$0xff]  ;;  %v2413_v60 = vld [vmem:[%s16724_s24 + $0x4b0] sm:$0xff] }
0x107b   : > { %9623 = vmatprep.subr.bf16.mxu0 %v13188_v56  ;;  %9729 = vmatprep.subr.bf16.mxu1 %v13190_v19  ;;  %v13246_v56 = vcombine.high %v2354_v63, %v2358_v12  ;;  %v2361_v19 = vld [vmem:[%s16724_s24 + $0x310] sm:$0xff]  ;;  %v2410_v42 = vld [vmem:[%s16724_s24 + $0x498] sm:$0xff] }
0x107c   : > { %v13251_v52 = vcombine.low %v2361_v19, %v2365_v3 }
0x107e   : > { %9624 = vmatpush1.bf16.msra.mxu0 %v13187_v44  ;;  %9730 = vmatpush1.bf16.msra.mxu1 %v13189_v30  ;;  %v13245_v44 = vcombine.low %v2354_v63, %v2358_v12  ;;  %v13252_v30 = vcombine.high %v2361_v19, %v2365_v3  ;;  %v2414_v63 = vld [vmem:[%s16724_s24 + $0x4b8] sm:$0xff] }
0x107f   : > { %9625 = vmatprep.subr.bf16.mxu0 %v13196_v0  ;;  %9731 = vmatprep.subr.bf16.mxu1 %v13198_v2  ;;  %v13254_v0 = vcombine.high %v2362_v11, %v2366_v59  ;;  %v2369_v2 = vld [vmem:[%s16724_s24 + $0x350] sm:$0xff]  ;;  %v2418_v19 = vld [vmem:[%s16724_s24 + $0x4d8] sm:$0xff] }
0x1080   : > { %v13259_v17 = vcombine.low %v2369_v2, %v2373_v20  ;;  %v2422_v3 = vld [vmem:[%s16724_s24 + $0x4f8] sm:$0xff] }
0x1082   : > { %9626 = vmatpush1.bf16.msra.mxu0 %v13195_v7  ;;  %9732 = vmatpush1.bf16.msra.mxu1 %v13197_v45  ;;  %v13253_v7 = vcombine.low %v2362_v11, %v2366_v59  ;;  %v13260_v45 = vcombine.high %v2369_v2, %v2373_v20  ;;  %v13301_v59 = vcombine.low %v2410_v42, %v2414_v63  ;;  %v2430_v2 = vld [vmem:[%s16724_s24 + $0x538] sm:$0xff] }
0x1083   : > { %9627 = vmatprep.subr.bf16.mxu0 %v13204_v29  ;;  %9733 = vmatprep.subr.bf16.mxu1 %v13206_v36  ;;  %v13262_v29 = vcombine.high %v2370_v16, %v2374_v24  ;;  %v2377_v36 = vld [vmem:[%s16724_s24 + $0x390] sm:$0xff] }
0x1084   : > { %v13267_v38 = vcombine.low %v2377_v36, %v2381_v58 }
0x1086   : > { %9628 = vmatpush1.bf16.msra.mxu0 %v13203_v53  ;;  %9734 = vmatpush1.bf16.msra.mxu1 %v13205_v43  ;;  %v13261_v53 = vcombine.low %v2370_v16, %v2374_v24  ;;  %v13268_v43 = vcombine.high %v2377_v36, %v2381_v58  ;;  %v13309_v16 = vcombine.low %v2418_v19, %v2422_v3 }
0x1087   : > { %9629 = vmatprep.subr.bf16.mxu0 %v13212_v39  ;;  %9735 = vmatprep.subr.bf16.mxu1 %v13214_v25  ;;  %v13270_v39 = vcombine.high %v2378_v62, %v2382_v10  ;;  %v2385_v25 = vld [vmem:[%s16724_s24 + $0x3d0] sm:$0xff] }
0x1088   : > { %v13275_v22 = vcombine.low %v2385_v25, %v2389_v18 }
0x108a   : > { %9630 = vmatpush1.bf16.msra.mxu0 %v13211_v35  ;;  %9736 = vmatpush1.bf16.msra.mxu1 %v13213_v57  ;;  %v13269_v35 = vcombine.low %v2378_v62, %v2382_v10  ;;  %v13276_v57 = vcombine.high %v2385_v25, %v2389_v18  ;;  %v2441_v10 = vld [vmem:[%s16724_s24 + $0x590] sm:$0xff] }
0x108b   : > { %9631 = vmatprep.subr.bf16.mxu0 %v13220_v34  ;;  %9737 = vmatprep.subr.bf16.mxu1 %v13222_v6  ;;  %v13278_v34 = vcombine.high %v2386_v40, %v2390_v4  ;;  %v2393_v6 = vld [vmem:[%s16724_s24 + $0x410] sm:$0xff] }
0x108c   : > { %v13283_v46 = vcombine.low %v2393_v6, %v2397_v13 }
0x108e   : > { %9632 = vmatpush1.bf16.msra.mxu0 %v13219_v14  ;;  %9738 = vmatpush1.bf16.msra.mxu1 %v13221_v33  ;;  %v13277_v14 = vcombine.low %v2386_v40, %v2390_v4  ;;  %v13284_v33 = vcombine.high %v2393_v6, %v2397_v13  ;;  %v2449_v4 = vld [vmem:[%s16724_s24 + $0x5d0] sm:$0xff] }
0x108f   : > { %9633 = vmatprep.subr.bf16.mxu0 %v13228_v23  ;;  %9739 = vmatprep.subr.bf16.mxu1 %v13230_v37  ;;  %v13286_v23 = vcombine.high %v2394_v55, %v2398_v32  ;;  %v2401_v37 = vld [vmem:[%s16724_s24 + $0x450] sm:$0xff] }
0x1090   : > { %v13291_v12 = vcombine.low %v2401_v37, %v2405_v41 }
0x1092   : > { %9634 = vmatpush1.bf16.msra.mxu0 %v13227_v9  ;;  %9740 = vmatpush1.bf16.msra.mxu1 %v13229_v21  ;;  %v13285_v9 = vcombine.low %v2394_v55, %v2398_v32  ;;  %v13292_v21 = vcombine.high %v2401_v37, %v2405_v41  ;;  %v2457_v32 = vld [vmem:[%s16724_s24 + $0x610] sm:$0xff] }
0x1093   : > { %9635 = vmatprep.subr.bf16.mxu0 %v13236_v26  ;;  %9741 = vmatprep.subr.bf16.mxu1 %v13238_v54  ;;  %v13294_v26 = vcombine.high %v2402_v48, %v2406_v49  ;;  %v2409_v54 = vld [vmem:[%s16724_s24 + $0x490] sm:$0xff] }
0x1094   : > { %v13299_v11 = vcombine.low %v2409_v54, %v2413_v60 }
0x1096   : > { %9636 = vmatpush1.bf16.msra.mxu0 %v13235_v1  ;;  %9742 = vmatpush1.bf16.msra.mxu1 %v13237_v15  ;;  %v13293_v1 = vcombine.low %v2402_v48, %v2406_v49  ;;  %v13300_v15 = vcombine.high %v2409_v54, %v2413_v60  ;;  %v2465_v49 = vld [vmem:[%s16724_s24 + $0x650] sm:$0xff] }
0x1097   : > { %9637 = vmatprep.subr.bf16.mxu0 %v13244_v28  ;;  %9743 = vmatprep.subr.bf16.mxu1 %v13246_v56  ;;  %v13302_v28 = vcombine.high %v2410_v42, %v2414_v63  ;;  %v2417_v56 = vld [vmem:[%s16724_s24 + $0x4d0] sm:$0xff] }
0x1098   : > { %v2473_v63 = vld [vmem:[%s16724_s24 + $0x690] sm:$0xff] }
0x109a   : > { %9638 = vmatpush1.bf16.msra.mxu0 %v13243_v8  ;;  %9744 = vmatpush1.bf16.msra.mxu1 %v13245_v44  ;;  %v13310_v8 = vcombine.high %v2418_v19, %v2422_v3  ;;  %v2425_v44 = vld [vmem:[%s16724_s24 + $0x510] sm:$0xff] }
0x109b   : > { %9639 = vmatprep.subr.bf16.mxu0 %v13252_v30  ;;  %9745 = vmatprep.subr.bf16.mxu1 %v13254_v0  ;;  %v2429_v30 = vld [vmem:[%s16724_s24 + $0x530] sm:$0xff]  ;;  %v2426_v0 = vld [vmem:[%s16724_s24 + $0x518] sm:$0xff] }
0x109c   : > { %v13316_v24 = vcombine.high %v2425_v44, %v2429_v30  ;;  %v13315_v36 = vcombine.low %v2425_v44, %v2429_v30  ;;  %v13317_v58 = vcombine.low %v2426_v0, %v2430_v2  ;;  %v2481_v3 = vld [vmem:[%s16724_s24 + $0x6d0] sm:$0xff] }
0x109e   : > { %9640 = vmatpush1.bf16.msra.mxu0 %v13251_v52  ;;  %9746 = vmatpush1.bf16.msra.mxu1 %v13253_v7  ;;  %v13318_v52 = vcombine.high %v2426_v0, %v2430_v2  ;;  %v2437_v7 = vld [vmem:[%s16724_s24 + $0x570] sm:$0xff] }
0x109f   : > { %9641 = vmatprep.subr.bf16.mxu0 %v13260_v45  ;;  %9747 = vmatprep.subr.bf16.mxu1 %v13262_v29  ;;  %v2434_v45 = vld [vmem:[%s16724_s24 + $0x558] sm:$0xff]  ;;  %v2489_v2 = vld [vmem:[%s16724_s24 + $0x710] sm:$0xff] }
0x10a0   : > { %v2438_v29 = vld [vmem:[%s16724_s24 + $0x578] sm:$0xff] }
0x10a1   : > { %v13326_v62 = vcombine.high %v2434_v45, %v2438_v29  ;;  %v13325_v25 = vcombine.low %v2434_v45, %v2438_v29  ;;  %v2497_v29 = vld [vmem:[%s16724_s24 + $0x750] sm:$0xff] }
0x10a2   : > { %9642 = vmatpush1.bf16.msra.mxu0 %v13259_v17  ;;  %9748 = vmatpush1.bf16.msra.mxu1 %v13261_v53  ;;  %v2445_v17 = vld [vmem:[%s16724_s24 + $0x5b0] sm:$0xff]  ;;  %v2442_v53 = vld [vmem:[%s16724_s24 + $0x598] sm:$0xff] }
0x10a3   : > { %9643 = vmatprep.subr.bf16.mxu0 %v13268_v43  ;;  %9749 = vmatprep.subr.bf16.mxu1 %v13270_v39  ;;  %v2446_v43 = vld [vmem:[%s16724_s24 + $0x5b8] sm:$0xff]  ;;  %v13332_v18 = vcombine.high %v2441_v10, %v2445_v17 }
0x10a4   : > { %v13334_v40 = vcombine.high %v2442_v53, %v2446_v43  ;;  %v13333_v6 = vcombine.low %v2442_v53, %v2446_v43  ;;  %v2505_v43 = vld [vmem:[%s16724_s24 + $0x790] sm:$0xff] }
0x10a6   : > { %9644 = vmatpush1.bf16.msra.mxu0 %v13267_v38  ;;  %9750 = vmatpush1.bf16.msra.mxu1 %v13269_v35  ;;  %v2453_v38 = vld [vmem:[%s16724_s24 + $0x5f0] sm:$0xff]  ;;  %v2450_v35 = vld [vmem:[%s16724_s24 + $0x5d8] sm:$0xff] }
0x10a7   : > { %9645 = vmatprep.subr.bf16.mxu0 %v13276_v57  ;;  %9751 = vmatprep.subr.bf16.mxu1 %v13278_v34  ;;  %v2454_v57 = vld [vmem:[%s16724_s24 + $0x5f8] sm:$0xff]  ;;  %v13331_v34 = vcombine.low %v2441_v10, %v2445_v17  ;;  %v13340_v13 = vcombine.high %v2449_v4, %v2453_v38 }
0x10a8   : > { %v13342_v55 = vcombine.high %v2450_v35, %v2454_v57  ;;  %v13341_v37 = vcombine.low %v2450_v35, %v2454_v57  ;;  %v2513_v57 = vld [vmem:[%s16724_s24 + $0x7d0] sm:$0xff] }
0x10aa   : > { %9646 = vmatpush1.bf16.msra.mxu0 %v13275_v22  ;;  %9752 = vmatpush1.bf16.msra.mxu1 %v13277_v14  ;;  %v2461_v22 = vld [vmem:[%s16724_s24 + $0x630] sm:$0xff]  ;;  %v2458_v14 = vld [vmem:[%s16724_s24 + $0x618] sm:$0xff] }
0x10ab   : > { %9668 = vmatprep.subr.bf16.mxu0 %v13284_v33  ;;  %9774 = vmatprep.subr.bf16.mxu1 %v13286_v23  ;;  %v2462_v33 = vld [vmem:[%s16724_s24 + $0x638] sm:$0xff]  ;;  %v13339_v23 = vcombine.low %v2449_v4, %v2453_v38  ;;  %v13348_v41 = vcombine.high %v2457_v32, %v2461_v22 }
0x10ac   : > { %v13350_v48 = vcombine.high %v2458_v14, %v2462_v33  ;;  %v13349_v54 = vcombine.low %v2458_v14, %v2462_v33 }
0x10ad   : > { %9648 = vmatmul.mubr.bf16.vlgmr.msra.gmra.mrb[76].mxu0 %v18613_v47  ;;  %9754 = vmatmul.mubr.bf16.vlgmr.msra.gmra.mrb[124].mxu1 %v18613_v47  ;;  %v2421_v47 = vld [vmem:[%s16724_s24 + $0x4f0] sm:$0xff] }
0x10ae   : > { %9657 = vmatprep.mubr.bf16.mxu0 %v18648_v27  ;;  %9669 = vmatpush1.bf16.msra.mxu0 %v13283_v46  ;;  %v13307_v20 = vcombine.low %v2417_v56, %v2421_v47  ;;  %v2469_v46 = vld [vmem:[%s16724_s24 + $0x670] sm:$0xff] }
0x10af   : > { %9763 = vmatprep.mubr.bf16.mxu1 %v18648_v27  ;;  %9775 = vmatpush1.bf16.msra.mxu1 %v13285_v9  ;;  %v13308_v27 = vcombine.high %v2417_v56, %v2421_v47  ;;  %v2466_v9 = vld [vmem:[%s16724_s24 + $0x658] sm:$0xff]  ;;  %v13356_v60 = vcombine.high %v2465_v49, %v2469_v46 }
0x10b0   : > { %9670 = vmatprep.subr.bf16.mxu0 %v13292_v21  ;;  %9776 = vmatprep.subr.bf16.mxu1 %v13294_v26  ;;  %v2470_v21 = vld [vmem:[%s16724_s24 + $0x678] sm:$0xff]  ;;  %v13347_v26 = vcombine.low %v2457_v32, %v2461_v22 }
0x10b1   : > { %v13358_v42 = vcombine.high %v2466_v9, %v2470_v21  ;;  %v13357_v56 = vcombine.low %v2466_v9, %v2470_v21  ;;  %v15077_v9 = vld [vmem:[%s16726_s1 + $0x20] ss:$8 sps:$4 sm:$0xff]   ;;  %v15082_v21 = vld [vmem:[%s16726_s1 + $0x34] ss:$8 sps:$4 sm:$0xff]  }
0x10b2   : > { %9671 = vmatpush1.bf16.msra.mxu0 %v13291_v12  ;;  %v2477_v12 = vld [vmem:[%s16724_s24 + $0x6b0] sm:$0xff] }
0x10b3   : > { %9777 = vmatpush1.bf16.msra.mxu1 %v13293_v1  ;;  %9672 = vmatprep.subr.bf16.mxu0 %v13300_v15  ;;  %v2474_v1 = vld [vmem:[%s16724_s24 + $0x698] sm:$0xff]  ;;  %v13364_v47 = vcombine.high %v2473_v63, %v2477_v12 }
0x10b4   : > { %9778 = vmatprep.subr.bf16.mxu1 %v13302_v28  ;;  %v2478_v15 = vld [vmem:[%s16724_s24 + $0x6b8] sm:$0xff]  ;;  %v13355_v28 = vcombine.low %v2465_v49, %v2469_v46  ;;  %v15079_v46 = vld [vmem:[%s16726_s1 + $0x24] ss:$8 sps:$4 sm:$0xff]  }
0x10b5   : > { %9658 = vmatmul.mubr.bf16.gmra.mrb[80].mxu0 %v18652_v31  ;;  %9764 = vmatmul.mubr.bf16.gmra.mrb[128].mxu1 %v18652_v31  ;;  %v2433_v31 = vld [vmem:[%s16724_s24 + $0x550] sm:$0xff]  ;;  %v13366_v19 = vcombine.high %v2474_v1, %v2478_v15  ;;  %v13365_v44 = vcombine.low %v2474_v1, %v2478_v15  ;;  %v15097_v1 = vld [vmem:[%s16726_s1 + $0x84] ss:$8 sps:$4 sm:$0xff]   ;;  %v15095_v15 = vld [vmem:[%s16726_s1 + $0x80] ss:$8 sps:$4 sm:$0xff]  }
0x10b6   : > { %9673 = vmatpush1.bf16.msra.mxu0 %v13299_v11  ;;  %9700 = vmatprep.mubr.bf16.mxu0 %v18615_v51  ;;  %v13323_v39 = vcombine.low %v2433_v31, %v2437_v7  ;;  %v2485_v11 = vld [vmem:[%s16724_s24 + $0x6f0] sm:$0xff] }
0x10b7   : > { %9779 = vmatpush1.bf16.msra.mxu1 %v13301_v59  ;;  %9806 = vmatprep.mubr.bf16.mxu1 %v18615_v51  ;;  %v13324_v51 = vcombine.high %v2433_v31, %v2437_v7  ;;  %v2482_v59 = vld [vmem:[%s16724_s24 + $0x6d8] sm:$0xff]  ;;  %v13372_v30 = vcombine.high %v2481_v3, %v2485_v11 }
0x10b8   : > { %9674 = vmatprep.subr.bf16.mxu0 %v13308_v27  ;;  %9780 = vmatprep.subr.bf16.mxu1 %v13310_v8  ;;  %v2486_v27 = vld [vmem:[%s16724_s24 + $0x6f8] sm:$0xff]  ;;  %v13363_v8 = vcombine.low %v2473_v63, %v2477_v12 }
0x10b9   : > { %v13374_v0 = vcombine.high %v2482_v59, %v2486_v27  ;;  %v13373_v31 = vcombine.low %v2482_v59, %v2486_v27  ;;  %v15074_v49 = vld [vmem:[%s16726_s1 + $0x10] ss:$8 sps:$4 sm:$0xff]   ;;  %v15094_v63 = vld [vmem:[%s16726_s1 + $0x74] ss:$8 sps:$4 sm:$0xff]   ;;  %v15109_v59 = vld [vmem:[%s16726_s1 + $0xc4] ss:$8 sps:$4 sm:$0xff]  }
0x10ba   : > { %9675 = vmatpush1.bf16.msra.mxu0 %v13307_v20  ;;  %v2493_v20 = vld [vmem:[%s16724_s24 + $0x730] sm:$0xff]  ;;  %v15107_v27 = vld [vmem:[%s16726_s1 + $0xc0] ss:$8 sps:$4 sm:$0xff]  }
0x10bb   : > { %9781 = vmatpush1.bf16.msra.mxu1 %v13309_v16  ;;  %9676 = vmatprep.subr.bf16.mxu0 %v13316_v24  ;;  %v2490_v16 = vld [vmem:[%s16724_s24 + $0x718] sm:$0xff]  ;;  %v13380_v7 = vcombine.high %v2489_v2, %v2493_v20 }
0x10bc   : > { %9782 = vmatprep.subr.bf16.mxu1 %v13318_v52  ;;  %v2494_v24 = vld [vmem:[%s16724_s24 + $0x738] sm:$0xff]  ;;  %v13371_v52 = vcombine.low %v2481_v3, %v2485_v11 }
0x10bd   : > { %v13382_v45 = vcombine.high %v2490_v16, %v2494_v24  ;;  %v13381_v10 = vcombine.low %v2490_v16, %v2494_v24  ;;  %v15092_v12 = vld [vmem:[%s16726_s1 + $0x70] ss:$8 sps:$4 sm:$0xff]   ;;  %v15106_v3 = vld [vmem:[%s16726_s1 + $0xb4] ss:$8 sps:$4 sm:$0xff]   ;;  %v15121_v16 = vld [vmem:[%s16726_s1 + $0x104] ss:$8 sps:$4 sm:$0xff]  }
0x10be   : > { %9677 = vmatpush1.bf16.msra.mxu0 %v13315_v36  ;;  %v2501_v36 = vld [vmem:[%s16724_s24 + $0x770] sm:$0xff]  ;;  %v18903_v24 = vld [vmem:[%s16749_s21 + $0x28] sm:$0xff] }
0x10bf   : > { %9783 = vmatpush1.bf16.msra.mxu1 %v13317_v58  ;;  %9678 = vmatprep.subr.bf16.mxu0 %v13324_v51  ;;  %v2498_v58 = vld [vmem:[%s16724_s24 + $0x758] sm:$0xff]  ;;  %v13388_v17 = vcombine.high %v2497_v29, %v2501_v36 }
0x10c0   : > { %9784 = vmatprep.subr.bf16.mxu1 %v13326_v62  ;;  %v2502_v51 = vld [vmem:[%s16724_s24 + $0x778] sm:$0xff]  ;;  %v13379_v62 = vcombine.low %v2489_v2, %v2493_v20 }
0x10c1   : > { %v13390_v53 = vcombine.high %v2498_v58, %v2502_v51  ;;  %v13389_v4 = vcombine.low %v2498_v58, %v2502_v51  ;;  %v15104_v11 = vld [vmem:[%s16726_s1 + $0xb0] ss:$8 sps:$4 sm:$0xff]   ;;  %v15118_v2 = vld [vmem:[%s16726_s1 + $0xf4] ss:$8 sps:$4 sm:$0xff]  }
0x10c2   : > { %9679 = vmatpush1.bf16.msra.mxu0 %v13323_v39  ;;  %v2509_v39 = vld [vmem:[%s16724_s24 + $0x7b0] sm:$0xff] }
0x10c3   : > { %9785 = vmatpush1.bf16.msra.mxu1 %v13325_v25  ;;  %9680 = vmatprep.subr.bf16.mxu0 %v13332_v18  ;;  %v2506_v25 = vld [vmem:[%s16724_s24 + $0x798] sm:$0xff]  ;;  %v13396_v38 = vcombine.high %v2505_v43, %v2509_v39 }
0x10c4   : > { %9786 = vmatprep.subr.bf16.mxu1 %v13334_v40  ;;  %v2510_v18 = vld [vmem:[%s16724_s24 + $0x7b8] sm:$0xff]  ;;  %v13387_v40 = vcombine.low %v2497_v29, %v2501_v36  ;;  %v19804_v36 = vld [vmem:[#allocation41_spill] sm:$0xff] }
0x10c5   : > { %v13398_v35 = vcombine.high %v2506_v25, %v2510_v18  ;;  %v13397_v32 = vcombine.low %v2506_v25, %v2510_v18  ;;  %v15116_v20 = vld [vmem:[%s16726_s1 + $0xf0] ss:$8 sps:$4 sm:$0xff]  }
0x10c6   : > { %9681 = vmatpush1.bf16.msra.mxu0 %v13331_v34  ;;  %v2517_v34 = vld [vmem:[%s16724_s24 + $0x7f0] sm:$0xff] }
0x10c7   : > { %9787 = vmatpush1.bf16.msra.mxu1 %v13333_v6  ;;  %9682 = vmatprep.subr.bf16.mxu0 %v13340_v13  ;;  %v2514_v6 = vld [vmem:[%s16724_s24 + $0x7d8] sm:$0xff]  ;;  %v13404_v22 = vcombine.high %v2513_v57, %v2517_v34  ;;  %v13403_v33 = vcombine.low %v2513_v57, %v2517_v34 }
0x10c8   : > { %9788 = vmatprep.subr.bf16.mxu1 %v13342_v55  ;;  %v2518_v13 = vld [vmem:[%s16724_s24 + $0x7f8] sm:$0xff]  ;;  %v13395_v55 = vcombine.low %v2505_v43, %v2509_v39  ;;  %s19827_s24 = sld [smem:[#allocation123_spill]] (!%p13535_p13) }
0x10c9   : > { %v13406_v14 = vcombine.high %v2514_v6, %v2518_v13 }
0x10ca   : > { %9683 = vmatpush1.bf16.msra.mxu0 %v13339_v23  ;;  %v13405_v23 = vcombine.low %v2514_v6, %v2518_v13 }
0x10cb   : > { %9789 = vmatpush1.bf16.msra.mxu1 %v13341_v37  ;;  %9684 = vmatprep.subr.bf16.mxu0 %v13348_v41  ;;  %v15073_v37 = vld [vmem:[%s16726_s1 + $0x4] ss:$8 sps:$4 sm:$0xff]   ;;  %v15071_v41 = vld [vmem:[%s16726_s1] ss:$8 sps:$4 sm:$0xff]  }
0x10cc   : > { %9790 = vmatprep.subr.bf16.mxu1 %v13350_v48  ;;  %v15076_v48 = vld [vmem:[%s16726_s1 + $0x14] ss:$8 sps:$4 sm:$0xff]  }
0x10ce   : > { %9685 = vmatpush1.bf16.msra.mxu0 %v13347_v26  ;;  %v15083_v26 = vld [vmem:[%s16726_s1 + $0x40] ss:$8 sps:$4 sm:$0xff]  }
0x10cf   : > { %9791 = vmatpush1.bf16.msra.mxu1 %v13349_v54  ;;  %9686 = vmatprep.subr.bf16.mxu0 %v13356_v60  ;;  %v15088_v54 = vld [vmem:[%s16726_s1 + $0x54] ss:$8 sps:$4 sm:$0xff]   ;;  %v15086_v60 = vld [vmem:[%s16726_s1 + $0x50] ss:$8 sps:$4 sm:$0xff]  }
0x10d0   : > { %9792 = vmatprep.subr.bf16.mxu1 %v13358_v42  ;;  %v15091_v42 = vld [vmem:[%s16726_s1 + $0x64] ss:$8 sps:$4 sm:$0xff]  }
0x10d2   : > { %9687 = vmatpush1.bf16.msra.mxu0 %v13355_v28  ;;  %v15100_v28 = vld [vmem:[%s16726_s1 + $0x94] ss:$8 sps:$4 sm:$0xff]  }
0x10d3   : > { %9793 = vmatpush1.bf16.msra.mxu1 %v13357_v56  ;;  %9688 = vmatprep.subr.bf16.mxu0 %v13364_v47  ;;  %v15098_v56 = vld [vmem:[%s16726_s1 + $0x90] ss:$8 sps:$4 sm:$0xff]   ;;  %v15103_v47 = vld [vmem:[%s16726_s1 + $0xa4] ss:$8 sps:$4 sm:$0xff]  }
0x10d4   : > { %9794 = vmatprep.subr.bf16.mxu1 %v13366_v19  ;;  %v15101_v19 = vld [vmem:[%s16726_s1 + $0xa0] ss:$8 sps:$4 sm:$0xff]  }
0x10d6   : > { %9689 = vmatpush1.bf16.msra.mxu0 %v13363_v8  ;;  %v15112_v8 = vld [vmem:[%s16726_s1 + $0xd4] ss:$8 sps:$4 sm:$0xff]  }
0x10d7   : > { %9795 = vmatpush1.bf16.msra.mxu1 %v13365_v44  ;;  %9690 = vmatprep.subr.bf16.mxu0 %v13372_v30  ;;  %v15110_v44 = vld [vmem:[%s16726_s1 + $0xd0] ss:$8 sps:$4 sm:$0xff]   ;;  %v15115_v30 = vld [vmem:[%s16726_s1 + $0xe4] ss:$8 sps:$4 sm:$0xff]  }
0x10d8   : > { %9796 = vmatprep.subr.bf16.mxu1 %v13374_v0  ;;  %v15113_v0 = vld [vmem:[%s16726_s1 + $0xe0] ss:$8 sps:$4 sm:$0xff]  }
0x10da   : > { %9691 = vmatpush1.bf16.msra.mxu0 %v13371_v52  ;;  %v8047_v52 = vunpack.c.l.bf16 %v18903_v24 }
0x10db   : > { %9797 = vmatpush1.bf16.msra.mxu1 %v13373_v31  ;;  %9692 = vmatprep.subr.bf16.mxu0 %v13380_v7  ;;  %v19802_v31 = vld [vmem:[#allocation40_spill] sm:$0xff] }
0x10dc   : > { %9798 = vmatprep.subr.bf16.mxu1 %v13382_v45  ;;  %v8054_v7 = vrot.slane %v8047_v52, %v19802_v31  ;;  %v19803_v45 = vld [vmem:[#allocation58_spill] sm:$0xff]  ;;  %v8058_v58 = vrot.slane %v8047_v52, %v19804_v36 }
0x10dd   : > { %v8062_v29 = vrot.slane %v8047_v52, %v19803_v45 }
0x10de   : > { %9693 = vmatpush1.bf16.msra.mxu0 %v13379_v62  ;;  %v18910_v51 = vrot.slane %v8054_v7, %v19802_v31 }
0x10df   : > { %9799 = vmatpush1.bf16.msra.mxu1 %v13381_v10  ;;  %9694 = vmatprep.subr.bf16.mxu0 %v13388_v17  ;;  %v18913_v62 = vrot.slane %v8062_v29, %v19802_v31  ;;  %v18916_v10 = vrot.slane %v8058_v58, %v19802_v31  ;;  %v19805_v17 = vld [vmem:[#allocation59_spill] sm:$0xff] }
0x10e0   : > { %9800 = vmatprep.subr.bf16.mxu1 %v13390_v53  ;;  %v8066_v53 = vrot.slane %v8047_v52, %v19805_v17 }
0x10e2   : > { %9695 = vmatpush1.bf16.msra.mxu0 %v13387_v40  ;;  %v18925_v13 = vrot.slane %v8066_v53, %v19802_v31 }
0x10e3   : > { %9801 = vmatpush1.bf16.msra.mxu1 %v13389_v4  ;;  %9696 = vmatprep.subr.bf16.mxu0 %v13396_v38 }
0x10e4   : > { %9802 = vmatprep.subr.bf16.mxu1 %v13398_v35 }
0x10e6   : > { %9697 = vmatpush1.bf16.msra.mxu0 %v13395_v55 }
0x10e7   : > { %9803 = vmatpush1.bf16.msra.mxu1 %v13397_v32  ;;  %9698 = vmatprep.subr.bf16.mxu0 %v13404_v22 }
0x10e8   : > { %9804 = vmatprep.subr.bf16.mxu1 %v13406_v14 }
0x10ea   : > { %9699 = vmatpush1.bf16.msra.mxu0 %v13403_v33 }
0x10eb   : > { %9805 = vmatpush1.bf16.msra.mxu1 %v13405_v23  ;;  %10791 = vmatprep.subr.bf16.mxu0 %v15073_v37 }
0x10ed   : > { %9701 = vmatmul.mubr.bf16.vlgmr.msra.gmra.mrb[76].mxu0 %v18617_v50 }
0x10ee   : > { %9807 = vmatmul.mubr.bf16.vlgmr.msra.gmra.mrb[124].mxu1 %v18617_v50  ;;  %9710 = vmatprep.mubr.bf16.mxu0 %v18661_v5  ;;  %v15080_v50 = vld [vmem:[%s16726_s1 + $0x30] ss:$8 sps:$4 sm:$0xff]  }
0x10ef   : > { %9816 = vmatprep.mubr.bf16.mxu1 %v18661_v5  ;;  %10792 = vmatpush1.bf16.msra.mxu0 %v15071_v41  ;;  %v15085_v5 = vld [vmem:[%s16726_s1 + $0x44] ss:$8 sps:$4 sm:$0xff]  }
0x10f0   : > { %10793 = vmatprep.subr.bf16.mxu0 %v15076_v48 }
0x10f3   : > { %10794 = vmatpush1.bf16.msra.mxu0 %v15074_v49 }
0x10f4   : > { %10795 = vmatprep.subr.bf16.mxu0 %v15079_v46 }
0x10f5   : > { %9711 = vmatmul.mubr.bf16.gmra.mrb[80].mxu0 %v18669_v61 }
0x10f6   : > { %9817 = vmatmul.mubr.bf16.gmra.mrb[128].mxu1 %v18669_v61  ;;  %v15089_v61 = vld [vmem:[%s16726_s1 + $0x60] ss:$8 sps:$4 sm:$0xff]  }
0x10f7   : > { %10796 = vmatpush1.bf16.msra.mxu0 %v15077_v9 }
0x10f8   : > { %10797 = vmatprep.subr.bf16.mxu0 %v15082_v21 }
0x10fb   : > { %10798 = vmatpush1.bf16.msra.mxu0 %v15080_v50 }
0x10fc   : > { %10799 = vmatprep.subr.bf16.mxu0 %v15085_v5 }
0x10ff   : > { %10800 = vmatpush1.bf16.msra.mxu0 %v15083_v26 }
0x1100   : > { %10801 = vmatprep.subr.bf16.mxu0 %v15088_v54 }
0x1103   : > { %10802 = vmatpush1.bf16.msra.mxu0 %v15086_v60 }
0x1104   : > { %10803 = vmatprep.subr.bf16.mxu0 %v15091_v42 }
0x1107   : > { %10804 = vmatpush1.bf16.msra.mxu0 %v15089_v61 }
0x1108   : > { %10805 = vmatprep.subr.bf16.mxu0 %v15094_v63 }
0x110b   : > { %10806 = vmatpush1.bf16.msra.mxu0 %v15092_v12 }
0x110c   : > { %10807 = vmatprep.subr.bf16.mxu0 %v15097_v1 }
0x110f   : > { %10808 = vmatpush1.bf16.msra.mxu0 %v15095_v15 }
0x1110   : > { %10809 = vmatprep.subr.bf16.mxu0 %v15100_v28 }
0x1113   : > { %10810 = vmatpush1.bf16.msra.mxu0 %v15098_v56 }
0x1114   : > { %10811 = vmatprep.subr.bf16.mxu0 %v15103_v47 }
0x1117   : > { %10812 = vmatpush1.bf16.msra.mxu0 %v15101_v19 }
0x1118   : > { %10813 = vmatprep.subr.bf16.mxu0 %v15106_v3 }
0x111b   : > { %10814 = vmatpush1.bf16.msra.mxu0 %v15104_v11 }
0x111c   : > { %10815 = vmatprep.subr.bf16.mxu0 %v15109_v59 }
0x111f   : > { %10816 = vmatpush1.bf16.msra.mxu0 %v15107_v27 }
0x1120   : > { %10817 = vmatprep.subr.bf16.mxu0 %v15112_v8 }
0x1123   : > { %10818 = vmatpush1.bf16.msra.mxu0 %v15110_v44 }
0x1124   : > { %10819 = vmatprep.subr.bf16.mxu0 %v15115_v30 }
0x1127   : > { %10820 = vmatpush1.bf16.msra.mxu0 %v15113_v0 }
0x1128   : > { %10821 = vmatprep.subr.bf16.mxu0 %v15118_v2 }
0x112b   : > { %10822 = vmatpush1.bf16.msra.mxu0 %v15116_v20 }
0x112c   : > { %10844 = vmatprep.subr.bf16.mxu0 %v15121_v16 }
0x113f   : > { %v9490_v43 = vpop.f32.mrb[68].mxu0  ;;  %v9596_v39 = vpop.f32.mrb[116].mxu1 }
0x1140   : > { %v13717_v25 = vadd.f32 %v9490_v43, %v18910_v51  ;;  %v13725_v18 = vadd.f32 %v9596_v39, %v18913_v62  ;;  %v9492_v40 = vpop.f32.mrb[69].mxu0  ;;  %v9598_v4 = vpop.f32.mrb[117].mxu1 }
0x1141   : > { %v18922_v38 = vadd.f32 %v9492_v40, %v18916_v10  ;;  %v9494_v35 = vpop.f32.mrb[70].mxu0  ;;  %v9600_v57 = vpop.f32.mrb[118].mxu1  ;;  %v18936_v9 = vadd.f32 %v9598_v4, %v18925_v13 }
0x1142   : > { %v9859_v34 = vmul.f32 0.044715, %v13717_v25  ;;  %v9861_v6 = vmul.f32 0.044715, %v13725_v18  ;;  %v13719_v55 = vadd.f32 %v9494_v35, %v18910_v51  ;;  %v18929_v32 = vadd.f32 %v9600_v57, %v18913_v62  ;;  %v9496_v22 = vpop.f32.mrb[71].mxu0  ;;  %v9602_v14 = vpop.f32.mrb[119].mxu1 }
0x1143   : > { %v9860_v37 = vmul.f32 0.044715, %v18922_v38  ;;  %v18933_v41 = vadd.f32 %v9496_v22, %v18916_v10  ;;  %v18939_v50 = vmul.f32 0.5, %v13717_v25  ;;  %v18943_v54 = vadd.f32 %v9602_v14, %v18925_v13 }
0x1144   : > { %v9891_v33 = vmul.f32 %v13717_v25, %v9859_v34  ;;  %v9893_v23 = vmul.f32 %v13725_v18, %v9861_v6  ;;  %v9867_v48 = vmul.f32 0.044715, %v13719_v55  ;;  %v9869_v21 = vmul.f32 0.044715, %v18929_v32 }
0x1145   : > { %v9868_v26 = vmul.f32 0.044715, %v18933_v41  ;;  %v9892_v12 = vmul.f32 %v18922_v38, %v9860_v37  ;;  %v18955_v2 = vmul.f32 0.5, %v13725_v18  ;;  %v9862_v20 = vmul.f32 0.044715, %v18936_v9 }
0x1146   : > { %v9923_v49 = vmul.f32 %v13717_v25, %v9891_v33  ;;  %v9925_v46 = vmul.f32 %v13725_v18, %v9893_v23  ;;  %v9899_v5 = vmul.f32 %v13719_v55, %v9867_v48  ;;  %v9901_v1 = vmul.f32 %v18929_v32, %v9869_v21 }
0x1147   : > { %v9500_v60 = vpop.f32.mrb[72].mxu0  ;;  %v9606_v42 = vpop.f32.mrb[120].mxu1  ;;  %v9900_v47 = vmul.f32 %v18933_v41, %v9868_v26  ;;  %v9924_v7 = vmul.f32 %v18922_v38, %v9892_v12  ;;  %v9870_v39 = vmul.f32 0.044715, %v18943_v54  ;;  %v9894_v33 = vmul.f32 %v18936_v9, %v9862_v20 }
0x1148   : > { %v9955_v61 = vadd.f32 %v13717_v25, %v9923_v49  ;;  %v9957_v63 = vadd.f32 %v13725_v18, %v9925_v46  ;;  %v9502_v15 = vpop.f32.mrb[73].mxu0  ;;  %v9608_v28 = vpop.f32.mrb[121].mxu1  ;;  %v9931_v56 = vmul.f32 %v13719_v55, %v9899_v5  ;;  %v18949_v19 = vadd.f32 %v9500_v60, %v18910_v51 }
0x1149   : > { %v18952_v3 = vadd.f32 %v9606_v42, %v18913_v62  ;;  %v9504_v11 = vpop.f32.mrb[74].mxu0  ;;  %v9610_v59 = vpop.f32.mrb[122].mxu1  ;;  %v9933_v44 = vmul.f32 %v18929_v32, %v9901_v1  ;;  %v18962_v58 = vadd.f32 %v9502_v15, %v18916_v10  ;;  %v9932_v43 = vmul.f32 %v18933_v41, %v9900_v47 }
0x114a   : > { %v9987_v27 = vmul.f32 0.7978846, %v9955_v61  ;;  %v9989_v8 = vmul.f32 0.7978846, %v9957_v63  ;;  %v9506_v30 = vpop.f32.mrb[75].mxu0  ;;  %v9612_v0 = vpop.f32.mrb[123].mxu1  ;;  %v9963_v16 = vadd.f32 %v13719_v55, %v9931_v56  ;;  %v18968_v40 = vadd.f32 %v9608_v28, %v18925_v13 }
0x114b   : > { %v9875_v52 = vmul.f32 0.044715, %v18949_v19  ;;  %v9965_v29 = vadd.f32 %v18929_v32, %v9933_v44  ;;  %v9876_v18 = vmul.f32 0.044715, %v18962_v58  ;;  %v18971_v4 = vadd.f32 %v9504_v11, %v18910_v51 }
0x114c   : > { %15343 = vtanh.f32 %v9987_v27  ;;  %v9995_v53 = vmul.f32 0.7978846, %v9963_v16  ;;  %v9877_v57 = vmul.f32 0.044715, %v18952_v3  ;;  %v18976_v34 = vadd.f32 %v9610_v59, %v18913_v62 }
0x114d   : > { %15345 = vtanh.f32 %v9989_v8  ;;  %v9997_v25 = vmul.f32 0.7978846, %v9965_v29  ;;  %v9907_v35 = vmul.f32 %v18949_v19, %v9875_v52  ;;  %v9908_v6 = vmul.f32 %v18962_v58, %v9876_v18 }
0x114e   : > { %15347 = vtanh.f32 %v9995_v53  ;;  %v9878_v22 = vmul.f32 0.044715, %v18968_v40  ;;  %v9883_v14 = vmul.f32 0.044715, %v18971_v4  ;;  %v9835_v23 = vmul.f32 0.5, %v13719_v55 }
0x114f   : > { %15349 = vtanh.f32 %v9997_v25  ;;  %v18983_v51 = vadd.f32 %v9506_v30, %v18916_v10  ;;  %v18986_v37 = vadd.f32 %v9612_v0, %v18925_v13  ;;  %v9837_v48 = vmul.f32 0.5, %v18929_v32 }
0x1150   : > { %v9902_v62 = vmul.f32 %v18943_v54, %v9870_v39  ;;  %v9940_v49 = vmul.f32 %v18962_v58, %v9908_v6  ;;  %v9915_v46 = vmul.f32 %v18971_v4, %v9883_v14  ;;  %v9909_v21 = vmul.f32 %v18952_v3, %v9877_v57 }
0x1151   : > { %v9884_v5 = vmul.f32 0.044715, %v18983_v51  ;;  %v9886_v55 = vmul.f32 0.044715, %v18986_v37  ;;  %v9956_v10 = vadd.f32 %v18922_v38, %v9924_v7  ;;  %v9939_v26 = vmul.f32 %v18949_v19, %v9907_v35 }
0x1152   : > { %v9910_v13 = vmul.f32 %v18968_v40, %v9878_v22  ;;  %v9885_v32 = vmul.f32 0.044715, %v18976_v34  ;;  %v9964_v60 = vadd.f32 %v18933_v41, %v9932_v43  ;;  %v9947_v42 = vmul.f32 %v18971_v4, %v9915_v46 }
0x1153   : > { %v9916_v61 = vmul.f32 %v18983_v51, %v9884_v5  ;;  %v9918_v63 = vmul.f32 %v18986_v37, %v9886_v55  ;;  %v9988_v12 = vmul.f32 0.7978846, %v9956_v10  ;;  %v9926_v15 = vmul.f32 %v18936_v9, %v9894_v33 }
0x1154   : > { %v9934_v28 = vmul.f32 %v18943_v54, %v9902_v62  ;;  %v9996_v56 = vmul.f32 0.7978846, %v9964_v60  ;;  %v9972_v47 = vadd.f32 %v18962_v58, %v9940_v49  ;;  %v9941_v59 = vmul.f32 %v18952_v3, %v9909_v21 }
0x1155   : > { %v9948_v27 = vmul.f32 %v18983_v51, %v9916_v61  ;;  %15351 = vtanh.f32 %v9988_v12  ;;  %v9917_v44 = vmul.f32 %v18976_v34, %v9885_v32  ;;  %v9971_v0 = vadd.f32 %v18949_v19, %v9939_v26 }
0x1156   : > { %v15344_v1 = vpop.eup %15343  ;;  %15353 = vtanh.f32 %v9996_v56  ;;  %v10004_v30 = vmul.f32 0.7978846, %v9972_v47  ;;  %v9942_v16 = vmul.f32 %v18968_v40, %v9910_v13  ;;  %v9950_v52 = vmul.f32 %v18986_v37, %v9918_v63 }
0x1157   : > { %v15346_v11 = vpop.eup %15345  ;;  %v10051_v8 = vadd.f32 1.0, %v15344_v1  ;;  %v9980_v7 = vadd.f32 %v18983_v51, %v9948_v27  ;;  %v9979_v29 = vadd.f32 %v18971_v4, %v9947_v42  ;;  %v10003_v25 = vmul.f32 0.7978846, %v9971_v0 }
0x1158   : > { %v15348_v20 = vpop.eup %15347  ;;  %15355 = vtanh.f32 %v10004_v30  ;;  %v9958_v57 = vadd.f32 %v18936_v9, %v9926_v15  ;;  %v9966_v6 = vadd.f32 %v18943_v54, %v9934_v28  ;;  %v10053_v14 = vadd.f32 1.0, %v15346_v11  ;;  %v15124_v30 = vld [vmem:[%s16726_s1 + $0x114] ss:$8 sps:$4 sm:$0xff]  }
0x1159   : > { %v15350_v53 = vpop.eup %15349  ;;  %v10059_v43 = vadd.f32 1.0, %v15348_v20  ;;  %v10083_v39 = vmul.f32 %v10051_v8, %v18939_v50  ;;  %v10012_v18 = vmul.f32 0.7978846, %v9980_v7  ;;  %v10011_v35 = vmul.f32 0.7978846, %v9979_v29 }
0x115a   : > { %15357 = vtanh.f32 %v10003_v25  ;;  %v10061_v33 = vadd.f32 1.0, %v15350_v53  ;;  %v9949_v62 = vmul.f32 %v18976_v34, %v9917_v44  ;;  %v9990_v49 = vmul.f32 0.7978846, %v9958_v57 }
0x115b   : > { %v10091_v22 = vmul.f32 %v10059_v43, %v9835_v23  ;;  %15359 = vtanh.f32 %v10012_v18  ;;  %v9998_v46 = vmul.f32 0.7978846, %v9966_v6  ;;  %v19019_v50 = vmul.f32 %v10053_v14, %v18955_v2 }
0x115c   : > { %15361 = vtanh.f32 %v10011_v35  ;;  %v19021_v5 = vmul.f32 %v10061_v33, %v9837_v48  ;;  %v9974_v55 = vadd.f32 %v18968_v40, %v9942_v16  ;;  %v9982_v23 = vadd.f32 %v18986_v37, %v9950_v52 }
0x115d   : > { %v10115_v21 = vpack.c.bf16 %v10091_v22, %v10083_v39  ;;  %15363 = vtanh.f32 %v9990_v49  ;;  %v9973_v60 = vadd.f32 %v18952_v3, %v9941_v59  ;;  %v9981_v42 = vadd.f32 %v18976_v34, %v9949_v62 }
0x115e   : > { %15365 = vtanh.f32 %v9998_v46  ;;  %v10117_v10 = vpack.c.bf16 %v19021_v5, %v19019_v50  ;;  %v10006_v13 = vmul.f32 0.7978846, %v9974_v55  ;;  %v10014_v32 = vmul.f32 0.7978846, %v9982_v23  ;;  %v15125_v55 = vld [vmem:[%s16726_s1 + $0x120] ss:$8 sps:$4 sm:$0xff]  }
0x115f   : > { %v15352_v26 = vpop.eup %15351  ;;  %v9828_v48 = vmul.f32 0.5, %v18922_v38  ;;  %v9836_v61 = vmul.f32 0.5, %v18933_v41  ;;  %v10005_v1 = vmul.f32 0.7978846, %v9973_v60  ;;  %v10013_v15 = vmul.f32 0.7978846, %v9981_v42 }
0x1160   : > { %v15354_v2 = vpop.eup %15353  ;;  %v10052_v63 = vadd.f32 1.0, %v15352_v26  ;;  %15367 = vtanh.f32 %v10006_v13  ;;  %v15119_v38 = vld [vmem:[%s16726_s1 + $0x100] ss:$8 sps:$4 sm:$0xff]   ;;  %v9844_v0 = vmul.f32 0.5, %v18962_v58  ;;  %v9852_v20 = vmul.f32 0.5, %v18983_v51 }
0x1161   : > { %v10060_v12 = vadd.f32 1.0, %v15354_v2  ;;  %15369 = vtanh.f32 %v10014_v32  ;;  %v9843_v7 = vmul.f32 0.5, %v18949_v19  ;;  %v9851_v29 = vmul.f32 0.5, %v18971_v4  ;;  %v15122_v58 = vld [vmem:[%s16726_s1 + $0x110] ss:$8 sps:$4 sm:$0xff]  }
0x1162   : > { %v15356_v28 = vpop.eup %15355  ;;  %v10084_v56 = vmul.f32 %v10052_v63, %v9828_v48  ;;  %15371 = vtanh.f32 %v10005_v1  ;;  %v9830_v18 = vmul.f32 0.5, %v18936_v9  ;;  %v9838_v6 = vmul.f32 0.5, %v18943_v54  ;;  %v15127_v4 = vld [vmem:[%s16726_s1 + $0x124] ss:$8 sps:$4 sm:$0xff]   ;;  %v15130_v60 = vld [vmem:[%s16726_s1 + $0x134] ss:$8 sps:$4 sm:$0xff]  }
0x1163   : > { %v10092_v47 = vmul.f32 %v10060_v12, %v9836_v61  ;;  %v10068_v59 = vadd.f32 1.0, %v15356_v28  ;;  %15373 = vtanh.f32 %v10013_v15  ;;  %v9846_v26 = vmul.f32 0.5, %v18968_v40  ;;  %v15128_v40 = vld [vmem:[%s16726_s1 + $0x130] ss:$8 sps:$4 sm:$0xff]   ;;  %v15133_v15 = vld [vmem:[%s16726_s1 + $0x144] ss:$8 sps:$4 sm:$0xff]  }
0x1164   : > { %v15358_v11 = vpop.eup %15357  ;;  %v9854_v54 = vmul.f32 0.5, %v18986_v37  ;;  %v9845_v42 = vmul.f32 0.5, %v18952_v3  ;;  %v9853_v63 = vmul.f32 0.5, %v18976_v34  ;;  %v15131_v28 = vld [vmem:[%s16726_s1 + $0x140] ss:$8 sps:$4 sm:$0xff]   ;;  %v8048_v50 = vunpack.c.h.bf16 %v18903_v24 }
0x1165   : > { %v15360_v27 = vpop.eup %15359  ;;  %v10116_v8 = vpack.c.bf16 %v10092_v47, %v10084_v56  ;;  %v10067_v44 = vadd.f32 1.0, %v15358_v11  ;;  %v10100_v39 = vmul.f32 %v10068_v59, %v9844_v0  ;;  %v15136_v56 = vld [vmem:[%s16726_s1 + $0x154] ss:$8 sps:$4 sm:$0xff]   ;;  %v15134_v47 = vld [vmem:[%s16726_s1 + $0x150] ss:$8 sps:$4 sm:$0xff]  }
0x1166   : > { %v15362_v41 = vpop.eup %15361  ;;  %v10076_v16 = vadd.f32 1.0, %v15360_v27  ;;  %v15139_v11 = vld [vmem:[%s16726_s1 + $0x164] ss:$8 sps:$4 sm:$0xff]   ;;  %v15137_v59 = vld [vmem:[%s16726_s1 + $0x160] ss:$8 sps:$4 sm:$0xff]  }
0x1167   : > { %v15364_v52 = vpop.eup %15363  ;;  %10823 = vmatprep.mubr.bf16.mxu0 %v10116_v8  ;;  %v10075_v53 = vadd.f32 1.0, %v15362_v41  ;;  %v10099_v57 = vmul.f32 %v10067_v44, %v9843_v7  ;;  %v15142_v27 = vld [vmem:[%s16726_s1 + $0x174] ss:$8 sps:$4 sm:$0xff]   ;;  %v15140_v8 = vld [vmem:[%s16726_s1 + $0x170] ss:$8 sps:$4 sm:$0xff]  }
0x1168   : > { %v15366_v43 = vpop.eup %15365  ;;  %10824 = vmatmul.mubr.bf16.vlgmr.msra.gmra.mrb[84].mxu0 %v10115_v21  ;;  %v10108_v25 = vmul.f32 %v10076_v16, %v9852_v20  ;;  %v10054_v35 = vadd.f32 1.0, %v15364_v52  ;;  %v15143_v44 = vld [vmem:[%s16726_s1 + $0x180] ss:$8 sps:$4 sm:$0xff]   ;;  %v15148_v41 = vld [vmem:[%s16726_s1 + $0x194] ss:$8 sps:$4 sm:$0xff]  }
0x1169   : > { %10845 = vmatpush1.bf16.msra.mxu0 %v15119_v38  ;;  %v10107_v51 = vmul.f32 %v10075_v53, %v9851_v29  ;;  %v10062_v22 = vadd.f32 1.0, %v15366_v43  ;;  %v15145_v38 = vld [vmem:[%s16726_s1 + $0x184] ss:$8 sps:$4 sm:$0xff]   ;;  %v15149_v20 = vld [vmem:[%s16726_s1 + $0x1a0] ss:$8 sps:$4 sm:$0xff]  }
0x116a   : > { %10846 = vmatprep.subr.bf16.mxu0 %v15124_v30  ;;  %v10124_v19 = vpack.c.bf16 %v10108_v25, %v10100_v39  ;;  %v15368_v14 = vpop.eup %15367  ;;  %v10086_v62 = vmul.f32 %v10054_v35, %v9830_v18  ;;  %v15146_v30 = vld [vmem:[%s16726_s1 + $0x190] ss:$8 sps:$4 sm:$0xff]   ;;  %v15151_v0 = vld [vmem:[%s16726_s1 + $0x1a4] ss:$8 sps:$4 sm:$0xff]   ;;  %v15154_v16 = vld [vmem:[%s16726_s1 + $0x1b4] ss:$8 sps:$4 sm:$0xff]  }
0x116b   : > { %v10123_v33 = vpack.c.bf16 %v10107_v51, %v10099_v57  ;;  %v10094_v49 = vmul.f32 %v10062_v22, %v9838_v6  ;;  %v15370_v46 = vpop.eup %15369  ;;  %v10070_v9 = vadd.f32 1.0, %v15368_v14  ;;  %v15152_v52 = vld [vmem:[%s16726_s1 + $0x1b0] ss:$8 sps:$4 sm:$0xff]   ;;  %v15157_v7 = vld [vmem:[%s16726_s1 + $0x1c4] ss:$8 sps:$4 sm:$0xff]  }
0x116c   : > { %10833 = vmatprep.mubr.bf16.mxu0 %v10124_v19  ;;  %v15372_v21 = vpop.eup %15371  ;;  %v10078_v13 = vadd.f32 1.0, %v15370_v46  ;;  %v15155_v29 = vld [vmem:[%s16726_s1 + $0x1c0] ss:$8 sps:$4 sm:$0xff]   ;;  %v15160_v53 = vld [vmem:[%s16726_s1 + $0x1d4] ss:$8 sps:$4 sm:$0xff]   ;;  %v8074_v46 = vrot.slane %v8048_v50, %v19804_v36 }
0x116d   : > { %10847 = vmatpush1.bf16.msra.mxu0 %v15122_v58  ;;  %v10118_v23 = vpack.c.bf16 %v10094_v49, %v10086_v62  ;;  %v15374_v32 = vpop.eup %15373  ;;  %v10069_v2 = vadd.f32 1.0, %v15372_v21  ;;  %v19046_v48 = vmul.f32 %v10070_v9, %v9846_v26  ;;  %v15158_v43 = vld [vmem:[%s16726_s1 + $0x1d0] ss:$8 sps:$4 sm:$0xff]   ;;  %v15163_v39 = vld [vmem:[%s16726_s1 + $0x1e4] ss:$8 sps:$4 sm:$0xff]   ;;  %v8070_v62 = vrot.slane %v8048_v50, %v19802_v31 }
0x116e   : > { %10848 = vmatprep.subr.bf16.mxu0 %v15127_v4  ;;  %v19048_v61 = vmul.f32 %v10078_v13, %v9854_v54  ;;  %v10077_v12 = vadd.f32 1.0, %v15374_v32  ;;  %v15161_v25 = vld [vmem:[%s16726_s1 + $0x1e0] ss:$8 sps:$4 sm:$0xff]   ;;  %v15166_v18 = vld [vmem:[%s16726_s1 + $0x1f4] ss:$8 sps:$4 sm:$0xff]   ;;  %v8078_v49 = vrot.slane %v8048_v50, %v19803_v45  ;;  %v19112_v26 = vrot.slane %v8074_v46, %v19802_v31 }
0x116f   : > { %v19054_v37 = vmul.f32 %v10069_v2, %v9845_v42  ;;  %v15164_v35 = vld [vmem:[%s16726_s1 + $0x1f0] ss:$8 sps:$4 sm:$0xff]   ;;  %v15169_v58 = vld [vmem:[%s16726_s1 + $0x204] ss:$8 sps:$4 sm:$0xff]   ;;  %v15167_v57 = vld [vmem:[%s16726_s1 + $0x200] ss:$8 sps:$4 sm:$0xff]   ;;  %v19106_v24 = vrot.slane %v8070_v62, %v19802_v31 }
0x1170   : > { %10834 = vmatmul.mubr.bf16.gmra.mrb[88].mxu0 %v10123_v33  ;;  %v10126_v3 = vpack.c.bf16 %v19048_v61, %v19046_v48  ;;  %v19056_v1 = vmul.f32 %v10077_v12, %v9853_v63  ;;  %v15172_v51 = vld [vmem:[%s16726_s1 + $0x214] ss:$8 sps:$4 sm:$0xff]   ;;  %v15170_v6 = vld [vmem:[%s16726_s1 + $0x210] ss:$8 sps:$4 sm:$0xff]   ;;  %v15175_v22 = vld [vmem:[%s16726_s1 + $0x224] ss:$8 sps:$4 sm:$0xff]  }
0x1171   : > { %10849 = vmatpush1.bf16.msra.mxu0 %v15125_v55  ;;  %10876 = vmatprep.mubr.bf16.mxu0 %v10118_v23  ;;  %v15173_v19 = vld [vmem:[%s16726_s1 + $0x220] ss:$8 sps:$4 sm:$0xff]   ;;  %v15178_v4 = vld [vmem:[%s16726_s1 + $0x234] ss:$8 sps:$4 sm:$0xff]   ;;  %v15176_v14 = vld [vmem:[%s16726_s1 + $0x230] ss:$8 sps:$4 sm:$0xff]   ;;  %v8082_v55 = vrot.slane %v8048_v50, %v19805_v17  ;;  %v19109_v23 = vrot.slane %v8078_v49, %v19802_v31 }
0x1172   : > { %10850 = vmatprep.subr.bf16.mxu0 %v15130_v60  ;;  %v10125_v34 = vpack.c.bf16 %v19056_v1, %v19054_v37  ;;  %v15181_v33 = vld [vmem:[%s16726_s1 + $0x244] ss:$8 sps:$4 sm:$0xff]   ;;  %v15179_v5 = vld [vmem:[%s16726_s1 + $0x240] ss:$8 sps:$4 sm:$0xff]   ;;  %v15182_v9 = vld [vmem:[%s16726_s1 + $0x250] ss:$8 sps:$4 sm:$0xff]  }
0x1173   : > { %v15187_v21 = vld [vmem:[%s16726_s1 + $0x264] ss:$8 sps:$4 sm:$0xff]   ;;  %v15185_v45 = vld [vmem:[%s16726_s1 + $0x260] ss:$8 sps:$4 sm:$0xff]   ;;  %v15190_v54 = vld [vmem:[%s16726_s1 + $0x274] ss:$8 sps:$4 sm:$0xff]   ;;  %v19117_v32 = vrot.slane %v8082_v55, %v19802_v31 }
0x1174   : > { %v15188_v12 = vld [vmem:[%s16726_s1 + $0x270] ss:$8 sps:$4 sm:$0xff]  }
0x1175   : > { %10851 = vmatpush1.bf16.msra.mxu0 %v15128_v40 }
0x1176   : > { %10852 = vmatprep.subr.bf16.mxu0 %v15133_v15 }
0x1179   : > { %10853 = vmatpush1.bf16.msra.mxu0 %v15131_v28  ;;  %v15193_v28 = vld [vmem:[%s16726_s1 + $0x284] ss:$8 sps:$4 sm:$0xff]  }
0x117a   : > { %10854 = vmatprep.subr.bf16.mxu0 %v15136_v56 }
0x117d   : > { %10855 = vmatpush1.bf16.msra.mxu0 %v15134_v47 }
0x117e   : > { %10856 = vmatprep.subr.bf16.mxu0 %v15139_v11 }
0x1181   : > { %10857 = vmatpush1.bf16.msra.mxu0 %v15137_v59 }
0x1182   : > { %10858 = vmatprep.subr.bf16.mxu0 %v15142_v27 }
0x1185   : > { %10859 = vmatpush1.bf16.msra.mxu0 %v15140_v8 }
0x1186   : > { %10860 = vmatprep.subr.bf16.mxu0 %v15145_v38 }
0x1189   : > { %10861 = vmatpush1.bf16.msra.mxu0 %v15143_v44 }
0x118a   : > { %10862 = vmatprep.subr.bf16.mxu0 %v15148_v41  ;;  %v15191_v41 = vld [vmem:[%s16726_s1 + $0x280] ss:$8 sps:$4 sm:$0xff]  }
0x118d   : > { %10863 = vmatpush1.bf16.msra.mxu0 %v15146_v30 }
0x118e   : > { %10864 = vmatprep.subr.bf16.mxu0 %v15151_v0 }
0x1191   : > { %10865 = vmatpush1.bf16.msra.mxu0 %v15149_v20 }
0x1192   : > { %10866 = vmatprep.subr.bf16.mxu0 %v15154_v16 }
0x1195   : > { %10867 = vmatpush1.bf16.msra.mxu0 %v15152_v52 }
0x1196   : > { %10868 = vmatprep.subr.bf16.mxu0 %v15157_v7  ;;  %v15196_v7 = vld [vmem:[%s16726_s1 + $0x294] ss:$8 sps:$4 sm:$0xff]  }
0x1199   : > { %10869 = vmatpush1.bf16.msra.mxu0 %v15155_v29 }
0x119a   : > { %10870 = vmatprep.subr.bf16.mxu0 %v15160_v53 }
0x119d   : > { %10871 = vmatpush1.bf16.msra.mxu0 %v15158_v43 }
0x119e   : > { %10872 = vmatprep.subr.bf16.mxu0 %v15163_v39 }
0x11a1   : > { %10873 = vmatpush1.bf16.msra.mxu0 %v15161_v25 }
0x11a2   : > { %10874 = vmatprep.subr.bf16.mxu0 %v15166_v18 }
0x11a5   : > { %10875 = vmatpush1.bf16.msra.mxu0 %v15164_v35 }
0x11a6   : > { %10897 = vmatprep.subr.bf16.mxu0 %v15169_v58 }
0x11a8   : > { %10877 = vmatmul.mubr.bf16.vlgmr.msra.gmra.mrb[84].mxu0 %v10117_v10  ;;  %v15184_v10 = vld [vmem:[%s16726_s1 + $0x254] ss:$8 sps:$4 sm:$0xff]  }
0x11a9   : > { %10886 = vmatprep.mubr.bf16.mxu0 %v10126_v3  ;;  %10898 = vmatpush1.bf16.msra.mxu0 %v15167_v57 }
0x11aa   : > { %10899 = vmatprep.subr.bf16.mxu0 %v15172_v51 }
0x11ad   : > { %10900 = vmatpush1.bf16.msra.mxu0 %v15170_v6  ;;  %v15194_v6 = vld [vmem:[%s16726_s1 + $0x290] ss:$8 sps:$4 sm:$0xff]  }
0x11ae   : > { %10901 = vmatprep.subr.bf16.mxu0 %v15175_v22 }
0x11b0   : > { %10887 = vmatmul.mubr.bf16.gmra.mrb[88].mxu0 %v10125_v34 }
0x11b1   : > { %10902 = vmatpush1.bf16.msra.mxu0 %v15173_v19 }
0x11b2   : > { %10903 = vmatprep.subr.bf16.mxu0 %v15178_v4 }
0x11b5   : > { %10904 = vmatpush1.bf16.msra.mxu0 %v15176_v14 }
0x11b6   : > { %10905 = vmatprep.subr.bf16.mxu0 %v15181_v33 }
0x11b9   : > { %10906 = vmatpush1.bf16.msra.mxu0 %v15179_v5 }
0x11ba   : > { %10907 = vmatprep.subr.bf16.mxu0 %v15184_v10  ;;  %v15199_v10 = vld [vmem:[%s16726_s1 + $0x2a4] ss:$8 sps:$4 sm:$0xff]  }
0x11bd   : > { %10908 = vmatpush1.bf16.msra.mxu0 %v15182_v9 }
0x11be   : > { %10909 = vmatprep.subr.bf16.mxu0 %v15187_v21 }
0x11c0   : > { %v9702_v13 = vpop.f32.mrb[76].mxu0 }
0x11c1   : > { %v13733_v17 = vadd.f32 %v9702_v13, %v19106_v24  ;;  %v9808_v60 = vpop.f32.mrb[124].mxu1  ;;  %v9704_v42 = vpop.f32.mrb[77].mxu0  ;;  %10910 = vmatpush1.bf16.msra.mxu0 %v15185_v45 }
0x11c2   : > { %v13741_v2 = vadd.f32 %v9808_v60, %v19109_v23  ;;  %v19122_v48 = vadd.f32 %v9704_v42, %v19112_v26  ;;  %v9810_v61 = vpop.f32.mrb[125].mxu1  ;;  %v9706_v63 = vpop.f32.mrb[78].mxu0  ;;  %10911 = vmatprep.subr.bf16.mxu0 %v15190_v54 }
0x11c3   : > { %v9863_v40 = vmul.f32 0.044715, %v13733_v17  ;;  %v13735_v3 = vadd.f32 %v9706_v63, %v19106_v24  ;;  %v9812_v37 = vpop.f32.mrb[126].mxu1  ;;  %v9708_v1 = vpop.f32.mrb[79].mxu0  ;;  %v19127_v34 = vadd.f32 %v9810_v61, %v19117_v32  ;;  %v19157_v46 = vmul.f32 0.5, %v13733_v17 }
0x11c4   : > { %v9865_v15 = vmul.f32 0.044715, %v13741_v2  ;;  %v19131_v56 = vadd.f32 %v9812_v37, %v19109_v23  ;;  %v9814_v47 = vpop.f32.mrb[127].mxu1  ;;  %v9864_v59 = vmul.f32 0.044715, %v19122_v48  ;;  %v19137_v0 = vadd.f32 %v9708_v1, %v19112_v26 }
0x11c5   : > { %v9895_v11 = vmul.f32 %v13733_v17, %v9863_v40  ;;  %v9871_v27 = vmul.f32 0.044715, %v13735_v3  ;;  %10912 = vmatpush1.bf16.msra.mxu0 %v15188_v12  ;;  %v9866_v16 = vmul.f32 0.044715, %v19127_v34  ;;  %v19146_v51 = vadd.f32 %v9814_v47, %v19117_v32 }
0x11c6   : > { %v9897_v8 = vmul.f32 %v13741_v2, %v9865_v15  ;;  %v9873_v38 = vmul.f32 0.044715, %v19131_v56  ;;  %10913 = vmatprep.subr.bf16.mxu0 %v15193_v28  ;;  %v9896_v43 = vmul.f32 %v19122_v48, %v9864_v59  ;;  %v9872_v25 = vmul.f32 0.044715, %v19137_v0  ;;  %v15202_v28 = vld [vmem:[%s16726_s1 + $0x2b4] ss:$8 sps:$4 sm:$0xff]  }
0x11c7   : > { %v9927_v44 = vmul.f32 %v13733_v17, %v9895_v11  ;;  %v9903_v30 = vmul.f32 %v13735_v3, %v9871_v27  ;;  %v19159_v9 = vmul.f32 0.5, %v13741_v2  ;;  %v9898_v54 = vmul.f32 %v19127_v34, %v9866_v16 }
0x11c8   : > { %v9929_v20 = vmul.f32 %v13741_v2, %v9897_v8  ;;  %v9905_v52 = vmul.f32 %v19131_v56, %v9873_v38  ;;  %v9712_v29 = vpop.f32.mrb[80].mxu0  ;;  %v9904_v50 = vmul.f32 %v19137_v0, %v9872_v25  ;;  %v19163_v13 = vmul.f32 0.5, %v13735_v3 }
0x11c9   : > { %v9959_v53 = vadd.f32 %v13733_v17, %v9927_v44  ;;  %v9935_v39 = vmul.f32 %v13735_v3, %v9903_v30  ;;  %v9818_v18 = vpop.f32.mrb[128].mxu1  ;;  %v9714_v35 = vpop.f32.mrb[81].mxu0  ;;  %v19150_v22 = vadd.f32 %v9712_v29, %v19106_v24  ;;  %10914 = vmatpush1.bf16.msra.mxu0 %v15191_v41  ;;  %v9928_v42 = vmul.f32 %v19122_v48, %v9896_v43  ;;  %v15200_v30 = vld [vmem:[%s16726_s1 + $0x2b0] ss:$8 sps:$4 sm:$0xff]  }
0x11ca   : > { %v9961_v58 = vadd.f32 %v13741_v2, %v9929_v20  ;;  %v9937_v57 = vmul.f32 %v19131_v56, %v9905_v52  ;;  %v9820_v19 = vpop.f32.mrb[129].mxu1  ;;  %v9716_v4 = vpop.f32.mrb[82].mxu0  ;;  %v19154_v5 = vadd.f32 %v9818_v18, %v19109_v23  ;;  %10915 = vmatprep.subr.bf16.mxu0 %v15196_v7  ;;  %v9874_v17 = vmul.f32 0.044715, %v19146_v51 }
0x11cb   : > { %v9991_v14 = vmul.f32 0.7978846, %v9959_v53  ;;  %v9967_v33 = vadd.f32 %v13735_v3, %v9935_v39  ;;  %v9822_v62 = vpop.f32.mrb[130].mxu1  ;;  %v9718_v49 = vpop.f32.mrb[83].mxu0  ;;  %v9879_v2 = vmul.f32 0.044715, %v19150_v22  ;;  %v9936_v63 = vmul.f32 %v19137_v0, %v9904_v50 }
0x11cc   : > { %v9993_v21 = vmul.f32 0.7978846, %v9961_v58  ;;  %v9969_v55 = vadd.f32 %v19131_v56, %v9937_v57  ;;  %v9824_v45 = vpop.f32.mrb[131].mxu1  ;;  %v19170_v12 = vadd.f32 %v9714_v35, %v19112_v26  ;;  %v19173_v40 = vadd.f32 %v9820_v19, %v19117_v32  ;;  %v15197_v3 = vld [vmem:[%s16726_s1 + $0x2a0] ss:$8 sps:$4 sm:$0xff]  }
0x11cd   : > { %15375 = vtanh.f32 %v9991_v14  ;;  %v9999_v60 = vmul.f32 0.7978846, %v9967_v33  ;;  %10916 = vmatpush1.bf16.msra.mxu0 %v15194_v6  ;;  %v9881_v37 = vmul.f32 0.044715, %v19154_v5  ;;  %v19178_v1 = vadd.f32 %v9716_v4, %v19106_v24  ;;  %v15203_v4 = vld [vmem:[%s16726_s1 + $0x2c0] ss:$8 sps:$4 sm:$0xff]  }
0x11ce   : > { %v10001_v61 = vmul.f32 0.7978846, %v9969_v55  ;;  %10917 = vmatprep.subr.bf16.mxu0 %v15199_v10  ;;  %v19181_v15 = vadd.f32 %v9822_v62, %v19109_v23  ;;  %v9880_v47 = vmul.f32 0.044715, %v19170_v12  ;;  %v9882_v11 = vmul.f32 0.044715, %v19173_v40 }
0x11cf   : > { %15377 = vtanh.f32 %v9999_v60  ;;  %v19187_v59 = vadd.f32 %v9718_v49, %v19112_v26  ;;  %v9911_v27 = vmul.f32 %v19150_v22, %v9879_v2  ;;  %v9887_v8 = vmul.f32 0.044715, %v19178_v1  ;;  %v15208_v50 = vld [vmem:[%s16726_s1 + $0x2d4] ss:$8 sps:$4 sm:$0xff]  }
0x11d0   : > { %15379 = vtanh.f32 %v9993_v21  ;;  %v9889_v24 = vmul.f32 0.044715, %v19181_v15  ;;  %v19193_v38 = vadd.f32 %v9824_v45, %v19117_v32  ;;  %v19196_v23 = vmul.f32 0.5, %v19131_v56  ;;  %v15205_v32 = vld [vmem:[%s16726_s1 + $0x2c4] ss:$8 sps:$4 sm:$0xff]  }
0x11d1   : > { %15381 = vtanh.f32 %v10001_v61  ;;  %v9906_v44 = vmul.f32 %v19146_v51, %v9874_v17  ;;  %v9912_v41 = vmul.f32 %v19170_v12, %v9880_v47  ;;  %10918 = vmatpush1.bf16.msra.mxu0 %v15197_v3  ;;  %v9888_v26 = vmul.f32 0.044715, %v19187_v59  ;;  %v15206_v3 = vld [vmem:[%s16726_s1 + $0x2d0] ss:$8 sps:$4 sm:$0xff]  }
0x11d2   : > { %v9913_v20 = vmul.f32 %v19154_v5, %v9881_v37  ;;  %v9919_v16 = vmul.f32 %v19178_v1, %v9887_v8  ;;  %v9890_v52 = vmul.f32 0.044715, %v19193_v38  ;;  %10919 = vmatprep.subr.bf16.mxu0 %v15202_v28  ;;  %v9960_v56 = vadd.f32 %v19122_v48, %v9928_v42 }
0x11d3   : > { %v9944_v7 = vmul.f32 %v19170_v12, %v9912_v41  ;;  %v9914_v29 = vmul.f32 %v19173_v40, %v9882_v11  ;;  %v9920_v53 = vmul.f32 %v19187_v59, %v9888_v26  ;;  %v9968_v43 = vadd.f32 %v19137_v0, %v9936_v63  ;;  %v15211_v11 = vld [vmem:[%s16726_s1 + $0x2e4] ss:$8 sps:$4 sm:$0xff]  }
0x11d4   : > { %v9930_v39 = vmul.f32 %v19127_v34, %v9898_v54  ;;  %v9943_v25 = vmul.f32 %v19150_v22, %v9911_v27  ;;  %v9921_v18 = vmul.f32 %v19181_v15, %v9889_v24  ;;  %v9992_v35 = vmul.f32 0.7978846, %v9960_v56 }
0x11d5   : > { %v9951_v57 = vmul.f32 %v19178_v1, %v9919_v16  ;;  %v9952_v6 = vmul.f32 %v19187_v59, %v9920_v53  ;;  %v9922_v19 = vmul.f32 %v19193_v38, %v9890_v52  ;;  %10920 = vmatpush1.bf16.msra.mxu0 %v15200_v30  ;;  %v10000_v14 = vmul.f32 0.7978846, %v9968_v43  ;;  %v15214_v52 = vld [vmem:[%s16726_s1 + $0x2f4] ss:$8 sps:$4 sm:$0xff]   ;;  %v15212_v43 = vld [vmem:[%s16726_s1 + $0x2f0] ss:$8 sps:$4 sm:$0xff]  }
0x11d6   : > { %v9938_v33 = vmul.f32 %v19146_v51, %v9906_v44  ;;  %10921 = vmatprep.subr.bf16.mxu0 %v15205_v32  ;;  %15383 = vtanh.f32 %v9992_v35  ;;  %v9976_v62 = vadd.f32 %v19170_v12, %v9944_v7  ;;  %v9945_v21 = vmul.f32 %v19154_v5, %v9913_v20 }
0x11d7   : > { %v15376_v58 = vpop.eup %15375  ;;  %v9946_v55 = vmul.f32 %v19173_v40, %v9914_v29  ;;  %15385 = vtanh.f32 %v10000_v14  ;;  %v9984_v45 = vadd.f32 %v19187_v59, %v9952_v6  ;;  %v9953_v60 = vmul.f32 %v19181_v15, %v9921_v18 }
0x11d8   : > { %v10055_v10 = vadd.f32 1.0, %v15376_v58  ;;  %v10008_v61 = vmul.f32 0.7978846, %v9976_v62  ;;  %v9975_v17 = vadd.f32 %v19150_v22, %v9943_v25  ;;  %v9954_v63 = vmul.f32 %v19193_v38, %v9922_v19 }
0x11d9   : > { %v15378_v49 = vpop.eup %15377  ;;  %10922 = vmatpush1.bf16.msra.mxu0 %v15203_v4  ;;  %v10016_v28 = vmul.f32 0.7978846, %v9984_v45  ;;  %v9983_v47 = vadd.f32 %v19178_v1, %v9951_v57  ;;  %v9962_v24 = vadd.f32 %v19127_v34, %v9930_v39  ;;  %v9970_v41 = vadd.f32 %v19146_v51, %v9938_v33  ;;  %v15217_v39 = vld [vmem:[%s16726_s1 + $0x304] ss:$8 sps:$4 sm:$0xff]  }
0x11da   : > { %v15380_v54 = vpop.eup %15379  ;;  %v10063_v42 = vadd.f32 1.0, %v15378_v49  ;;  %v19229_v37 = vmul.f32 %v10055_v10, %v19157_v46  ;;  %10923 = vmatprep.subr.bf16.mxu0 %v15208_v50  ;;  %15387 = vtanh.f32 %v10008_v61  ;;  %v10007_v8 = vmul.f32 0.7978846, %v9975_v17  ;;  %v15220_v61 = vld [vmem:[%s16726_s1 + $0x314] ss:$8 sps:$4 sm:$0xff]  }
0x11db   : > { %v15382_v2 = vpop.eup %15381  ;;  %15389 = vtanh.f32 %v10016_v28  ;;  %v10015_v44 = vmul.f32 0.7978846, %v9983_v47  ;;  %v10057_v46 = vadd.f32 1.0, %v15380_v54  ;;  %v9994_v30 = vmul.f32 0.7978846, %v9962_v24 }
0x11dc   : > { %v19234_v27 = vmul.f32 %v10063_v42, %v19163_v13  ;;  %15391 = vtanh.f32 %v10007_v8  ;;  %v10065_v20 = vadd.f32 1.0, %v15382_v2  ;;  %v15209_v13 = vld [vmem:[%s16726_s1 + $0x2e0] ss:$8 sps:$4 sm:$0xff]   ;;  %v10002_v16 = vmul.f32 0.7978846, %v9970_v41 }
0x11dd   : > { %10924 = vmatpush1.bf16.msra.mxu0 %v15206_v3  ;;  %15393 = vtanh.f32 %v10015_v44  ;;  %v19243_v32 = vmul.f32 %v10057_v46, %v19159_v9  ;;  %v9978_v7 = vadd.f32 %v19173_v40, %v9946_v55  ;;  %v9986_v29 = vadd.f32 %v19193_v38, %v9954_v63  ;;  %v15215_v55 = vld [vmem:[%s16726_s1 + $0x300] ss:$8 sps:$4 sm:$0xff]   ;;  %v15218_v8 = vld [vmem:[%s16726_s1 + $0x310] ss:$8 sps:$4 sm:$0xff]   ;;  %v15223_v46 = vld [vmem:[%s16726_s1 + $0x324] ss:$8 sps:$4 sm:$0xff]  }
0x11de   : > { %v10119_v26 = vpack.c.bf16 %v19234_v27, %v19229_v37  ;;  %10925 = vmatprep.subr.bf16.mxu0 %v15211_v11  ;;  %15395 = vtanh.f32 %v9994_v30  ;;  %v19246_v56 = vmul.f32 %v10065_v20, %v19196_v23  ;;  %v9977_v35 = vadd.f32 %v19154_v5, %v9945_v21 }
0x11df   : > { %15397 = vtanh.f32 %v10002_v16  ;;  %v10010_v18 = vmul.f32 0.7978846, %v9978_v7  ;;  %v9985_v9 = vadd.f32 %v19181_v15, %v9953_v60  ;;  %v9832_v23 = vmul.f32 0.5, %v19122_v48 }
0x11e0   : > { %v15384_v53 = vpop.eup %15383  ;;  %v10121_v25 = vpack.c.bf16 %v19246_v56, %v19243_v32  ;;  %v9840_v57 = vmul.f32 0.5, %v19137_v0  ;;  %v10018_v19 = vmul.f32 0.7978846, %v9986_v29  ;;  %v10009_v14 = vmul.f32 0.7978846, %v9977_v35 }
0x11e1   : > { %v15386_v58 = vpop.eup %15385  ;;  %10926 = vmatpush1.bf16.msra.mxu0 %v15209_v13  ;;  %v10056_v6 = vadd.f32 1.0, %v15384_v53  ;;  %15399 = vtanh.f32 %v10010_v18  ;;  %v10017_v33 = vmul.f32 0.7978846, %v9985_v9  ;;  %v9848_v45 = vmul.f32 0.5, %v19170_v12 }
0x11e2   : > { %10927 = vmatprep.subr.bf16.mxu0 %v15214_v52  ;;  %v10064_v4 = vadd.f32 1.0, %v15386_v58  ;;  %15401 = vtanh.f32 %v10018_v19  ;;  %v9856_v54 = vmul.f32 0.5, %v19187_v59  ;;  %v9847_v17 = vmul.f32 0.5, %v19150_v22  ;;  %v15229_v19 = vld [vmem:[%s16726_s1 + $0x344] ss:$8 sps:$4 sm:$0xff]  }
0x11e3   : > { %v10088_v10 = vmul.f32 %v10056_v6, %v9832_v23  ;;  %15403 = vtanh.f32 %v10009_v14  ;;  %v9855_v28 = vmul.f32 0.5, %v19178_v1  ;;  %v9834_v12 = vmul.f32 0.5, %v19127_v34  ;;  %v15232_v14 = vld [vmem:[%s16726_s1 + $0x354] ss:$8 sps:$4 sm:$0xff]  }
0x11e4   : > { %v15388_v50 = vpop.eup %15387  ;;  %v10096_v62 = vmul.f32 %v10064_v4, %v9840_v57  ;;  %15405 = vtanh.f32 %v10017_v33  ;;  %v9842_v59 = vmul.f32 0.5, %v19146_v51  ;;  %v15221_v51 = vld [vmem:[%s16726_s1 + $0x320] ss:$8 sps:$4 sm:$0xff]   ;;  %v9850_v7 = vmul.f32 0.5, %v19173_v40  ;;  %v15224_v40 = vld [vmem:[%s16726_s1 + $0x330] ss:$8 sps:$4 sm:$0xff]  }
0x11e5   : > { %v15390_v49 = vpop.eup %15389  ;;  %10928 = vmatpush1.bf16.msra.mxu0 %v15212_v43  ;;  %v10072_v21 = vadd.f32 1.0, %v15388_v50  ;;  %v9858_v29 = vmul.f32 0.5, %v19193_v38  ;;  %v9849_v18 = vmul.f32 0.5, %v19154_v5  ;;  %v9857_v23 = vmul.f32 0.5, %v19181_v15  ;;  %v15227_v15 = vld [vmem:[%s16726_s1 + $0x340] ss:$8 sps:$4 sm:$0xff]  }
0x11e6   : > { %v15392_v48 = vpop.eup %15391  ;;  %v10120_v0 = vpack.c.bf16 %v10096_v62, %v10088_v10  ;;  %10950 = vmatprep.subr.bf16.mxu0 %v15217_v39  ;;  %v10080_v60 = vadd.f32 1.0, %v15390_v49  ;;  %v15226_v39 = vld [vmem:[%s16726_s1 + $0x334] ss:$8 sps:$4 sm:$0xff]   ;;  %v15230_v33 = vld [vmem:[%s16726_s1 + $0x350] ss:$8 sps:$4 sm:$0xff]  }
0x11e7   : > { %v15394_v42 = vpop.eup %15393  ;;  %v10071_v2 = vadd.f32 1.0, %v15392_v48  ;;  %v10104_v3 = vmul.f32 %v10072_v21, %v9848_v45  ;;  %v15235_v50 = vld [vmem:[%s16726_s1 + $0x364] ss:$8 sps:$4 sm:$0xff]   ;;  %v15233_v10 = vld [vmem:[%s16726_s1 + $0x360] ss:$8 sps:$4 sm:$0xff]  }
0x11e8   : > { %v15396_v63 = vpop.eup %15395  ;;  %10929 = vmatprep.mubr.bf16.mxu0 %v10120_v0  ;;  %v10112_v37 = vmul.f32 %v10080_v60, %v9856_v54  ;;  %v10079_v47 = vadd.f32 1.0, %v15394_v42  ;;  %v15238_v62 = vld [vmem:[%s16726_s1 + $0x374] ss:$8 sps:$4 sm:$0xff]   ;;  %v15236_v49 = vld [vmem:[%s16726_s1 + $0x370] ss:$8 sps:$4 sm:$0xff]  }
0x11e9   : > { %v15398_v11 = vpop.eup %15397  ;;  %10930 = vmatmul.mubr.bf16.vlgmr.msra.gmra.mrb[84].mxu0 %v10119_v26  ;;  %v10058_v27 = vadd.f32 1.0, %v15396_v63  ;;  %v10103_v24 = vmul.f32 %v10071_v2, %v9847_v17  ;;  %v15241_v21 = vld [vmem:[%s16726_s1 + $0x384] ss:$8 sps:$4 sm:$0xff]   ;;  %v15239_v48 = vld [vmem:[%s16726_s1 + $0x380] ss:$8 sps:$4 sm:$0xff]  }
0x11ea   : > { %10951 = vmatpush1.bf16.msra.mxu0 %v15215_v55  ;;  %v10128_v22 = vpack.c.bf16 %v10112_v37, %v10104_v3  ;;  %v10111_v44 = vmul.f32 %v10079_v47, %v9855_v28  ;;  %v10066_v41 = vadd.f32 1.0, %v15398_v11  ;;  %v15244_v0 = vld [vmem:[%s16726_s1 + $0x394] ss:$8 sps:$4 sm:$0xff]   ;;  %v15242_v55 = vld [vmem:[%s16726_s1 + $0x390] ss:$8 sps:$4 sm:$0xff]  }
0x11eb   : > { %10952 = vmatprep.subr.bf16.mxu0 %v15220_v61  ;;  %v15400_v30 = vpop.eup %15399  ;;  %v10090_v20 = vmul.f32 %v10058_v27, %v9834_v12  ;;  %v15247_v45 = vld [vmem:[%s16726_s1 + $0x3a4] ss:$8 sps:$4 sm:$0xff]   ;;  %v15245_v54 = vld [vmem:[%s16726_s1 + $0x3a0] ss:$8 sps:$4 sm:$0xff]   ;;  %v15250_v60 = vld [vmem:[%s16726_s1 + $0x3b4] ss:$8 sps:$4 sm:$0xff]  }
0x11ec   : > { %10939 = vmatprep.mubr.bf16.mxu0 %v10128_v22  ;;  %v10127_v1 = vpack.c.bf16 %v10111_v44, %v10103_v24  ;;  %v10098_v26 = vmul.f32 %v10066_v41, %v9842_v59  ;;  %v15402_v13 = vpop.eup %15401  ;;  %v10074_v34 = vadd.f32 1.0, %v15400_v30  ;;  %v15248_v42 = vld [vmem:[%s16726_s1 + $0x3b0] ss:$8 sps:$4 sm:$0xff]   ;;  %v15253_v61 = vld [vmem:[%s16726_s1 + $0x3c4] ss:$8 sps:$4 sm:$0xff]  }
0x11ed   : > { %v15404_v16 = vpop.eup %15403  ;;  %v10082_v53 = vadd.f32 1.0, %v15402_v13  ;;  %v15251_v17 = vld [vmem:[%s16726_s1 + $0x3c0] ss:$8 sps:$4 sm:$0xff]   ;;  %v15256_v2 = vld [vmem:[%s16726_s1 + $0x3d4] ss:$8 sps:$4 sm:$0xff]  }
0x11ee   : > { %10953 = vmatpush1.bf16.msra.mxu0 %v15218_v8  ;;  %v10122_v52 = vpack.c.bf16 %v10098_v26, %v10090_v20  ;;  %v15406_v43 = vpop.eup %15405  ;;  %v10073_v35 = vadd.f32 1.0, %v15404_v16  ;;  %v19273_v9 = vmul.f32 %v10074_v34, %v9850_v7  ;;  %v15254_v63 = vld [vmem:[%s16726_s1 + $0x3d0] ss:$8 sps:$4 sm:$0xff]   ;;  %v15259_v3 = vld [vmem:[%s16726_s1 + $0x3e4] ss:$8 sps:$4 sm:$0xff]  }
0x11ef   : > { %10954 = vmatprep.subr.bf16.mxu0 %v15223_v46  ;;  %v10114_v58 = vmul.f32 %v10082_v53, %v9858_v29  ;;  %v10081_v57 = vadd.f32 1.0, %v15406_v43  ;;  %v15257_v37 = vld [vmem:[%s16726_s1 + $0x3e0] ss:$8 sps:$4 sm:$0xff]   ;;  %v15262_v28 = vld [vmem:[%s16726_s1 + $0x3f4] ss:$8 sps:$4 sm:$0xff]  }
0x11f0   : > { %v10105_v6 = vmul.f32 %v10073_v35, %v9849_v18  ;;  %v15260_v47 = vld [vmem:[%s16726_s1 + $0x3f0] ss:$8 sps:$4 sm:$0xff]   ;;  %v2653_v11 = vld [vmem:[%s16749_s21 + $0x30] sm:$0x3]  ;;  %s19828_s21 = smov (!%p13535_p13), %s19827_s24 }
0x11f1   : > { %10940 = vmatmul.mubr.bf16.gmra.mrb[88].mxu0 %v10127_v1  ;;  %v10130_v38 = vpack.c.bf16 %v10114_v58, %v19273_v9  ;;  %v10113_v5 = vmul.f32 %v10081_v57, %v9857_v23  ;;  %v10131_v12 = vunpack.c.l.bf16 %v2653_v11  ;;  %v19806_v1 = vld [vmem:[#allocation60_spill] sm:$0xff]  ;;  %v19807_v20 = vld [vmem:[#allocation61_spill] sm:$0xff]  ;;  %v19808_v34 = vld [vmem:[#allocation54_spill] sm:$0xff] }
0x11f2   : > { %10955 = vmatpush1.bf16.msra.mxu0 %v15221_v51  ;;  %10982 = vmatprep.mubr.bf16.mxu0 %v10122_v52  ;;  %v19810_v52 = vld [vmem:[#allocation51_spill] sm:$0xff]  ;;  %v19812_v53 = vld [vmem:[#allocation52_spill] sm:$0xff] }
0x11f3   : > { %10956 = vmatprep.subr.bf16.mxu0 %v15226_v39  ;;  %v10129_v4 = vpack.c.bf16 %v10113_v5, %v10105_v6  ;;  %v10136_v59 = vrot.slane %v10131_v12, %v19802_v31  ;;  %v10140_v27 = vrot.slane %v10131_v12, %v19804_v36  ;;  %v19809_v36 = vld [vmem:[#allocation62_spill] sm:$0xff]  ;;  %v15427_v11 = vld [vmem:[#allocation19 + $0x24] ss:$16 sps:$4 sm:$0xff] (!%p13535_p13)  }
0x11f4   : > { %v19813_v39 = vld [vmem:[#allocation50_spill] sm:$0xff] }
0x11f5   : > { %v10146_v8 = vrot.slane %v10136_v59, %v19802_v31  ;;  %v10150_v22 = vrot.slane %v10140_v27, %v19802_v31  ;;  %v19811_v31 = vld [vmem:[#allocation64_spill] sm:$0xff]  ;;  %v15431_v59 = vld [vmem:[#allocation19 + $0x20] ss:$16 sps:$4 sm:$0xff] (!%p13535_p13)   ;;  %v15433_v27 = vld [vmem:[#allocation19 + $0x44] ss:$16 sps:$4 sm:$0xff] (!%p13535_p13)  }
0x11f6   : > { %10957 = vmatpush1.bf16.msra.mxu0 %v15224_v40  ;;  %v19814_v40 = vld [vmem:[#allocation66_spill] sm:$0xff] }
0x11f7   : > { %10958 = vmatprep.subr.bf16.mxu0 %v15229_v19  ;;  %v19815_v19 = vld [vmem:[#allocation68_spill] sm:$0xff] }
0x11f8   : > { %v15429_v12 = vld [vmem:[#allocation19 + $0x4c] ss:$16 sps:$4 sm:$0xff] (!%p13535_p13)  }
0x11fa   : > { %10959 = vmatpush1.bf16.msra.mxu0 %v15227_v15 }
0x11fb   : > { %10960 = vmatprep.subr.bf16.mxu0 %v15232_v14  ;;  %v19816_v14 = vld [vmem:[#allocation57_spill] sm:$0xff] }
0x11fe   : > { %10961 = vmatpush1.bf16.msra.mxu0 %v15230_v33 }
0x11ff   : > { %10962 = vmatprep.subr.bf16.mxu0 %v15235_v50  ;;  %v19817_v50 = vld [vmem:[#allocation70_spill] sm:$0xff] }
0x1202   : > { %10963 = vmatpush1.bf16.msra.mxu0 %v15233_v10 }
0x1203   : > { %10964 = vmatprep.subr.bf16.mxu0 %v15238_v62  ;;  %v19818_v62 = vld [vmem:[#allocation55_spill] sm:$0xff] }
0x1206   : > { %10965 = vmatpush1.bf16.msra.mxu0 %v15236_v49 }
0x1207   : > { %10966 = vmatprep.subr.bf16.mxu0 %v15241_v21  ;;  %v19819_v21 = vld [vmem:[#allocation72_spill] sm:$0xff] }
0x120a   : > { %10967 = vmatpush1.bf16.msra.mxu0 %v15239_v48 }
0x120b   : > { %10968 = vmatprep.subr.bf16.mxu0 %v15244_v0  ;;  %v19820_v0 = vld [vmem:[#allocation56_spill] sm:$0xff] }
0x120e   : > { %10969 = vmatpush1.bf16.msra.mxu0 %v15242_v55 }
0x120f   : > { %10970 = vmatprep.subr.bf16.mxu0 %v15247_v45  ;;  %v19821_v45 = vld [vmem:[#allocation53_spill] sm:$0xff] }
0x1212   : > { %10971 = vmatpush1.bf16.msra.mxu0 %v15245_v54 }
0x1213   : > { %10972 = vmatprep.subr.bf16.mxu0 %v15250_v60 }
0x1216   : > { %10973 = vmatpush1.bf16.msra.mxu0 %v15248_v42 }
0x1217   : > { %10974 = vmatprep.subr.bf16.mxu0 %v15253_v61  ;;  %v15418_v61 = vld [vmem:[#allocation19 + $0xc] ss:$16 sps:$4 sm:$0xff] (!%p13535_p13)  }
0x1218   : > { %11584 = vmatprep.subr.bf16.mxu1 (!%p13535_p13), %v15418_v61  ;;  %v15495_v61 = vld [vmem:[#allocation19 + $0x1ac] ss:$16 sps:$4 sm:$0xff] (!%p13535_p13)  }
0x121a   : > { %10975 = vmatpush1.bf16.msra.mxu0 %v15251_v17  ;;  %v15420_v17 = vld [vmem:[#allocation19 + $0x8] ss:$16 sps:$4 sm:$0xff] (!%p13535_p13)  }
0x121b   : > { %10976 = vmatprep.subr.bf16.mxu0 %v15256_v2  ;;  %11585 = vmatpush1.bf16.msra.mxu1 (!%p13535_p13), %v15420_v17  ;;  %v15497_v17 = vld [vmem:[#allocation19 + $0x180] ss:$16 sps:$4 sm:$0xff] (!%p13535_p13)  }
0x121e   : > { %10977 = vmatpush1.bf16.msra.mxu0 %v15254_v63 }
0x121f   : > { %10978 = vmatprep.subr.bf16.mxu0 %v15259_v3  ;;  %v15421_v3 = vld [vmem:[#allocation19 + $0x4] ss:$16 sps:$4 sm:$0xff] (!%p13535_p13)  }
0x1222   : > { %10979 = vmatpush1.bf16.msra.mxu0 %v15257_v37  ;;  %v15423_v37 = vld [vmem:[#allocation19 + $0x2c] ss:$16 sps:$4 sm:$0xff] (!%p13535_p13)  }
0x1223   : > { %10980 = vmatprep.subr.bf16.mxu0 %v15262_v28  ;;  %v15425_v28 = vld [vmem:[#allocation19] ss:$16 sps:$4 sm:$0xff] (!%p13535_p13)   ;;  %11586 = vmatprep.subr.bf16.mxu1 (!%p13535_p13), %v15423_v37 }
0x1224   : > { %v15503_v37 = vld [vmem:[#allocation19 + $0x1a0] ss:$16 sps:$4 sm:$0xff] (!%p13535_p13)  }
0x1226   : > { %10981 = vmatpush1.bf16.msra.mxu0 %v15260_v47  ;;  %v15426_v47 = vld [vmem:[#allocation19 + $0x28] ss:$16 sps:$4 sm:$0xff] (!%p13535_p13)  }
0x1227   : > { %11531 = vmatprep.subr.bf16.mxu0 (!%p13535_p13), %v15421_v3  ;;  %11587 = vmatpush1.bf16.msra.mxu1 (!%p13535_p13), %v15426_v47  ;;  %v15501_v3 = vld [vmem:[#allocation19 + $0x1cc] ss:$16 sps:$4 sm:$0xff] (!%p13535_p13)   ;;  %v15504_v47 = vld [vmem:[#allocation19 + $0x1c8] ss:$16 sps:$4 sm:$0xff] (!%p13535_p13)  }
0x1228   : > { %11588 = vmatprep.subr.bf16.mxu1 (!%p13535_p13), %v15429_v12  ;;  %v15509_v12 = vld [vmem:[#allocation19 + $0x1c0] ss:$16 sps:$4 sm:$0xff] (!%p13535_p13)  }
0x1229   : > { %10983 = vmatmul.mubr.bf16.vlgmr.msra.gmra.mrb[84].mxu0 %v10121_v25 }
0x122a   : > { %10992 = vmatprep.mubr.bf16.mxu0 %v10130_v38  ;;  %11532 = vmatpush1.bf16.msra.mxu0 (!%p13535_p13), %v15425_v28  ;;  %v15505_v28 = vld [vmem:[#allocation19 + $0x1c4] ss:$16 sps:$4 sm:$0xff] (!%p13535_p13)  }
0x122b   : > { %11533 = vmatprep.subr.bf16.mxu0 (!%p13535_p13), %v15427_v11  ;;  %v15507_v11 = vld [vmem:[#allocation19 + $0x1ec] ss:$16 sps:$4 sm:$0xff] (!%p13535_p13)  }
0x122e   : > { %11534 = vmatpush1.bf16.msra.mxu0 (!%p13535_p13), %v15431_v59  ;;  %v15511_v59 = vld [vmem:[#allocation19 + $0x1e4] ss:$16 sps:$4 sm:$0xff] (!%p13535_p13)  }
0x122f   : > { %11535 = vmatprep.subr.bf16.mxu0 (!%p13535_p13), %v15433_v27  ;;  %v15510_v27 = vld [vmem:[#allocation19 + $0x1e8] ss:$16 sps:$4 sm:$0xff] (!%p13535_p13)  }
0x1231   : > { %10993 = vmatmul.mubr.bf16.gmra.mrb[88].mxu0 %v10129_v4 }
0x12fc   : > { %v10984_v24 = vpop.f32.mrb[84].mxu0 }
0x12fd   : > { %v13749_v44 = vadd.f32 %v10984_v24, %v10146_v8  ;;  %v10986_v41 = vpop.f32.mrb[85].mxu0  ;;  %v15437_v24 = vld [vmem:[#allocation19 + $0x40] ss:$16 sps:$4 sm:$0xff] (!%p13535_p13)  }
0x12fe   : > { %v13750_v46 = vadd.f32 %v10986_v41, %v10150_v22  ;;  %v10988_v30 = vpop.f32.mrb[86].mxu0  ;;  %v15438_v41 = vld [vmem:[#allocation19 + $0x68] ss:$16 sps:$4 sm:$0xff] (!%p13535_p13)   ;;  %11536 = vmatpush1.bf16.msra.mxu0 (!%p13535_p13), %v15437_v24  ;;  %v15513_v24 = vld [vmem:[#allocation19 + $0x1e0] ss:$16 sps:$4 sm:$0xff] (!%p13535_p13)  }
0x12ff   : > { %v11003_v32 = vmul.f32 %v13749_v44, %v19806_v1  ;;  %v13751_v56 = vadd.f32 %v10988_v30, %v10146_v8  ;;  %v10990_v25 = vpop.f32.mrb[87].mxu0  ;;  %v15439_v44 = vld [vmem:[#allocation19 + $0x64] ss:$16 sps:$4 sm:$0xff] (!%p13535_p13)   ;;  %v15443_v30 = vld [vmem:[#allocation19 + $0x60] ss:$16 sps:$4 sm:$0xff] (!%p13535_p13)  }
0x1300   : > { %v11004_v26 = vmul.f32 %v13750_v46, %v19807_v20  ;;  %v13752_v13 = vadd.f32 %v10990_v25, %v10150_v22  ;;  %v15441_v46 = vld [vmem:[#allocation19 + $0x8c] ss:$16 sps:$4 sm:$0xff] (!%p13535_p13)   ;;  %11537 = vmatprep.subr.bf16.mxu0 (!%p13535_p13), %v15439_v44  ;;  %v15445_v1 = vld [vmem:[#allocation19 + $0x84] ss:$16 sps:$4 sm:$0xff] (!%p13535_p13)   ;;  %v15449_v25 = vld [vmem:[#allocation19 + $0x80] ss:$16 sps:$4 sm:$0xff] (!%p13535_p13)  }
0x1301   : > { %v19313_v16 = vadd.f32 %v11003_v32, %v19808_v34  ;;  %v11005_v51 = vmul.f32 %v13751_v56, %v19809_v36  ;;  %v15444_v32 = vld [vmem:[#allocation19 + $0x88] ss:$16 sps:$4 sm:$0xff] (!%p13535_p13)   ;;  %v15447_v56 = vld [vmem:[#allocation19 + $0xac] ss:$16 sps:$4 sm:$0xff] (!%p13535_p13)   ;;  %v15451_v20 = vld [vmem:[#allocation19 + $0xa4] ss:$16 sps:$4 sm:$0xff] (!%p13535_p13)  }
0x1302   : > { %v19317_v7 = vadd.f32 %v11004_v26, %v19810_v52  ;;  %v11006_v29 = vmul.f32 %v13752_v13, %v19811_v31  ;;  %11538 = vmatpush1.bf16.msra.mxu0 (!%p13535_p13), %v15443_v30  ;;  %v15450_v26 = vld [vmem:[#allocation19 + $0xa8] ss:$16 sps:$4 sm:$0xff] (!%p13535_p13)   ;;  %v15453_v13 = vld [vmem:[#allocation19 + $0xcc] ss:$16 sps:$4 sm:$0xff] (!%p13535_p13)   ;;  %v15455_v34 = vld [vmem:[#allocation19 + $0xa0] ss:$16 sps:$4 sm:$0xff] (!%p13535_p13)  }
0x1303   : > { %11019 = vst [vmem:[#allocation2] sm:$0xff] %v19313_v16  ;;  %v19322_v43 = vadd.f32 %v11005_v51, %v19812_v53  ;;  %11539 = vmatprep.subr.bf16.mxu0 (!%p13535_p13), %v15445_v1  ;;  %v15457_v36 = vld [vmem:[#allocation19 + $0xc4] ss:$16 sps:$4 sm:$0xff] (!%p13535_p13)   ;;  %v15456_v51 = vld [vmem:[#allocation19 + $0xc8] ss:$16 sps:$4 sm:$0xff] (!%p13535_p13)  }
0x1304   : > { %11020 = vst [vmem:[#allocation2 + $0x8] sm:$0xff] %v19317_v7  ;;  %v19326_v18 = vadd.f32 %v11006_v29, %v19813_v39  ;;  %v10994_v35 = vpop.f32.mrb[88].mxu0  ;;  %v11637_v60 = vadd.f32 (!%p13535_p13), %v19317_v7, %v19313_v16  ;;  %v15459_v52 = vld [vmem:[#allocation19 + $0xec] ss:$16 sps:$4 sm:$0xff] (!%p13535_p13)   ;;  %v15461_v31 = vld [vmem:[#allocation19 + $0xc0] ss:$16 sps:$4 sm:$0xff] (!%p13535_p13)  }
0x1305   : > { %11021 = vst [vmem:[#allocation2 + $0x10] sm:$0xff] %v19322_v43  ;;  %v13753_v9 = vadd.f32 %v10994_v35, %v10146_v8  ;;  %v10996_v58 = vpop.f32.mrb[89].mxu0  ;;  %v15463_v29 = vld [vmem:[#allocation19 + $0xe4] ss:$16 sps:$4 sm:$0xff] (!%p13535_p13)   ;;  %v15462_v53 = vld [vmem:[#allocation19 + $0xe8] ss:$16 sps:$4 sm:$0xff] (!%p13535_p13)  }
0x1306   : > { %11022 = vst [vmem:[#allocation2 + $0x18] sm:$0xff] %v19326_v18  ;;  %v13754_v23 = vadd.f32 %v10996_v58, %v10150_v22  ;;  %v10998_v57 = vpop.f32.mrb[90].mxu0  ;;  %11638 = vadd.xlane.f32.xlu0 (!%p13535_p13), %v11637_v60  ;;  %v11640_v2 = vadd.f32 (!%p13535_p13), %v19326_v18, %v19322_v43  ;;  %11540 = vmatpush1.bf16.msra.mxu0 (!%p13535_p13), %v15449_v25  ;;  %v15465_v39 = vld [vmem:[#allocation19 + $0x10c] ss:$16 sps:$4 sm:$0xff] (!%p13535_p13)   ;;  %v15467_v35 = vld [vmem:[#allocation19 + $0xe0] ss:$16 sps:$4 sm:$0xff] (!%p13535_p13)  }
0x1307   : > { %v11007_v38 = vmul.f32 %v13753_v9, %v19814_v40  ;;  %v13755_v6 = vadd.f32 %v10998_v57, %v10146_v8  ;;  %v11000_v5 = vpop.f32.mrb[91].mxu0  ;;  %v15432_v8 = vld [vmem:[#allocation19 + $0x48] ss:$16 sps:$4 sm:$0xff] (!%p13535_p13)   ;;  %11541 = vmatprep.subr.bf16.mxu0 (!%p13535_p13), %v15451_v20  ;;  %v15469_v9 = vld [vmem:[#allocation19 + $0x104] ss:$16 sps:$4 sm:$0xff] (!%p13535_p13)   ;;  %v11035_v25 = vld [vmem:[#allocation3 + $0x20] sm:$0xff] (!%p13535_p13) }
0x1308   : > { %v11008_v4 = vmul.f32 %v13754_v23, %v19815_v19  ;;  %v13756_v15 = vadd.f32 %v11000_v5, %v10150_v22  ;;  %11030 = sbr.rel (%p13535_p13) target bundleno = 5420 (0x152c), region = 168  ;;  %v15435_v22 = vld [vmem:[#allocation19 + $0x6c] ss:$16 sps:$4 sm:$0xff] (!%p13535_p13)   ;;  %11589 = vmatpush1.bf16.msra.mxu1 (!%p13535_p13), %v15432_v8  ;;  %v15468_v58 = vld [vmem:[#allocation19 + $0x108] ss:$16 sps:$4 sm:$0xff] (!%p13535_p13)  }
0x1309   : > { %v19333_v33 = vadd.f32 %v11007_v38, %v19816_v14  ;;  %v11009_v10 = vmul.f32 %v13755_v6, %v19817_v50  ;;  %11590 = vmatprep.subr.bf16.mxu1 (!%p13535_p13), %v15435_v22  ;;  %v15471_v23 = vld [vmem:[#allocation19 + $0x12c] ss:$16 sps:$4 sm:$0xff] (!%p13535_p13)   ;;  %v15473_v57 = vld [vmem:[#allocation19 + $0x100] ss:$16 sps:$4 sm:$0xff] (!%p13535_p13)   ;;  %v15475_v40 = vld [vmem:[#allocation19 + $0x124] ss:$16 sps:$4 sm:$0xff] (!%p13535_p13)  }
0x130a   : > { %v19337_v49 = vadd.f32 %v11008_v4, %v19818_v62  ;;  %v11010_v48 = vmul.f32 %v13756_v15, %v19819_v21  ;;  %11641 = vadd.xlane.f32.xlu0 (!%p13535_p13), %v11640_v2  ;;  %11542 = vmatpush1.bf16.msra.mxu0 (!%p13535_p13), %v15455_v34  ;;  %v15474_v38 = vld [vmem:[#allocation19 + $0x128] ss:$16 sps:$4 sm:$0xff] (!%p13535_p13)   ;;  %v15477_v6 = vld [vmem:[#allocation19 + $0x14c] ss:$16 sps:$4 sm:$0xff] (!%p13535_p13)   ;;  %v15479_v5 = vld [vmem:[#allocation19 + $0x120] ss:$16 sps:$4 sm:$0xff] (!%p13535_p13)  }
0x130b   : > { %11023 = vst [vmem:[#allocation2 + $0x20] sm:$0xff] %v19333_v33  ;;  %v19342_v55 = vadd.f32 %v11009_v10, %v19820_v0  ;;  %11543 = vmatprep.subr.bf16.mxu0 (!%p13535_p13), %v15457_v36  ;;  %v15481_v19 = vld [vmem:[#allocation19 + $0x144] ss:$16 sps:$4 sm:$0xff] (!%p13535_p13)   ;;  %v15480_v4 = vld [vmem:[#allocation19 + $0x148] ss:$16 sps:$4 sm:$0xff] (!%p13535_p13)   ;;  %v11031_v8 = vld [vmem:[#allocation3] sm:$0xff] (!%p13535_p13) }
0x130c   : > { %11024 = vst [vmem:[#allocation2 + $0x28] sm:$0xff] %v19337_v49  ;;  %v19346_v54 = vadd.f32 %v11010_v48, %v19821_v45  ;;  %v11643_v42 = vadd.f32 (!%p13535_p13), %v19337_v49, %v19333_v33  ;;  %11591 = vmatpush1.bf16.msra.mxu1 (!%p13535_p13), %v15438_v41  ;;  %v15483_v15 = vld [vmem:[#allocation19 + $0x16c] ss:$16 sps:$4 sm:$0xff] (!%p13535_p13)   ;;  %v15485_v14 = vld [vmem:[#allocation19 + $0x140] ss:$16 sps:$4 sm:$0xff] (!%p13535_p13)   ;;  %v11032_v50 = vld [vmem:[#allocation3 + $0x8] sm:$0xff] (!%p13535_p13) }
0x130d   : > { %11025 = vst [vmem:[#allocation2 + $0x30] sm:$0xff] %v19342_v55  ;;  %11592 = vmatprep.subr.bf16.mxu1 (!%p13535_p13), %v15441_v46  ;;  %v11034_v10 = vld [vmem:[#allocation3 + $0x18] sm:$0xff] (!%p13535_p13)  ;;  %v15489_v0 = vld [vmem:[#allocation19 + $0x18c] ss:$16 sps:$4 sm:$0xff] (!%p13535_p13)   ;;  %v15491_v45 = vld [vmem:[#allocation19 + $0x160] ss:$16 sps:$4 sm:$0xff] (!%p13535_p13)  }
0x130e   : > { %11026 = vst [vmem:[#allocation2 + $0x38] sm:$0xff] %v19346_v54  ;;  %11644 = vadd.xlane.f32.xlu1 (!%p13535_p13), %v11643_v42  ;;  %v11646_v63 = vadd.f32 (!%p13535_p13), %v19346_v54, %v19342_v55  ;;  %11544 = vmatpush1.bf16.msra.mxu0 (!%p13535_p13), %v15461_v31  ;;  %v15487_v62 = vld [vmem:[#allocation19 + $0x164] ss:$16 sps:$4 sm:$0xff] (!%p13535_p13)   ;;  %v11170_v21 = vpack.c.bf16 (!%p13535_p13), %v11034_v10, %v11032_v50  ;;  %v15486_v48 = vld [vmem:[#allocation19 + $0x168] ss:$16 sps:$4 sm:$0xff] (!%p13535_p13)   ;;  %v11033_v22 = vld [vmem:[#allocation3 + $0x10] sm:$0xff] (!%p13535_p13) }
0x130f   : > { %11545 = vmatprep.subr.bf16.mxu0 %v15463_v29  ;;  %v15493_v60 = vld [vmem:[#allocation19 + $0x184] ss:$16 sps:$4 sm:$0xff]   ;;  %v15492_v42 = vld [vmem:[#allocation19 + $0x188] ss:$16 sps:$4 sm:$0xff]   ;;  %v15519_v46 = vld [vmem:[#allocation21 + $0xc] ss:$16 sps:$4 sm:$0xff]   ;;  %v11169_v1 = vpack.c.bf16 %v11033_v22, %v11031_v8 }
0x1310   : > { %11593 = vmatpush1.bf16.msra.mxu1 %v15444_v32  ;;  %11616 = vmatprep.mubr.bf16.mxu1 %v11170_v21  ;;  %v15499_v2 = vld [vmem:[#allocation19 + $0x1a4] ss:$16 sps:$4 sm:$0xff]   ;;  %v15516_v30 = vld [vmem:[#allocation21 + $0x4] ss:$16 sps:$4 sm:$0xff]   ;;  %v11037_v20 = vld [vmem:[#allocation3 + $0x30] sm:$0xff] }
0x1311   : > { %11594 = vmatprep.subr.bf16.mxu1 %v15447_v56  ;;  %11563 = vmatprep.mubr.bf16.mxu0 %v11170_v21  ;;  %v11036_v44 = vld [vmem:[#allocation3 + $0x28] sm:$0xff]  ;;  %v11038_v41 = vld [vmem:[#allocation3 + $0x38] sm:$0xff]  ;;  %v15525_v36 = vld [vmem:[#allocation21 + $0x2c] ss:$16 sps:$4 sm:$0xff]   ;;  %v11171_v29 = vpack.c.bf16 %v11037_v20, %v11035_v25 }
0x1312   : > { %11647 = vadd.xlane.f32.xlu1 %v11646_v63  ;;  %11546 = vmatpush1.bf16.msra.mxu0 %v15467_v35  ;;  %v15498_v63 = vld [vmem:[#allocation19 + $0x1a8] ss:$16 sps:$4 sm:$0xff]   ;;  %v11172_v32 = vpack.c.bf16 %v11038_v41, %v11036_v44  ;;  %v15514_v56 = vld [vmem:[#allocation21] ss:$16 sps:$4 sm:$0xff]   ;;  %v15531_v31 = vld [vmem:[#allocation21 + $0x4c] ss:$16 sps:$4 sm:$0xff]  }
0x1313   : > { %11547 = vmatprep.subr.bf16.mxu0 %v15469_v9  ;;  %v15520_v34 = vld [vmem:[#allocation21 + $0x20] ss:$16 sps:$4 sm:$0xff]   ;;  %v15534_v35 = vld [vmem:[#allocation21 + $0x64] ss:$16 sps:$4 sm:$0xff]   ;;  %v15537_v9 = vld [vmem:[#allocation21 + $0x6c] ss:$16 sps:$4 sm:$0xff]  }
0x1314   : > { %11595 = vmatpush1.bf16.msra.mxu1 %v15450_v26  ;;  %v15517_v26 = vld [vmem:[#allocation21 + $0x8] ss:$16 sps:$4 sm:$0xff]   ;;  %v15555_v50 = vld [vmem:[#allocation21 + $0xcc] ss:$16 sps:$4 sm:$0xff]   ;;  %v15550_v10 = vld [vmem:[#allocation21 + $0xc0] ss:$16 sps:$4 sm:$0xff]  }
0x1315   : > { %11596 = vmatprep.subr.bf16.mxu1 %v15453_v13  ;;  %v15522_v13 = vld [vmem:[#allocation21 + $0x24] ss:$16 sps:$4 sm:$0xff]   ;;  %v15573_v20 = vld [vmem:[#allocation21 + $0x12c] ss:$16 sps:$4 sm:$0xff]  }
0x1316   : > { %11548 = vmatpush1.bf16.msra.mxu0 %v15473_v57  ;;  %v15540_v57 = vld [vmem:[#allocation21 + $0x84] ss:$16 sps:$4 sm:$0xff]  }
0x1317   : > { %11549 = vmatprep.subr.bf16.mxu0 %v15475_v40  ;;  %v15543_v40 = vld [vmem:[#allocation21 + $0x8c] ss:$16 sps:$4 sm:$0xff]   ;;  %v15558_v21 = vld [vmem:[#allocation21 + $0xe4] ss:$16 sps:$4 sm:$0xff]  }
0x1318   : > { %11597 = vmatpush1.bf16.msra.mxu1 %v15456_v51  ;;  %v15523_v51 = vld [vmem:[#allocation21 + $0x28] ss:$16 sps:$4 sm:$0xff]  }
0x1319   : > { %11598 = vmatprep.subr.bf16.mxu1 %v15459_v52  ;;  %v15528_v52 = vld [vmem:[#allocation21 + $0x44] ss:$16 sps:$4 sm:$0xff]  }
0x131a   : > { %11550 = vmatpush1.bf16.msra.mxu0 %v15479_v5  ;;  %v15546_v5 = vld [vmem:[#allocation21 + $0xa4] ss:$16 sps:$4 sm:$0xff]  }
0x131b   : > { %11551 = vmatprep.subr.bf16.mxu0 %v15481_v19  ;;  %v15549_v19 = vld [vmem:[#allocation21 + $0xac] ss:$16 sps:$4 sm:$0xff]  }
0x131c   : > { %11599 = vmatpush1.bf16.msra.mxu1 %v15462_v53  ;;  %v15526_v53 = vld [vmem:[#allocation21 + $0x40] ss:$16 sps:$4 sm:$0xff]  }
0x131d   : > { %11600 = vmatprep.subr.bf16.mxu1 %v15465_v39  ;;  %v15529_v39 = vld [vmem:[#allocation21 + $0x48] ss:$16 sps:$4 sm:$0xff]  }
0x131e   : > { %11552 = vmatpush1.bf16.msra.mxu0 %v15485_v14  ;;  %v15552_v14 = vld [vmem:[#allocation21 + $0xc4] ss:$16 sps:$4 sm:$0xff]  }
0x131f   : > { %11553 = vmatprep.subr.bf16.mxu0 %v15487_v62  ;;  %v15553_v62 = vld [vmem:[#allocation21 + $0xc8] ss:$16 sps:$4 sm:$0xff]  }
0x1320   : > { %11601 = vmatpush1.bf16.msra.mxu1 %v15468_v58  ;;  %v15532_v58 = vld [vmem:[#allocation21 + $0x60] ss:$16 sps:$4 sm:$0xff]  }
0x1321   : > { %11602 = vmatprep.subr.bf16.mxu1 %v15471_v23  ;;  %v15535_v23 = vld [vmem:[#allocation21 + $0x68] ss:$16 sps:$4 sm:$0xff]  }
0x1322   : > { %11554 = vmatpush1.bf16.msra.mxu0 %v15491_v45  ;;  %v15559_v45 = vld [vmem:[#allocation21 + $0xe8] ss:$16 sps:$4 sm:$0xff]  }
0x1323   : > { %11555 = vmatprep.subr.bf16.mxu0 %v15493_v60  ;;  %v15564_v60 = vld [vmem:[#allocation21 + $0x104] ss:$16 sps:$4 sm:$0xff]  }
0x1324   : > { %11603 = vmatpush1.bf16.msra.mxu1 %v15474_v38  ;;  %v15538_v38 = vld [vmem:[#allocation21 + $0x80] ss:$16 sps:$4 sm:$0xff]  }
0x1325   : > { %11604 = vmatprep.subr.bf16.mxu1 %v15477_v6  ;;  %v15541_v6 = vld [vmem:[#allocation21 + $0x88] ss:$16 sps:$4 sm:$0xff]  }
0x1326   : > { %11556 = vmatpush1.bf16.msra.mxu0 %v15497_v17  ;;  %v15565_v17 = vld [vmem:[#allocation21 + $0x108] ss:$16 sps:$4 sm:$0xff]  }
0x1327   : > { %11557 = vmatprep.subr.bf16.mxu0 %v15499_v2 }
0x1328   : > { %11605 = vmatpush1.bf16.msra.mxu1 %v15480_v4  ;;  %v15544_v4 = vld [vmem:[#allocation21 + $0xa0] ss:$16 sps:$4 sm:$0xff]  }
0x1329   : > { %11606 = vmatprep.subr.bf16.mxu1 %v15483_v15  ;;  %v15547_v15 = vld [vmem:[#allocation21 + $0xa8] ss:$16 sps:$4 sm:$0xff]  }
0x132a   : > { %11558 = vmatpush1.bf16.msra.mxu0 %v15503_v37 }
0x132b   : > { %11559 = vmatprep.subr.bf16.mxu0 %v15505_v28 }
0x132c   : > { %11607 = vmatpush1.bf16.msra.mxu1 %v15486_v48  ;;  %v15561_v48 = vld [vmem:[#allocation21 + $0xec] ss:$16 sps:$4 sm:$0xff]  }
0x132d   : > { %11608 = vmatprep.subr.bf16.mxu1 %v15489_v0  ;;  %v15556_v0 = vld [vmem:[#allocation21 + $0xe0] ss:$16 sps:$4 sm:$0xff]  }
0x132e   : > { %11560 = vmatpush1.bf16.msra.mxu0 %v15509_v12 }
0x132f   : > { %11561 = vmatprep.subr.bf16.mxu0 %v15511_v59 }
0x1330   : > { %11609 = vmatpush1.bf16.msra.mxu1 %v15492_v42  ;;  %v15567_v42 = vld [vmem:[#allocation21 + $0x10c] ss:$16 sps:$4 sm:$0xff]  }
0x1331   : > { %11610 = vmatprep.subr.bf16.mxu1 %v15495_v61  ;;  %v15562_v61 = vld [vmem:[#allocation21 + $0x100] ss:$16 sps:$4 sm:$0xff]  }
0x1332   : > { %11562 = vmatpush1.bf16.msra.mxu0 %v15513_v24 }
0x1333   : > { %12087 = vmatprep.subr.bf16.mxu0 %v15516_v30 }
0x1334   : > { %11611 = vmatpush1.bf16.msra.mxu1 %v15498_v63 }
0x1335   : > { %11612 = vmatprep.subr.bf16.mxu1 %v15501_v3  ;;  %11564 = vmatmul.mubr.bf16.vlgmr.msra.gmra.mrb[0].mxu0 %v11169_v1 }
0x1336   : > { %11573 = vmatprep.mubr.bf16.mxu0 %v11172_v32  ;;  %12088 = vmatpush1.bf16.msra.mxu0 %v15514_v56 }
0x1337   : > { %12089 = vmatprep.subr.bf16.mxu0 %v15522_v13  ;;  %v15571_v13 = vld [vmem:[#allocation21 + $0x128] ss:$16 sps:$4 sm:$0xff]  }
0x1338   : > { %11613 = vmatpush1.bf16.msra.mxu1 %v15504_v47 }
0x1339   : > { %11614 = vmatprep.subr.bf16.mxu1 %v15507_v11 }
0x133a   : > { %12090 = vmatpush1.bf16.msra.mxu0 %v15520_v34  ;;  %v15576_v34 = vld [vmem:[#allocation21 + $0x144] ss:$16 sps:$4 sm:$0xff]  }
0x133b   : > { %12091 = vmatprep.subr.bf16.mxu0 %v15528_v52  ;;  %v15577_v52 = vld [vmem:[#allocation21 + $0x148] ss:$16 sps:$4 sm:$0xff]  }
0x133c   : > { %11615 = vmatpush1.bf16.msra.mxu1 %v15510_v27 }
0x133d   : > { %12140 = vmatprep.subr.bf16.mxu1 %v15519_v46  ;;  %11574 = vmatmul.mubr.bf16.gmra.mrb[4].mxu0 %v11171_v29 }
0x133e   : > { %12092 = vmatpush1.bf16.msra.mxu0 %v15526_v53  ;;  %v15580_v53 = vld [vmem:[#allocation21 + $0x160] ss:$16 sps:$4 sm:$0xff]  }
0x133f   : > { %11617 = vmatmul.mubr.bf16.vlgmr.msra.gmra.mrb[0].mxu1 %v11169_v1  ;;  %12093 = vmatprep.subr.bf16.mxu0 %v15534_v35  ;;  %v15588_v35 = vld [vmem:[#allocation21 + $0x184] ss:$16 sps:$4 sm:$0xff]  }
0x1340   : > { %11626 = vmatprep.mubr.bf16.mxu1 %v11172_v32  ;;  %12141 = vmatpush1.bf16.msra.mxu1 %v15517_v26  ;;  %v15568_v26 = vld [vmem:[#allocation21 + $0x120] ss:$16 sps:$4 sm:$0xff]  }
0x1341   : > { %12142 = vmatprep.subr.bf16.mxu1 %v15525_v36  ;;  %v15579_v36 = vld [vmem:[#allocation21 + $0x14c] ss:$16 sps:$4 sm:$0xff]  }
0x1342   : > { %12094 = vmatpush1.bf16.msra.mxu0 %v15532_v58  ;;  %v15586_v58 = vld [vmem:[#allocation21 + $0x180] ss:$16 sps:$4 sm:$0xff]  }
0x1343   : > { %12095 = vmatprep.subr.bf16.mxu0 %v15540_v57  ;;  %v15594_v57 = vld [vmem:[#allocation21 + $0x1a4] ss:$16 sps:$4 sm:$0xff]  }
0x1344   : > { %12143 = vmatpush1.bf16.msra.mxu1 %v15523_v51  ;;  %v15574_v51 = vld [vmem:[#allocation21 + $0x140] ss:$16 sps:$4 sm:$0xff]  }
0x1345   : > { %12144 = vmatprep.subr.bf16.mxu1 %v15531_v31  ;;  %v15582_v31 = vld [vmem:[#allocation21 + $0x164] ss:$16 sps:$4 sm:$0xff]  }
0x1346   : > { %12096 = vmatpush1.bf16.msra.mxu0 %v15538_v38  ;;  %v15592_v38 = vld [vmem:[#allocation21 + $0x1a0] ss:$16 sps:$4 sm:$0xff]  }
0x1347   : > { %11627 = vmatmul.mubr.bf16.gmra.mrb[4].mxu1 %v11171_v29  ;;  %12097 = vmatprep.subr.bf16.mxu0 %v15546_v5  ;;  %v15585_v29 = vld [vmem:[#allocation21 + $0x16c] ss:$16 sps:$4 sm:$0xff]   ;;  %v15600_v5 = vld [vmem:[#allocation21 + $0x1c4] ss:$16 sps:$4 sm:$0xff]  }
0x1348   : > { %12145 = vmatpush1.bf16.msra.mxu1 %v15529_v39  ;;  %v15583_v39 = vld [vmem:[#allocation21 + $0x168] ss:$16 sps:$4 sm:$0xff]  }
0x1349   : > { %12146 = vmatprep.subr.bf16.mxu1 %v15537_v9  ;;  %v15591_v9 = vld [vmem:[#allocation21 + $0x18c] ss:$16 sps:$4 sm:$0xff]  }
0x134a   : > { %12098 = vmatpush1.bf16.msra.mxu0 %v15544_v4  ;;  %v15598_v4 = vld [vmem:[#allocation21 + $0x1c0] ss:$16 sps:$4 sm:$0xff]  }
0x134b   : > { %12099 = vmatprep.subr.bf16.mxu0 %v15552_v14  ;;  %v15606_v14 = vld [vmem:[#allocation21 + $0x1e4] ss:$16 sps:$4 sm:$0xff]  }
0x134c   : > { %12147 = vmatpush1.bf16.msra.mxu1 %v15535_v23  ;;  %v15589_v23 = vld [vmem:[#allocation21 + $0x188] ss:$16 sps:$4 sm:$0xff]  }
0x134d   : > { %12148 = vmatprep.subr.bf16.mxu1 %v15543_v40  ;;  %v15597_v40 = vld [vmem:[#allocation21 + $0x1ac] ss:$16 sps:$4 sm:$0xff]  }
0x134e   : > { %12100 = vmatpush1.bf16.msra.mxu0 %v15550_v10  ;;  %v15604_v10 = vld [vmem:[#allocation21 + $0x1e0] ss:$16 sps:$4 sm:$0xff]  }
0x134f   : > { %12101 = vmatprep.subr.bf16.mxu0 %v15558_v21 }
0x1350   : > { %12149 = vmatpush1.bf16.msra.mxu1 %v15541_v6  ;;  %v15595_v6 = vld [vmem:[#allocation21 + $0x1a8] ss:$16 sps:$4 sm:$0xff]  }
0x1351   : > { %12150 = vmatprep.subr.bf16.mxu1 %v15549_v19  ;;  %v15603_v19 = vld [vmem:[#allocation21 + $0x1cc] ss:$16 sps:$4 sm:$0xff]  }
0x1352   : > { %12102 = vmatpush1.bf16.msra.mxu0 %v15556_v0 }
0x1353   : > { %12103 = vmatprep.subr.bf16.mxu0 %v15564_v60 }
0x1354   : > { %12151 = vmatpush1.bf16.msra.mxu1 %v15547_v15  ;;  %v15601_v15 = vld [vmem:[#allocation21 + $0x1c8] ss:$16 sps:$4 sm:$0xff]  }
0x1355   : > { %12152 = vmatprep.subr.bf16.mxu1 %v15555_v50  ;;  %v15609_v50 = vld [vmem:[#allocation21 + $0x1ec] ss:$16 sps:$4 sm:$0xff]  }
0x1356   : > { %12104 = vmatpush1.bf16.msra.mxu0 %v15562_v61 }
0x1358   : > { %12153 = vmatpush1.bf16.msra.mxu1 %v15553_v62  ;;  %v15607_v62 = vld [vmem:[#allocation21 + $0x1e8] ss:$16 sps:$4 sm:$0xff]  }
0x1359   : > { %12154 = vmatprep.subr.bf16.mxu1 %v15561_v48 }
0x135c   : > { %12155 = vmatpush1.bf16.msra.mxu1 %v15559_v45 }
0x135d   : > { %12156 = vmatprep.subr.bf16.mxu1 %v15567_v42 }
0x1360   : > { %12157 = vmatpush1.bf16.msra.mxu1 %v15565_v17 }
0x1361   : > { %12158 = vmatprep.subr.bf16.mxu1 %v15573_v20 }
0x1364   : > { %12159 = vmatpush1.bf16.msra.mxu1 %v15571_v13 }
0x1365   : > { %12160 = vmatprep.subr.bf16.mxu1 %v15579_v36 }
0x1368   : > { %12161 = vmatpush1.bf16.msra.mxu1 %v15577_v52 }
0x1369   : > { %12162 = vmatprep.subr.bf16.mxu1 %v15585_v29 }
0x136c   : > { %12163 = vmatpush1.bf16.msra.mxu1 %v15583_v39 }
0x136d   : > { %12164 = vmatprep.subr.bf16.mxu1 %v15591_v9 }
0x1370   : > { %12165 = vmatpush1.bf16.msra.mxu1 %v15589_v23 }
0x1371   : > { %12166 = vmatprep.subr.bf16.mxu1 %v15597_v40 }
0x1374   : > { %12167 = vmatpush1.bf16.msra.mxu1 %v15595_v6 }
0x1375   : > { %12168 = vmatprep.subr.bf16.mxu1 %v15603_v19 }
0x1378   : > { %12169 = vmatpush1.bf16.msra.mxu1 %v15601_v15 }
0x1379   : > { %12170 = vmatprep.subr.bf16.mxu1 %v15609_v50 }
0x137c   : > { %12171 = vmatpush1.bf16.msra.mxu1 %v15607_v62 }
0x1393   : > { %v11639_v2 = vpop.xlane.xlu0 %11638 }
0x1394   : > { %v11649_v3 = vmul.f32 0.00390625, %v11639_v2 }
0x1396   : > { %v19360_v28 = vsub.f32 %v19313_v16, %v11649_v3  ;;  %v19363_v47 = vsub.f32 %v19317_v7, %v11649_v3 }
0x1397   : > { %v11642_v59 = vpop.xlane.xlu0 %11641 }
0x1398   : > { %v11650_v8 = vmul.f32 0.00390625, %v11642_v59  ;;  %v11661_v24 = vmul.f32 %v19360_v28, %v19360_v28  ;;  %v11662_v16 = vmul.f32 %v19363_v47, %v19363_v47 }
0x139a   : > { %v19380_v44 = vsub.f32 %v19322_v43, %v11650_v8  ;;  %v11669_v30 = vadd.f32 %v11662_v16, %v11661_v24 }
0x139b   : > { %v11645_v63 = vpop.xlane.xlu1 %11644 }
0x139c   : > { %v11651_v37 = vmul.f32 0.00390625, %v11645_v63  ;;  %v11663_v1 = vmul.f32 %v19380_v44, %v19380_v44  ;;  %11670 = vadd.xlane.f32.xlu0 %v11669_v30  ;;  %v19823_v30 = vld [vmem:[#allocation58_spill] sm:$0xff] }
0x139e   : > { %v19366_v11 = vsub.f32 %v19333_v33, %v11651_v37  ;;  %v19369_v12 = vsub.f32 %v19337_v49, %v11651_v37  ;;  %v19383_v49 = vsub.f32 %v19326_v18, %v11650_v8 }
0x139f   : > { %v11648_v27 = vpop.xlane.xlu1 %11647 }
0x13a0   : > { %v11652_v22 = vmul.f32 0.00390625, %v11648_v27  ;;  %v11665_v7 = vmul.f32 %v19366_v11, %v19366_v11  ;;  %v11666_v33 = vmul.f32 %v19369_v12, %v19369_v12  ;;  %v11664_v32 = vmul.f32 %v19383_v49, %v19383_v49  ;;  %v11103_v27 = vld [vmem:[#allocation20] sm:$0xf] }
0x13a1   : > { %v11173_v16 = vunpack.c.l.bf16 %v11103_v27 }
0x13a2   : > { %v19386_v41 = vsub.f32 %v19342_v55, %v11652_v22  ;;  %v19389_v46 = vsub.f32 %v19346_v54, %v11652_v22  ;;  %v11675_v56 = vadd.f32 %v11666_v33, %v11665_v7  ;;  %v11672_v55 = vadd.f32 %v11664_v32, %v11663_v1  ;;  %v15570_v54 = vld [vmem:[#allocation21 + $0x124] ss:$16 sps:$4 sm:$0xff]   ;;  %v19824_v32 = vld [vmem:[#allocation59_spill] sm:$0xff] }
0x13a3   : > { %12105 = vmatprep.subr.bf16.mxu0 %v15570_v54  ;;  %v11186_v1 = vrot.slane %v11173_v16, %v19823_v30 }
0x13a4   : > { %v11667_v43 = vmul.f32 %v19386_v41, %v19386_v41  ;;  %v11668_v18 = vmul.f32 %v19389_v46, %v19389_v46  ;;  %11673 = vadd.xlane.f32.xlu1 %v11672_v55  ;;  %11676 = vadd.xlane.f32.xlu0 %v11675_v56 }
0x13a5   : > { %12106 = vmatpush1.bf16.msra.mxu0 %v15568_v26  ;;  %v19825_v26 = vld [vmem:[#allocation40_spill] sm:$0xff] }
0x13a6   : > { %v11678_v25 = vadd.f32 %v11668_v18, %v11667_v43  ;;  %12107 = vmatprep.subr.bf16.mxu0 %v15576_v34  ;;  %v11190_v43 = vrot.slane %v11173_v16, %v19824_v32  ;;  %v11206_v13 = vrot.slane %v11186_v1, %v19825_v26  ;;  %v11178_v52 = vrot.slane %v11173_v16, %v19825_v26 }
0x13a8   : > { %11679 = vadd.xlane.f32.xlu1 %v11678_v25  ;;  %v11210_v34 = vrot.slane %v11190_v43, %v19825_v26 }
0x13a9   : > { %12108 = vmatpush1.bf16.msra.mxu0 %v15574_v51 }
0x13aa   : > { %12109 = vmatprep.subr.bf16.mxu0 %v15582_v31  ;;  %v19826_v31 = vld [vmem:[#allocation41_spill] sm:$0xff] }
0x13ab   : > { %v11182_v29 = vrot.slane %v11173_v16, %v19826_v31 }
0x13ad   : > { %12110 = vmatpush1.bf16.msra.mxu0 %v15580_v53  ;;  %v11202_v23 = vrot.slane %v11182_v29, %v19825_v26 }
0x13ae   : > { %12111 = vmatprep.subr.bf16.mxu0 %v15588_v35 }
0x13b1   : > { %12112 = vmatpush1.bf16.msra.mxu0 %v15586_v58  ;;  %v11198_v58 = vrot.slane %v11178_v52, %v19825_v26 }
0x13b2   : > { %12113 = vmatprep.subr.bf16.mxu0 %v15594_v57 }
0x13b5   : > { %12114 = vmatpush1.bf16.msra.mxu0 %v15592_v38 }
0x13b6   : > { %12115 = vmatprep.subr.bf16.mxu0 %v15600_v5 }
0x13b9   : > { %12116 = vmatpush1.bf16.msra.mxu0 %v15598_v4 }
0x13ba   : > { %12117 = vmatprep.subr.bf16.mxu0 %v15606_v14 }
0x13bd   : > { %12118 = vmatpush1.bf16.msra.mxu0 %v15604_v10 }
0x1408   : > { %v11565_v0 = vpop.f32.mrb[0].mxu0 }
0x1409   : > { %v11567_v60 = vpop.f32.mrb[1].mxu0  ;;  %v11566_v15 = vadd.f32 %v11565_v0, %v11198_v58 }
0x140a   : > { %v11569_v61 = vpop.f32.mrb[2].mxu0  ;;  %v11568_v14 = vadd.f32 %v11567_v60, %v11202_v23 }
0x140b   : > { %v11571_v17 = vpop.f32.mrb[3].mxu0 }
0x140c   : > { %v11572_v27 = vadd.f32 %v11571_v17, %v11202_v23 }
0x1410   : > { %v11575_v3 = vpop.f32.mrb[4].mxu0 }
0x1411   : > { %v11577_v59 = vpop.f32.mrb[5].mxu0  ;;  %v11576_v60 = vadd.f32 %v11575_v3, %v11198_v58 }
0x1412   : > { %v11618_v21 = vpop.f32.mrb[0].mxu1  ;;  %v19399_v22 = vpop.f32.mrb[6].mxu0 }
0x1413   : > { %v11620_v48 = vpop.f32.mrb[1].mxu1  ;;  %v19401_v24 = vpop.f32.mrb[7].mxu0  ;;  %v11619_v35 = vadd.f32 %v11618_v21, %v11206_v13  ;;  %v11570_v21 = vadd.f32 %v11569_v61, %v11198_v58 }
0x1414   : > { %v11622_v45 = vpop.f32.mrb[2].mxu1  ;;  %v11621_v9 = vadd.f32 %v11620_v48, %v11210_v34 }
0x1415   : > { %v11624_v42 = vpop.f32.mrb[3].mxu1  ;;  %v11623_v57 = vadd.f32 %v11622_v45, %v11206_v13  ;;  %v11701_v38 = vadd.f32 1.0, %v11619_v35 }
0x1416   : > { %v11625_v40 = vadd.f32 %v11624_v42, %v11210_v34  ;;  %v11702_v6 = vadd.f32 1.0, %v11621_v9 }
0x1417   : > { %v11703_v62 = vadd.f32 1.0, %v11623_v57 }
0x1418   : > { %v11704_v48 = vadd.f32 1.0, %v11625_v40 }
0x141a   : > { %v11628_v2 = vpop.f32.mrb[4].mxu1 }
0x141b   : > { %v11630_v63 = vpop.f32.mrb[5].mxu1  ;;  %v11629_v5 = vadd.f32 %v11628_v2, %v11206_v13 }
0x141c   : > { %v11632_v37 = vpop.f32.mrb[6].mxu1  ;;  %v11631_v19 = vadd.f32 %v11630_v63, %v11210_v34 }
0x141d   : > { %v11634_v8 = vpop.f32.mrb[7].mxu1  ;;  %v11633_v16 = vadd.f32 %v11632_v37, %v11206_v13  ;;  %v11705_v1 = vadd.f32 1.0, %v11629_v5  ;;  %v11580_v13 = vadd.f32 %v19399_v22, %v11198_v58 }
0x141e   : > { %v11706_v43 = vadd.f32 1.0, %v11631_v19 }
0x1429   : > { %v11671_v7 = vpop.xlane.xlu0 %11670 }
0x142a   : > { %v11681_v33 = vmul.f32 0.00390625, %v11671_v7  ;;  %v11635_v7 = vadd.f32 %v11634_v8, %v11210_v34 }
0x142c   : > { %v11685_v18 = vadd.f32 1e-06, %v11681_v33 }
0x142e   : > { %15610 = vrsqrt.f32 %v11685_v18 }
0x1431   : > { %v11674_v56 = vpop.xlane.xlu1 %11673  ;;  %v11677_v25 = vpop.xlane.xlu0 %11676 }
0x1432   : > { %v11682_v55 = vmul.f32 0.00390625, %v11674_v56  ;;  %v11683_v54 = vmul.f32 0.00390625, %v11677_v25  ;;  %v11707_v56 = vadd.f32 1.0, %v11633_v16 }
0x1434   : > { %v11686_v20 = vadd.f32 1e-06, %v11682_v55  ;;  %v11687_v36 = vadd.f32 1e-06, %v11683_v54  ;;  %v11708_v55 = vadd.f32 1.0, %v11635_v7 }
0x1435   : > { %v11680_v51 = vpop.xlane.xlu1 %11679 }
0x1436   : > { %15612 = vrsqrt.f32 %v11686_v20  ;;  %v11684_v53 = vmul.f32 0.00390625, %v11680_v51 }
0x1437   : > { %15614 = vrsqrt.f32 %v11687_v36 }
0x1438   : > { %v11688_v39 = vadd.f32 1e-06, %v11684_v53  ;;  %v15611_v4 = vpop.eup %15610 }
0x1439   : > { %v11693_v50 = vmul.f32 %v15611_v4, %v19360_v28  ;;  %v11694_v10 = vmul.f32 %v15611_v4, %v19363_v47  ;;  %v11578_v28 = vadd.f32 %v11577_v59, %v11202_v23 }
0x143a   : > { %15616 = vrsqrt.f32 %v11688_v39 }
0x143b   : > { %v11709_v45 = vmul.f32 %v11701_v38, %v11693_v50  ;;  %v11710_v42 = vmul.f32 %v11702_v6, %v11694_v10 }
0x143d   : > { %v11717_v18 = vadd.f32 %v11709_v45, %v11566_v15  ;;  %v11718_v47 = vadd.f32 %v11710_v42, %v11568_v14 }
0x1440   : > { %v15613_v33 = vpop.eup %15612 }
0x1441   : > { %v15615_v2 = vpop.eup %15614  ;;  %v11695_v63 = vmul.f32 %v15613_v33, %v19380_v44  ;;  %v11696_v0 = vmul.f32 %v15613_v33, %v19383_v49  ;;  %v11582_v44 = vadd.f32 %v19401_v24, %v11202_v23 }
0x1442   : > { %v11697_v61 = vmul.f32 %v15615_v2, %v19366_v11  ;;  %v11698_v17 = vmul.f32 %v15615_v2, %v19369_v12 }
0x1443   : > { %v11711_v37 = vmul.f32 %v11703_v62, %v11695_v63  ;;  %v11712_v8 = vmul.f32 %v11704_v48, %v11696_v0 }
0x1444   : > { %v15617_v25 = vpop.eup %15616  ;;  %v11713_v54 = vmul.f32 %v11705_v1, %v11697_v61  ;;  %v11714_v20 = vmul.f32 %v11706_v43, %v11698_v17 }
0x1445   : > { %v11719_v49 = vadd.f32 %v11711_v37, %v11570_v21  ;;  %v11720_v3 = vadd.f32 %v11712_v8, %v11572_v27  ;;  %v11699_v59 = vmul.f32 %v15617_v25, %v19386_v41  ;;  %v11700_v34 = vmul.f32 %v15617_v25, %v19389_v46  ;;  %v11168_v41 = vld [vmem:[#allocation22] sm:$0xf] }
0x1446   : > { %v11721_v11 = vadd.f32 %v11713_v54, %v11576_v60  ;;  %v11722_v36 = vadd.f32 %v11714_v20, %v11578_v28  ;;  %v11729_v46 = vunpack.c.l.bf16 %v11168_v41 }
0x1447   : > { %v11725_v12 = vpack.c.bf16 %v11719_v49, %v11717_v18  ;;  %v11715_v51 = vmul.f32 %v11707_v56, %v11699_v59  ;;  %v11716_v52 = vmul.f32 %v11708_v55, %v11700_v34  ;;  %v11726_v29 = vpack.c.bf16 %v11720_v3, %v11718_v47 }
0x1448   : > { %v11734_v35 = vrot.slane %v11729_v46, %v19825_v26  ;;  %v11742_v9 = vrot.slane %v11729_v46, %v19823_v30  ;;  %v11738_v58 = vrot.slane %v11729_v46, %v19826_v31  ;;  %v11746_v23 = vrot.slane %v11729_v46, %v19824_v32 }
0x1449   : > { %v11723_v53 = vadd.f32 %v11715_v51, %v11580_v13  ;;  %v11724_v39 = vadd.f32 %v11716_v52, %v11582_v44  ;;  %12119 = vmatprep.mubr.bf16.mxu0 %v11726_v29  ;;  %12172 = vmatprep.mubr.bf16.mxu1 %v11726_v29 }
0x144a   : > { %12120 = vmatmul.mubr.bf16.vlgmr.msra.gmra.mrb[8].mxu0 %v11725_v12  ;;  %12173 = vmatmul.mubr.bf16.vlgmr.msra.gmra.mrb[8].mxu1 %v11725_v12  ;;  %v11754_v57 = vrot.slane %v11734_v35, %v19825_v26  ;;  %v11762_v40 = vrot.slane %v11742_v9, %v19825_v26  ;;  %v11758_v38 = vrot.slane %v11738_v58, %v19825_v26 }
0x144b   : > { %v11728_v22 = vpack.c.bf16 %v11724_v39, %v11722_v36  ;;  %v11727_v24 = vpack.c.bf16 %v11723_v53, %v11721_v11  ;;  %v11766_v6 = vrot.slane %v11746_v23, %v19825_v26 }
0x144d   : > { %12129 = vmatprep.mubr.bf16.mxu0 %v11728_v22  ;;  %12182 = vmatprep.mubr.bf16.mxu1 %v11728_v22 }
0x1452   : > { %12130 = vmatmul.mubr.bf16.gmra.mrb[12].mxu0 %v11727_v24  ;;  %12183 = vmatmul.mubr.bf16.gmra.mrb[12].mxu1 %v11727_v24 }
0x151d   : > { %v12121_v5 = vpop.f32.mrb[8].mxu0  ;;  %v12174_v19 = vpop.f32.mrb[8].mxu1 }
0x151e   : > { %v12122_v4 = vadd.f32 %v12121_v5, %v11754_v57  ;;  %v12175_v15 = vadd.f32 %v12174_v19, %v11762_v40  ;;  %v12123_v14 = vpop.f32.mrb[9].mxu0  ;;  %v12176_v50 = vpop.f32.mrb[9].mxu1 }
0x151f   : > { %v12124_v10 = vadd.f32 %v12123_v14, %v11758_v38  ;;  %v12177_v30 = vadd.f32 %v12176_v50, %v11766_v6  ;;  %v12125_v62 = vpop.f32.mrb[10].mxu0  ;;  %v12178_v31 = vpop.f32.mrb[10].mxu1 }
0x1520   : > { %12193 = vst [vmem:[%s19827_s24] sm:$0xff] %v12122_v4  ;;  %v12126_v32 = vadd.f32 %v12125_v62, %v11754_v57  ;;  %v12179_v26 = vadd.f32 %v12178_v31, %v11762_v40  ;;  %v12127_v21 = vpop.f32.mrb[11].mxu0  ;;  %v12180_v48 = vpop.f32.mrb[11].mxu1 }
0x1521   : > { %12195 = vst [vmem:[%s19828_s21 + $0x10] sm:$0xff] %v12175_v15  ;;  %12194 = vst [vmem:[%s19828_s21 + $0x8] sm:$0xff] %v12124_v10  ;;  %v12128_v27 = vadd.f32 %v12127_v21, %v11758_v38  ;;  %v12181_v16 = vadd.f32 %v12180_v48, %v11766_v6 }
0x1522   : > { %12196 = vst [vmem:[%s19828_s21 + $0x18] sm:$0xff] %v12177_v30  ;;  %12197 = vst [vmem:[%s19828_s21 + $0x20] sm:$0xff] %v12126_v32 }
0x1523   : > { %12199 = vst [vmem:[%s19828_s21 + $0x30] sm:$0xff] %v12179_v26  ;;  %12198 = vst [vmem:[%s19828_s21 + $0x28] sm:$0xff] %v12128_v27 }
0x1524   : > { %12200 = vst [vmem:[%s19828_s21 + $0x38] sm:$0xff] %v12181_v16 }
0x1525   : > { %v12131_v7 = vpop.f32.mrb[12].mxu0  ;;  %v12184_v33 = vpop.f32.mrb[12].mxu1 }
0x1526   : > { %v12132_v45 = vadd.f32 %v12131_v7, %v11754_v57  ;;  %v12185_v42 = vadd.f32 %v12184_v33, %v11762_v40  ;;  %v12133_v1 = vpop.f32.mrb[13].mxu0  ;;  %v12186_v43 = vpop.f32.mrb[13].mxu1 }
0x1527   : > { %v12134_v2 = vadd.f32 %v12133_v1, %v11758_v38  ;;  %v12187_v63 = vadd.f32 %v12186_v43, %v11766_v6  ;;  %v12135_v0 = vpop.f32.mrb[14].mxu0  ;;  %v12188_v60 = vpop.f32.mrb[14].mxu1 }
0x1528   : > { %12201 = vst [vmem:[%s19828_s21 + $0x40] sm:$0xff] %v12132_v45  ;;  %12203 = vst [vmem:[%s19828_s21 + $0x50] sm:$0xff] %v12185_v42  ;;  %v12136_v28 = vadd.f32 %v12135_v0, %v11754_v57  ;;  %v12189_v18 = vadd.f32 %v12188_v60, %v11762_v40  ;;  %v12137_v47 = vpop.f32.mrb[15].mxu0  ;;  %v12190_v61 = vpop.f32.mrb[15].mxu1 }
0x1529   : > { %12202 = vst [vmem:[%s19828_s21 + $0x48] sm:$0xff] %v12134_v2  ;;  %12204 = vst [vmem:[%s19828_s21 + $0x58] sm:$0xff] %v12187_v63  ;;  %v12138_v17 = vadd.f32 %v12137_v47, %v11758_v38  ;;  %v12191_v37 = vadd.f32 %v12190_v61, %v11766_v6 }
0x152a   : > { %12205 = vst [vmem:[%s19828_s21 + $0x60] sm:$0xff] %v12136_v28  ;;  %12207 = vst [vmem:[%s19828_s21 + $0x70] sm:$0xff] %v12189_v18 }
0x152b   : > { %12206 = vst [vmem:[%s19828_s21 + $0x68] sm:$0xff] %v12138_v17  ;;  %12208 = vst [vmem:[%s19828_s21 + $0x78] sm:$0xff] %v12191_v37 }
0x152c PF: > { %s19829_s24 = sld [smem:[#allocation37_spill]]  ;;  %s19830_s1 = sld [smem:[#allocation33_spill]] }
0x152d   : > { %s19831_s22 = sld [smem:[#allocation34_spill]]  ;;  %s19832_s23 = sld [smem:[#allocation38_spill]] }
0x1532   : > { %p32_p3 = scmp.ge.s32.totalorder %s19829_s24, 4  }
0x1534   :  { %34 = sbr.rel (!%p32_p3) target bundleno = 23 (0x17), region = 230 }
0x153b   :  { %12220 = vsyncpa [#allocation5], 1 }
0x153c   :  { %12222 = vsyncpa [#allocation5 + $0x1], 1 }
0x153d   :  { %12223 = vsyncpa [#allocation7], 1 }
0x153e   :  { %12224 = vsyncpa [#allocation10], 1 }
0x153f   :  { %12225 = vsyncpa [#allocation13], 1 }
0x1540   :  { %12226 = vsyncpa [#allocation23], 1 }

</bundles_post_ra>
